<compile_context>
chip_gen: v5e
topology: v5e:2x2
jax: 0.10.0
libtpu: 0.0.40
codegen_flags: <defaults>
</compile_context>

<pallas_src>
import functools

import numpy as np
import jax
import jax.numpy as jnp
from jax.experimental import pallas as pl
from jax.experimental.pallas import tpu as pltpu

LANE = 128
VMEM_LIMIT = 48 * 1024 * 1024


# ----------------------------------------------------------------------------
# In-kernel helpers
# ----------------------------------------------------------------------------
def _conv3x3(x, w_ref, wp):
    """Implicit-GEMM 3x3 conv (stride 1, pad 1) on a flattened padded image.

    x:     (M, Cin) bf16 value, M = N*(H+2)*(W+2); border rows MUST be zero
           (they act as the conv zero padding).
    w_ref: (9, Cin, Cout) bf16 ref, tap-major (t = ki*3 + kj).
    wp:    padded row width W+2 (static Python int).

    Returns an f32 (M, Cout) value equal to the conv output at interior rows;
    border rows contain garbage and must be masked / dropped by the caller.
    """
    m = x.shape[0]
    cout = w_ref.shape[2]
    acc = jnp.zeros((m, cout), jnp.float32)
    for t in range(9):
        ki, kj = divmod(t, 3)
        delta = (ki - 1) * wp + (kj - 1)            # flat-index tap offset
        z = jnp.dot(x, w_ref[t], preferred_element_type=jnp.float32)
        if delta != 0:
            # acc[r] += z[r + delta]; no wraparound can hit an interior row.
            z = pltpu.roll(z, shift=(-delta) % m, axis=0)
        acc = acc + z
    return acc


# ----------------------------------------------------------------------------
# Pallas kernels (each call: whole arrays VMEM-resident, no grid)
# ----------------------------------------------------------------------------
def _stem_kernel(x_ref, w_ref, s_ref, b_ref, mask_ref, o_ref, *, wp):
    """conv3x3(stride 1) + BN(scale,bias in f32) + ReLU, zero-bordered out."""
    acc = _conv3x3(x_ref[...], w_ref, wp)
    y = jnp.maximum(acc * s_ref[...] + b_ref[...], 0.0) * mask_ref[...]
    o_ref[...] = y.astype(o_ref.dtype)


def _block_id_kernel(x_ref, w1_ref, s1_ref, b1_ref, w2_ref, s2_ref, b2_ref,
                     mask_ref, o_ref, *, wp):
    """BasicBlock, stride 1, identity shortcut - fused in one call."""
    x = x_ref[...]
    mask = mask_ref[...]
    acc1 = _conv3x3(x, w1_ref, wp)
    y = jnp.maximum(acc1 * s1_ref[...] + b1_ref[...], 0.0) * mask
    y = y.astype(jnp.bfloat16)                      # intermediate stays in VMEM
    acc2 = _conv3x3(y, w2_ref, wp)
    out = acc2 * s2_ref[...] + b2_ref[...] + x.astype(jnp.float32)
    o_ref[...] = (jnp.maximum(out, 0.0) * mask).astype(o_ref.dtype)


def _block_down_kernel(x_ref, sel_ref, w1_ref, s1_ref, b1_ref,
                       w2_ref, s2_ref, b2_ref, ws_ref, ss_ref, bs_ref,
                       mask_ref, o_ref, *, wp_in, wp_out):
    """BasicBlock, stride 2, 1x1-conv shortcut - fused in one call.

    The stride-2 conv1 is computed at full resolution on the input grid and
    spatially subsampled with the precomputed one-hot matrix `sel`
    (out_grid x in_grid), which also zeroes the output border rows.
    """
    x = x_ref[...]
    sel = sel_ref[...]
    acc1 = _conv3x3(x, w1_ref, wp_in)
    y_full = jnp.maximum(acc1 * s1_ref[...] + b1_ref[...], 0.0)
    y = jnp.dot(sel, y_full.astype(jnp.bfloat16),
                preferred_element_type=jnp.float32).astype(jnp.bfloat16)
    acc2 = _conv3x3(y, w2_ref, wp_out)
    x_ds = jnp.dot(sel, x, preferred_element_type=jnp.float32)
    sc = (jnp.dot(x_ds.astype(jnp.bfloat16), ws_ref[...],
                  preferred_element_type=jnp.float32)
          * ss_ref[...] + bs_ref[...])
    out = acc2 * s2_ref[...] + b2_ref[...] + sc
    o_ref[...] = (jnp.maximum(out, 0.0) * mask_ref[...]).astype(o_ref.dtype)


def _pool_fc_kernel(x_ref, p_ref, w_ref, b_ref, o_ref):
    """Global average pool (over interior rows, via P) fused with the fc."""
    pooled = jnp.dot(p_ref[...], x_ref[...].astype(jnp.float32),
                     preferred_element_type=jnp.float32)          # (N, 512)
    o_ref[...] = (jnp.dot(pooled.astype(jnp.bfloat16), w_ref[...],
                          preferred_element_type=jnp.float32) + b_ref[...])


def _pcall(kernel, out_shape, *args):
    return pl.pallas_call(
        kernel,
        out_shape=out_shape,
        compiler_params=pltpu.CompilerParams(vmem_limit_bytes=VMEM_LIMIT),
    )(*args)


# ----------------------------------------------------------------------------
# One-time parameter preprocessing (hoisted out of the forward pass)
# ----------------------------------------------------------------------------
def fold_bn(gamma, beta, mean, var, eps=1e-5):
    scale = gamma / jnp.sqrt(var + eps)
    bias = beta - mean * scale
    return scale, bias


def _phys(c):
    return max(c, LANE)


def _prep_scale_bias(scale, bias, cout_p):
    cout = scale.shape[0]
    scale = jnp.pad(scale, (0, cout_p - cout)).reshape(1, cout_p)
    bias = jnp.pad(bias, (0, cout_p - cout)).reshape(1, cout_p)
    return scale.astype(jnp.float32), bias.astype(jnp.float32)


def _prep_conv3(w):
    """(cout, cin, 3, 3) -> tap-major (9, cin_p, cout_p) bf16."""
    cout, cin, kh, kw = w.shape
    cin_p, cout_p = _phys(cin), _phys(cout)
    w = jnp.pad(w, ((0, cout_p - cout), (0, cin_p - cin), (0, 0), (0, 0)))
    w = jnp.transpose(w, (2, 3, 1, 0)).reshape(kh * kw, cin_p, cout_p)
    return w.astype(jnp.bfloat16), cout_p


def _prep_conv1(w):
    """(cout, cin, 1, 1) -> (cin_p, cout_p) bf16."""
    cout, cin, _, _ = w.shape
    cin_p, cout_p = _phys(cin), _phys(cout)
    w = jnp.pad(w[:, :, 0, 0], ((0, cout_p - cout), (0, cin_p - cin)))
    return jnp.transpose(w, (1, 0)).astype(jnp.bfloat16), cout_p


def _make_mask(n, h, w):
    """(N*(h+2)*(w+2), 1) f32, 1.0 at interior rows, 0.0 at border rows."""
    hp, wp = h + 2, w + 2
    m = np.zeros((n, hp, wp, 1), np.float32)
    m[:, 1:h + 1, 1:w + 1, :] = 1.0
    return jnp.asarray(m.reshape(n * hp * wp, 1))


def _make_sel(n, h_in, w_in, h_out, w_out, stride):
    """One-hot (out_grid, in_grid) matrix: strided spatial subsample that also
    zeroes the output border rows (rows for border positions are all-zero)."""
    hpi, wpi = h_in + 2, w_in + 2
    hpo, wpo = h_out + 2, w_out + 2
    s = np.zeros((n * hpo * wpo, n * hpi * wpi), np.float32)
    for b in range(n):
        for i in range(h_out):
            for j in range(w_out):
                s[b * hpo * wpo + (i + 1) * wpo + (j + 1),
                  b * hpi * wpi + (stride * i + 1) * wpi + (stride * j + 1)] = 1.0
    return jnp.asarray(s, dtype=jnp.bfloat16)


def _make_pool(n, h, w):
    """(N, N*(h+2)*(w+2)) f32 averaging matrix over interior positions."""
    hp, wp = h + 2, w + 2
    p = np.zeros((n, n * hp * wp), np.float32)
    for b in range(n):
        for i in range(h):
            for j in range(w):
                p[b, b * hp * wp + (i + 1) * wp + (j + 1)] = 1.0 / (h * w)
    return jnp.asarray(p)


def preprocess_params(params, batch, h_in):
    """Convert PyTorch-layout parameters into kernel-ready constants ONCE."""
    prep = {}
    h = h_in                                            # stem is stride 1
    w1, c1 = _prep_conv3(params['conv1_w'])
    sp, bp = _prep_scale_bias(*params['conv1_bn'], c1)
    prep['stem'] = dict(w=w1, s=sp, b=bp, mask=_make_mask(batch, h, h),
                        wp=h + 2, m=batch * (h + 2) * (h + 2), c=c1)

    blocks = []
    for layer in params['layers']:
        for blk in layer:
            stride = blk['stride']
            h_out = h // stride
            w1k, c1p = _prep_conv3(blk['w1'])
            s1, b1 = _prep_scale_bias(*blk['bn1'], c1p)
            w2k, c2p = _prep_conv3(blk['w2'])
            s2, b2 = _prep_scale_bias(*blk['bn2'], c2p)
            d = dict(w1=w1k, s1=s1, b1=b1, w2=w2k, s2=s2, b2=b2,
                     mask=_make_mask(batch, h_out, h_out),
                     wp_in=h + 2, wp_out=h_out + 2,
                     m=batch * (h_out + 2) * (h_out + 2), c=c2p)
            if 'ws' in blk:
                wsk, csp = _prep_conv1(blk['ws'])
                ss, bs = _prep_scale_bias(*blk['bns'], csp)
                d.update(kind='down', ws=wsk, ss=ss, bs=bs,
                         sel=_make_sel(batch, h, h, h_out, h_out, stride))
            else:
                d['kind'] = 'id'
            blocks.append(d)
            h = h_out
    prep['blocks'] = blocks

    nc = params['fc_w'].shape[1]
    nc_p = ((nc + LANE - 1) // LANE) * LANE
    prep['fc'] = dict(
        pool=_make_pool(batch, h, h),
        w=jnp.pad(params['fc_w'], ((0, 0), (0, nc_p - nc))).astype(jnp.bfloat16),
        b=jnp.pad(params['fc_b'], (0, nc_p - nc)).reshape(1, nc_p).astype(jnp.float32),
        nc=nc)
    return prep


# ----------------------------------------------------------------------------
# Forward pass: 10 fused pallas_calls, no per-step weight glue
# ----------------------------------------------------------------------------
def resnet_forward(prep, x_nchw):
    n, c, h, w = x_nchw.shape
    # NCHW f32 -> flattened zero-padded NHWC (N*(H+2)*(W+2), 128) bf16.
    x = jnp.transpose(x_nchw, (0, 2, 3, 1)).astype(jnp.bfloat16)
    x = jnp.pad(x, ((0, 0), (1, 1), (1, 1), (0, LANE - c)))
    x = x.reshape(n * (h + 2) * (w + 2), LANE)

    st = prep['stem']
    x = _pcall(functools.partial(_stem_kernel, wp=st['wp']),
               jax.ShapeDtypeStruct((st['m'], st['c']), jnp.bfloat16),
               x, st['w'], st['s'], st['b'], st['mask'])

    for blk in prep['blocks']:
        out_shape = jax.ShapeDtypeStruct((blk['m'], blk['c']), jnp.bfloat16)
        if blk['kind'] == 'down':
            x = _pcall(functools.partial(_block_down_kernel,
                                         wp_in=blk['wp_in'],
                                         wp_out=blk['wp_out']),
                       out_shape,
                       x, blk['sel'], blk['w1'], blk['s1'], blk['b1'],
                       blk['w2'], blk['s2'], blk['b2'],
                       blk['ws'], blk['ss'], blk['bs'], blk['mask'])
        else:
            x = _pcall(functools.partial(_block_id_kernel, wp=blk['wp_out']),
                       out_shape,
                       x, blk['w1'], blk['s1'], blk['b1'],
                       blk['w2'], blk['s2'], blk['b2'], blk['mask'])

    fc = prep['fc']
    logits = _pcall(_pool_fc_kernel,
                    jax.ShapeDtypeStruct((n, fc['w'].shape[1]), jnp.float32),
                    x, fc['pool'], fc['w'], fc['b'])
    return logits[:, :fc['nc']]


# ----------------------------------------------------------------------------
# Deterministic parameter generation (PyTorch layout), then one-time prep
# ----------------------------------------------------------------------------
class ParamGen:
    def __init__(self, key):
        self.key = key

    def next(self):
        self.key, sub = jax.random.split(self.key)
        return sub

    def conv(self, cout, cin, kh, kw):
        return 0.05 * jax.random.normal(self.next(), (cout, cin, kh, kw),
                                        jnp.float32)

    def bn(self, c):
        gamma = 1.0 + 0.1 * jax.random.normal(self.next(), (c,), jnp.float32)
        beta = 0.1 * jax.random.normal(self.next(), (c,), jnp.float32)
        mean = 0.1 * jax.random.normal(self.next(), (c,), jnp.float32)
        var = 1.0 + 0.1 * jnp.abs(jax.random.normal(self.next(), (c,),
                                                    jnp.float32))
        return fold_bn(gamma, beta, mean, var)


def build_params(key, num_block=(2, 2, 2, 2), num_classes=100):
    pg = ParamGen(key)
    params = {'conv1_w': pg.conv(64, 3, 3, 3), 'conv1_bn': pg.bn(64)}
    in_c = 64
    layers = []
    for out_c, nblk, first_stride in zip((64, 128, 256, 512), num_block,
                                         (1, 2, 2, 2)):
        strides = [first_stride] + [1] * (nblk - 1)
        blocks = []
        for s in strides:
            blk = {'w1': pg.conv(out_c, in_c, 3, 3), 'bn1': pg.bn(out_c),
                   'w2': pg.conv(out_c, out_c, 3, 3), 'bn2': pg.bn(out_c),
                   'stride': s}
            if s != 1 or in_c != out_c:
                blk['ws'] = pg.conv(out_c, in_c, 1, 1)
                blk['bns'] = pg.bn(out_c)
            blocks.append(blk)
            in_c = out_c
        layers.append(blocks)
    params['layers'] = layers
    params['fc_w'] = 0.05 * jax.random.normal(pg.next(), (512, num_classes),
                                              jnp.float32)
    params['fc_b'] = 0.1 * jax.random.normal(pg.next(), (num_classes,),
                                             jnp.float32)
    return params


# ----------------------------------------------------------------------------
if __name__ == "__main__":
    key = jax.random.PRNGKey(0)
    k_params, k_x = jax.random.split(key)
    params = build_params(k_params)                  # ResNet-18, 100 classes
    x = jax.random.normal(k_x, (2, 3, 16, 16), jnp.float32)

    prep = preprocess_params(params, batch=x.shape[0], h_in=x.shape[2])
    logits = resnet_forward(prep, x)
    jax.block_until_ready(logits)
    assert logits.shape == (2, 100), logits.shape
    assert bool(jnp.all(jnp.isfinite(logits)))
    print("KERNEL_OK")
</pallas_src>

<mosaic_0001>
module attributes {stable_mosaic.version = 11 : i64} {
  func.func @_stem_kernel(%arg0: memref<648x128xbf16, #tpu.memory_space<vmem>>, %arg1: memref<9x128x128xbf16, #tpu.memory_space<vmem>>, %arg2: memref<1x128xf32, #tpu.memory_space<vmem>>, %arg3: memref<1x128xf32, #tpu.memory_space<vmem>>, %arg4: memref<648x1xf32, #tpu.memory_space<vmem>>, %arg5: memref<648x128xbf16, #tpu.memory_space<vmem>>) attributes {dimension_semantics = [], scalar_prefetch = 0 : i64, scratch_operands = 0 : i64, tpu.core_type = #tpu.core_type<tc>} {
    %c0 = arith.constant 0 : index
    %c0_0 = arith.constant 0 : index
    %0 = vector.load %arg0[%c0, %c0_0] : memref<648x128xbf16, #tpu.memory_space<vmem>>, vector<648x128xbf16>
    %cst = arith.constant 0.000000e+00 : f32
    %1 = vector.broadcast %cst : f32 to vector<648x128xf32>
    %c0_1 = arith.constant 0 : index
    %c0_2 = arith.constant 0 : index
    %c0_3 = arith.constant 0 : index
    %2 = vector.load %arg1[%c0_1, %c0_2, %c0_3] : memref<9x128x128xbf16, #tpu.memory_space<vmem>>, vector<1x128x128xbf16>
    %3 = vector.shape_cast %2 : vector<1x128x128xbf16> to vector<128x128xbf16>
    %cst_4 = arith.constant dense<0.000000e+00> : vector<648x128xf32>
    %4 = tpu.matmul %0, %3, %cst_4 {dimension_numbers = #tpu.dot_dimension_numbers<[1], [0], [0], [1], [0, 0, 1, 1], [], []>} : vector<648x128xbf16>, vector<128x128xbf16>, vector<648x128xf32> -> vector<648x128xf32>
    %c19_i32 = arith.constant 19 : i32
    %5 = tpu.dynamic_rotate %4 by %c19_i32 dim 0 : vector<648x128xf32>, i32 -> vector<648x128xf32>
    %6 = arith.addf %1, %5 : vector<648x128xf32>
    %c1 = arith.constant 1 : index
    %c0_5 = arith.constant 0 : index
    %c0_6 = arith.constant 0 : index
    %7 = vector.load %arg1[%c1, %c0_5, %c0_6] : memref<9x128x128xbf16, #tpu.memory_space<vmem>>, vector<1x128x128xbf16>
    %8 = vector.shape_cast %7 : vector<1x128x128xbf16> to vector<128x128xbf16>
    %cst_7 = arith.constant dense<0.000000e+00> : vector<648x128xf32>
    %9 = tpu.matmul %0, %8, %cst_7 {dimension_numbers = #tpu.dot_dimension_numbers<[1], [0], [0], [1], [0, 0, 1, 1], [], []>} : vector<648x128xbf16>, vector<128x128xbf16>, vector<648x128xf32> -> vector<648x128xf32>
    %c18_i32 = arith.constant 18 : i32
    %10 = tpu.dynamic_rotate %9 by %c18_i32 dim 0 : vector<648x128xf32>, i32 -> vector<648x128xf32>
    %11 = arith.addf %6, %10 : vector<648x128xf32>
    %c2 = arith.constant 2 : index
    %c0_8 = arith.constant 0 : index
    %c0_9 = arith.constant 0 : index
    %12 = vector.load %arg1[%c2, %c0_8, %c0_9] : memref<9x128x128xbf16, #tpu.memory_space<vmem>>, vector<1x128x128xbf16>
    %13 = vector.shape_cast %12 : vector<1x128x128xbf16> to vector<128x128xbf16>
    %cst_10 = arith.constant dense<0.000000e+00> : vector<648x128xf32>
    %14 = tpu.matmul %0, %13, %cst_10 {dimension_numbers = #tpu.dot_dimension_numbers<[1], [0], [0], [1], [0, 0, 1, 1], [], []>} : vector<648x128xbf16>, vector<128x128xbf16>, vector<648x128xf32> -> vector<648x128xf32>
    %c17_i32 = arith.constant 17 : i32
    %15 = tpu.dynamic_rotate %14 by %c17_i32 dim 0 : vector<648x128xf32>, i32 -> vector<648x128xf32>
    %16 = arith.addf %11, %15 : vector<648x128xf32>
    %c3 = arith.constant 3 : index
    %c0_11 = arith.constant 0 : index
    %c0_12 = arith.constant 0 : index
    %17 = vector.load %arg1[%c3, %c0_11, %c0_12] : memref<9x128x128xbf16, #tpu.memory_space<vmem>>, vector<1x128x128xbf16>
    %18 = vector.shape_cast %17 : vector<1x128x128xbf16> to vector<128x128xbf16>
    %cst_13 = arith.constant dense<0.000000e+00> : vector<648x128xf32>
    %19 = tpu.matmul %0, %18, %cst_13 {dimension_numbers = #tpu.dot_dimension_numbers<[1], [0], [0], [1], [0, 0, 1, 1], [], []>} : vector<648x128xbf16>, vector<128x128xbf16>, vector<648x128xf32> -> vector<648x128xf32>
    %c1_i32 = arith.constant 1 : i32
    %20 = tpu.dynamic_rotate %19 by %c1_i32 dim 0 : vector<648x128xf32>, i32 -> vector<648x128xf32>
    %21 = arith.addf %16, %20 : vector<648x128xf32>
    %c4 = arith.constant 4 : index
    %c0_14 = arith.constant 0 : index
    %c0_15 = arith.constant 0 : index
    %22 = vector.load %arg1[%c4, %c0_14, %c0_15] : memref<9x128x128xbf16, #tpu.memory_space<vmem>>, vector<1x128x128xbf16>
    %23 = vector.shape_cast %22 : vector<1x128x128xbf16> to vector<128x128xbf16>
    %cst_16 = arith.constant dense<0.000000e+00> : vector<648x128xf32>
    %24 = tpu.matmul %0, %23, %cst_16 {dimension_numbers = #tpu.dot_dimension_numbers<[1], [0], [0], [1], [0, 0, 1, 1], [], []>} : vector<648x128xbf16>, vector<128x128xbf16>, vector<648x128xf32> -> vector<648x128xf32>
    %25 = arith.addf %21, %24 : vector<648x128xf32>
    %c5 = arith.constant 5 : index
    %c0_17 = arith.constant 0 : index
    %c0_18 = arith.constant 0 : index
    %26 = vector.load %arg1[%c5, %c0_17, %c0_18] : memref<9x128x128xbf16, #tpu.memory_space<vmem>>, vector<1x128x128xbf16>
    %27 = vector.shape_cast %26 : vector<1x128x128xbf16> to vector<128x128xbf16>
    %cst_19 = arith.constant dense<0.000000e+00> : vector<648x128xf32>
    %28 = tpu.matmul %0, %27, %cst_19 {dimension_numbers = #tpu.dot_dimension_numbers<[1], [0], [0], [1], [0, 0, 1, 1], [], []>} : vector<648x128xbf16>, vector<128x128xbf16>, vector<648x128xf32> -> vector<648x128xf32>
    %c647_i32 = arith.constant 647 : i32
    %29 = tpu.dynamic_rotate %28 by %c647_i32 dim 0 : vector<648x128xf32>, i32 -> vector<648x128xf32>
    %30 = arith.addf %25, %29 : vector<648x128xf32>
    %c6 = arith.constant 6 : index
    %c0_20 = arith.constant 0 : index
    %c0_21 = arith.constant 0 : index
    %31 = vector.load %arg1[%c6, %c0_20, %c0_21] : memref<9x128x128xbf16, #tpu.memory_space<vmem>>, vector<1x128x128xbf16>
    %32 = vector.shape_cast %31 : vector<1x128x128xbf16> to vector<128x128xbf16>
    %cst_22 = arith.constant dense<0.000000e+00> : vector<648x128xf32>
    %33 = tpu.matmul %0, %32, %cst_22 {dimension_numbers = #tpu.dot_dimension_numbers<[1], [0], [0], [1], [0, 0, 1, 1], [], []>} : vector<648x128xbf16>, vector<128x128xbf16>, vector<648x128xf32> -> vector<648x128xf32>
    %c631_i32 = arith.constant 631 : i32
    %34 = tpu.dynamic_rotate %33 by %c631_i32 dim 0 : vector<648x128xf32>, i32 -> vector<648x128xf32>
    %35 = arith.addf %30, %34 : vector<648x128xf32>
    %c7 = arith.constant 7 : index
    %c0_23 = arith.constant 0 : index
    %c0_24 = arith.constant 0 : index
    %36 = vector.load %arg1[%c7, %c0_23, %c0_24] : memref<9x128x128xbf16, #tpu.memory_space<vmem>>, vector<1x128x128xbf16>
    %37 = vector.shape_cast %36 : vector<1x128x128xbf16> to vector<128x128xbf16>
    %cst_25 = arith.constant dense<0.000000e+00> : vector<648x128xf32>
    %38 = tpu.matmul %0, %37, %cst_25 {dimension_numbers = #tpu.dot_dimension_numbers<[1], [0], [0], [1], [0, 0, 1, 1], [], []>} : vector<648x128xbf16>, vector<128x128xbf16>, vector<648x128xf32> -> vector<648x128xf32>
    %c630_i32 = arith.constant 630 : i32
    %39 = tpu.dynamic_rotate %38 by %c630_i32 dim 0 : vector<648x128xf32>, i32 -> vector<648x128xf32>
    %40 = arith.addf %35, %39 : vector<648x128xf32>
    %c8 = arith.constant 8 : index
    %c0_26 = arith.constant 0 : index
    %c0_27 = arith.constant 0 : index
    %41 = vector.load %arg1[%c8, %c0_26, %c0_27] : memref<9x128x128xbf16, #tpu.memory_space<vmem>>, vector<1x128x128xbf16>
    %42 = vector.shape_cast %41 : vector<1x128x128xbf16> to vector<128x128xbf16>
    %cst_28 = arith.constant dense<0.000000e+00> : vector<648x128xf32>
    %43 = tpu.matmul %0, %42, %cst_28 {dimension_numbers = #tpu.dot_dimension_numbers<[1], [0], [0], [1], [0, 0, 1, 1], [], []>} : vector<648x128xbf16>, vector<128x128xbf16>, vector<648x128xf32> -> vector<648x128xf32>
    %c629_i32 = arith.constant 629 : i32
    %44 = tpu.dynamic_rotate %43 by %c629_i32 dim 0 : vector<648x128xf32>, i32 -> vector<648x128xf32>
    %45 = arith.addf %40, %44 : vector<648x128xf32>
    %c0_29 = arith.constant 0 : index
    %c0_30 = arith.constant 0 : index
    %46 = vector.load %arg2[%c0_29, %c0_30] : memref<1x128xf32, #tpu.memory_space<vmem>>, vector<1x128xf32>
    %47 = vector.broadcast %46 : vector<1x128xf32> to vector<648x128xf32>
    %48 = arith.mulf %45, %47 : vector<648x128xf32>
    %c0_31 = arith.constant 0 : index
    %c0_32 = arith.constant 0 : index
    %49 = vector.load %arg3[%c0_31, %c0_32] : memref<1x128xf32, #tpu.memory_space<vmem>>, vector<1x128xf32>
    %50 = vector.broadcast %49 : vector<1x128xf32> to vector<648x128xf32>
    %51 = arith.addf %48, %50 : vector<648x128xf32>
    %cst_33 = arith.constant 0.000000e+00 : f32
    %52 = vector.broadcast %cst_33 : f32 to vector<648x128xf32>
    %53 = arith.maximumf %51, %52 : vector<648x128xf32>
    %c0_34 = arith.constant 0 : index
    %c0_35 = arith.constant 0 : index
    %54 = vector.load %arg4[%c0_34, %c0_35] : memref<648x1xf32, #tpu.memory_space<vmem>>, vector<648x1xf32>
    %55 = vector.broadcast %54 : vector<648x1xf32> to vector<648x128xf32>
    %56 = arith.mulf %53, %55 : vector<648x128xf32>
    %57 = arith.truncf %56 : vector<648x128xf32> to vector<648x128xbf16>
    %c0_36 = arith.constant 0 : index
    %c0_37 = arith.constant 0 : index
    %58 = vector.load %arg5[%c0_36, %c0_37] : memref<648x128xbf16, #tpu.memory_space<vmem>>, vector<648x128xbf16>
    tpu.vector_store %arg5[%c0_36, %c0_37], %57 {strides = array<i32>} : memref<648x128xbf16, #tpu.memory_space<vmem>>, vector<648x128xbf16>,
    return
  }
}

</mosaic_0001>

<bundles_post_ra>
// kernel: tpu_custom_call.1
= control target key start
LH: loop header
LB: loop body
LE: loop exit
PB: predicated region body
PF: predicated region fallthrough
CT: control target
= control target key end

     0   :  { %10 = vsyncpa [#allocation3], 0  ;;  %s10961_s0 = inlined_call_operand.hbm [shape: bf16[648,128], index: 0, kind: input, shape index: {}]   ;;  %s10962_s1 = inlined_call_operand.vmem [shape: bf16[9,128,128], index: 1, kind: input, shape index: {}]   ;;  %s10963_s2 = inlined_call_operand.vmem [shape: f32[1,128], index: 2, kind: input, shape index: {}]   ;;  %s10964_s3 = inlined_call_operand.vmem [shape: f32[1,128], index: 3, kind: input, shape index: {}]   ;;  %s10965_s4 = inlined_call_operand.vmem [shape: f32[648,1], index: 4, kind: input, shape index: {}]   ;;  %s10966_s5 = inlined_call_operand.hbm [shape: bf16[648,128], index: 5, kind: output, shape index: {}]  }
   0x1   :  { %11 = vsyncpa [#allocation4], 0  ;;  %s16_s20 = sshll.u32 %s10961_s0, 4  ;;  %s6983_s21 = smov [#allocation2]   ;;  %s17_s20 = int_to_ptr.hbm [resolvable:$true] %s16_s20 }
   0x2   :  { %s18_s22 = sshll.u32 %s6983_s21, 4  ;;  %s6984_s23 = smov 64   ;;  %s19_s22 = int_to_ptr.vmem [resolvable:$true] %s18_s22 }
   0x3   :  { %s6985_s24 = smov 4  }
   0x4   :  { %24 = dma.hbm_to_vmem [thread:$0]  %s17_s20, 5184, %s19_s22, [#allocation3], %s6984_s23, %s6984_s23, %s6985_s24  }
   0x5   :  { %6979 = dma.done.wait [#allocation3], 5184  }
   0x6   :  { %6980 = vsyncadd [#allocation3], 4294962112  ;;  %v6518_v0 = vld [vmem:[%s10962_s1 + $0x38] sm:$0xff]  ;;  %v6517_v1 = vld [vmem:[%s10962_s1 + $0x30] sm:$0xff]  ;;  %s5882_s0 = sshll.u32 %s10966_s5, 4  ;;  %s5883_s0 = int_to_ptr.hbm [resolvable:$true] %s5882_s0 }
   0x7   :  { %426 = vmatpush.bf16.msra.mxu0 %v6518_v0  ;;  %6822 = vmatpush.bf16.msra.mxu1 %v6518_v0  ;;  %v6516_v2 = vld [vmem:[%s10962_s1 + $0x28] sm:$0xff]  ;;  %v6515_v3 = vld [vmem:[%s10962_s1 + $0x20] sm:$0xff]  ;;  %v6514_v4 = vld [vmem:[%s10962_s1 + $0x18] sm:$0xff] }
   0x8   :  { %6823 = vmatpush.bf16.msra.mxu2 %v6518_v0  ;;  %6824 = vmatpush.bf16.msra.mxu3 %v6518_v0  ;;  %v6513_v5 = vld [vmem:[%s10962_s1 + $0x10] sm:$0xff]  ;;  %v6512_v6 = vld [vmem:[%s10962_s1 + $0x8] sm:$0xff]  ;;  %v6511_v7 = vld [vmem:[%s10962_s1] sm:$0xff] }
   0x9   :  { %v6534_v8 = vld [vmem:[%s10962_s1 + $0xb8] sm:$0xff]  ;;  %v7054_v10 = vld [vmem:[#allocation2] sm:$0xff]  ;;  %v6493_v12 = vld [vmem:[#allocation2 + $0xb0] sm:$0xff] }
   0xa   :  { %v6526_v9 = vld [vmem:[%s10962_s1 + $0x78] sm:$0xff]  ;;  %v6504_v13 = vld [vmem:[#allocation2 + $0x108] sm:$0xff]  ;;  %v6533_v15 = vld [vmem:[%s10962_s1 + $0xb0] sm:$0xff] }
   0xb   :  { %427 = vmatpush.bf16.msra.mxu0 %v6517_v1  ;;  %6825 = vmatpush.bf16.msra.mxu1 %v6517_v1  ;;  %v7056_v11 = vld [vmem:[#allocation2 + $0x58] sm:$0xff]  ;;  %v6525_v16 = vld [vmem:[%s10962_s1 + $0x70] sm:$0xff]  ;;  %v6532_v18 = vld [vmem:[%s10962_s1 + $0xa8] sm:$0xff] }
   0xc   :  { %6826 = vmatpush.bf16.msra.mxu2 %v6517_v1  ;;  %6827 = vmatpush.bf16.msra.mxu3 %v6517_v1  ;;  %v6550_v14 = vld [vmem:[%s10962_s1 + $0x138] sm:$0xff]  ;;  %v6549_v17 = vld [vmem:[%s10962_s1 + $0x130] sm:$0xff]  ;;  %v7075_v19 = vld [vmem:[#allocation2 + $0x8] sm:$0xff] }
   0xd   :  { %v7077_v20 = vld [vmem:[#allocation2 + $0x60] sm:$0xff]  ;;  %v6494_v21 = vld [vmem:[#allocation2 + $0xb8] sm:$0xff]  ;;  %v6505_v22 = vld [vmem:[#allocation2 + $0x110] sm:$0xff] }
   0xe   :  { %v6524_v23 = vld [vmem:[%s10962_s1 + $0x68] sm:$0xff]  ;;  %v6542_v24 = vld [vmem:[%s10962_s1 + $0xf8] sm:$0xff]  ;;  %v7090_v26 = vld [vmem:[#allocation2 + $0x10] sm:$0xff] }
   0xf   :  { %428 = vmatpush.bf16.msra.mxu0 %v6516_v2  ;;  %6828 = vmatpush.bf16.msra.mxu1 %v6516_v2  ;;  %v6548_v25 = vld [vmem:[%s10962_s1 + $0x128] sm:$0xff]  ;;  %v6495_v28 = vld [vmem:[#allocation2 + $0xc0] sm:$0xff]  ;;  %v6506_v29 = vld [vmem:[#allocation2 + $0x118] sm:$0xff] }
  0x10   :  { %6829 = vmatpush.bf16.msra.mxu2 %v6516_v2  ;;  %6830 = vmatpush.bf16.msra.mxu3 %v6516_v2  ;;  %v7092_v27 = vld [vmem:[#allocation2 + $0x68] sm:$0xff]  ;;  %v6531_v30 = vld [vmem:[%s10962_s1 + $0xa0] sm:$0xff]  ;;  %v6541_v31 = vld [vmem:[%s10962_s1 + $0xf0] sm:$0xff] }
  0x11   :  { %v6523_v32 = vld [vmem:[%s10962_s1 + $0x60] sm:$0xff]  ;;  %v7108_v34 = vld [vmem:[#allocation2 + $0x18] sm:$0xff]  ;;  %v6485_v35 = vld [vmem:[#allocation2 + $0x70] sm:$0xff] }
  0x12   :  { %v6547_v33 = vld [vmem:[%s10962_s1 + $0x120] sm:$0xff]  ;;  %v6496_v36 = vld [vmem:[#allocation2 + $0xc8] sm:$0xff]  ;;  %v6530_v39 = vld [vmem:[%s10962_s1 + $0x98] sm:$0xff] }
  0x13   :  { %429 = vmatpush.bf16.msra.mxu0 %v6515_v3  ;;  %6831 = vmatpush.bf16.msra.mxu1 %v6515_v3  ;;  %v6507_v37 = vld [vmem:[#allocation2 + $0x120] sm:$0xff]  ;;  %v6540_v38 = vld [vmem:[%s10962_s1 + $0xe8] sm:$0xff]  ;;  %v6522_v40 = vld [vmem:[%s10962_s1 + $0x58] sm:$0xff] }
  0x14   :  { %6832 = vmatpush.bf16.msra.mxu2 %v6515_v3  ;;  %6833 = vmatpush.bf16.msra.mxu3 %v6515_v3  ;;  %v7120_v41 = vld [vmem:[#allocation2 + $0x20] sm:$0xff]  ;;  %v6486_v42 = vld [vmem:[#allocation2 + $0x78] sm:$0xff]  ;;  %v6497_v43 = vld [vmem:[#allocation2 + $0xd0] sm:$0xff] }
  0x15   :  { %v6508_v44 = vld [vmem:[#allocation2 + $0x128] sm:$0xff]  ;;  %v6539_v45 = vld [vmem:[%s10962_s1 + $0xe0] sm:$0xff]  ;;  %v6546_v46 = vld [vmem:[%s10962_s1 + $0x118] sm:$0xff] }
  0x16   :  { %v6529_v47 = vld [vmem:[%s10962_s1 + $0x90] sm:$0xff]  ;;  %v7132_v48 = vld [vmem:[#allocation2 + $0x28] sm:$0xff]  ;;  %v6487_v49 = vld [vmem:[#allocation2 + $0x80] sm:$0xff] }
  0x17   :  { %430 = vmatpush.bf16.msra.mxu0 %v6514_v4  ;;  %6834 = vmatpush.bf16.msra.mxu1 %v6514_v4  ;;  %v6498_v50 = vld [vmem:[#allocation2 + $0xd8] sm:$0xff]  ;;  %v6509_v51 = vld [vmem:[#allocation2 + $0x130] sm:$0xff]  ;;  %v6536_v56 = vld [vmem:[%s10962_s1 + $0xc8] sm:$0xff] }
  0x18   :  { %6835 = vmatpush.bf16.msra.mxu2 %v6514_v4  ;;  %6836 = vmatpush.bf16.msra.mxu3 %v6514_v4  ;;  %v6538_v52 = vld [vmem:[%s10962_s1 + $0xd8] sm:$0xff]  ;;  %v6521_v53 = vld [vmem:[%s10962_s1 + $0x50] sm:$0xff]  ;;  %v6488_v58 = vld [vmem:[#allocation2 + $0x88] sm:$0xff] }
  0x19   :  { %v6545_v54 = vld [vmem:[%s10962_s1 + $0x110] sm:$0xff]  ;;  %v6535_v59 = vld [vmem:[%s10962_s1 + $0xc0] sm:$0xff]  ;;  %v6510_v61 = vld [vmem:[#allocation2 + $0x138] sm:$0xff] }
  0x1a   :  { %v6537_v55 = vld [vmem:[%s10962_s1 + $0xd0] sm:$0xff]  ;;  %v6499_v60 = vld [vmem:[#allocation2 + $0xe0] sm:$0xff]  ;;  %v6528_v62 = vld [vmem:[%s10962_s1 + $0x88] sm:$0xff] }
  0x1b   :  { %431 = vmatpush.bf16.msra.mxu0 %v6513_v5  ;;  %6837 = vmatpush.bf16.msra.mxu1 %v6513_v5  ;;  %v7150_v57 = vld [vmem:[#allocation2 + $0x30] sm:$0xff]  ;;  %v117_v63 = vld [vmem:[#allocation2 + $0x140] sm:$0xf]  ;;  %v6520_v0 = vld [vmem:[%s10962_s1 + $0x48] sm:$0xff] }
  0x1c   :  { %6838 = vmatpush.bf16.msra.mxu2 %v6513_v5  ;;  %6839 = vmatpush.bf16.msra.mxu3 %v6513_v5  ;;  %v295_v1 = vunpack.c.l.b16 %v117_v63  ;;  %v7162_v2 = vld [vmem:[#allocation2 + $0x38] sm:$0xff]  ;;  %v6489_v3 = vld [vmem:[#allocation2 + $0x90] sm:$0xff]  ;;  %v6500_v4 = vld [vmem:[#allocation2 + $0xe8] sm:$0xff] }
  0x1e   :  { %v7164_v5 = vpack.c.b16 %v295_v1, %v295_v1 }
  0x1f   :  { %432 = vmatpush.bf16.msra.mxu0 %v6512_v6  ;;  %6840 = vmatpush.bf16.msra.mxu1 %v6512_v6 }
  0x20   :  { %6841 = vmatpush.bf16.msra.mxu2 %v6512_v6  ;;  %6842 = vmatpush.bf16.msra.mxu3 %v6512_v6  ;;  %10989 = vst [vmem:[#allocation8_spill] sm:$0xff] %v7164_v5  ;;  %v6544_v6 = vld [vmem:[%s10962_s1 + $0x108] sm:$0xff] }
  0x23   :  { %433 = vmatpush.bf16.msra.mxu0 %v6511_v7  ;;  %6843 = vmatpush.bf16.msra.mxu1 %v6511_v7 }
  0x24   :  { %6844 = vmatpush.bf16.msra.mxu2 %v6511_v7  ;;  %6845 = vmatpush.bf16.msra.mxu3 %v6511_v7  ;;  %v6527_v7 = vld [vmem:[%s10962_s1 + $0x80] sm:$0xff] }
  0x26   :  { %434 = vmatmul.bf16.vlgmr.msra.gmra.mxu0 %v7054_v10  ;;  %489 = vmatmul.bf16.vlgmr.msra.gmra.mxu1 %v7056_v11 }
  0x27   :  { %950 = vmatpush.bf16.msrb.mxu1 %v6526_v9  ;;  %544 = vmatmul.bf16.vlgmr.msra.gmra.mxu2 %v6493_v12  ;;  %v6490_v9 = vld [vmem:[#allocation2 + $0x98] sm:$0xff] }
  0x28   :  { %1472 = vmatpush.bf16.msrb.mxu2 %v6534_v8  ;;  %599 = vmatmul.bf16.vlgmr.msra.gmra.mxu3 %v6504_v13  ;;  %v7174_v8 = vld [vmem:[#allocation2 + $0x40] sm:$0xff] }
  0x29   :  { %2515 = vmatpush.bf16.msrb.mxu0 %v6550_v14  ;;  %1994 = vmatpush.bf16.msrb.mxu3 %v6542_v24  ;;  %v6501_v14 = vld [vmem:[#allocation2 + $0xf0] sm:$0xff] }
  0x2b   :  { %951 = vmatpush.bf16.msrb.mxu1 %v6525_v16  ;;  %v6519_v16 = vld [vmem:[%s10962_s1 + $0x40] sm:$0xff] }
  0x2c   :  { %1473 = vmatpush.bf16.msrb.mxu2 %v6533_v15  ;;  %v720_v15 = vlaneseq }
  0x2d   :  { %2516 = vmatpush.bf16.msrb.mxu0 %v6549_v17  ;;  %1995 = vmatpush.bf16.msrb.mxu3 %v6541_v31 }
  0x2e   :  { %v7185_v17 = vshrl.u32 %v720_v15, 7  ;;  %v7263_v15 = vld [vmem:[#allocation2 + $0x50] sm:$0xff] }
  0x2f   :  { %952 = vmatpush.bf16.msrb.mxu1 %v6524_v23 }
  0x30   :  { %1474 = vmatpush.bf16.msrb.mxu2 %v6532_v18  ;;  %vm722_vm0 = vcmp.lt.s32.totalorder %v7185_v17, 3  ;;  %vm1766_vm1 = vcmp.lt.s32.totalorder %v7185_v17, 1  ;;  %vm1244_vm2 = vcmp.lt.s32.totalorder %v7185_v17, 2  ;;  %vm4211_vm3 = vcmp.lt.s32.totalorder %v7185_v17, 6 }
  0x31   :  { %2517 = vmatpush.bf16.msrb.mxu0 %v6548_v25  ;;  %1996 = vmatpush.bf16.msrb.mxu3 %v6540_v38  ;;  %v6491_v38 = vld [vmem:[#allocation2 + $0xa0] sm:$0xff]  ;;  %vm4733_vm4 = vcmp.lt.s32.totalorder %v7185_v17, 5  ;;  %vm3168_vm5 = vcmp.lt.s32.totalorder %v7185_v17, 7 }
  0x33   :  { %953 = vmatpush.bf16.msrb.mxu1 %v6523_v32 }
  0x34   :  { %1475 = vmatpush.bf16.msrb.mxu2 %v6531_v30  ;;  %v6543_v30 = vld [vmem:[%s10962_s1 + $0x100] sm:$0xff] }
  0x35   :  { %2518 = vmatpush.bf16.msrb.mxu0 %v6547_v33  ;;  %1997 = vmatpush.bf16.msrb.mxu3 %v6539_v45  ;;  %v6502_v45 = vld [vmem:[#allocation2 + $0xf8] sm:$0xff] }
  0x36   :  { %439 = vmatmul.bf16.gmra.mxu0 %v7075_v19  ;;  %494 = vmatmul.bf16.gmra.mxu1 %v7077_v20 }
  0x37   :  { %549 = vmatmul.bf16.gmra.mxu2 %v6494_v21  ;;  %954 = vmatpush.bf16.msrb.mxu1 %v6522_v40 }
  0x38   :  { %604 = vmatmul.bf16.gmra.mxu3 %v6505_v22  ;;  %1476 = vmatpush.bf16.msrb.mxu2 %v6530_v39 }
  0x39   :  { %2519 = vmatpush.bf16.msrb.mxu0 %v6546_v46  ;;  %1998 = vmatpush.bf16.msrb.mxu3 %v6538_v52 }
  0x3b   :  { %955 = vmatpush.bf16.msrb.mxu1 %v6521_v53  ;;  %v6566_v53 = vld [vmem:[%s10962_s1 + $0x1b8] sm:$0xff] }
  0x3c   :  { %1477 = vmatpush.bf16.msrb.mxu2 %v6529_v47 }
  0x3d   :  { %2520 = vmatpush.bf16.msrb.mxu0 %v6545_v54  ;;  %1999 = vmatpush.bf16.msrb.mxu3 %v6537_v55  ;;  %v6574_v54 = vld [vmem:[%s10962_s1 + $0x1f8] sm:$0xff] }
  0x3f   :  { %956 = vmatpush.bf16.msrb.mxu1 %v6520_v0 }
  0x40   :  { %1478 = vmatpush.bf16.msrb.mxu2 %v6528_v62 }
  0x41   :  { %2000 = vmatpush.bf16.msrb.mxu3 %v6536_v56  ;;  %2521 = vmatpush.bf16.msrb.mxu0 %v6544_v6 }
  0x43   :  { %957 = vmatpush.bf16.msrb.mxu1 %v6519_v16  ;;  %v6492_v16 = vld [vmem:[#allocation2 + $0xa8] sm:$0xff] }
  0x44   :  { %1479 = vmatpush.bf16.msrb.mxu2 %v6527_v7  ;;  %v6582_v7 = vld [vmem:[%s10962_s1 + $0x238] sm:$0xff] }
  0x45   :  { %2001 = vmatpush.bf16.msrb.mxu3 %v6535_v59  ;;  %2522 = vmatpush.bf16.msrb.mxu0 %v6543_v30  ;;  %v6503_v30 = vld [vmem:[#allocation2 + $0x100] sm:$0xff] }
  0x46   :  { %444 = vmatmul.bf16.gmra.mxu0 %v7090_v26  ;;  %499 = vmatmul.bf16.gmra.mxu1 %v7092_v27 }
  0x47   :  { %554 = vmatmul.bf16.gmra.mxu2 %v6495_v28 }
  0x48   :  { %609 = vmatmul.bf16.gmra.mxu3 %v6506_v29  ;;  %3396 = vmatpush.bf16.msra.mxu2 %v6566_v53 }
  0x49   :  { %3917 = vmatpush.bf16.msra.mxu3 %v6574_v54  ;;  %4439 = vmatpush.bf16.msra.mxu0 %v6582_v7 }
  0x56   :  { %449 = vmatmul.bf16.gmra.mxu0 %v7108_v34  ;;  %504 = vmatmul.bf16.gmra.mxu1 %v6485_v35 }
  0x57   :  { %559 = vmatmul.bf16.gmra.mxu2 %v6496_v36 }
  0x58   :  { %614 = vmatmul.bf16.gmra.mxu3 %v6507_v37  ;;  %v7210_v37 = vld [vmem:[#allocation2 + $0x48] sm:$0xff] }
  0x66   :  { %454 = vmatmul.bf16.gmra.mxu0 %v7120_v41  ;;  %509 = vmatmul.bf16.gmra.mxu1 %v6486_v42 }
  0x67   :  { %564 = vmatmul.bf16.gmra.mxu2 %v6497_v43 }
  0x68   :  { %619 = vmatmul.bf16.gmra.mxu3 %v6508_v44 }
  0x76   :  { %459 = vmatmul.bf16.gmra.mxu0 %v7132_v48  ;;  %514 = vmatmul.bf16.gmra.mxu1 %v6487_v49 }
  0x77   :  { %569 = vmatmul.bf16.gmra.mxu2 %v6498_v50 }
  0x78   :  { %624 = vmatmul.bf16.gmra.mxu3 %v6509_v51 }
  0x86   :  { %464 = vmatmul.bf16.gmra.mxu0 %v7150_v57  ;;  %519 = vmatmul.bf16.gmra.mxu1 %v6488_v58 }
  0x87   :  { %574 = vmatmul.bf16.gmra.mxu2 %v6499_v60 }
  0x88   :  { %629 = vmatmul.bf16.gmra.mxu3 %v6510_v61 }
  0x96   :  { %469 = vmatmul.bf16.gmra.mxu0 %v7162_v2  ;;  %524 = vmatmul.bf16.gmra.mxu1 %v6489_v3  ;;  %v6558_v3 = vld [vmem:[%s10962_s1 + $0x178] sm:$0xff] }
  0x97   :  { %579 = vmatmul.bf16.gmra.mxu2 %v6500_v4  ;;  %2874 = vmatpush.bf16.msra.mxu1 %v6558_v3 }
  0x98   :  { %634 = vmatmul.bf16.gmra.mxu3 %v7164_v5 }
  0xa3   :  { %v7176_v12 = vpop.f32.mrf.mxu0  ;;  %v7178_v13 = vpop.f32.mrf.mxu1 }
  0xa4   :  { %v10970_v18 = vrot.slane %v7176_v12, 5  ;;  %v10969_v25 = vrot.slane %v7178_v13, 5 }
  0xa6   :  { %474 = vmatmul.bf16.gmra.mxu0 %v7174_v8  ;;  %529 = vmatmul.bf16.gmra.mxu1 %v6490_v9 }
  0xa7   :  { %584 = vmatmul.bf16.gmra.mxu2 %v6501_v14 }
  0xa8   :  { %2002 = vmatmul.bf16.vlgmr.msrb.gmra.mxu3 %v7054_v10 }
  0xaa   :  { %v7188_v21 = vpop.f32.mrf.mxu2 }
  0xab   :  { %v7190_v22 = vpop.f32.mrf.mxu3  ;;  %v437_v23 = vpop.f32.mrf.mxu0  ;;  %v10968_v39 = vrot.slane %v7188_v21, 5 }
  0xac   :  { %v492_v24 = vpop.f32.mrf.mxu1  ;;  %v640_v28 = vrot.slane %v437_v23, 5  ;;  %v10967_v33 = vrot.slane %v7190_v22, 5 }
  0xad   :  { %v662_v29 = vrot.slane %v492_v24, 5 }
  0xae   :  { %v7201_v31 = vsel %vm722_vm0, %v10970_v18, %v640_v28 }
  0xaf   :  { %v7207_v32 = vsel %vm722_vm0, %v10969_v25, %v662_v29 }
  0xb2   :  { %v547_v35 = vpop.f32.mrf.mxu2 }
  0xb3   :  { %v602_v36 = vpop.f32.mrf.mxu3  ;;  %v684_v40 = vrot.slane %v547_v35, 5  ;;  %v440_v43 = vpop.f32.mrf.mxu0 }
  0xb4   :  { %v706_v42 = vrot.slane %v602_v36, 5  ;;  %v495_v44 = vpop.f32.mrf.mxu1  ;;  %v641_v46 = vrot.slane %v440_v43, 5 }
  0xb5   :  { %v663_v47 = vrot.slane %v495_v44, 5  ;;  %v7217_v49 = vsel %vm722_vm0, %v10968_v39, %v684_v40 }
  0xb6   :  { %10990 = vst [vmem:[#allocation9_spill] sm:$0xff] %v7217_v49  ;;  %v7223_v50 = vsel %vm722_vm0, %v10967_v33, %v706_v42  ;;  %v7227_v51 = vsel %vm722_vm0, %v640_v28, %v641_v46  ;;  %479 = vmatmul.bf16.gmra.mxu0 %v7210_v37  ;;  %534 = vmatmul.bf16.gmra.mxu1 %v6491_v38 }
  0xb7   :  { %10991 = vst [vmem:[#allocation10_spill] sm:$0xff] %v7223_v50  ;;  %v7231_v52 = vsel %vm722_vm0, %v662_v29, %v663_v47  ;;  %589 = vmatmul.bf16.gmra.mxu2 %v6502_v45 }
  0xb8   :  { %2007 = vmatmul.bf16.gmra.mxu3 %v7075_v19 }
  0xba   :  { %v550_v55 = vpop.f32.mrf.mxu2 }
  0xbb   :  { %v605_v56 = vpop.f32.mrf.mxu3  ;;  %v685_v58 = vrot.slane %v550_v55, 5  ;;  %v442_v60 = vpop.f32.mrf.mxu0 }
  0xbc   :  { %v707_v59 = vrot.slane %v605_v56, 5  ;;  %v497_v61 = vpop.f32.mrf.mxu1  ;;  %v642_v62 = vrot.slane %v442_v60, 5 }
  0xbd   :  { %v664_v63 = vrot.slane %v497_v61, 5  ;;  %v7243_v0 = vsel %vm722_vm0, %v684_v40, %v685_v58 }
  0xbe   :  { %10992 = vst [vmem:[#allocation11_spill] sm:$0xff] %v7243_v0  ;;  %v7247_v1 = vsel %vm722_vm0, %v706_v42, %v707_v59  ;;  %v7254_v4 = vsel %vm722_vm0, %v641_v46, %v642_v62 }
  0xbf   :  { %10993 = vst [vmem:[#allocation12_spill] sm:$0xff] %v7247_v1  ;;  %v7258_v6 = vsel %vm722_vm0, %v663_v47, %v664_v63 }
  0xc2   :  { %v552_v9 = vpop.f32.mrf.mxu2 }
  0xc3   :  { %v607_v14 = vpop.f32.mrf.mxu3  ;;  %v686_v23 = vrot.slane %v552_v9, 5  ;;  %v445_v28 = vpop.f32.mrf.mxu0 }
  0xc4   :  { %v708_v24 = vrot.slane %v607_v14, 5  ;;  %v500_v29 = vpop.f32.mrf.mxu1  ;;  %v643_v35 = vrot.slane %v445_v28, 5 }
  0xc5   :  { %v665_v36 = vrot.slane %v500_v29, 5  ;;  %v7267_v38 = vsel %vm722_vm0, %v685_v58, %v686_v23 }
  0xc6   :  { %10994 = vst [vmem:[#allocation13_spill] sm:$0xff] %v7267_v38  ;;  %v7271_v40 = vsel %vm722_vm0, %v707_v59, %v708_v24  ;;  %v7275_v42 = vsel %vm722_vm0, %v642_v62, %v643_v35  ;;  %484 = vmatmul.bf16.gmra.mxu0 %v7263_v15  ;;  %539 = vmatmul.bf16.gmra.mxu1 %v6492_v16 }
  0xc7   :  { %10995 = vst [vmem:[#allocation14_spill] sm:$0xff] %v7271_v40  ;;  %v7279_v43 = vsel %vm722_vm0, %v664_v63, %v665_v36  ;;  %594 = vmatmul.bf16.gmra.mxu2 %v6503_v30 }
  0xc8   :  { %2012 = vmatmul.bf16.gmra.mxu3 %v7090_v26 }
  0xca   :  { %v555_v44 = vpop.f32.mrf.mxu2 }
  0xcb   :  { %v610_v45 = vpop.f32.mrf.mxu3  ;;  %v687_v46 = vrot.slane %v555_v44, 5  ;;  %v447_v53 = vpop.f32.mrf.mxu0 }
  0xcc   :  { %v709_v47 = vrot.slane %v610_v45, 5  ;;  %v502_v54 = vpop.f32.mrf.mxu1  ;;  %v644_v55 = vrot.slane %v447_v53, 5 }
  0xcd   :  { %v666_v56 = vrot.slane %v502_v54, 5  ;;  %v7285_v58 = vsel %vm722_vm0, %v686_v23, %v687_v46 }
  0xce   :  { %10996 = vst [vmem:[#allocation15_spill] sm:$0xff] %v7285_v58  ;;  %v7289_v59 = vsel %vm722_vm0, %v708_v24, %v709_v47  ;;  %v7293_v60 = vsel %vm722_vm0, %v643_v35, %v644_v55 }
  0xcf   :  { %10997 = vst [vmem:[#allocation16_spill] sm:$0xff] %v7289_v59  ;;  %v7297_v61 = vsel %vm722_vm0, %v665_v36, %v666_v56 }
  0xd2   :  { %v557_v62 = vpop.f32.mrf.mxu2 }
  0xd3   :  { %v612_v63 = vpop.f32.mrf.mxu3  ;;  %v688_v3 = vrot.slane %v557_v62, 5  ;;  %v450_v9 = vpop.f32.mrf.mxu0 }
  0xd4   :  { %v710_v7 = vrot.slane %v612_v63, 5  ;;  %v505_v14 = vpop.f32.mrf.mxu1  ;;  %v645_v16 = vrot.slane %v450_v9, 5 }
  0xd5   :  { %v667_v23 = vrot.slane %v505_v14, 5  ;;  %v7301_v24 = vsel %vm722_vm0, %v687_v46, %v688_v3 }
  0xd6   :  { %10998 = vst [vmem:[#allocation17_spill] sm:$0xff] %v7301_v24  ;;  %v7305_v28 = vsel %vm722_vm0, %v709_v47, %v710_v7  ;;  %v7309_v29 = vsel %vm722_vm0, %v644_v55, %v645_v16  ;;  %958 = vmatmul.bf16.vlgmr.msrb.gmra.mxu1 %v7054_v10  ;;  %2523 = vmatmul.bf16.vlgmr.msrb.gmra.mxu0 %v7054_v10 }
  0xd7   :  { %10999 = vst [vmem:[#allocation18_spill] sm:$0xff] %v7305_v28  ;;  %v7313_v30 = vsel %vm722_vm0, %v666_v56, %v667_v23  ;;  %1480 = vmatmul.bf16.vlgmr.msrb.gmra.mxu2 %v7054_v10 }
  0xd8   :  { %2017 = vmatmul.bf16.gmra.mxu3 %v7108_v34 }
  0xda   :  { %v560_v35 = vpop.f32.mrf.mxu2 }
  0xdb   :  { %v615_v36 = vpop.f32.mrf.mxu3  ;;  %v689_v44 = vrot.slane %v560_v35, 5  ;;  %v452_v46 = vpop.f32.mrf.mxu0 }
  0xdc   :  { %v711_v45 = vrot.slane %v615_v36, 5  ;;  %v507_v47 = vpop.f32.mrf.mxu1  ;;  %v646_v53 = vrot.slane %v452_v46, 5 }
  0xdd   :  { %v668_v54 = vrot.slane %v507_v47, 5  ;;  %v7321_v55 = vsel %vm722_vm0, %v688_v3, %v689_v44 }
  0xde   :  { %11000 = vst [vmem:[#allocation19_spill] sm:$0xff] %v7321_v55  ;;  %v7325_v56 = vsel %vm722_vm0, %v710_v7, %v711_v45  ;;  %v7329_v10 = vsel %vm722_vm0, %v645_v16, %v646_v53 }
  0xdf   :  { %11001 = vst [vmem:[#allocation20_spill] sm:$0xff] %v7325_v56  ;;  %v7333_v62 = vsel %vm722_vm0, %v667_v23, %v668_v54 }
  0xe2   :  { %v562_v63 = vpop.f32.mrf.mxu2 }
  0xe3   :  { %v617_v9 = vpop.f32.mrf.mxu3  ;;  %v690_v14 = vrot.slane %v562_v63, 5  ;;  %v455_v36 = vpop.f32.mrf.mxu0 }
  0xe4   :  { %v712_v35 = vrot.slane %v617_v9, 5  ;;  %v510_v46 = vpop.f32.mrf.mxu1  ;;  %v647_v3 = vrot.slane %v455_v36, 5 }
  0xe5   :  { %v669_v47 = vrot.slane %v510_v46, 5  ;;  %v7337_v7 = vsel %vm722_vm0, %v689_v44, %v690_v14 }
  0xe6   :  { %11002 = vst [vmem:[#allocation21_spill] sm:$0xff] %v7337_v7  ;;  %v7341_v16 = vsel %vm722_vm0, %v711_v45, %v712_v35  ;;  %v7345_v23 = vsel %vm722_vm0, %v646_v53, %v647_v3  ;;  %963 = vmatmul.bf16.gmra.mxu1 %v7075_v19  ;;  %2528 = vmatmul.bf16.gmra.mxu0 %v7075_v19 }
  0xe7   :  { %11003 = vst [vmem:[#allocation22_spill] sm:$0xff] %v7341_v16  ;;  %v7349_v63 = vsel %vm722_vm0, %v668_v54, %v669_v47  ;;  %1485 = vmatmul.bf16.gmra.mxu2 %v7075_v19 }
  0xe8   :  { %2022 = vmatmul.bf16.gmra.mxu3 %v7120_v41 }
  0xea   :  { %v565_v44 = vpop.f32.mrf.mxu2 }
  0xeb   :  { %v620_v9 = vpop.f32.mrf.mxu3  ;;  %v691_v45 = vrot.slane %v565_v44, 5  ;;  %v457_v46 = vpop.f32.mrf.mxu0 }
  0xec   :  { %v713_v36 = vrot.slane %v620_v9, 5  ;;  %v512_v33 = vpop.f32.mrf.mxu1  ;;  %v648_v53 = vrot.slane %v457_v46, 5 }
  0xed   :  { %v670_v39 = vrot.slane %v512_v33, 5  ;;  %v7357_v54 = vsel %vm722_vm0, %v690_v14, %v691_v45 }
  0xee   :  { %11004 = vst [vmem:[#allocation23_spill] sm:$0xff] %v7357_v54  ;;  %v7361_v25 = vsel %vm722_vm0, %v712_v35, %v713_v36  ;;  %v7365_v19 = vsel %vm722_vm0, %v647_v3, %v648_v53 }
  0xef   :  { %11005 = vst [vmem:[#allocation24_spill] sm:$0xff] %v7361_v25  ;;  %v7369_v44 = vsel %vm722_vm0, %v669_v47, %v670_v39 }
  0xf2   :  { %v567_v9 = vpop.f32.mrf.mxu2 }
  0xf3   :  { %v622_v18 = vpop.f32.mrf.mxu3  ;;  %v692_v46 = vrot.slane %v567_v9, 5  ;;  %v460_v16 = vpop.f32.mrf.mxu0 }
  0xf4   :  { %v714_v33 = vrot.slane %v622_v18, 5  ;;  %v515_v56 = vpop.f32.mrf.mxu1  ;;  %v649_v14 = vrot.slane %v460_v16, 5 }
  0xf5   :  { %v671_v28 = vrot.slane %v515_v56, 5  ;;  %v7373_v35 = vsel %vm722_vm0, %v691_v45, %v692_v46 }
  0xf6   :  { %11006 = vst [vmem:[#allocation25_spill] sm:$0xff] %v7373_v35  ;;  %v7377_v3 = vsel %vm722_vm0, %v713_v36, %v714_v33  ;;  %v7381_v47 = vsel %vm722_vm0, %v648_v53, %v649_v14  ;;  %968 = vmatmul.bf16.gmra.mxu1 %v7090_v26  ;;  %2533 = vmatmul.bf16.gmra.mxu0 %v7090_v26 }
  0xf7   :  { %11007 = vst [vmem:[#allocation26_spill] sm:$0xff] %v7377_v3  ;;  %v7385_v9 = vsel %vm722_vm0, %v670_v39, %v671_v28  ;;  %1490 = vmatmul.bf16.gmra.mxu2 %v7090_v26 }
  0xf8   :  { %2027 = vmatmul.bf16.gmra.mxu3 %v7132_v48 }
  0xfa   :  { %v570_v18 = vpop.f32.mrf.mxu2 }
  0xfb   :  { %v625_v56 = vpop.f32.mrf.mxu3  ;;  %v693_v16 = vrot.slane %v570_v18, 5  ;;  %v462_v36 = vpop.f32.mrf.mxu0 }
  0xfc   :  { %v715_v45 = vrot.slane %v625_v56, 5  ;;  %v517_v3 = vpop.f32.mrf.mxu1  ;;  %v650_v53 = vrot.slane %v462_v36, 5 }
  0xfd   :  { %v672_v25 = vrot.slane %v517_v3, 5  ;;  %v7393_v39 = vsel %vm722_vm0, %v692_v46, %v693_v16 }
  0xfe   :  { %11008 = vst [vmem:[#allocation27_spill] sm:$0xff] %v7393_v39  ;;  %v7397_v59 = vsel %vm722_vm0, %v714_v33, %v715_v45  ;;  %v7401_v26 = vsel %vm722_vm0, %v649_v14, %v650_v53 }
  0xff   :  { %11009 = vst [vmem:[#allocation28_spill] sm:$0xff] %v7397_v59  ;;  %v7405_v18 = vsel %vm722_vm0, %v671_v28, %v672_v25 }
 0x102   :  { %v572_v56 = vpop.f32.mrf.mxu2 }
 0x103   :  { %v627_v40 = vpop.f32.mrf.mxu3  ;;  %v694_v36 = vrot.slane %v572_v56, 5  ;;  %v465_v1 = vpop.f32.mrf.mxu0 }
 0x104   :  { %v716_v3 = vrot.slane %v627_v40, 5  ;;  %v520_v50 = vpop.f32.mrf.mxu1  ;;  %v651_v46 = vrot.slane %v465_v1, 5 }
 0x105   :  { %v673_v5 = vrot.slane %v520_v50, 5  ;;  %v7409_v33 = vsel %vm722_vm0, %v693_v16, %v694_v36  ;;  %v6565_v50 = vld [vmem:[%s10962_s1 + $0x1b0] sm:$0xff] }
 0x106   :  { %11010 = vst [vmem:[#allocation29_spill] sm:$0xff] %v7409_v33  ;;  %v7413_v14 = vsel %vm722_vm0, %v715_v45, %v716_v3  ;;  %v7417_v28 = vsel %vm722_vm0, %v650_v53, %v651_v46  ;;  %973 = vmatmul.bf16.gmra.mxu1 %v7108_v34  ;;  %2538 = vmatmul.bf16.gmra.mxu0 %v7108_v34 }
 0x107   :  { %11011 = vst [vmem:[#allocation30_spill] sm:$0xff] %v7413_v14  ;;  %v7421_v56 = vsel %vm722_vm0, %v672_v25, %v673_v5  ;;  %1495 = vmatmul.bf16.gmra.mxu2 %v7108_v34 }
 0x108   :  { %2032 = vmatmul.bf16.gmra.mxu3 %v7150_v57  ;;  %3397 = vmatpush.bf16.msra.mxu2 %v6565_v50  ;;  %v6573_v50 = vld [vmem:[%s10962_s1 + $0x1f0] sm:$0xff] }
 0x109   :  { %3918 = vmatpush.bf16.msra.mxu3 %v6573_v50  ;;  %v6581_v50 = vld [vmem:[%s10962_s1 + $0x230] sm:$0xff] }
 0x10a   :  { %v575_v1 = vpop.f32.mrf.mxu2  ;;  %4440 = vmatpush.bf16.msra.mxu0 %v6581_v50 }
 0x10b   :  { %v630_v40 = vpop.f32.mrf.mxu3  ;;  %v695_v16 = vrot.slane %v575_v1, 5  ;;  %v467_v53 = vpop.f32.mrf.mxu0 }
 0x10c   :  { %v717_v45 = vrot.slane %v630_v40, 5  ;;  %v522_v25 = vpop.f32.mrf.mxu1  ;;  %v652_v14 = vrot.slane %v467_v53, 5 }
 0x10d   :  { %v674_v59 = vrot.slane %v522_v25, 5  ;;  %v7432_v33 = vsel %vm722_vm0, %v694_v36, %v695_v16  ;;  %v6557_v36 = vld [vmem:[%s10962_s1 + $0x170] sm:$0xff] }
 0x10e   :  { %11012 = vst [vmem:[#allocation31_spill] sm:$0xff] %v7432_v33  ;;  %v7436_v34 = vsel %vm722_vm0, %v716_v3, %v717_v45  ;;  %v7443_v1 = vsel %vm722_vm0, %v651_v46, %v652_v14  ;;  %2875 = vmatpush.bf16.msra.mxu1 %v6557_v36 }
 0x10f   :  { %11013 = vst [vmem:[#allocation32_spill] sm:$0xff] %v7436_v34  ;;  %v7447_v40 = vsel %vm722_vm0, %v673_v5, %v674_v59 }
 0x112   :  { %v577_v3 = vpop.f32.mrf.mxu2 }
 0x113   :  { %v632_v53 = vpop.f32.mrf.mxu3  ;;  %v696_v25 = vrot.slane %v577_v3, 5  ;;  %v470_v33 = vpop.f32.mrf.mxu0 }
 0x114   :  { %v718_v34 = vrot.slane %v632_v53, 5  ;;  %v525_v39 = vpop.f32.mrf.mxu1  ;;  %v653_v35 = vrot.slane %v470_v33, 5 }
 0x115   :  { %v675_v54 = vrot.slane %v525_v39, 5  ;;  %v7454_v46 = vsel %vm722_vm0, %v695_v16, %v696_v25 }
 0x116   :  { %11014 = vst [vmem:[#allocation33_spill] sm:$0xff] %v7454_v46  ;;  %v7458_v5 = vsel %vm722_vm0, %v717_v45, %v718_v34  ;;  %v7465_v36 = vsel %vm722_vm0, %v652_v14, %v653_v35  ;;  %978 = vmatmul.bf16.gmra.mxu1 %v7120_v41  ;;  %2543 = vmatmul.bf16.gmra.mxu0 %v7120_v41 }
 0x117   :  { %11015 = vst [vmem:[#allocation34_spill] sm:$0xff] %v7458_v5  ;;  %v7469_v33 = vsel %vm722_vm0, %v674_v59, %v675_v54  ;;  %1500 = vmatmul.bf16.gmra.mxu2 %v7120_v41  ;;  %v11018_v41 = vrot.slane %v7176_v12, 5 }
 0x118   :  { %2037 = vmatmul.bf16.gmra.mxu3 %v7162_v2 }
 0x11a   :  { %v580_v39 = vpop.f32.mrf.mxu2 }
 0x11b   :  { %v635_v16 = vpop.f32.mrf.mxu3  ;;  %v697_v45 = vrot.slane %v580_v39, 5  ;;  %v472_v53 = vpop.f32.mrf.mxu0 }
 0x11c   :  { %v719_v3 = vrot.slane %v635_v16, 5  ;;  %v527_v14 = vpop.f32.mrf.mxu1  ;;  %v654_v5 = vrot.slane %v472_v53, 5 }
 0x11d   :  { %v676_v46 = vrot.slane %v527_v14, 5  ;;  %v7477_v59 = vsel %vm722_vm0, %v696_v25, %v697_v45 }
 0x11e   :  { %11016 = vst [vmem:[#allocation35_spill] sm:$0xff] %v7477_v59  ;;  %v7481_v7 = vsel %vm722_vm0, %v718_v34, %v719_v3  ;;  %v7487_v50 = vsel %vm722_vm0, %v719_v3, %v11018_v41  ;;  %v7491_v39 = vsel %vm722_vm0, %v653_v35, %v654_v5 }
 0x11f   :  { %11017 = vst [vmem:[#allocation36_spill] sm:$0xff] %v7481_v7  ;;  %v7495_v16 = vsel %vm722_vm0, %v675_v54, %v676_v46 }
 0x120   :  { %11019 = vst [vmem:[#allocation37_spill] sm:$0xff] %v7487_v50 }
 0x122   :  { %v582_v25 = vpop.f32.mrf.mxu2 }
 0x123   :  { %v637_v53 = vpop.f32.mrf.mxu3  ;;  %v698_v14 = vrot.slane %v582_v25, 5  ;;  %v475_v59 = vpop.f32.mrf.mxu0 }
 0x124   :  { %v530_v34 = vpop.f32.mrf.mxu1  ;;  %v655_v7 = vrot.slane %v475_v59, 5 }
 0x125   :  { %v677_v55 = vrot.slane %v530_v34, 5  ;;  %v7499_v12 = vsel %vm722_vm0, %v697_v45, %v698_v14 }
 0x126   :  { %11020 = vst [vmem:[#allocation38_spill] sm:$0xff] %v7499_v12  ;;  %v7503_v3 = vsel %vm722_vm0, %v654_v5, %v655_v7  ;;  %983 = vmatmul.bf16.gmra.mxu1 %v7132_v48  ;;  %2548 = vmatmul.bf16.gmra.mxu0 %v7132_v48 }
 0x127   :  { %v7507_v35 = vsel %vm722_vm0, %v676_v46, %v677_v55  ;;  %1505 = vmatmul.bf16.gmra.mxu2 %v7132_v48 }
 0x128   :  { %2042 = vmatmul.bf16.gmra.mxu3 %v7174_v8 }
 0x12a   :  { %v585_v54 = vpop.f32.mrf.mxu2 }
 0x12b   :  { %v7513_v59 = vpop.f32.mrf.mxu3  ;;  %v699_v45 = vrot.slane %v585_v54, 5  ;;  %v477_v41 = vpop.f32.mrf.mxu0 }
 0x12c   :  { %11021 = vst [vmem:[#allocation39_spill] sm:$0xff] %v7513_v59  ;;  %v532_v25 = vpop.f32.mrf.mxu1  ;;  %v656_v5 = vrot.slane %v477_v41, 5  ;;  %v10973_v50 = vrot.slane %v7513_v59, 7 }
 0x12d   :  { %v678_v53 = vrot.slane %v532_v25, 5  ;;  %v7517_v46 = vsel %vm722_vm0, %v698_v14, %v699_v45 }
 0x12e   :  { %11022 = vst [vmem:[#allocation40_spill] sm:$0xff] %v7517_v46  ;;  %v7521_v34 = vsel %vm722_vm0, %v655_v7, %v656_v5 }
 0x12f   :  { %v7525_v48 = vsel %vm722_vm0, %v677_v55, %v678_v53 }
 0x132   :  { %v587_v12 = vpop.f32.mrf.mxu2 }
 0x133   :  { %v2005_v54 = vpop.f32.mrf.mxu3  ;;  %v700_v41 = vrot.slane %v587_v12, 5  ;;  %v480_v24 = vpop.f32.mrf.mxu0 }
 0x134   :  { %v2208_v25 = vrot.slane %v2005_v54, 7  ;;  %v535_v58 = vpop.f32.mrf.mxu1  ;;  %v657_v14 = vrot.slane %v480_v24, 5 }
 0x135   :  { %v679_v46 = vrot.slane %v535_v58, 5  ;;  %v7531_v7 = vsel %vm722_vm0, %v699_v45, %v700_v41 }
 0x136   :  { %11023 = vst [vmem:[#allocation41_spill] sm:$0xff] %v7531_v7  ;;  %v7537_v55 = vsel %vm1766_vm1, %v10973_v50, %v2208_v25  ;;  %v7541_v38 = vsel %vm722_vm0, %v656_v5, %v657_v14  ;;  %988 = vmatmul.bf16.gmra.mxu1 %v7150_v57  ;;  %2553 = vmatmul.bf16.gmra.mxu0 %v7150_v57 }
 0x137   :  { %11024 = vst [vmem:[#allocation42_spill] sm:$0xff] %v7537_v55  ;;  %v7545_v12 = vsel %vm722_vm0, %v678_v53, %v679_v46  ;;  %1510 = vmatmul.bf16.gmra.mxu2 %v7150_v57 }
 0x138   :  { %11025 = vst [vmem:[#allocation43_spill] sm:$0xff] %v7545_v12  ;;  %2047 = vmatmul.bf16.gmra.mxu3 %v7210_v37 }
 0x13a   :  { %v590_v58 = vpop.f32.mrf.mxu2 }
 0x13b   :  { %v2008_v24 = vpop.f32.mrf.mxu3  ;;  %v701_v45 = vrot.slane %v590_v58, 5  ;;  %v482_v50 = vpop.f32.mrf.mxu0 }
 0x13c   :  { %v2209_v54 = vrot.slane %v2008_v24, 7  ;;  %v537_v55 = vpop.f32.mrf.mxu1  ;;  %v658_v5 = vrot.slane %v482_v50, 5 }
 0x13d   :  { %v680_v59 = vrot.slane %v537_v55, 5  ;;  %v7553_v53 = vsel %vm722_vm0, %v700_v41, %v701_v45 }
 0x13e   :  { %11026 = vst [vmem:[#allocation44_spill] sm:$0xff] %v7553_v53  ;;  %v7557_v7 = vsel %vm1766_vm1, %v2208_v25, %v2209_v54  ;;  %v7561_v57 = vsel %vm722_vm0, %v657_v14, %v658_v5 }
 0x13f   :  { %11027 = vst [vmem:[#allocation45_spill] sm:$0xff] %v7557_v7  ;;  %v7565_v58 = vsel %vm722_vm0, %v679_v46, %v680_v59 }
 0x140   :  { %11028 = vst [vmem:[#allocation46_spill] sm:$0xff] %v7565_v58 }
 0x142   :  { %v592_v24 = vpop.f32.mrf.mxu2 }
 0x143   :  { %v2010_v0 = vpop.f32.mrf.mxu3  ;;  %v702_v50 = vrot.slane %v592_v24, 5  ;;  %v485_v49 = vpop.f32.mrf.mxu0 }
 0x144   :  { %v2210_v55 = vrot.slane %v2010_v0, 7  ;;  %v540_v12 = vpop.f32.mrf.mxu1  ;;  %v659_v41 = vrot.slane %v485_v49, 5 }
 0x145   :  { %v681_v53 = vrot.slane %v540_v12, 5  ;;  %v7569_v25 = vsel %vm722_vm0, %v701_v45, %v702_v50 }
 0x146   :  { %11029 = vst [vmem:[#allocation47_spill] sm:$0xff] %v7569_v25  ;;  %v7573_v14 = vsel %vm722_vm0, %v658_v5, %v659_v41  ;;  %993 = vmatmul.bf16.gmra.mxu1 %v7162_v2  ;;  %2558 = vmatmul.bf16.gmra.mxu0 %v7162_v2  ;;  %v7585_v49 = vsel %vm1766_vm1, %v2209_v54, %v2210_v55 }
 0x147   :  { %v7577_v46 = vsel %vm722_vm0, %v680_v59, %v681_v53  ;;  %1515 = vmatmul.bf16.gmra.mxu2 %v7162_v2  ;;  %v11032_v2 = vrot.slane %v7178_v13, 5 }
 0x148   :  { %11030 = vst [vmem:[#allocation48_spill] sm:$0xff] %v7577_v46  ;;  %2052 = vmatmul.bf16.gmra.mxu3 %v7263_v15 }
 0x14a   :  { %v595_v0 = vpop.f32.mrf.mxu2 }
 0x14b   :  { %v2013_v12 = vpop.f32.mrf.mxu3  ;;  %v703_v45 = vrot.slane %v595_v0, 5  ;;  %v487_v24 = vpop.f32.mrf.mxu0  ;;  %v11033_v0 = vrot.slane %v7188_v21, 5  ;;  %v11038_v21 = vrot.slane %v7190_v22, 5 }
 0x14c   :  { %v2211_v5 = vrot.slane %v2013_v12, 7  ;;  %v542_v7 = vpop.f32.mrf.mxu1  ;;  %v660_v59 = vrot.slane %v487_v24, 5 }
 0x14d   :  { %v682_v25 = vrot.slane %v542_v7, 5  ;;  %v7589_v46 = vsel %vm722_vm0, %v702_v50, %v703_v45 }
 0x14e   :  { %11031 = vst [vmem:[#allocation49_spill] sm:$0xff] %v7589_v46  ;;  %v7595_v58 = vsel %vm722_vm0, %v660_v59, %v11032_v2  ;;  %v7599_v54 = vsel %vm722_vm0, %v659_v41, %v660_v59  ;;  %v7613_v13 = vsel %vm1766_vm1, %v2210_v55, %v2211_v5 }
 0x14f   :  { %v7605_v12 = vsel %vm722_vm0, %v682_v25, %v11033_v0  ;;  %v7609_v7 = vsel %vm722_vm0, %v681_v53, %v682_v25 }
 0x150   :  { %11034 = vst [vmem:[#allocation50_spill] sm:$0xff] %v7605_v12 }
 0x151   :  { %11035 = vst [vmem:[#allocation51_spill] sm:$0xff] %v7609_v7 }
 0x152   :  { %v597_v50 = vpop.f32.mrf.mxu2 }
 0x153   :  { %v2015_v24 = vpop.f32.mrf.mxu3  ;;  %v704_v2 = vrot.slane %v597_v50, 5  ;;  %v7617_v59 = vpop.f32.mrf.mxu0 }
 0x154   :  { %v2212_v46 = vrot.slane %v2015_v24, 7  ;;  %v7615_v41 = vpop.f32.mrf.mxu1  ;;  %11037 = vst [vmem:[#allocation53_spill] sm:$0xff] %v7617_v59 }
 0x155   :  { %11036 = vst [vmem:[#allocation52_spill] sm:$0xff] %v7615_v41  ;;  %v7623_v0 = vsel %vm722_vm0, %v704_v2, %v11038_v21  ;;  %v7627_v53 = vsel %vm722_vm0, %v703_v45, %v704_v2  ;;  %v10976_v2 = vrot.slane %v7615_v41, 6 }
 0x156   :  { %11039 = vst [vmem:[#allocation54_spill] sm:$0xff] %v7623_v0  ;;  %998 = vmatmul.bf16.gmra.mxu1 %v7174_v8  ;;  %2563 = vmatmul.bf16.gmra.mxu0 %v7174_v8  ;;  %v7635_v55 = vsel %vm1766_vm1, %v2211_v5, %v2212_v46 }
 0x157   :  { %11040 = vst [vmem:[#allocation55_spill] sm:$0xff] %v7627_v53  ;;  %1520 = vmatmul.bf16.gmra.mxu2 %v7174_v8 }
 0x158   :  { %2057 = vmatmul.bf16.gmra.mxu3 %v7056_v11  ;;  %v6564_v11 = vld [vmem:[%s10962_s1 + $0x1a8] sm:$0xff] }
 0x159   :  { %3398 = vmatpush.bf16.msra.mxu2 %v6564_v11 }
 0x15a   :  { %v7637_v22 = vpop.f32.mrf.mxu2 }
 0x15b   :  { %11041 = vst [vmem:[#allocation56_spill] sm:$0xff] %v7637_v22  ;;  %v2018_v25 = vpop.f32.mrf.mxu3  ;;  %v7640_v45 = vpop.f32.mrf.mxu0 }
 0x15c   :  { %v2213_v50 = vrot.slane %v2018_v25, 7  ;;  %v961_v24 = vpop.f32.mrf.mxu1  ;;  %11042 = vst [vmem:[#allocation57_spill] sm:$0xff] %v7640_v45  ;;  %v6572_v25 = vld [vmem:[%s10962_s1 + $0x1e8] sm:$0xff] }
 0x15d   :  { %v1164_v21 = vrot.slane %v961_v24, 6  ;;  %v6556_v24 = vld [vmem:[%s10962_s1 + $0x168] sm:$0xff]  ;;  %3919 = vmatpush.bf16.msra.mxu3 %v6572_v25 }
 0x15e   :  { %v7659_v45 = vsel %vm1766_vm1, %v2212_v46, %v2213_v50  ;;  %2876 = vmatpush.bf16.msra.mxu1 %v6556_v24 }
 0x15f   :  { %v1324_v8 = vsel %vm1244_vm2, %v10976_v2, %v1164_v21  ;;  %v10977_v2 = vrot.slane %v7637_v22, 7 }
 0x160   :  { %v1329_v5 = vadd.f32 %v1324_v8, %v7201_v31 }
 0x162   :  { %v1483_v59 = vpop.f32.mrf.mxu2 }
 0x163   :  { %v2020_v41 = vpop.f32.mrf.mxu3  ;;  %v1686_v31 = vrot.slane %v1483_v59, 7  ;;  %v7662_v0 = vpop.f32.mrf.mxu0 }
 0x164   :  { %v2214_v11 = vrot.slane %v2020_v41, 7  ;;  %v964_v8 = vpop.f32.mrf.mxu1  ;;  %11043 = vst [vmem:[#allocation58_spill] sm:$0xff] %v7662_v0  ;;  %v6580_v41 = vld [vmem:[%s10962_s1 + $0x228] sm:$0xff] }
 0x165   :  { %v1165_v53 = vrot.slane %v964_v8, 6  ;;  %v1846_v12 = vsel %vm1766_vm1, %v10977_v2, %v1686_v31  ;;  %4441 = vmatpush.bf16.msra.mxu0 %v6580_v41 }
 0x166   :  { %1003 = vmatmul.bf16.gmra.mxu1 %v7210_v37  ;;  %2568 = vmatmul.bf16.gmra.mxu0 %v7210_v37  ;;  %v1851_v25 = vadd.f32 %v1846_v12, %v1329_v5  ;;  %v7680_v24 = vsel %vm1766_vm1, %v2213_v50, %v2214_v11 }
 0x167   :  { %v1323_v46 = vsel %vm1244_vm2, %v1164_v21, %v1165_v53  ;;  %1525 = vmatmul.bf16.gmra.mxu2 %v7210_v37 }
 0x168   :  { %v1330_v59 = vadd.f32 %v1323_v46, %v7227_v51  ;;  %2062 = vmatmul.bf16.gmra.mxu3 %v7077_v20  ;;  %v2372_v21 = vadd.f32 %v7585_v49, %v1851_v25 }
 0x16a   :  { %v1486_v8 = vpop.f32.mrf.mxu2 }
 0x16b   :  { %v2023_v2 = vpop.f32.mrf.mxu3  ;;  %v1687_v12 = vrot.slane %v1486_v8, 7  ;;  %v2531_v46 = vpop.f32.mrf.mxu0 }
 0x16c   :  { %v2215_v5 = vrot.slane %v2023_v2, 7  ;;  %v966_v51 = vpop.f32.mrf.mxu1  ;;  %v7683_v0 = vadd.f32 %v2531_v46, %v2372_v21 }
 0x16d   :  { %v1166_v37 = vrot.slane %v966_v51, 6  ;;  %v1845_v20 = vsel %vm1766_vm1, %v1686_v31, %v1687_v12 }
 0x16e   :  { %11044 = vst [vmem:[#allocation59_spill] sm:$0xff] %v7683_v0  ;;  %v1852_v50 = vadd.f32 %v1845_v20, %v1330_v59  ;;  %v7692_v49 = vsel %vm1766_vm1, %v2214_v11, %v2215_v5 }
 0x16f   :  { %v1322_v22 = vsel %vm1244_vm2, %v1165_v53, %v1166_v37 }
 0x170   :  { %v1331_v7 = vadd.f32 %v1322_v22, %v7254_v4  ;;  %v2373_v2 = vadd.f32 %v7613_v13, %v1852_v50 }
 0x172   :  { %v1488_v25 = vpop.f32.mrf.mxu2 }
 0x173   :  { %v2025_v41 = vpop.f32.mrf.mxu3  ;;  %v1688_v8 = vrot.slane %v1488_v25, 7  ;;  %v2534_v46 = vpop.f32.mrf.mxu0 }
 0x174   :  { %v2216_v21 = vrot.slane %v2025_v41, 7  ;;  %v969_v51 = vpop.f32.mrf.mxu1  ;;  %v7695_v31 = vadd.f32 %v2534_v46, %v2373_v2 }
 0x175   :  { %v1167_v0 = vrot.slane %v969_v51, 6  ;;  %v1844_v53 = vsel %vm1766_vm1, %v1687_v12, %v1688_v8 }
 0x176   :  { %1008 = vmatmul.bf16.gmra.mxu1 %v7263_v15  ;;  %2573 = vmatmul.bf16.gmra.mxu0 %v7263_v15  ;;  %v1853_v13 = vadd.f32 %v1844_v53, %v1331_v7  ;;  %v7708_v11 = vsel %vm1766_vm1, %v2215_v5, %v2216_v21 }
 0x177   :  { %v1321_v4 = vsel %vm1244_vm2, %v1166_v37, %v1167_v0  ;;  %1530 = vmatmul.bf16.gmra.mxu2 %v7263_v15 }
 0x178   :  { %v1332_v22 = vadd.f32 %v1321_v4, %v7275_v42  ;;  %2067 = vmatmul.bf16.gmra.mxu3 %v7092_v27  ;;  %v2374_v59 = vadd.f32 %v7635_v55, %v1853_v13 }
 0x17a   :  { %v1491_v12 = vpop.f32.mrf.mxu2 }
 0x17b   :  { %v2028_v20 = vpop.f32.mrf.mxu3  ;;  %v1689_v37 = vrot.slane %v1491_v12, 7  ;;  %v2536_v25 = vpop.f32.mrf.mxu0 }
 0x17c   :  { %v2217_v50 = vrot.slane %v2028_v20, 7  ;;  %v971_v2 = vpop.f32.mrf.mxu1  ;;  %v7711_v7 = vadd.f32 %v2536_v25, %v2374_v59 }
 0x17d   :  { %v1168_v41 = vrot.slane %v971_v2, 6  ;;  %v1843_v15 = vsel %vm1766_vm1, %v1688_v8, %v1689_v37  ;;  %v7730_v2 = vld [vmem:[#allocation2 + $0x70] sm:$0xff] }
 0x17e   :  { %v1854_v42 = vadd.f32 %v1843_v15, %v1332_v22  ;;  %v7720_v55 = vsel %vm1766_vm1, %v2216_v21, %v2217_v50  ;;  %v6856_v22 = vld [vmem:[#allocation2 + $0x58] sm:$0xff] }
 0x17f   :  { %v1320_v27 = vsel %vm1244_vm2, %v1167_v0, %v1168_v41 }
 0x180   :  { %v1333_v5 = vadd.f32 %v1320_v27, %v7293_v60  ;;  %v2375_v51 = vadd.f32 %v7659_v45, %v1854_v42 }
 0x182   :  { %v1493_v46 = vpop.f32.mrf.mxu2 }
 0x183   :  { %v2030_v53 = vpop.f32.mrf.mxu3  ;;  %v1690_v4 = vrot.slane %v1493_v46, 7  ;;  %v2539_v12 = vpop.f32.mrf.mxu0 }
 0x184   :  { %v2218_v13 = vrot.slane %v2030_v53, 7  ;;  %v974_v59 = vpop.f32.mrf.mxu1  ;;  %v7723_v8 = vadd.f32 %v2539_v12, %v2375_v51 }
 0x185   :  { %v1169_v20 = vrot.slane %v974_v59, 6  ;;  %v1842_v0 = vsel %vm1766_vm1, %v1689_v37, %v1690_v4 }
 0x186   :  { %1013 = vmatmul.bf16.gmra.mxu1 %v6856_v22  ;;  %2578 = vmatmul.bf16.gmra.mxu0 %v6856_v22  ;;  %v1855_v21 = vadd.f32 %v1842_v0, %v1333_v5  ;;  %v7735_v25 = vsel %vm1766_vm1, %v2217_v50, %v2218_v13 }
 0x187   :  { %v1319_v60 = vsel %vm1244_vm2, %v1168_v41, %v1169_v20  ;;  %1535 = vmatmul.bf16.gmra.mxu2 %v6856_v22 }
 0x188   :  { %v1334_v45 = vadd.f32 %v1319_v60, %v7309_v29  ;;  %2072 = vmatmul.bf16.gmra.mxu3 %v7730_v2  ;;  %v2376_v37 = vadd.f32 %v7680_v24, %v1855_v21 }
 0x18a   :  { %v1496_v15 = vpop.f32.mrf.mxu2 }
 0x18b   :  { %v2033_v27 = vpop.f32.mrf.mxu3  ;;  %v1691_v41 = vrot.slane %v1496_v15, 7  ;;  %v2541_v46 = vpop.f32.mrf.mxu0 }
 0x18c   :  { %v2219_v42 = vrot.slane %v2033_v27, 7  ;;  %v976_v51 = vpop.f32.mrf.mxu1  ;;  %v7738_v53 = vadd.f32 %v2541_v46, %v2376_v37  ;;  %v7757_v46 = vld [vmem:[#allocation2 + $0x78] sm:$0xff] }
 0x18d   :  { %v1170_v5 = vrot.slane %v976_v51, 6  ;;  %v1841_v29 = vsel %vm1766_vm1, %v1690_v4, %v1691_v41 }
 0x18e   :  { %v1856_v12 = vadd.f32 %v1841_v29, %v1334_v45  ;;  %v7747_v24 = vsel %vm1766_vm1, %v2218_v13, %v2219_v42  ;;  %v6858_v45 = vld [vmem:[#allocation2 + $0x60] sm:$0xff] }
 0x18f   :  { %v1318_v59 = vsel %vm1244_vm2, %v1169_v20, %v1170_v5 }
 0x190   :  { %v1335_v50 = vadd.f32 %v1318_v59, %v7329_v10  ;;  %v2377_v0 = vadd.f32 %v7692_v49, %v1856_v12 }
 0x192   :  { %v1498_v60 = vpop.f32.mrf.mxu2 }
 0x193   :  { %v2035_v22 = vpop.f32.mrf.mxu3  ;;  %v1692_v21 = vrot.slane %v1498_v60, 7  ;;  %v2544_v27 = vpop.f32.mrf.mxu0 }
 0x194   :  { %v2220_v37 = vrot.slane %v2035_v22, 7  ;;  %v979_v15 = vpop.f32.mrf.mxu1  ;;  %v7750_v4 = vadd.f32 %v2544_v27, %v2377_v0 }
 0x195   :  { %v1171_v51 = vrot.slane %v979_v15, 6  ;;  %v1840_v20 = vsel %vm1766_vm1, %v1691_v41, %v1692_v21 }
 0x196   :  { %1018 = vmatmul.bf16.gmra.mxu1 %v6858_v45  ;;  %2583 = vmatmul.bf16.gmra.mxu0 %v6858_v45  ;;  %v1857_v13 = vadd.f32 %v1840_v20, %v1335_v50  ;;  %v7762_v29 = vsel %vm1766_vm1, %v2219_v42, %v2220_v37 }
 0x197   :  { %v1317_v10 = vsel %vm1244_vm2, %v1170_v5, %v1171_v51  ;;  %1540 = vmatmul.bf16.gmra.mxu2 %v6858_v45 }
 0x198   :  { %v1336_v49 = vadd.f32 %v1317_v10, %v7345_v23  ;;  %2077 = vmatmul.bf16.gmra.mxu3 %v7757_v46  ;;  %v2378_v41 = vadd.f32 %v7708_v11, %v1857_v13 }
 0x19a   :  { %v1501_v59 = vpop.f32.mrf.mxu2 }
 0x19b   :  { %v2038_v12 = vpop.f32.mrf.mxu3  ;;  %v1693_v5 = vrot.slane %v1501_v59, 7  ;;  %v2546_v22 = vpop.f32.mrf.mxu0 }
 0x19c   :  { %v2221_v0 = vrot.slane %v2038_v12, 7  ;;  %v981_v60 = vpop.f32.mrf.mxu1  ;;  %v7765_v15 = vadd.f32 %v2546_v22, %v2378_v41 }
 0x19d   :  { %v1172_v50 = vrot.slane %v981_v60, 6  ;;  %v1839_v23 = vsel %vm1766_vm1, %v1692_v21, %v1693_v5 }
 0x19e   :  { %v1858_v20 = vadd.f32 %v1839_v23, %v1336_v49  ;;  %v7774_v11 = vsel %vm1766_vm1, %v2220_v37, %v2221_v0  ;;  %v6860_v49 = vld [vmem:[#allocation2 + $0x68] sm:$0xff]  ;;  %v7784_v23 = vld [vmem:[#allocation2 + $0x80] sm:$0xff] }
 0x19f   :  { %v1316_v27 = vsel %vm1244_vm2, %v1171_v51, %v1172_v50 }
 0x1a0   :  { %v1337_v42 = vadd.f32 %v1316_v27, %v7365_v19  ;;  %v2379_v10 = vadd.f32 %v7720_v55, %v1858_v20 }
 0x1a2   :  { %v1503_v45 = vpop.f32.mrf.mxu2 }
 0x1a3   :  { %v2040_v13 = vpop.f32.mrf.mxu3  ;;  %v1694_v59 = vrot.slane %v1503_v45, 7  ;;  %v2549_v60 = vpop.f32.mrf.mxu0 }
 0x1a4   :  { %v2222_v41 = vrot.slane %v2040_v13, 7  ;;  %v984_v12 = vpop.f32.mrf.mxu1  ;;  %v7777_v21 = vadd.f32 %v2549_v60, %v2379_v10 }
 0x1a5   :  { %v1173_v22 = vrot.slane %v984_v12, 6  ;;  %v1838_v51 = vsel %vm1766_vm1, %v1693_v5, %v1694_v59 }
 0x1a6   :  { %1023 = vmatmul.bf16.gmra.mxu1 %v6860_v49  ;;  %2588 = vmatmul.bf16.gmra.mxu0 %v6860_v49  ;;  %v1859_v37 = vadd.f32 %v1838_v51, %v1337_v42  ;;  %v7789_v27 = vsel %vm1766_vm1, %v2221_v0, %v2222_v41 }
 0x1a7   :  { %v1315_v19 = vsel %vm1244_vm2, %v1172_v50, %v1173_v22  ;;  %1545 = vmatmul.bf16.gmra.mxu2 %v6860_v49  ;;  %v6571_v49 = vld [vmem:[%s10962_s1 + $0x1e0] sm:$0xff] }
 0x1a8   :  { %v1338_v55 = vadd.f32 %v1315_v19, %v7381_v47  ;;  %2082 = vmatmul.bf16.gmra.mxu3 %v7784_v23  ;;  %v2380_v5 = vadd.f32 %v7735_v25, %v1859_v37  ;;  %v6563_v25 = vld [vmem:[%s10962_s1 + $0x1a0] sm:$0xff] }
 0x1a9   :  { %v6555_v37 = vld [vmem:[%s10962_s1 + $0x160] sm:$0xff]  ;;  %3399 = vmatpush.bf16.msra.mxu2 %v6563_v25  ;;  %3920 = vmatpush.bf16.msra.mxu3 %v6571_v49  ;;  %v7823_v25 = vld [vmem:[#allocation2 + $0x88] sm:$0xff] }
 0x1aa   :  { %v1506_v20 = vpop.f32.mrf.mxu2  ;;  %2877 = vmatpush.bf16.msra.mxu1 %v6555_v37 }
 0x1ab   :  { %v2043_v10 = vpop.f32.mrf.mxu3  ;;  %v1695_v50 = vrot.slane %v1506_v20, 7  ;;  %v2551_v12 = vpop.f32.mrf.mxu0 }
 0x1ac   :  { %v2223_v45 = vrot.slane %v2043_v10, 7  ;;  %v986_v13 = vpop.f32.mrf.mxu1  ;;  %v7792_v60 = vadd.f32 %v2551_v12, %v2380_v5 }
 0x1ad   :  { %v1174_v42 = vrot.slane %v986_v13, 6  ;;  %v1837_v47 = vsel %vm1766_vm1, %v1694_v59, %v1695_v50 }
 0x1ae   :  { %v1860_v19 = vadd.f32 %v1837_v47, %v1338_v55  ;;  %v7810_v59 = vsel %vm1766_vm1, %v2222_v41, %v2223_v45 }
 0x1af   :  { %v1314_v51 = vsel %vm1244_vm2, %v1173_v22, %v1174_v42 }
 0x1b0   :  { %v1339_v0 = vadd.f32 %v1314_v51, %v7401_v26  ;;  %v2381_v22 = vadd.f32 %v7747_v24, %v1860_v19 }
 0x1b2   :  { %v1508_v26 = vpop.f32.mrf.mxu2 }
 0x1b3   :  { %v2045_v55 = vpop.f32.mrf.mxu3  ;;  %v1696_v5 = vrot.slane %v1508_v26, 7  ;;  %v2554_v13 = vpop.f32.mrf.mxu0 }
 0x1b4   :  { %v2224_v20 = vrot.slane %v2045_v55, 7  ;;  %v989_v10 = vpop.f32.mrf.mxu1  ;;  %v7813_v47 = vadd.f32 %v2554_v13, %v2381_v22 }
 0x1b5   :  { %v1175_v12 = vrot.slane %v989_v10, 6  ;;  %v1836_v51 = vsel %vm1766_vm1, %v1695_v50, %v1696_v5  ;;  %v6579_v50 = vld [vmem:[%s10962_s1 + $0x220] sm:$0xff] }
 0x1b6   :  { %1028 = vmatmul.bf16.gmra.mxu1 %v7730_v2  ;;  %2593 = vmatmul.bf16.gmra.mxu0 %v7730_v2  ;;  %v1861_v24 = vadd.f32 %v1836_v51, %v1339_v0 }
 0x1b7   :  { %v1313_v41 = vsel %vm1244_vm2, %v1174_v42, %v1175_v12  ;;  %1550 = vmatmul.bf16.gmra.mxu2 %v7730_v2  ;;  %v7831_v42 = vsel %vm1766_vm1, %v2223_v45, %v2224_v20  ;;  %4442 = vmatpush.bf16.msra.mxu0 %v6579_v50 }
 0x1b8   :  { %v1340_v19 = vadd.f32 %v1313_v41, %v7417_v28  ;;  %2087 = vmatmul.bf16.gmra.mxu3 %v7823_v25  ;;  %v2382_v49 = vadd.f32 %v7762_v29, %v1861_v24 }
 0x1ba   :  { %v1511_v0 = vpop.f32.mrf.mxu2 }
 0x1bb   :  { %v2048_v37 = vpop.f32.mrf.mxu3  ;;  %v1697_v28 = vrot.slane %v1511_v0, 7  ;;  %v2556_v26 = vpop.f32.mrf.mxu0 }
 0x1bc   :  { %v2225_v22 = vrot.slane %v2048_v37, 7  ;;  %v991_v2 = vpop.f32.mrf.mxu1  ;;  %v7834_v10 = vadd.f32 %v2556_v26, %v2382_v49 }
 0x1bd   :  { %v1176_v55 = vrot.slane %v991_v2, 6  ;;  %v1835_v13 = vsel %vm1766_vm1, %v1696_v5, %v1697_v28 }
 0x1be   :  { %11045 = vst [vmem:[#allocation60_spill] sm:$0xff] %v7834_v10  ;;  %v1862_v45 = vadd.f32 %v1835_v13, %v1340_v19  ;;  %v7843_v29 = vsel %vm1766_vm1, %v2224_v20, %v2225_v22  ;;  %v7856_v19 = vld [vmem:[#allocation2 + $0x90] sm:$0xff] }
 0x1bf   :  { %v1312_v51 = vsel %vm1244_vm2, %v1175_v12, %v1176_v55 }
 0x1c0   :  { %v1341_v41 = vadd.f32 %v1312_v51, %v7443_v1  ;;  %v2383_v24 = vadd.f32 %v7774_v11, %v1862_v45 }
 0x1c2   :  { %v1513_v50 = vpop.f32.mrf.mxu2 }
 0x1c3   :  { %v2050_v0 = vpop.f32.mrf.mxu3  ;;  %v1698_v37 = vrot.slane %v1513_v50, 7  ;;  %v2559_v26 = vpop.f32.mrf.mxu0 }
 0x1c4   :  { %v2226_v49 = vrot.slane %v2050_v0, 7  ;;  %v994_v2 = vpop.f32.mrf.mxu1  ;;  %v7846_v5 = vadd.f32 %v2559_v26, %v2383_v24 }
 0x1c5   :  { %v1177_v10 = vrot.slane %v994_v2, 6  ;;  %v1834_v12 = vsel %vm1766_vm1, %v1697_v28, %v1698_v37 }
 0x1c6   :  { %1033 = vmatmul.bf16.gmra.mxu1 %v7757_v46  ;;  %2598 = vmatmul.bf16.gmra.mxu0 %v7757_v46  ;;  %v1863_v11 = vadd.f32 %v1834_v12, %v1341_v41  ;;  %v7861_v13 = vsel %vm1766_vm1, %v2225_v22, %v2226_v49 }
 0x1c7   :  { %v1311_v1 = vsel %vm1244_vm2, %v1176_v55, %v1177_v10  ;;  %1555 = vmatmul.bf16.gmra.mxu2 %v7757_v46 }
 0x1c8   :  { %v1342_v20 = vadd.f32 %v1311_v1, %v7465_v36  ;;  %2092 = vmatmul.bf16.gmra.mxu3 %v7856_v19  ;;  %v2384_v28 = vadd.f32 %v7789_v27, %v1863_v11 }
 0x1ca   :  { %v1516_v55 = vpop.f32.mrf.mxu2 }
 0x1cb   :  { %v2053_v51 = vpop.f32.mrf.mxu3  ;;  %v1699_v45 = vrot.slane %v1516_v55, 7  ;;  %v2561_v41 = vpop.f32.mrf.mxu0 }
 0x1cc   :  { %v2227_v24 = vrot.slane %v2053_v51, 7  ;;  %v996_v50 = vpop.f32.mrf.mxu1  ;;  %v7864_v36 = vadd.f32 %v2561_v41, %v2384_v28 }
 0x1cd   :  { %v1178_v0 = vrot.slane %v996_v50, 6  ;;  %v1833_v46 = vsel %vm1766_vm1, %v1698_v37, %v1699_v45 }
 0x1ce   :  { %v1864_v26 = vadd.f32 %v1833_v46, %v1342_v20  ;;  %v7873_v27 = vsel %vm1766_vm1, %v2226_v49, %v2227_v24  ;;  %v7886_v20 = vld [vmem:[#allocation2 + $0x98] sm:$0xff] }
 0x1cf   :  { %v1310_v2 = vsel %vm1244_vm2, %v1177_v10, %v1178_v0 }
 0x1d0   :  { %v1343_v22 = vadd.f32 %v1310_v2, %v7491_v39  ;;  %v2385_v12 = vadd.f32 %v7810_v59, %v1864_v26 }
 0x1d2   :  { %v1518_v1 = vpop.f32.mrf.mxu2 }
 0x1d3   :  { %v2055_v11 = vpop.f32.mrf.mxu3  ;;  %v1700_v55 = vrot.slane %v1518_v1, 7  ;;  %v2564_v50 = vpop.f32.mrf.mxu0 }
 0x1d4   :  { %v2228_v28 = vrot.slane %v2055_v11, 7  ;;  %v999_v51 = vpop.f32.mrf.mxu1  ;;  %v7876_v37 = vadd.f32 %v2564_v50, %v2385_v12 }
 0x1d5   :  { %v1179_v41 = vrot.slane %v999_v51, 6  ;;  %v1832_v10 = vsel %vm1766_vm1, %v1699_v45, %v1700_v55 }
 0x1d6   :  { %1038 = vmatmul.bf16.gmra.mxu1 %v7784_v23  ;;  %2603 = vmatmul.bf16.gmra.mxu0 %v7784_v23  ;;  %v1865_v59 = vadd.f32 %v1832_v10, %v1343_v22  ;;  %v7891_v46 = vsel %vm1766_vm1, %v2227_v24, %v2228_v28 }
 0x1d7   :  { %v1309_v39 = vsel %vm1244_vm2, %v1178_v0, %v1179_v41  ;;  %1560 = vmatmul.bf16.gmra.mxu2 %v7784_v23 }
 0x1d8   :  { %v1344_v49 = vadd.f32 %v1309_v39, %v7503_v3  ;;  %2097 = vmatmul.bf16.gmra.mxu3 %v7886_v20  ;;  %v2386_v45 = vadd.f32 %v7831_v42, %v1865_v59 }
 0x1da   :  { %v1521_v0 = vpop.f32.mrf.mxu2 }
 0x1db   :  { %v2058_v2 = vpop.f32.mrf.mxu3  ;;  %v1701_v26 = vrot.slane %v1521_v0, 7  ;;  %v2566_v22 = vpop.f32.mrf.mxu0 }
 0x1dc   :  { %v2229_v12 = vrot.slane %v2058_v2, 7  ;;  %v1001_v1 = vpop.f32.mrf.mxu1  ;;  %v7894_v3 = vadd.f32 %v2566_v22, %v2386_v45 }
 0x1dd   :  { %v1180_v11 = vrot.slane %v1001_v1, 6  ;;  %v1831_v23 = vsel %vm1766_vm1, %v1700_v55, %v1701_v26 }
 0x1de   :  { %v1866_v50 = vadd.f32 %v1831_v23, %v1344_v49  ;;  %v7903_v42 = vsel %vm1766_vm1, %v2228_v28, %v2229_v12  ;;  %v7916_v49 = vld [vmem:[#allocation2 + $0xa0] sm:$0xff] }
 0x1df   :  { %v1308_v51 = vsel %vm1244_vm2, %v1179_v41, %v1180_v11 }
 0x1e0   :  { %v1345_v24 = vadd.f32 %v1308_v51, %v7521_v34  ;;  %v2387_v10 = vadd.f32 %v7843_v29, %v1866_v50 }
 0x1e2   :  { %v1523_v39 = vpop.f32.mrf.mxu2 }
 0x1e3   :  { %v2060_v59 = vpop.f32.mrf.mxu3  ;;  %v1702_v0 = vrot.slane %v1523_v39, 7  ;;  %v2569_v1 = vpop.f32.mrf.mxu0 }
 0x1e4   :  { %v2230_v45 = vrot.slane %v2060_v59, 7  ;;  %v1004_v2 = vpop.f32.mrf.mxu1  ;;  %v7906_v55 = vadd.f32 %v2569_v1, %v2387_v10 }
 0x1e5   :  { %v1181_v22 = vrot.slane %v1004_v2, 6  ;;  %v1830_v41 = vsel %vm1766_vm1, %v1701_v26, %v1702_v0 }
 0x1e6   :  { %1043 = vmatmul.bf16.gmra.mxu1 %v7823_v25  ;;  %2608 = vmatmul.bf16.gmra.mxu0 %v7823_v25  ;;  %v1867_v29 = vadd.f32 %v1830_v41, %v1345_v24  ;;  %v7921_v23 = vsel %vm1766_vm1, %v2229_v12, %v2230_v45 }
 0x1e7   :  { %v1307_v34 = vsel %vm1244_vm2, %v1180_v11, %v1181_v22  ;;  %1565 = vmatmul.bf16.gmra.mxu2 %v7823_v25 }
 0x1e8   :  { %v1346_v28 = vadd.f32 %v1307_v34, %v7541_v38  ;;  %2102 = vmatmul.bf16.gmra.mxu3 %v7916_v49  ;;  %v2388_v26 = vadd.f32 %v7861_v13, %v1867_v29 }
 0x1ea   :  { %v1526_v11 = vpop.f32.mrf.mxu2 }
 0x1eb   :  { %v2063_v51 = vpop.f32.mrf.mxu3  ;;  %v1703_v50 = vrot.slane %v1526_v11, 7  ;;  %v2571_v24 = vpop.f32.mrf.mxu0 }
 0x1ec   :  { %v2231_v10 = vrot.slane %v2063_v51, 7  ;;  %v1006_v39 = vpop.f32.mrf.mxu1  ;;  %v7924_v38 = vadd.f32 %v2571_v24, %v2388_v26 }
 0x1ed   :  { %v1182_v59 = vrot.slane %v1006_v39, 6  ;;  %v1829_v25 = vsel %vm1766_vm1, %v1702_v0, %v1703_v50 }
 0x1ee   :  { %v1868_v1 = vadd.f32 %v1829_v25, %v1346_v28  ;;  %v7933_v13 = vsel %vm1766_vm1, %v2230_v45, %v2231_v10  ;;  %v7946_v28 = vld [vmem:[#allocation2 + $0xa8] sm:$0xff] }
 0x1ef   :  { %v1306_v2 = vsel %vm1244_vm2, %v1181_v22, %v1182_v59 }
 0x1f0   :  { %v1347_v12 = vadd.f32 %v1306_v2, %v7561_v57  ;;  %v2389_v41 = vadd.f32 %v7873_v27, %v1868_v1 }
 0x1f2   :  { %v1528_v34 = vpop.f32.mrf.mxu2 }
 0x1f3   :  { %v2065_v29 = vpop.f32.mrf.mxu3  ;;  %v1704_v11 = vrot.slane %v1528_v34, 7  ;;  %v2574_v39 = vpop.f32.mrf.mxu0 }
 0x1f4   :  { %v2232_v26 = vrot.slane %v2065_v29, 7  ;;  %v1009_v51 = vpop.f32.mrf.mxu1  ;;  %v7936_v0 = vadd.f32 %v2574_v39, %v2389_v41 }
 0x1f5   :  { %v1183_v24 = vrot.slane %v1009_v51, 6  ;;  %v1828_v22 = vsel %vm1766_vm1, %v1703_v50, %v1704_v11 }
 0x1f6   :  { %1048 = vmatmul.bf16.gmra.mxu1 %v7856_v19  ;;  %2613 = vmatmul.bf16.gmra.mxu0 %v7856_v19  ;;  %v1869_v27 = vadd.f32 %v1828_v22, %v1347_v12  ;;  %v7951_v25 = vsel %vm1766_vm1, %v2231_v10, %v2232_v26  ;;  %v6570_v22 = vld [vmem:[%s10962_s1 + $0x1d8] sm:$0xff] }
 0x1f7   :  { %v1305_v57 = vsel %vm1244_vm2, %v1182_v59, %v1183_v24  ;;  %1570 = vmatmul.bf16.gmra.mxu2 %v7856_v19  ;;  %3921 = vmatpush.bf16.msra.mxu3 %v6570_v22 }
 0x1f8   :  { %v1348_v45 = vadd.f32 %v1305_v57, %v7573_v14  ;;  %2107 = vmatmul.bf16.gmra.mxu3 %v7946_v28  ;;  %v2390_v50 = vadd.f32 %v7891_v46, %v1869_v27  ;;  %v6562_v46 = vld [vmem:[%s10962_s1 + $0x198] sm:$0xff] }
 0x1f9   :  { %3400 = vmatpush.bf16.msra.mxu2 %v6562_v46 }
 0x1fa   :  { %v1531_v59 = vpop.f32.mrf.mxu2 }
 0x1fb   :  { %v2068_v2 = vpop.f32.mrf.mxu3  ;;  %v1705_v1 = vrot.slane %v1531_v59, 7  ;;  %v2576_v12 = vpop.f32.mrf.mxu0 }
 0x1fc   :  { %v2233_v41 = vrot.slane %v2068_v2, 7  ;;  %v1011_v34 = vpop.f32.mrf.mxu1  ;;  %v7954_v14 = vadd.f32 %v2576_v12, %v2390_v50 }
 0x1fd   :  { %v1184_v29 = vrot.slane %v1011_v34, 6  ;;  %v1827_v19 = vsel %vm1766_vm1, %v1704_v11, %v1705_v1 }
 0x1fe   :  { %v1870_v39 = vadd.f32 %v1827_v19, %v1348_v45  ;;  %v7969_v57 = vsel %vm1766_vm1, %v2232_v26, %v2233_v41  ;;  %v6554_v26 = vld [vmem:[%s10962_s1 + $0x158] sm:$0xff] }
 0x1ff   :  { %v1304_v51 = vsel %vm1244_vm2, %v1183_v24, %v1184_v29  ;;  %2878 = vmatpush.bf16.msra.mxu1 %v6554_v26 }
 0x200   :  { %v1349_v10 = vadd.f32 %v1304_v51, %v7599_v54  ;;  %v2391_v11 = vadd.f32 %v7903_v42, %v1870_v39  ;;  %v7985_v39 = vld [vmem:[#allocation2 + $0xb0] sm:$0xff] }
 0x202   :  { %v1533_v24 = vpop.f32.mrf.mxu2 }
 0x203   :  { %v2070_v27 = vpop.f32.mrf.mxu3  ;;  %v1706_v45 = vrot.slane %v1533_v24, 7  ;;  %v2579_v59 = vpop.f32.mrf.mxu0 }
 0x204   :  { %v2234_v54 = vrot.slane %v2070_v27, 7  ;;  %v1014_v50 = vpop.f32.mrf.mxu1  ;;  %v7972_v34 = vadd.f32 %v2579_v59, %v2391_v11 }
 0x205   :  { %v1185_v2 = vrot.slane %v1014_v50, 6  ;;  %v1826_v12 = vsel %vm1766_vm1, %v1705_v1, %v1706_v45  ;;  %v6578_v1 = vld [vmem:[%s10962_s1 + $0x218] sm:$0xff] }
 0x206   :  { %1053 = vmatmul.bf16.gmra.mxu1 %v7886_v20  ;;  %2618 = vmatmul.bf16.gmra.mxu0 %v7886_v20  ;;  %v1871_v19 = vadd.f32 %v1826_v12, %v1349_v10 }
 0x207   :  { %v1303_v42 = vsel %vm1244_vm2, %v1184_v29, %v1185_v2  ;;  %1575 = vmatmul.bf16.gmra.mxu2 %v7886_v20  ;;  %v7993_v29 = vsel %vm1766_vm1, %v2233_v41, %v2234_v54  ;;  %4443 = vmatpush.bf16.msra.mxu0 %v6578_v1 }
 0x208   :  { %v1350_v51 = vadd.f32 %v1303_v42, %v7595_v58  ;;  %2112 = vmatmul.bf16.gmra.mxu3 %v7985_v39  ;;  %v2392_v46 = vadd.f32 %v7921_v23, %v1871_v19 }
 0x20a   :  { %v1536_v10 = vpop.f32.mrf.mxu2 }
 0x20b   :  { %v2073_v58 = vpop.f32.mrf.mxu3  ;;  %v1707_v22 = vrot.slane %v1536_v10, 7  ;;  %v2581_v24 = vpop.f32.mrf.mxu0 }
 0x20c   :  { %v2235_v20 = vrot.slane %v2073_v58, 7  ;;  %v1016_v11 = vpop.f32.mrf.mxu1  ;;  %v7996_v50 = vadd.f32 %v2581_v24, %v2392_v46 }
 0x20d   :  { %v1186_v27 = vrot.slane %v1016_v11, 6  ;;  %v1825_v59 = vsel %vm1766_vm1, %v1706_v45, %v1707_v22 }
 0x20e   :  { %v1872_v12 = vadd.f32 %v1825_v59, %v1350_v51  ;;  %v8005_v26 = vsel %vm1766_vm1, %v2234_v54, %v2235_v20  ;;  %v8018_v51 = vld [vmem:[#allocation2 + $0xb8] sm:$0xff] }
 0x20f   :  { %v1302_v41 = vsel %vm1244_vm2, %v1185_v2, %v1186_v27 }
 0x210   :  { %v1351_v23 = vadd.f32 %v1302_v41, %v7207_v32  ;;  %v2393_v42 = vadd.f32 %v7933_v13, %v1872_v12 }
 0x212   :  { %v1538_v19 = vpop.f32.mrf.mxu2 }
 0x213   :  { %v2075_v1 = vpop.f32.mrf.mxu3  ;;  %v1708_v10 = vrot.slane %v1538_v19, 7  ;;  %v2584_v11 = vpop.f32.mrf.mxu0 }
 0x214   :  { %v2236_v46 = vrot.slane %v2075_v1, 7  ;;  %v1019_v58 = vpop.f32.mrf.mxu1  ;;  %v8008_v45 = vadd.f32 %v2584_v11, %v2393_v42 }
 0x215   :  { %v1187_v24 = vrot.slane %v1019_v58, 6  ;;  %v1824_v2 = vsel %vm1766_vm1, %v1707_v22, %v1708_v10 }
 0x216   :  { %1058 = vmatmul.bf16.gmra.mxu1 %v7916_v49  ;;  %2623 = vmatmul.bf16.gmra.mxu0 %v7916_v49  ;;  %v1873_v13 = vadd.f32 %v1824_v2, %v1351_v23  ;;  %v8023_v59 = vsel %vm1766_vm1, %v2235_v20, %v2236_v46 }
 0x217   :  { %v1301_v32 = vsel %vm1244_vm2, %v1186_v27, %v1187_v24  ;;  %1580 = vmatmul.bf16.gmra.mxu2 %v7916_v49 }
 0x218   :  { %v1352_v54 = vadd.f32 %v1301_v32, %v7231_v52  ;;  %2117 = vmatmul.bf16.gmra.mxu3 %v8018_v51  ;;  %v2394_v22 = vadd.f32 %v7951_v25, %v1873_v13 }
 0x21a   :  { %v1541_v27 = vpop.f32.mrf.mxu2 }
 0x21b   :  { %v2078_v41 = vpop.f32.mrf.mxu3  ;;  %v1709_v12 = vrot.slane %v1541_v27, 7  ;;  %v2586_v23 = vpop.f32.mrf.mxu0 }
 0x21c   :  { %v2237_v42 = vrot.slane %v2078_v41, 7  ;;  %v1021_v19 = vpop.f32.mrf.mxu1  ;;  %v8026_v52 = vadd.f32 %v2586_v23, %v2394_v22 }
 0x21d   :  { %v1188_v1 = vrot.slane %v1021_v19, 6  ;;  %v1823_v49 = vsel %vm1766_vm1, %v1708_v10, %v1709_v12 }
 0x21e   :  { %v1874_v11 = vadd.f32 %v1823_v49, %v1352_v54  ;;  %v8035_v25 = vsel %vm1766_vm1, %v2236_v46, %v2237_v42  ;;  %v8048_v54 = vld [vmem:[#allocation2 + $0xc0] sm:$0xff] }
 0x21f   :  { %v1300_v58 = vsel %vm1244_vm2, %v1187_v24, %v1188_v1 }
 0x220   :  { %v1353_v20 = vadd.f32 %v1300_v58, %v7258_v6  ;;  %v2395_v2 = vadd.f32 %v7969_v57, %v1874_v11 }
 0x222   :  { %v1543_v32 = vpop.f32.mrf.mxu2 }
 0x223   :  { %v2080_v13 = vpop.f32.mrf.mxu3  ;;  %v1710_v27 = vrot.slane %v1543_v32, 7  ;;  %v2589_v19 = vpop.f32.mrf.mxu0 }
 0x224   :  { %v2238_v22 = vrot.slane %v2080_v13, 7  ;;  %v1024_v41 = vpop.f32.mrf.mxu1  ;;  %v8038_v10 = vadd.f32 %v2589_v19, %v2395_v2 }
 0x225   :  { %v1189_v23 = vrot.slane %v1024_v41, 6  ;;  %v1822_v24 = vsel %vm1766_vm1, %v1709_v12, %v1710_v27 }
 0x226   :  { %1063 = vmatmul.bf16.gmra.mxu1 %v7946_v28  ;;  %2628 = vmatmul.bf16.gmra.mxu0 %v7946_v28  ;;  %v1875_v57 = vadd.f32 %v1822_v24, %v1353_v20  ;;  %v8053_v49 = vsel %vm1766_vm1, %v2237_v42, %v2238_v22 }
 0x227   :  { %v1299_v6 = vsel %vm1244_vm2, %v1188_v1, %v1189_v23  ;;  %1585 = vmatmul.bf16.gmra.mxu2 %v7946_v28 }
 0x228   :  { %v1354_v46 = vadd.f32 %v1299_v6, %v7279_v43  ;;  %2122 = vmatmul.bf16.gmra.mxu3 %v8048_v54  ;;  %v2396_v12 = vadd.f32 %v7993_v29, %v1875_v57 }
 0x22a   :  { %v1546_v1 = vpop.f32.mrf.mxu2 }
 0x22b   :  { %v2083_v58 = vpop.f32.mrf.mxu3  ;;  %v1711_v11 = vrot.slane %v1546_v1, 7  ;;  %v2591_v20 = vpop.f32.mrf.mxu0 }
 0x22c   :  { %v2239_v2 = vrot.slane %v2083_v58, 7  ;;  %v1026_v32 = vpop.f32.mrf.mxu1  ;;  %v8056_v43 = vadd.f32 %v2591_v20, %v2396_v12 }
 0x22d   :  { %v1190_v13 = vrot.slane %v1026_v32, 6  ;;  %v1821_v28 = vsel %vm1766_vm1, %v1710_v27, %v1711_v11 }
 0x22e   :  { %11046 = vst [vmem:[#allocation61_spill] sm:$0xff] %v8056_v43  ;;  %v1876_v19 = vadd.f32 %v1821_v28, %v1354_v46  ;;  %v8065_v29 = vsel %vm1766_vm1, %v2238_v22, %v2239_v2  ;;  %v8078_v46 = vld [vmem:[#allocation2 + $0xc8] sm:$0xff] }
 0x22f   :  { %v1298_v41 = vsel %vm1244_vm2, %v1189_v23, %v1190_v13 }
 0x230   :  { %v1355_v42 = vadd.f32 %v1298_v41, %v7297_v61  ;;  %v2397_v24 = vadd.f32 %v8005_v26, %v1876_v19 }
 0x232   :  { %v1548_v6 = vpop.f32.mrf.mxu2 }
 0x233   :  { %v2085_v57 = vpop.f32.mrf.mxu3  ;;  %v1712_v1 = vrot.slane %v1548_v6, 7  ;;  %v2594_v32 = vpop.f32.mrf.mxu0 }
 0x234   :  { %v2240_v12 = vrot.slane %v2085_v57, 7  ;;  %v1029_v58 = vpop.f32.mrf.mxu1  ;;  %v8068_v27 = vadd.f32 %v2594_v32, %v2397_v24 }
 0x235   :  { %v1191_v20 = vrot.slane %v1029_v58, 6  ;;  %v1820_v23 = vsel %vm1766_vm1, %v1711_v11, %v1712_v1 }
 0x236   :  { %11047 = vst [vmem:[#allocation62_spill] sm:$0xff] %v8068_v27  ;;  %1068 = vmatmul.bf16.gmra.mxu1 %v7985_v39  ;;  %2633 = vmatmul.bf16.gmra.mxu0 %v7985_v39  ;;  %v1877_v26 = vadd.f32 %v1820_v23, %v1355_v42  ;;  %v8083_v28 = vsel %vm1766_vm1, %v2239_v2, %v2240_v12 }
 0x237   :  { %v1297_v61 = vsel %vm1244_vm2, %v1190_v13, %v1191_v20  ;;  %1590 = vmatmul.bf16.gmra.mxu2 %v7985_v39 }
 0x238   :  { %v1356_v22 = vadd.f32 %v1297_v61, %v7313_v30  ;;  %2127 = vmatmul.bf16.gmra.mxu3 %v8078_v46  ;;  %v2398_v11 = vadd.f32 %v8023_v59, %v1877_v26 }
 0x23a   :  { %v1551_v13 = vpop.f32.mrf.mxu2 }
 0x23b   :  { %v2088_v41 = vpop.f32.mrf.mxu3  ;;  %v1713_v19 = vrot.slane %v1551_v13, 7  ;;  %v2596_v42 = vpop.f32.mrf.mxu0 }
 0x23c   :  { %v2241_v24 = vrot.slane %v2088_v41, 7  ;;  %v1031_v6 = vpop.f32.mrf.mxu1  ;;  %v8086_v30 = vadd.f32 %v2596_v42, %v2398_v11 }
 0x23d   :  { %v1192_v57 = vrot.slane %v1031_v6, 6  ;;  %v1819_v39 = vsel %vm1766_vm1, %v1712_v1, %v1713_v19 }
 0x23e   :  { %11048 = vst [vmem:[#allocation63_spill] sm:$0xff] %v8086_v30  ;;  %v1878_v32 = vadd.f32 %v1819_v39, %v1356_v22  ;;  %v8095_v59 = vsel %vm1766_vm1, %v2240_v12, %v2241_v24  ;;  %v8108_v22 = vld [vmem:[#allocation2 + $0xd0] sm:$0xff] }
 0x23f   :  { %v1296_v58 = vsel %vm1244_vm2, %v1191_v20, %v1192_v57 }
 0x240   :  { %v1357_v2 = vadd.f32 %v1296_v58, %v7333_v62  ;;  %v2399_v23 = vadd.f32 %v8035_v25, %v1878_v32 }
 0x242   :  { %v1553_v61 = vpop.f32.mrf.mxu2 }
 0x243   :  { %v2090_v26 = vpop.f32.mrf.mxu3  ;;  %v1714_v13 = vrot.slane %v1553_v61, 7  ;;  %v2599_v6 = vpop.f32.mrf.mxu0 }
 0x244   :  { %v2242_v11 = vrot.slane %v2090_v26, 7  ;;  %v1034_v41 = vpop.f32.mrf.mxu1  ;;  %v8098_v1 = vadd.f32 %v2599_v6, %v2399_v23 }
 0x245   :  { %v1193_v42 = vrot.slane %v1034_v41, 6  ;;  %v1818_v20 = vsel %vm1766_vm1, %v1713_v19, %v1714_v13 }
 0x246   :  { %11049 = vst [vmem:[#allocation64_spill] sm:$0xff] %v8098_v1  ;;  %1073 = vmatmul.bf16.gmra.mxu1 %v8018_v51  ;;  %2638 = vmatmul.bf16.gmra.mxu0 %v8018_v51  ;;  %v1879_v25 = vadd.f32 %v1818_v20, %v1357_v2  ;;  %v8113_v39 = vsel %vm1766_vm1, %v2241_v24, %v2242_v11 }
 0x247   :  { %v1295_v62 = vsel %vm1244_vm2, %v1192_v57, %v1193_v42  ;;  %1595 = vmatmul.bf16.gmra.mxu2 %v8018_v51 }
 0x248   :  { %v1358_v12 = vadd.f32 %v1295_v62, %v7349_v63  ;;  %2132 = vmatmul.bf16.gmra.mxu3 %v8108_v22  ;;  %v2400_v19 = vadd.f32 %v8053_v49, %v1879_v25  ;;  %v6561_v49 = vld [vmem:[%s10962_s1 + $0x190] sm:$0xff] }
 0x249   :  { %3401 = vmatpush.bf16.msra.mxu2 %v6561_v49 }
 0x24a   :  { %v1556_v57 = vpop.f32.mrf.mxu2 }
 0x24b   :  { %v2093_v58 = vpop.f32.mrf.mxu3  ;;  %v1715_v32 = vrot.slane %v1556_v57, 7  ;;  %v2601_v2 = vpop.f32.mrf.mxu0 }
 0x24c   :  { %v2243_v23 = vrot.slane %v2093_v58, 7  ;;  %v1036_v61 = vpop.f32.mrf.mxu1  ;;  %v8116_v63 = vadd.f32 %v2601_v2, %v2400_v19 }
 0x24d   :  { %v1194_v26 = vrot.slane %v1036_v61, 6  ;;  %v1817_v51 = vsel %vm1766_vm1, %v1714_v13, %v1715_v32 }
 0x24e   :  { %11050 = vst [vmem:[#allocation65_spill] sm:$0xff] %v8116_v63  ;;  %v1880_v6 = vadd.f32 %v1817_v51, %v1358_v12  ;;  %v8128_v20 = vsel %vm1766_vm1, %v2242_v11, %v2243_v23  ;;  %v6569_v11 = vld [vmem:[%s10962_s1 + $0x1d0] sm:$0xff] }
 0x24f   :  { %v1294_v41 = vsel %vm1244_vm2, %v1193_v42, %v1194_v26  ;;  %3922 = vmatpush.bf16.msra.mxu3 %v6569_v11 }
 0x250   :  { %v1359_v24 = vadd.f32 %v1294_v41, %v7369_v44  ;;  %v2401_v62 = vadd.f32 %v8065_v29, %v1880_v6  ;;  %v8144_v41 = vld [vmem:[#allocation2 + $0xd8] sm:$0xff] }
 0x252   :  { %v1558_v25 = vpop.f32.mrf.mxu2 }
 0x253   :  { %v2095_v19 = vpop.f32.mrf.mxu3  ;;  %v1716_v13 = vrot.slane %v1558_v25, 7  ;;  %v2604_v42 = vpop.f32.mrf.mxu0 }
 0x254   :  { %v2244_v57 = vrot.slane %v2095_v19, 7  ;;  %v1039_v58 = vpop.f32.mrf.mxu1  ;;  %v8131_v61 = vadd.f32 %v2604_v42, %v2401_v62 }
 0x255   :  { %v1195_v12 = vrot.slane %v1039_v58, 6  ;;  %v1816_v44 = vsel %vm1766_vm1, %v1715_v32, %v1716_v13  ;;  %v6553_v32 = vld [vmem:[%s10962_s1 + $0x150] sm:$0xff] }
 0x256   :  { %11051 = vst [vmem:[#allocation66_spill] sm:$0xff] %v8131_v61  ;;  %1078 = vmatmul.bf16.gmra.mxu1 %v8048_v54  ;;  %2643 = vmatmul.bf16.gmra.mxu0 %v8048_v54  ;;  %v1881_v2 = vadd.f32 %v1816_v44, %v1359_v24 }
 0x257   :  { %v1293_v29 = vsel %vm1244_vm2, %v1194_v26, %v1195_v12  ;;  %1600 = vmatmul.bf16.gmra.mxu2 %v8048_v54  ;;  %v8152_v26 = vsel %vm1766_vm1, %v2243_v23, %v2244_v57  ;;  %2879 = vmatpush.bf16.msra.mxu1 %v6553_v32  ;;  %v6577_v23 = vld [vmem:[%s10962_s1 + $0x210] sm:$0xff] }
 0x258   :  { %v1360_v51 = vadd.f32 %v1293_v29, %v7385_v9  ;;  %2137 = vmatmul.bf16.gmra.mxu3 %v8144_v41  ;;  %v2402_v6 = vadd.f32 %v8083_v28, %v1881_v2  ;;  %4444 = vmatpush.bf16.msra.mxu0 %v6577_v23 }
 0x25a   :  { %v1561_v24 = vpop.f32.mrf.mxu2 }
 0x25b   :  { %v2098_v9 = vpop.f32.mrf.mxu3  ;;  %v1717_v49 = vrot.slane %v1561_v24, 7  ;;  %v2606_v25 = vpop.f32.mrf.mxu0 }
 0x25c   :  { %v2245_v54 = vrot.slane %v2098_v9, 7  ;;  %v1041_v62 = vpop.f32.mrf.mxu1  ;;  %v8155_v58 = vadd.f32 %v2606_v25, %v2402_v6 }
 0x25d   :  { %v1196_v19 = vrot.slane %v1041_v62, 6  ;;  %v1815_v42 = vsel %vm1766_vm1, %v1716_v13, %v1717_v49 }
 0x25e   :  { %11052 = vst [vmem:[#allocation67_spill] sm:$0xff] %v8155_v58  ;;  %v1882_v44 = vadd.f32 %v1815_v42, %v1360_v51  ;;  %v8167_v29 = vsel %vm1766_vm1, %v2244_v57, %v2245_v54  ;;  %v8180_v51 = vld [vmem:[#allocation2 + $0xe0] sm:$0xff] }
 0x25f   :  { %v1292_v28 = vsel %vm1244_vm2, %v1195_v12, %v1196_v19 }
 0x260   :  { %v1361_v11 = vadd.f32 %v1292_v28, %v7405_v18  ;;  %v2403_v2 = vadd.f32 %v8095_v59, %v1882_v44 }
 0x262   :  { %v1563_v32 = vpop.f32.mrf.mxu2 }
 0x263   :  { %v2100_v6 = vpop.f32.mrf.mxu3  ;;  %v1718_v13 = vrot.slane %v1563_v32, 7  ;;  %v2609_v62 = vpop.f32.mrf.mxu0 }
 0x264   :  { %v2246_v24 = vrot.slane %v2100_v6, 7  ;;  %v1044_v9 = vpop.f32.mrf.mxu1  ;;  %v8170_v58 = vadd.f32 %v2609_v62, %v2403_v2 }
 0x265   :  { %v1197_v25 = vrot.slane %v1044_v9, 6  ;;  %v1814_v12 = vsel %vm1766_vm1, %v1717_v49, %v1718_v13 }
 0x266   :  { %11053 = vst [vmem:[#allocation68_spill] sm:$0xff] %v8170_v58  ;;  %1083 = vmatmul.bf16.gmra.mxu1 %v8078_v46  ;;  %2648 = vmatmul.bf16.gmra.mxu0 %v8078_v46  ;;  %v1883_v59 = vadd.f32 %v1814_v12, %v1361_v11  ;;  %v8185_v42 = vsel %vm1766_vm1, %v2245_v54, %v2246_v24 }
 0x267   :  { %v1291_v18 = vsel %vm1244_vm2, %v1196_v19, %v1197_v25  ;;  %1605 = vmatmul.bf16.gmra.mxu2 %v8078_v46 }
 0x268   :  { %v1362_v57 = vadd.f32 %v1291_v18, %v7421_v56  ;;  %2142 = vmatmul.bf16.gmra.mxu3 %v8180_v51  ;;  %v2404_v49 = vadd.f32 %v8113_v39, %v1883_v59 }
 0x26a   :  { %v1566_v19 = vpop.f32.mrf.mxu2 }
 0x26b   :  { %v2103_v23 = vpop.f32.mrf.mxu3  ;;  %v1719_v28 = vrot.slane %v1566_v19, 7  ;;  %v2611_v11 = vpop.f32.mrf.mxu0 }
 0x26c   :  { %v2247_v44 = vrot.slane %v2103_v23, 7  ;;  %v1046_v2 = vpop.f32.mrf.mxu1  ;;  %v8188_v56 = vadd.f32 %v2611_v11, %v2404_v49 }
 0x26d   :  { %v1198_v32 = vrot.slane %v1046_v2, 6  ;;  %v1813_v46 = vsel %vm1766_vm1, %v1718_v13, %v1719_v28 }
 0x26e   :  { %11054 = vst [vmem:[#allocation69_spill] sm:$0xff] %v8188_v56  ;;  %v1884_v9 = vadd.f32 %v1813_v46, %v1362_v57  ;;  %v8197_v39 = vsel %vm1766_vm1, %v2246_v24, %v2247_v44  ;;  %v8210_v57 = vld [vmem:[#allocation2 + $0xe8] sm:$0xff] }
 0x26f   :  { %v1290_v6 = vsel %vm1244_vm2, %v1197_v25, %v1198_v32 }
 0x270   :  { %v1363_v54 = vadd.f32 %v1290_v6, %v7447_v40  ;;  %v2405_v62 = vadd.f32 %v8128_v20, %v1884_v9 }
 0x272   :  { %v1568_v12 = vpop.f32.mrf.mxu2 }
 0x273   :  { %v2105_v18 = vpop.f32.mrf.mxu3  ;;  %v1720_v59 = vrot.slane %v1568_v12, 7  ;;  %v2614_v23 = vpop.f32.mrf.mxu0 }
 0x274   :  { %v2248_v49 = vrot.slane %v2105_v18, 7  ;;  %v1049_v19 = vpop.f32.mrf.mxu1  ;;  %v8200_v13 = vadd.f32 %v2614_v23, %v2405_v62 }
 0x275   :  { %v1199_v2 = vrot.slane %v1049_v19, 6  ;;  %v1812_v25 = vsel %vm1766_vm1, %v1719_v28, %v1720_v59 }
 0x276   :  { %11055 = vst [vmem:[#allocation70_spill] sm:$0xff] %v8200_v13  ;;  %1088 = vmatmul.bf16.gmra.mxu1 %v8108_v22  ;;  %2653 = vmatmul.bf16.gmra.mxu0 %v8108_v22  ;;  %v1885_v20 = vadd.f32 %v1812_v25, %v1363_v54  ;;  %v8215_v11 = vsel %vm1766_vm1, %v2247_v44, %v2248_v49 }
 0x277   :  { %v1289_v40 = vsel %vm1244_vm2, %v1198_v32, %v1199_v2  ;;  %1610 = vmatmul.bf16.gmra.mxu2 %v8108_v22 }
 0x278   :  { %v1364_v24 = vadd.f32 %v1289_v40, %v7469_v33  ;;  %2147 = vmatmul.bf16.gmra.mxu3 %v8210_v57  ;;  %v2406_v28 = vadd.f32 %v8152_v26, %v1885_v20 }
 0x27a   :  { %v1571_v32 = vpop.f32.mrf.mxu2 }
 0x27b   :  { %v2108_v46 = vpop.f32.mrf.mxu3  ;;  %v1721_v6 = vrot.slane %v1571_v32, 7  ;;  %v2616_v54 = vpop.f32.mrf.mxu0 }
 0x27c   :  { %v2249_v9 = vrot.slane %v2108_v46, 7  ;;  %v1051_v62 = vpop.f32.mrf.mxu1  ;;  %v8218_v33 = vadd.f32 %v2616_v54, %v2406_v28 }
 0x27d   :  { %v1200_v12 = vrot.slane %v1051_v62, 6  ;;  %v1811_v22 = vsel %vm1766_vm1, %v1720_v59, %v1721_v6 }
 0x27e   :  { %11056 = vst [vmem:[#allocation71_spill] sm:$0xff] %v8218_v33  ;;  %v1886_v19 = vadd.f32 %v1811_v22, %v1364_v24  ;;  %v8227_v26 = vsel %vm1766_vm1, %v2248_v49, %v2249_v9  ;;  %v8240_v24 = vld [vmem:[#allocation2 + $0xf0] sm:$0xff] }
 0x27f   :  { %v1288_v18 = vsel %vm1244_vm2, %v1199_v2, %v1200_v12 }
 0x280   :  { %v1365_v44 = vadd.f32 %v1288_v18, %v7495_v16  ;;  %v2407_v23 = vadd.f32 %v8167_v29, %v1886_v19 }
 0x282   :  { %v1573_v25 = vpop.f32.mrf.mxu2 }
 0x283   :  { %v2110_v40 = vpop.f32.mrf.mxu3  ;;  %v1722_v20 = vrot.slane %v1573_v25, 7  ;;  %v2619_v46 = vpop.f32.mrf.mxu0 }
 0x284   :  { %v2250_v28 = vrot.slane %v2110_v40, 7  ;;  %v1054_v32 = vpop.f32.mrf.mxu1  ;;  %v8230_v59 = vadd.f32 %v2619_v46, %v2407_v23 }
 0x285   :  { %v1201_v62 = vrot.slane %v1054_v32, 6  ;;  %v1810_v2 = vsel %vm1766_vm1, %v1721_v6, %v1722_v20 }
 0x286   :  { %11057 = vst [vmem:[#allocation72_spill] sm:$0xff] %v8230_v59  ;;  %1093 = vmatmul.bf16.gmra.mxu1 %v8144_v41  ;;  %2658 = vmatmul.bf16.gmra.mxu0 %v8144_v41  ;;  %v1887_v29 = vadd.f32 %v1810_v2, %v1365_v44  ;;  %v8245_v54 = vsel %vm1766_vm1, %v2249_v9, %v2250_v28 }
 0x287   :  { %v1287_v16 = vsel %vm1244_vm2, %v1200_v12, %v1201_v62  ;;  %1615 = vmatmul.bf16.gmra.mxu2 %v8144_v41 }
 0x288   :  { %v1366_v49 = vadd.f32 %v1287_v16, %v7507_v35  ;;  %2152 = vmatmul.bf16.gmra.mxu3 %v8240_v24  ;;  %v2408_v6 = vadd.f32 %v8185_v42, %v1887_v29 }
 0x28a   :  { %v1576_v12 = vpop.f32.mrf.mxu2 }
 0x28b   :  { %v2113_v22 = vpop.f32.mrf.mxu3  ;;  %v1723_v18 = vrot.slane %v1576_v12, 7  ;;  %v2621_v44 = vpop.f32.mrf.mxu0 }
 0x28c   :  { %v2251_v19 = vrot.slane %v2113_v22, 7  ;;  %v1056_v23 = vpop.f32.mrf.mxu1  ;;  %v8248_v35 = vadd.f32 %v2621_v44, %v2408_v6  ;;  %v8270_v44 = vld [vmem:[#allocation2 + $0xf8] sm:$0xff] }
 0x28d   :  { %v1202_v25 = vrot.slane %v1056_v23, 6  ;;  %v1809_v41 = vsel %vm1766_vm1, %v1722_v20, %v1723_v18 }
 0x28e   :  { %11058 = vst [vmem:[#allocation73_spill] sm:$0xff] %v8248_v35  ;;  %v1888_v32 = vadd.f32 %v1809_v41, %v1366_v49  ;;  %v8257_v42 = vsel %vm1766_vm1, %v2250_v28, %v2251_v19  ;;  %v11060_v28 = vld [vmem:[#allocation43_spill] sm:$0xff] }
 0x28f   :  { %v1286_v40 = vsel %vm1244_vm2, %v1201_v62, %v1202_v25 }
 0x290   :  { %v1367_v9 = vadd.f32 %v1286_v40, %v7525_v48  ;;  %v2409_v46 = vadd.f32 %v8197_v39, %v1888_v32 }
 0x292   :  { %v1578_v2 = vpop.f32.mrf.mxu2 }
 0x293   :  { %v2115_v16 = vpop.f32.mrf.mxu3  ;;  %v1724_v29 = vrot.slane %v1578_v2, 7  ;;  %v2624_v22 = vpop.f32.mrf.mxu0 }
 0x294   :  { %v2252_v6 = vrot.slane %v2115_v16, 7  ;;  %v1059_v12 = vpop.f32.mrf.mxu1  ;;  %v8260_v20 = vadd.f32 %v2624_v22, %v2409_v46 }
 0x295   :  { %v1203_v23 = vrot.slane %v1059_v12, 6  ;;  %v1808_v62 = vsel %vm1766_vm1, %v1723_v18, %v1724_v29 }
 0x296   :  { %11059 = vst [vmem:[#allocation74_spill] sm:$0xff] %v8260_v20  ;;  %1098 = vmatmul.bf16.gmra.mxu1 %v8180_v51  ;;  %2663 = vmatmul.bf16.gmra.mxu0 %v8180_v51  ;;  %v1889_v39 = vadd.f32 %v1808_v62, %v1367_v9  ;;  %v8275_v41 = vsel %vm1766_vm1, %v2251_v19, %v2252_v6  ;;  %v11062_v19 = vld [vmem:[#allocation46_spill] sm:$0xff] }
 0x297   :  { %v1285_v48 = vsel %vm1244_vm2, %v1202_v25, %v1203_v23  ;;  %1620 = vmatmul.bf16.gmra.mxu2 %v8180_v51 }
 0x298   :  { %v1368_v49 = vadd.f32 %v1285_v48, %v11060_v28  ;;  %2157 = vmatmul.bf16.gmra.mxu3 %v8270_v44  ;;  %v2410_v18 = vadd.f32 %v8215_v11, %v1889_v39 }
 0x29a   :  { %v1581_v25 = vpop.f32.mrf.mxu2 }
 0x29b   :  { %v2118_v40 = vpop.f32.mrf.mxu3  ;;  %v1725_v32 = vrot.slane %v1581_v25, 7  ;;  %v2626_v9 = vpop.f32.mrf.mxu0 }
 0x29c   :  { %v2253_v46 = vrot.slane %v2118_v40, 7  ;;  %v1061_v2 = vpop.f32.mrf.mxu1  ;;  %v8278_v12 = vadd.f32 %v2626_v9, %v2410_v18 }
 0x29d   :  { %v1204_v16 = vrot.slane %v1061_v2, 6  ;;  %v1807_v51 = vsel %vm1766_vm1, %v1724_v29, %v1725_v32 }
 0x29e   :  { %11061 = vst [vmem:[#allocation43_spill] sm:$0xff] %v8278_v12  ;;  %v1890_v62 = vadd.f32 %v1807_v51, %v1368_v49  ;;  %v8287_v11 = vsel %vm1766_vm1, %v2252_v6, %v2253_v46  ;;  %v6560_v49 = vld [vmem:[%s10962_s1 + $0x188] sm:$0xff] }
 0x29f   :  { %v1284_v22 = vsel %vm1244_vm2, %v1203_v23, %v1204_v16  ;;  %v11064_v51 = vld [vmem:[#allocation48_spill] sm:$0xff]  ;;  %3402 = vmatpush.bf16.msra.mxu2 %v6560_v49 }
 0x2a0   :  { %v1369_v48 = vadd.f32 %v1284_v22, %v11062_v19  ;;  %v2411_v39 = vadd.f32 %v8227_v26, %v1890_v62  ;;  %v8303_v62 = vld [vmem:[#allocation2 + $0x100] sm:$0xff] }
 0x2a2   :  { %v1583_v28 = vpop.f32.mrf.mxu2 }
 0x2a3   :  { %v2120_v25 = vpop.f32.mrf.mxu3  ;;  %v1726_v40 = vrot.slane %v1583_v28, 7  ;;  %v2629_v9 = vpop.f32.mrf.mxu0 }
 0x2a4   :  { %v2254_v18 = vrot.slane %v2120_v25, 7  ;;  %v1064_v2 = vpop.f32.mrf.mxu1  ;;  %v8290_v29 = vadd.f32 %v2629_v9, %v2411_v39 }
 0x2a5   :  { %v1205_v12 = vrot.slane %v1064_v2, 6  ;;  %v1806_v23 = vsel %vm1766_vm1, %v1725_v32, %v1726_v40  ;;  %v6568_v32 = vld [vmem:[%s10962_s1 + $0x1c8] sm:$0xff] }
 0x2a6   :  { %11063 = vst [vmem:[#allocation46_spill] sm:$0xff] %v8290_v29  ;;  %1103 = vmatmul.bf16.gmra.mxu1 %v8210_v57  ;;  %2668 = vmatmul.bf16.gmra.mxu0 %v8210_v57  ;;  %v1891_v26 = vadd.f32 %v1806_v23, %v1369_v48  ;;  %v8314_v19 = vsel %vm1766_vm1, %v2253_v46, %v2254_v18 }
 0x2a7   :  { %v1283_v6 = vsel %vm1244_vm2, %v1204_v16, %v1205_v12  ;;  %1625 = vmatmul.bf16.gmra.mxu2 %v8210_v57  ;;  %v6552_v16 = vld [vmem:[%s10962_s1 + $0x148] sm:$0xff]  ;;  %3923 = vmatpush.bf16.msra.mxu3 %v6568_v32 }
 0x2a8   :  { %v1370_v22 = vadd.f32 %v1283_v6, %v11064_v51  ;;  %2162 = vmatmul.bf16.gmra.mxu3 %v8303_v62  ;;  %v2412_v48 = vadd.f32 %v8245_v54, %v1891_v26  ;;  %2880 = vmatpush.bf16.msra.mxu1 %v6552_v16  ;;  %v11066_v54 = vld [vmem:[#allocation51_spill] sm:$0xff]  ;;  %v6576_v26 = vld [vmem:[%s10962_s1 + $0x208] sm:$0xff] }
 0x2a9   :  { %4445 = vmatpush.bf16.msra.mxu0 %v6576_v26 }
 0x2aa   :  { %v1586_v57 = vpop.f32.mrf.mxu2 }
 0x2ab   :  { %v2123_v39 = vpop.f32.mrf.mxu3  ;;  %v1727_v28 = vrot.slane %v1586_v57, 7  ;;  %v2631_v9 = vpop.f32.mrf.mxu0 }
 0x2ac   :  { %v2255_v25 = vrot.slane %v2123_v39, 7  ;;  %v1066_v2 = vpop.f32.mrf.mxu1  ;;  %v8317_v6 = vadd.f32 %v2631_v9, %v2412_v48 }
 0x2ad   :  { %v1206_v23 = vrot.slane %v1066_v2, 6  ;;  %v1805_v51 = vsel %vm1766_vm1, %v1726_v40, %v1727_v28 }
 0x2ae   :  { %11065 = vst [vmem:[#allocation48_spill] sm:$0xff] %v8317_v6  ;;  %v1892_v29 = vadd.f32 %v1805_v51, %v1370_v22  ;;  %v8329_v32 = vsel %vm1766_vm1, %v2254_v18, %v2255_v25  ;;  %v11068_v18 = vld [vmem:[#allocation50_spill] sm:$0xff] }
 0x2af   :  { %v1282_v46 = vsel %vm1244_vm2, %v1205_v12, %v1206_v23 }
 0x2b0   :  { %v1371_v49 = vadd.f32 %v1282_v46, %v11066_v54  ;;  %v2413_v16 = vadd.f32 %v8257_v42, %v1892_v29  ;;  %v8342_v54 = vld [vmem:[#allocation2 + $0x108] sm:$0xff] }
 0x2b2   :  { %v1588_v48 = vpop.f32.mrf.mxu2 }
 0x2b3   :  { %v2125_v57 = vpop.f32.mrf.mxu3  ;;  %v1728_v40 = vrot.slane %v1588_v48, 7  ;;  %v2634_v12 = vpop.f32.mrf.mxu0 }
 0x2b4   :  { %v2256_v39 = vrot.slane %v2125_v57, 7  ;;  %v1069_v2 = vpop.f32.mrf.mxu1  ;;  %v8332_v9 = vadd.f32 %v2634_v12, %v2413_v16 }
 0x2b5   :  { %v1207_v22 = vrot.slane %v1069_v2, 6  ;;  %v1804_v51 = vsel %vm1766_vm1, %v1727_v28, %v1728_v40 }
 0x2b6   :  { %11067 = vst [vmem:[#allocation51_spill] sm:$0xff] %v8332_v9  ;;  %1108 = vmatmul.bf16.gmra.mxu1 %v8240_v24  ;;  %2673 = vmatmul.bf16.gmra.mxu0 %v8240_v24  ;;  %v1893_v42 = vadd.f32 %v1804_v51, %v1371_v49  ;;  %v8347_v26 = vsel %vm1766_vm1, %v2255_v25, %v2256_v39  ;;  %v11070_v25 = vld [vmem:[#allocation9_spill] sm:$0xff] }
 0x2b7   :  { %v1281_v46 = vsel %vm1244_vm2, %v1206_v23, %v1207_v22  ;;  %1630 = vmatmul.bf16.gmra.mxu2 %v8240_v24 }
 0x2b8   :  { %v1372_v29 = vadd.f32 %v1281_v46, %v11068_v18  ;;  %2167 = vmatmul.bf16.gmra.mxu3 %v8342_v54  ;;  %v2414_v28 = vadd.f32 %v8275_v41, %v1893_v42 }
 0x2ba   :  { %v1591_v23 = vpop.f32.mrf.mxu2 }
 0x2bb   :  { %v2128_v16 = vpop.f32.mrf.mxu3  ;;  %v1729_v48 = vrot.slane %v1591_v23, 7  ;;  %v2636_v49 = vpop.f32.mrf.mxu0 }
 0x2bc   :  { %v2257_v57 = vrot.slane %v2128_v16, 7  ;;  %v1071_v2 = vpop.f32.mrf.mxu1  ;;  %v8350_v51 = vadd.f32 %v2636_v49, %v2414_v28 }
 0x2bd   :  { %v1208_v12 = vrot.slane %v1071_v2, 6  ;;  %v1803_v24 = vsel %vm1766_vm1, %v1728_v40, %v1729_v48 }
 0x2be   :  { %11069 = vst [vmem:[#allocation50_spill] sm:$0xff] %v8350_v51  ;;  %v1894_v18 = vadd.f32 %v1803_v24, %v1372_v29  ;;  %v8359_v41 = vsel %vm1766_vm1, %v2256_v39, %v2257_v57  ;;  %v11072_v39 = vld [vmem:[#allocation11_spill] sm:$0xff] }
 0x2bf   :  { %v1280_v46 = vsel %vm1244_vm2, %v1207_v22, %v1208_v12 }
 0x2c0   :  { %v1373_v9 = vadd.f32 %v1280_v46, %v11070_v25  ;;  %v2415_v42 = vadd.f32 %v8287_v11, %v1894_v18  ;;  %v8372_v46 = vld [vmem:[#allocation2 + $0x110] sm:$0xff] }
 0x2c2   :  { %v1593_v23 = vpop.f32.mrf.mxu2 }
 0x2c3   :  { %v2130_v16 = vpop.f32.mrf.mxu3  ;;  %v1730_v2 = vrot.slane %v1593_v23, 7  ;;  %v2639_v51 = vpop.f32.mrf.mxu0 }
 0x2c4   :  { %v2258_v28 = vrot.slane %v2130_v16, 7  ;;  %v1074_v49 = vpop.f32.mrf.mxu1  ;;  %v8362_v40 = vadd.f32 %v2639_v51, %v2415_v42 }
 0x2c5   :  { %v1209_v6 = vrot.slane %v1074_v49, 6  ;;  %v1802_v22 = vsel %vm1766_vm1, %v1729_v48, %v1730_v2 }
 0x2c6   :  { %11071 = vst [vmem:[#allocation9_spill] sm:$0xff] %v8362_v40  ;;  %1113 = vmatmul.bf16.gmra.mxu1 %v8270_v44  ;;  %2678 = vmatmul.bf16.gmra.mxu0 %v8270_v44  ;;  %v1895_v11 = vadd.f32 %v1802_v22, %v1373_v9  ;;  %v8377_v51 = vsel %vm1766_vm1, %v2257_v57, %v2258_v28  ;;  %v11074_v57 = vld [vmem:[#allocation13_spill] sm:$0xff] }
 0x2c7   :  { %v1279_v29 = vsel %vm1244_vm2, %v1208_v12, %v1209_v6  ;;  %1635 = vmatmul.bf16.gmra.mxu2 %v8270_v44 }
 0x2c8   :  { %v1374_v24 = vadd.f32 %v1279_v29, %v11072_v39  ;;  %2172 = vmatmul.bf16.gmra.mxu3 %v8372_v46  ;;  %v2416_v48 = vadd.f32 %v8314_v19, %v1895_v11 }
 0x2ca   :  { %v1596_v12 = vpop.f32.mrf.mxu2 }
 0x2cb   :  { %v2133_v18 = vpop.f32.mrf.mxu3  ;;  %v1731_v25 = vrot.slane %v1596_v12, 7  ;;  %v2641_v9 = vpop.f32.mrf.mxu0 }
 0x2cc   :  { %v2259_v42 = vrot.slane %v2133_v18, 7  ;;  %v1076_v23 = vpop.f32.mrf.mxu1  ;;  %v8380_v49 = vadd.f32 %v2641_v9, %v2416_v48 }
 0x2cd   :  { %v1210_v16 = vrot.slane %v1076_v23, 6  ;;  %v1801_v44 = vsel %vm1766_vm1, %v1730_v2, %v1731_v25 }
 0x2ce   :  { %11073 = vst [vmem:[#allocation11_spill] sm:$0xff] %v8380_v49  ;;  %v1896_v29 = vadd.f32 %v1801_v44, %v1374_v24  ;;  %v8389_v19 = vsel %vm1766_vm1, %v2258_v28, %v2259_v42  ;;  %v11076_v28 = vld [vmem:[#allocation15_spill] sm:$0xff] }
 0x2cf   :  { %v1278_v22 = vsel %vm1244_vm2, %v1209_v6, %v1210_v16 }
 0x2d0   :  { %v1375_v39 = vadd.f32 %v1278_v22, %v11074_v57  ;;  %v2417_v11 = vadd.f32 %v8329_v32, %v1896_v29  ;;  %v8402_v22 = vld [vmem:[#allocation2 + $0x118] sm:$0xff] }
 0x2d2   :  { %v1598_v12 = vpop.f32.mrf.mxu2 }
 0x2d3   :  { %v2135_v18 = vpop.f32.mrf.mxu3  ;;  %v1732_v23 = vrot.slane %v1598_v12, 7  ;;  %v2644_v49 = vpop.f32.mrf.mxu0 }
 0x2d4   :  { %v2260_v48 = vrot.slane %v2135_v18, 7  ;;  %v1079_v9 = vpop.f32.mrf.mxu1  ;;  %v8392_v2 = vadd.f32 %v2644_v49, %v2417_v11 }
 0x2d5   :  { %v1211_v40 = vrot.slane %v1079_v9, 6  ;;  %v1800_v6 = vsel %vm1766_vm1, %v1731_v25, %v1732_v23 }
 0x2d6   :  { %11075 = vst [vmem:[#allocation13_spill] sm:$0xff] %v8392_v2  ;;  %1118 = vmatmul.bf16.gmra.mxu1 %v8303_v62  ;;  %2683 = vmatmul.bf16.gmra.mxu0 %v8303_v62  ;;  %v1897_v32 = vadd.f32 %v1800_v6, %v1375_v39  ;;  %v8407_v49 = vsel %vm1766_vm1, %v2259_v42, %v2260_v48  ;;  %v11078_v42 = vld [vmem:[#allocation17_spill] sm:$0xff] }
 0x2d7   :  { %v1277_v24 = vsel %vm1244_vm2, %v1210_v16, %v1211_v40  ;;  %1640 = vmatmul.bf16.gmra.mxu2 %v8303_v62 }
 0x2d8   :  { %v1376_v44 = vadd.f32 %v1277_v24, %v11076_v28  ;;  %2177 = vmatmul.bf16.gmra.mxu3 %v8402_v22  ;;  %v2418_v25 = vadd.f32 %v8347_v26, %v1897_v32 }
 0x2da   :  { %v1601_v16 = vpop.f32.mrf.mxu2 }
 0x2db   :  { %v2138_v29 = vpop.f32.mrf.mxu3  ;;  %v1733_v57 = vrot.slane %v1601_v16, 7  ;;  %v2646_v39 = vpop.f32.mrf.mxu0 }
 0x2dc   :  { %v2261_v11 = vrot.slane %v2138_v29, 7  ;;  %v1081_v12 = vpop.f32.mrf.mxu1  ;;  %v8410_v9 = vadd.f32 %v2646_v39, %v2418_v25 }
 0x2dd   :  { %v1212_v18 = vrot.slane %v1081_v12, 6  ;;  %v1799_v62 = vsel %vm1766_vm1, %v1732_v23, %v1733_v57 }
 0x2de   :  { %11077 = vst [vmem:[#allocation15_spill] sm:$0xff] %v8410_v9  ;;  %v1898_v24 = vadd.f32 %v1799_v62, %v1376_v44  ;;  %v8419_v26 = vsel %vm1766_vm1, %v2260_v48, %v2261_v11  ;;  %v11080_v48 = vld [vmem:[#allocation19_spill] sm:$0xff] }
 0x2df   :  { %v1276_v6 = vsel %vm1244_vm2, %v1211_v40, %v1212_v18 }
 0x2e0   :  { %v1377_v28 = vadd.f32 %v1276_v6, %v11078_v42  ;;  %v2419_v32 = vadd.f32 %v8359_v41, %v1898_v24  ;;  %v8432_v6 = vld [vmem:[#allocation2 + $0x120] sm:$0xff] }
 0x2e2   :  { %v1603_v16 = vpop.f32.mrf.mxu2 }
 0x2e3   :  { %v2140_v29 = vpop.f32.mrf.mxu3  ;;  %v1734_v12 = vrot.slane %v1603_v16, 7  ;;  %v2649_v9 = vpop.f32.mrf.mxu0 }
 0x2e4   :  { %v2262_v25 = vrot.slane %v2140_v29, 7  ;;  %v1084_v39 = vpop.f32.mrf.mxu1  ;;  %v8422_v23 = vadd.f32 %v2649_v9, %v2419_v32 }
 0x2e5   :  { %v1213_v2 = vrot.slane %v1084_v39, 6  ;;  %v1798_v40 = vsel %vm1766_vm1, %v1733_v57, %v1734_v12 }
 0x2e6   :  { %11079 = vst [vmem:[#allocation17_spill] sm:$0xff] %v8422_v23  ;;  %1123 = vmatmul.bf16.gmra.mxu1 %v8342_v54  ;;  %2688 = vmatmul.bf16.gmra.mxu0 %v8342_v54  ;;  %v1899_v41 = vadd.f32 %v1798_v40, %v1377_v28  ;;  %v8437_v9 = vsel %vm1766_vm1, %v2261_v11, %v2262_v25  ;;  %v11082_v11 = vld [vmem:[#allocation21_spill] sm:$0xff] }
 0x2e7   :  { %v1275_v44 = vsel %vm1244_vm2, %v1212_v18, %v1213_v2  ;;  %1645 = vmatmul.bf16.gmra.mxu2 %v8342_v54 }
 0x2e8   :  { %v1378_v62 = vadd.f32 %v1275_v44, %v11080_v48  ;;  %2182 = vmatmul.bf16.gmra.mxu3 %v8432_v6  ;;  %v2420_v57 = vadd.f32 %v8377_v51, %v1899_v41 }
 0x2ea   :  { %v1606_v18 = vpop.f32.mrf.mxu2 }
 0x2eb   :  { %v2143_v24 = vpop.f32.mrf.mxu3  ;;  %v1735_v42 = vrot.slane %v1606_v18, 7  ;;  %v2651_v28 = vpop.f32.mrf.mxu0 }
 0x2ec   :  { %v2263_v32 = vrot.slane %v2143_v24, 7  ;;  %v1086_v16 = vpop.f32.mrf.mxu1  ;;  %v8440_v39 = vadd.f32 %v2651_v28, %v2420_v57 }
 0x2ed   :  { %v1214_v29 = vrot.slane %v1086_v16, 6  ;;  %v1797_v54 = vsel %vm1766_vm1, %v1734_v12, %v1735_v42 }
 0x2ee   :  { %11081 = vst [vmem:[#allocation19_spill] sm:$0xff] %v8440_v39  ;;  %v1900_v44 = vadd.f32 %v1797_v54, %v1378_v62  ;;  %v8449_v51 = vsel %vm1766_vm1, %v2262_v25, %v2263_v32  ;;  %v11084_v25 = vld [vmem:[#allocation23_spill] sm:$0xff] }
 0x2ef   :  { %v1274_v40 = vsel %vm1244_vm2, %v1213_v2, %v1214_v29 }
 0x2f0   :  { %v1379_v48 = vadd.f32 %v1274_v40, %v11082_v11  ;;  %v2421_v41 = vadd.f32 %v8389_v19, %v1900_v44  ;;  %v8462_v40 = vld [vmem:[#allocation2 + $0x128] sm:$0xff] }
 0x2f2   :  { %v1608_v18 = vpop.f32.mrf.mxu2 }
 0x2f3   :  { %v2145_v24 = vpop.f32.mrf.mxu3  ;;  %v1736_v16 = vrot.slane %v1608_v18, 7  ;;  %v2654_v39 = vpop.f32.mrf.mxu0 }
 0x2f4   :  { %v2264_v57 = vrot.slane %v2145_v24, 7  ;;  %v1089_v28 = vpop.f32.mrf.mxu1  ;;  %v8452_v12 = vadd.f32 %v2654_v39, %v2421_v41  ;;  %v6551_v39 = vld [vmem:[%s10962_s1 + $0x140] sm:$0xff] }
 0x2f5   :  { %v1215_v23 = vrot.slane %v1089_v28, 6  ;;  %v1796_v2 = vsel %vm1766_vm1, %v1735_v42, %v1736_v16  ;;  %v6559_v42 = vld [vmem:[%s10962_s1 + $0x180] sm:$0xff]  ;;  %2881 = vmatpush.bf16.msra.mxu1 %v6551_v39 }
 0x2f6   :  { %11083 = vst [vmem:[#allocation21_spill] sm:$0xff] %v8452_v12  ;;  %1128 = vmatmul.bf16.gmra.mxu1 %v8372_v46  ;;  %2693 = vmatmul.bf16.gmra.mxu0 %v8372_v46  ;;  %v1901_v19 = vadd.f32 %v1796_v2, %v1379_v48  ;;  %v8476_v44 = vsel %vm1766_vm1, %v2263_v32, %v2264_v57 }
 0x2f7   :  { %v1273_v62 = vsel %vm1244_vm2, %v1214_v29, %v1215_v23  ;;  %1650 = vmatmul.bf16.gmra.mxu2 %v8372_v46  ;;  %v6567_v29 = vld [vmem:[%s10962_s1 + $0x1c0] sm:$0xff] }
 0x2f8   :  { %v1380_v54 = vadd.f32 %v1273_v62, %v11084_v25  ;;  %2187 = vmatmul.bf16.gmra.mxu3 %v8462_v40  ;;  %v2422_v46 = vadd.f32 %v8407_v49, %v1901_v19  ;;  %3403 = vmatpush.bf16.msra.mxu2 %v6559_v42  ;;  %v11086_v49 = vld [vmem:[#allocation25_spill] sm:$0xff]  ;;  %v6575_v42 = vld [vmem:[%s10962_s1 + $0x200] sm:$0xff] }
 0x2f9   :  { %3924 = vmatpush.bf16.msra.mxu3 %v6567_v29  ;;  %4446 = vmatpush.bf16.msra.mxu0 %v6575_v42 }
 0x2fa   :  { %v1611_v11 = vpop.f32.mrf.mxu2 }
 0x2fb   :  { %v2148_v48 = vpop.f32.mrf.mxu3  ;;  %v1737_v41 = vrot.slane %v1611_v11, 7  ;;  %v2656_v28 = vpop.f32.mrf.mxu0 }
 0x2fc   :  { %v2265_v18 = vrot.slane %v2148_v48, 7  ;;  %v1091_v24 = vpop.f32.mrf.mxu1  ;;  %v8479_v62 = vadd.f32 %v2656_v28, %v2422_v46 }
 0x2fd   :  { %v1216_v2 = vrot.slane %v1091_v24, 6  ;;  %v1795_v25 = vsel %vm1766_vm1, %v1736_v16, %v1737_v41 }
 0x2fe   :  { %11085 = vst [vmem:[#allocation23_spill] sm:$0xff] %v8479_v62  ;;  %v1902_v12 = vadd.f32 %v1795_v25, %v1380_v54  ;;  %v8491_v29 = vsel %vm1766_vm1, %v2264_v57, %v2265_v18  ;;  %v11088_v57 = vld [vmem:[#allocation27_spill] sm:$0xff] }
 0x2ff   :  { %v1272_v32 = vsel %vm1244_vm2, %v1215_v23, %v1216_v2 }
 0x300   :  { %v1381_v19 = vadd.f32 %v1272_v32, %v11086_v49  ;;  %v2423_v39 = vadd.f32 %v8419_v26, %v1902_v12  ;;  %v8504_v49 = vld [vmem:[#allocation2 + $0x130] sm:$0xff] }
 0x302   :  { %v1613_v46 = vpop.f32.mrf.mxu2 }
 0x303   :  { %v2150_v11 = vpop.f32.mrf.mxu3  ;;  %v1738_v16 = vrot.slane %v1613_v46, 7  ;;  %v2659_v23 = vpop.f32.mrf.mxu0 }
 0x304   :  { %v2266_v48 = vrot.slane %v2150_v11, 7  ;;  %v1094_v24 = vpop.f32.mrf.mxu1  ;;  %v8494_v28 = vadd.f32 %v2659_v23, %v2423_v39 }
 0x305   :  { %v1217_v54 = vrot.slane %v1094_v24, 6  ;;  %v1794_v25 = vsel %vm1766_vm1, %v1737_v41, %v1738_v16 }
 0x306   :  { %11087 = vst [vmem:[#allocation25_spill] sm:$0xff] %v8494_v28  ;;  %1133 = vmatmul.bf16.gmra.mxu1 %v8402_v22  ;;  %2698 = vmatmul.bf16.gmra.mxu0 %v8402_v22  ;;  %v1903_v26 = vadd.f32 %v1794_v25, %v1381_v19  ;;  %v8509_v42 = vsel %vm1766_vm1, %v2265_v18, %v2266_v48  ;;  %v11090_v18 = vld [vmem:[#allocation29_spill] sm:$0xff] }
 0x307   :  { %v1271_v32 = vsel %vm1244_vm2, %v1216_v2, %v1217_v54  ;;  %1655 = vmatmul.bf16.gmra.mxu2 %v8402_v22 }
 0x308   :  { %v1382_v12 = vadd.f32 %v1271_v32, %v11088_v57  ;;  %2192 = vmatmul.bf16.gmra.mxu3 %v8504_v49  ;;  %v2424_v41 = vadd.f32 %v8437_v9, %v1903_v26 }
 0x30a   :  { %v1616_v2 = vpop.f32.mrf.mxu2 }
 0x30b   :  { %v2153_v39 = vpop.f32.mrf.mxu3  ;;  %v1739_v46 = vrot.slane %v1616_v2, 7  ;;  %v2661_v19 = vpop.f32.mrf.mxu0 }
 0x30c   :  { %v2267_v11 = vrot.slane %v2153_v39, 7  ;;  %v1096_v24 = vpop.f32.mrf.mxu1  ;;  %v8512_v25 = vadd.f32 %v2661_v19, %v2424_v41 }
 0x30d   :  { %v1218_v23 = vrot.slane %v1096_v24, 6  ;;  %v1793_v22 = vsel %vm1766_vm1, %v1738_v16, %v1739_v46 }
 0x30e   :  { %11089 = vst [vmem:[#allocation27_spill] sm:$0xff] %v8512_v25  ;;  %v1904_v57 = vadd.f32 %v1793_v22, %v1382_v12  ;;  %v8521_v9 = vsel %vm1766_vm1, %v2266_v48, %v2267_v11  ;;  %v11092_v48 = vld [vmem:[#allocation31_spill] sm:$0xff] }
 0x30f   :  { %v1270_v32 = vsel %vm1244_vm2, %v1217_v54, %v1218_v23 }
 0x310   :  { %v1383_v28 = vadd.f32 %v1270_v32, %v11090_v18  ;;  %v2425_v26 = vadd.f32 %v8449_v51, %v1904_v57  ;;  %v8534_v32 = vld [vmem:[#allocation2 + $0x138] sm:$0xff] }
 0x312   :  { %v1618_v2 = vpop.f32.mrf.mxu2 }
 0x313   :  { %v2155_v39 = vpop.f32.mrf.mxu3  ;;  %v1740_v24 = vrot.slane %v1618_v2, 7  ;;  %v2664_v25 = vpop.f32.mrf.mxu0 }
 0x314   :  { %v2268_v41 = vrot.slane %v2155_v39, 7  ;;  %v1099_v19 = vpop.f32.mrf.mxu1  ;;  %v8524_v16 = vadd.f32 %v2664_v25, %v2425_v26 }
 0x315   :  { %v1219_v62 = vrot.slane %v1099_v19, 6  ;;  %v1792_v54 = vsel %vm1766_vm1, %v1739_v46, %v1740_v24 }
 0x316   :  { %11091 = vst [vmem:[#allocation29_spill] sm:$0xff] %v8524_v16  ;;  %1138 = vmatmul.bf16.gmra.mxu1 %v8432_v6  ;;  %2703 = vmatmul.bf16.gmra.mxu0 %v8432_v6  ;;  %v1905_v51 = vadd.f32 %v1792_v54, %v1383_v28  ;;  %v8539_v25 = vsel %vm1766_vm1, %v2267_v11, %v2268_v41  ;;  %v11094_v11 = vld [vmem:[#allocation33_spill] sm:$0xff] }
 0x317   :  { %v1269_v12 = vsel %vm1244_vm2, %v1218_v23, %v1219_v62  ;;  %1660 = vmatmul.bf16.gmra.mxu2 %v8432_v6 }
 0x318   :  { %v1384_v22 = vadd.f32 %v1269_v12, %v11092_v48  ;;  %2197 = vmatmul.bf16.gmra.mxu3 %v8534_v32  ;;  %v2426_v46 = vadd.f32 %v8476_v44, %v1905_v51 }
 0x31a   :  { %v1621_v23 = vpop.f32.mrf.mxu2 }
 0x31b   :  { %v2158_v57 = vpop.f32.mrf.mxu3  ;;  %v1741_v18 = vrot.slane %v1621_v23, 7  ;;  %v2666_v28 = vpop.f32.mrf.mxu0 }
 0x31c   :  { %v2269_v26 = vrot.slane %v2158_v57, 7  ;;  %v1101_v2 = vpop.f32.mrf.mxu1  ;;  %v8542_v19 = vadd.f32 %v2666_v28, %v2426_v46 }
 0x31d   :  { %v1220_v39 = vrot.slane %v1101_v2, 6  ;;  %v1791_v6 = vsel %vm1766_vm1, %v1740_v24, %v1741_v18 }
 0x31e   :  { %11093 = vst [vmem:[#allocation31_spill] sm:$0xff] %v8542_v19  ;;  %v1906_v12 = vadd.f32 %v1791_v6, %v1384_v22  ;;  %v8551_v44 = vsel %vm1766_vm1, %v2268_v41, %v2269_v26  ;;  %v11096_v41 = vld [vmem:[#allocation35_spill] sm:$0xff] }
 0x31f   :  { %v1268_v54 = vsel %vm1244_vm2, %v1219_v62, %v1220_v39 }
 0x320   :  { %v1385_v48 = vadd.f32 %v1268_v54, %v11094_v11  ;;  %v2427_v51 = vadd.f32 %v8491_v29, %v1906_v12  ;;  %v11097_v54 = vld [vmem:[#allocation8_spill] sm:$0xff] }
 0x322   :  { %v1623_v23 = vpop.f32.mrf.mxu2 }
 0x323   :  { %v2160_v57 = vpop.f32.mrf.mxu3  ;;  %v1742_v2 = vrot.slane %v1623_v23, 7  ;;  %v2669_v19 = vpop.f32.mrf.mxu0 }
 0x324   :  { %v2270_v46 = vrot.slane %v2160_v57, 7  ;;  %v1104_v28 = vpop.f32.mrf.mxu1  ;;  %v8554_v24 = vadd.f32 %v2669_v19, %v2427_v51 }
 0x325   :  { %v1221_v16 = vrot.slane %v1104_v28, 6  ;;  %v1790_v62 = vsel %vm1766_vm1, %v1741_v18, %v1742_v2 }
 0x326   :  { %11095 = vst [vmem:[#allocation33_spill] sm:$0xff] %v8554_v24  ;;  %1143 = vmatmul.bf16.gmra.mxu1 %v8462_v40  ;;  %2708 = vmatmul.bf16.gmra.mxu0 %v8462_v40  ;;  %v1907_v29 = vadd.f32 %v1790_v62, %v1385_v48  ;;  %v8567_v19 = vsel %vm1766_vm1, %v2269_v26, %v2270_v46  ;;  %v11099_v26 = vld [vmem:[#allocation38_spill] sm:$0xff] }
 0x327   :  { %v1267_v22 = vsel %vm1244_vm2, %v1220_v39, %v1221_v16  ;;  %1665 = vmatmul.bf16.gmra.mxu2 %v8462_v40 }
 0x328   :  { %v1386_v6 = vadd.f32 %v1267_v22, %v11096_v41  ;;  %2202 = vmatmul.bf16.gmra.mxu3 %v11097_v54  ;;  %v2428_v18 = vadd.f32 %v8509_v42, %v1907_v29 }
 0x32a   :  { %v1626_v12 = vpop.f32.mrf.mxu2 }
 0x32b   :  { %v2163_v11 = vpop.f32.mrf.mxu3  ;;  %v1743_v39 = vrot.slane %v1626_v12, 7  ;;  %v2671_v57 = vpop.f32.mrf.mxu0 }
 0x32c   :  { %v2271_v51 = vrot.slane %v2163_v11, 7  ;;  %v1106_v23 = vpop.f32.mrf.mxu1  ;;  %v8570_v48 = vadd.f32 %v2671_v57, %v2428_v18 }
 0x32d   :  { %v1222_v28 = vrot.slane %v1106_v23, 6  ;;  %v1789_v40 = vsel %vm1766_vm1, %v1742_v2, %v1743_v39 }
 0x32e   :  { %11098 = vst [vmem:[#allocation35_spill] sm:$0xff] %v8570_v48  ;;  %v1908_v22 = vadd.f32 %v1789_v40, %v1386_v6  ;;  %v8579_v42 = vsel %vm1766_vm1, %v2270_v46, %v2271_v51  ;;  %v11101_v46 = vld [vmem:[#allocation40_spill] sm:$0xff] }
 0x32f   :  { %v1266_v62 = vsel %vm1244_vm2, %v1221_v16, %v1222_v28 }
 0x330   :  { %v1387_v41 = vadd.f32 %v1266_v62, %v11099_v26  ;;  %v2429_v29 = vadd.f32 %v8521_v9, %v1908_v22  ;;  %v8592_v62 = vld [vmem:[#allocation2] sm:$0xff] }
 0x332   :  { %v1628_v12 = vpop.f32.mrf.mxu2 }
 0x333   :  { %v2165_v11 = vpop.f32.mrf.mxu3  ;;  %v1744_v23 = vrot.slane %v1628_v12, 7  ;;  %v2674_v48 = vpop.f32.mrf.mxu0 }
 0x334   :  { %v2272_v18 = vrot.slane %v2165_v11, 7  ;;  %v1109_v57 = vpop.f32.mrf.mxu1  ;;  %v8582_v2 = vadd.f32 %v2674_v48, %v2429_v29 }
 0x335   :  { %v1223_v24 = vrot.slane %v1109_v57, 6  ;;  %v1788_v16 = vsel %vm1766_vm1, %v1743_v39, %v1744_v23 }
 0x336   :  { %11100 = vst [vmem:[#allocation38_spill] sm:$0xff] %v8582_v2  ;;  %1148 = vmatmul.bf16.gmra.mxu1 %v8504_v49  ;;  %2713 = vmatmul.bf16.gmra.mxu0 %v8504_v49  ;;  %v1909_v9 = vadd.f32 %v1788_v16, %v1387_v41  ;;  %v8597_v48 = vsel %vm1766_vm1, %v2271_v51, %v2272_v18  ;;  %v11103_v51 = vld [vmem:[#allocation41_spill] sm:$0xff] }
 0x337   :  { %v1265_v6 = vsel %vm1244_vm2, %v1222_v28, %v1223_v24  ;;  %1670 = vmatmul.bf16.gmra.mxu2 %v8504_v49 }
 0x338   :  { %v1388_v40 = vadd.f32 %v1265_v6, %v11101_v46  ;;  %3925 = vmatmul.bf16.vlgmr.msra.gmra.mxu3 %v8592_v62  ;;  %v2430_v39 = vadd.f32 %v8539_v25, %v1909_v9 }
 0x33a   :  { %v1631_v28 = vpop.f32.mrf.mxu2 }
 0x33b   :  { %v2168_v22 = vpop.f32.mrf.mxu3  ;;  %v1745_v26 = vrot.slane %v1631_v28, 7  ;;  %v2676_v41 = vpop.f32.mrf.mxu0 }
 0x33c   :  { %v2273_v29 = vrot.slane %v2168_v22, 7  ;;  %v1111_v12 = vpop.f32.mrf.mxu1  ;;  %v8600_v57 = vadd.f32 %v2676_v41, %v2430_v39 }
 0x33d   :  { %v1224_v11 = vrot.slane %v1111_v12, 6  ;;  %v1787_v49 = vsel %vm1766_vm1, %v1744_v23, %v1745_v26 }
 0x33e   :  { %11102 = vst [vmem:[#allocation40_spill] sm:$0xff] %v8600_v57  ;;  %v1910_v6 = vadd.f32 %v1787_v49, %v1388_v40  ;;  %v8609_v25 = vsel %vm1766_vm1, %v2272_v18, %v2273_v29  ;;  %v11105_v18 = vld [vmem:[#allocation44_spill] sm:$0xff] }
 0x33f   :  { %v1264_v16 = vsel %vm1244_vm2, %v1223_v24, %v1224_v11 }
 0x340   :  { %v1389_v46 = vadd.f32 %v1264_v16, %v11103_v51  ;;  %v2431_v9 = vadd.f32 %v8551_v44, %v1910_v6  ;;  %v8622_v16 = vld [vmem:[#allocation2 + $0x8] sm:$0xff] }
 0x342   :  { %v1633_v28 = vpop.f32.mrf.mxu2 }
 0x343   :  { %v2170_v22 = vpop.f32.mrf.mxu3  ;;  %v1746_v12 = vrot.slane %v1633_v28, 7  ;;  %v2679_v57 = vpop.f32.mrf.mxu0 }
 0x344   :  { %v2274_v39 = vrot.slane %v2170_v22, 7  ;;  %v1114_v41 = vpop.f32.mrf.mxu1  ;;  %v8612_v23 = vadd.f32 %v2679_v57, %v2431_v9 }
 0x345   :  { %v1225_v2 = vrot.slane %v1114_v41, 6  ;;  %v1786_v24 = vsel %vm1766_vm1, %v1745_v26, %v1746_v12 }
 0x346   :  { %11104 = vst [vmem:[#allocation41_spill] sm:$0xff] %v8612_v23  ;;  %1153 = vmatmul.bf16.gmra.mxu1 %v8534_v32  ;;  %2718 = vmatmul.bf16.gmra.mxu0 %v8534_v32  ;;  %v1911_v44 = vadd.f32 %v1786_v24, %v1389_v46  ;;  %v8627_v57 = vsel %vm1766_vm1, %v2273_v29, %v2274_v39  ;;  %v11107_v29 = vld [vmem:[#allocation47_spill] sm:$0xff] }
 0x347   :  { %v1263_v40 = vsel %vm1244_vm2, %v1224_v11, %v1225_v2  ;;  %1675 = vmatmul.bf16.gmra.mxu2 %v8534_v32 }
 0x348   :  { %v1390_v49 = vadd.f32 %v1263_v40, %v11105_v18  ;;  %3930 = vmatmul.bf16.gmra.mxu3 %v8622_v16  ;;  %v2432_v26 = vadd.f32 %v8567_v19, %v1911_v44 }
 0x34a   :  { %v1636_v11 = vpop.f32.mrf.mxu2 }
 0x34b   :  { %v2173_v6 = vpop.f32.mrf.mxu3  ;;  %v1747_v51 = vrot.slane %v1636_v11, 7  ;;  %v2681_v46 = vpop.f32.mrf.mxu0 }
 0x34c   :  { %v2275_v9 = vrot.slane %v2173_v6, 7  ;;  %v1116_v28 = vpop.f32.mrf.mxu1  ;;  %v8630_v41 = vadd.f32 %v2681_v46, %v2432_v26 }
 0x34d   :  { %v1226_v22 = vrot.slane %v1116_v28, 6  ;;  %v1785_v32 = vsel %vm1766_vm1, %v1746_v12, %v1747_v51 }
 0x34e   :  { %11106 = vst [vmem:[#allocation44_spill] sm:$0xff] %v8630_v41  ;;  %v1912_v40 = vadd.f32 %v1785_v32, %v1390_v49  ;;  %v8639_v19 = vsel %vm1766_vm1, %v2274_v39, %v2275_v9  ;;  %v11109_v39 = vld [vmem:[#allocation49_spill] sm:$0xff] }
 0x34f   :  { %v1262_v24 = vsel %vm1244_vm2, %v1225_v2, %v1226_v22 }
 0x350   :  { %v1391_v18 = vadd.f32 %v1262_v24, %v11107_v29  ;;  %v2433_v44 = vadd.f32 %v8579_v42, %v1912_v40  ;;  %v8652_v24 = vld [vmem:[#allocation2 + $0x10] sm:$0xff] }
 0x352   :  { %v1638_v11 = vpop.f32.mrf.mxu2 }
 0x353   :  { %v2175_v6 = vpop.f32.mrf.mxu3  ;;  %v1748_v28 = vrot.slane %v1638_v11, 7  ;;  %v2684_v41 = vpop.f32.mrf.mxu0 }
 0x354   :  { %v2276_v26 = vrot.slane %v2175_v6, 7  ;;  %v1119_v46 = vpop.f32.mrf.mxu1  ;;  %v8642_v12 = vadd.f32 %v2684_v41, %v2433_v44 }
 0x355   :  { %v1227_v23 = vrot.slane %v1119_v46, 6  ;;  %v1784_v2 = vsel %vm1766_vm1, %v1747_v51, %v1748_v28 }
 0x356   :  { %11108 = vst [vmem:[#allocation47_spill] sm:$0xff] %v8642_v12  ;;  %1158 = vmatmul.bf16.gmra.mxu1 %v11097_v54  ;;  %2723 = vmatmul.bf16.gmra.mxu0 %v11097_v54  ;;  %v1913_v42 = vadd.f32 %v1784_v2, %v1391_v18  ;;  %v8657_v41 = vsel %vm1766_vm1, %v2275_v9, %v2276_v26  ;;  %v11111_v9 = vld [vmem:[#allocation55_spill] sm:$0xff] }
 0x357   :  { %v1261_v49 = vsel %vm1244_vm2, %v1226_v22, %v1227_v23  ;;  %1680 = vmatmul.bf16.gmra.mxu2 %v11097_v54 }
 0x358   :  { %v1392_v32 = vadd.f32 %v1261_v49, %v11109_v39  ;;  %3935 = vmatmul.bf16.gmra.mxu3 %v8652_v24  ;;  %v2434_v51 = vadd.f32 %v8597_v48, %v1913_v42 }
 0x35a   :  { %v1641_v22 = vpop.f32.mrf.mxu2 }
 0x35b   :  { %v2178_v40 = vpop.f32.mrf.mxu3  ;;  %v1749_v29 = vrot.slane %v1641_v22, 7  ;;  %v2686_v18 = vpop.f32.mrf.mxu0 }
 0x35c   :  { %v2277_v44 = vrot.slane %v2178_v40, 7  ;;  %v1121_v11 = vpop.f32.mrf.mxu1  ;;  %v8660_v46 = vadd.f32 %v2686_v18, %v2434_v51 }
 0x35d   :  { %v1228_v6 = vrot.slane %v1121_v11, 6  ;;  %v1783_v2 = vsel %vm1766_vm1, %v1748_v28, %v1749_v29 }
 0x35e   :  { %11110 = vst [vmem:[#allocation49_spill] sm:$0xff] %v8660_v46  ;;  %v1914_v39 = vadd.f32 %v1783_v2, %v1392_v32  ;;  %v8669_v48 = vsel %vm1766_vm1, %v2276_v26, %v2277_v44  ;;  %v11113_v26 = vld [vmem:[#allocation54_spill] sm:$0xff] }
 0x35f   :  { %v1260_v49 = vsel %vm1244_vm2, %v1227_v23, %v1228_v6 }
 0x360   :  { %v1393_v12 = vadd.f32 %v1260_v49, %v11111_v9  ;;  %v2435_v42 = vadd.f32 %v8609_v25, %v1914_v39  ;;  %v8682_v49 = vld [vmem:[#allocation2 + $0x18] sm:$0xff] }
 0x362   :  { %v1643_v22 = vpop.f32.mrf.mxu2 }
 0x363   :  { %v2180_v40 = vpop.f32.mrf.mxu3  ;;  %v1750_v11 = vrot.slane %v1643_v22, 7  ;;  %v2689_v46 = vpop.f32.mrf.mxu0 }
 0x364   :  { %v2278_v51 = vrot.slane %v2180_v40, 7  ;;  %v1124_v18 = vpop.f32.mrf.mxu1  ;;  %v8672_v28 = vadd.f32 %v2689_v46, %v2435_v42 }
 0x365   :  { %v1229_v54 = vrot.slane %v1124_v18, 6  ;;  %v1782_v23 = vsel %vm1766_vm1, %v1749_v29, %v1750_v11 }
 0x366   :  { %11112 = vst [vmem:[#allocation55_spill] sm:$0xff] %v8672_v28  ;;  %2882 = vmatmul.bf16.vlgmr.msra.gmra.mxu1 %v8592_v62  ;;  %4447 = vmatmul.bf16.vlgmr.msra.gmra.mxu0 %v8592_v62  ;;  %v1915_v25 = vadd.f32 %v1782_v23, %v1393_v12  ;;  %v8687_v46 = vsel %vm1766_vm1, %v2277_v44, %v2278_v51  ;;  %v11115_v44 = vld [vmem:[#allocation10_spill] sm:$0xff] }
 0x367   :  { %v1259_v32 = vsel %vm1244_vm2, %v1228_v6, %v1229_v54  ;;  %3404 = vmatmul.bf16.vlgmr.msra.gmra.mxu2 %v8592_v62 }
 0x368   :  { %v1394_v2 = vadd.f32 %v1259_v32, %v11113_v26  ;;  %3940 = vmatmul.bf16.gmra.mxu3 %v8682_v49  ;;  %v2436_v29 = vadd.f32 %v8627_v57, %v1915_v25 }
 0x36a   :  { %v1646_v6 = vpop.f32.mrf.mxu2 }
 0x36b   :  { %v2183_v39 = vpop.f32.mrf.mxu3  ;;  %v1751_v9 = vrot.slane %v1646_v6, 7  ;;  %v2691_v12 = vpop.f32.mrf.mxu0 }
 0x36c   :  { %v2279_v42 = vrot.slane %v2183_v39, 7  ;;  %v1126_v22 = vpop.f32.mrf.mxu1  ;;  %v8690_v18 = vadd.f32 %v2691_v12, %v2436_v29 }
 0x36d   :  { %v1230_v40 = vrot.slane %v1126_v22, 6  ;;  %v1781_v62 = vsel %vm1766_vm1, %v1750_v11, %v1751_v9 }
 0x36e   :  { %11114 = vst [vmem:[#allocation54_spill] sm:$0xff] %v8690_v18  ;;  %v1916_v32 = vadd.f32 %v1781_v62, %v1394_v2  ;;  %v8699_v57 = vsel %vm1766_vm1, %v2278_v51, %v2279_v42  ;;  %v11117_v51 = vld [vmem:[#allocation12_spill] sm:$0xff] }
 0x36f   :  { %v1258_v23 = vsel %vm1244_vm2, %v1229_v54, %v1230_v40 }
 0x370   :  { %v1395_v26 = vadd.f32 %v1258_v23, %v11115_v44  ;;  %v2437_v25 = vadd.f32 %v8639_v19, %v1916_v32  ;;  %v8712_v23 = vld [vmem:[#allocation2 + $0x20] sm:$0xff] }
 0x372   :  { %v1648_v6 = vpop.f32.mrf.mxu2 }
 0x373   :  { %v2185_v39 = vpop.f32.mrf.mxu3  ;;  %v1752_v22 = vrot.slane %v1648_v6, 7  ;;  %v2694_v18 = vpop.f32.mrf.mxu0 }
 0x374   :  { %v2280_v29 = vrot.slane %v2185_v39, 7  ;;  %v1129_v12 = vpop.f32.mrf.mxu1  ;;  %v8702_v11 = vadd.f32 %v2694_v18, %v2437_v25 }
 0x375   :  { %v1231_v28 = vrot.slane %v1129_v12, 6  ;;  %v1780_v54 = vsel %vm1766_vm1, %v1751_v9, %v1752_v22 }
 0x376   :  { %11116 = vst [vmem:[#allocation10_spill] sm:$0xff] %v8702_v11  ;;  %2887 = vmatmul.bf16.gmra.mxu1 %v8622_v16  ;;  %4452 = vmatmul.bf16.gmra.mxu0 %v8622_v16  ;;  %v1917_v19 = vadd.f32 %v1780_v54, %v1395_v26  ;;  %v8717_v18 = vsel %vm1766_vm1, %v2279_v42, %v2280_v29  ;;  %v6986_v42 = vmov 0  }
 0x377   :  { %v1257_v2 = vsel %vm1244_vm2, %v1230_v40, %v1231_v28  ;;  %3409 = vmatmul.bf16.gmra.mxu2 %v8622_v16  ;;  %6851 = vset.pattern.permute.xlu0 %v6986_v42 }
 0x378   :  { %v1396_v62 = vadd.f32 %v1257_v2, %v11117_v51  ;;  %3945 = vmatmul.bf16.gmra.mxu3 %v8712_v23  ;;  %v2438_v9 = vadd.f32 %v8657_v41, %v1917_v19  ;;  %v5147_v41 = vld [vmem:[%s10965_s4] sm:$0xff]  ;;  %6852 = vset.pattern.permute.xlu1 %v6986_v42  ;;  %v11119_v19 = vld [vmem:[#allocation14_spill] sm:$0xff] }
 0x379   :  { %5230 = vperm.xlu0 %6851, %v5147_v41   ;;  %6853 = vset.pattern.permute.xlu2 %v6986_v42 }
 0x37a   :  { %v1651_v40 = vpop.f32.mrf.mxu2 }
 0x37b   :  { %v2188_v32 = vpop.f32.mrf.mxu3  ;;  %v1753_v44 = vrot.slane %v1651_v40, 7  ;;  %v2696_v26 = vpop.f32.mrf.mxu0 }
 0x37c   :  { %v2281_v25 = vrot.slane %v2188_v32, 7  ;;  %v1131_v6 = vpop.f32.mrf.mxu1  ;;  %v8720_v12 = vadd.f32 %v2696_v26, %v2438_v9 }
 0x37d   :  { %v1232_v39 = vrot.slane %v1131_v6, 6  ;;  %v1779_v16 = vsel %vm1766_vm1, %v1752_v22, %v1753_v44 }
 0x37e   :  { %11118 = vst [vmem:[#allocation12_spill] sm:$0xff] %v8720_v12  ;;  %v1918_v2 = vadd.f32 %v1779_v16, %v1396_v62  ;;  %v8732_v9 = vsel %vm1766_vm1, %v2280_v29, %v2281_v25  ;;  %v5148_v29 = vld [vmem:[%s10965_s4 + $0x8] sm:$0xff] }
 0x37f   :  { %v1256_v54 = vsel %vm1244_vm2, %v1231_v28, %v1232_v39 }
 0x380   :  { %v1397_v51 = vadd.f32 %v1256_v54, %v11119_v19  ;;  %v2439_v22 = vadd.f32 %v8669_v48, %v1918_v2  ;;  %v11121_v2 = vld [vmem:[#allocation16_spill] sm:$0xff] }
 0x381   :  { %v8748_v19 = vld [vmem:[#allocation2 + $0x28] sm:$0xff]  ;;  %5235 = vperm.xlu0 %6851, %v5148_v29  }
 0x382   :  { %v1653_v40 = vpop.f32.mrf.mxu2 }
 0x383   :  { %v2190_v28 = vpop.f32.mrf.mxu3  ;;  %v1754_v62 = vrot.slane %v1653_v40, 7  ;;  %v2699_v26 = vpop.f32.mrf.mxu0 }
 0x384   :  { %v2282_v32 = vrot.slane %v2190_v28, 7  ;;  %v1134_v6 = vpop.f32.mrf.mxu1  ;;  %v8735_v12 = vadd.f32 %v2699_v26, %v2439_v22 }
 0x385   :  { %v1233_v16 = vrot.slane %v1134_v6, 6  ;;  %v1778_v54 = vsel %vm1766_vm1, %v1753_v44, %v1754_v62 }
 0x386   :  { %11120 = vst [vmem:[#allocation14_spill] sm:$0xff] %v8735_v12  ;;  %2892 = vmatmul.bf16.gmra.mxu1 %v8652_v24  ;;  %4457 = vmatmul.bf16.gmra.mxu0 %v8652_v24  ;;  %v1919_v48 = vadd.f32 %v1778_v54, %v1397_v51  ;;  %v8753_v44 = vsel %vm1766_vm1, %v2281_v25, %v2282_v32 }
 0x387   :  { %v1255_v41 = vsel %vm1244_vm2, %v1232_v39, %v1233_v16  ;;  %3414 = vmatmul.bf16.gmra.mxu2 %v8652_v24 }
 0x388   :  { %v1398_v42 = vadd.f32 %v1255_v41, %v11121_v2  ;;  %3950 = vmatmul.bf16.gmra.mxu3 %v8748_v19  ;;  %v2440_v39 = vadd.f32 %v8687_v46, %v1919_v48  ;;  %v5149_v46 = vld [vmem:[%s10965_s4 + $0x10] sm:$0xff]  ;;  %v11123_v48 = vld [vmem:[#allocation18_spill] sm:$0xff] }
 0x389   :  { %5240 = vperm.xlu1 %6852, %v5149_v46  }
 0x38a   :  { %v1656_v51 = vpop.f32.mrf.mxu2 }
 0x38b   :  { %v2193_v22 = vpop.f32.mrf.mxu3  ;;  %v1755_v40 = vrot.slane %v1656_v51, 7  ;;  %v2701_v26 = vpop.f32.mrf.mxu0 }
 0x38c   :  { %v2283_v28 = vrot.slane %v2193_v22, 7  ;;  %v1136_v6 = vpop.f32.mrf.mxu1  ;;  %v8756_v41 = vadd.f32 %v2701_v26, %v2440_v39 }
 0x38d   :  { %v1234_v54 = vrot.slane %v1136_v6, 6  ;;  %v1777_v24 = vsel %vm1766_vm1, %v1754_v62, %v1755_v40 }
 0x38e   :  { %11122 = vst [vmem:[#allocation16_spill] sm:$0xff] %v8756_v41  ;;  %v1920_v25 = vadd.f32 %v1777_v24, %v1398_v42  ;;  %v8768_v51 = vsel %vm1766_vm1, %v2282_v32, %v2283_v28  ;;  %v5150_v32 = vld [vmem:[%s10965_s4 + $0x18] sm:$0xff] }
 0x38f   :  { %v1254_v2 = vsel %vm1244_vm2, %v1233_v16, %v1234_v54 }
 0x390   :  { %v1399_v29 = vadd.f32 %v1254_v2, %v11123_v48  ;;  %v2441_v39 = vadd.f32 %v8699_v57, %v1920_v25  ;;  %v11125_v25 = vld [vmem:[#allocation20_spill] sm:$0xff] }
 0x391   :  { %5245 = vperm.xlu1 %6852, %v5150_v32  }
 0x392   :  { %v1658_v22 = vpop.f32.mrf.mxu2 }
 0x393   :  { %v2195_v6 = vpop.f32.mrf.mxu3  ;;  %v1756_v62 = vrot.slane %v1658_v22, 7  ;;  %v2704_v16 = vpop.f32.mrf.mxu0 }
 0x394   :  { %v2284_v26 = vrot.slane %v2195_v6, 7  ;;  %v1139_v41 = vpop.f32.mrf.mxu1  ;;  %v8771_v24 = vadd.f32 %v2704_v16, %v2441_v39 }
 0x395   :  { %v1235_v42 = vrot.slane %v1139_v41, 6  ;;  %v1776_v12 = vsel %vm1766_vm1, %v1755_v40, %v1756_v62  ;;  %v8784_v41 = vld [vmem:[#allocation2 + $0x30] sm:$0xff] }
 0x396   :  { %11124 = vst [vmem:[#allocation18_spill] sm:$0xff] %v8771_v24  ;;  %2897 = vmatmul.bf16.gmra.mxu1 %v8682_v49  ;;  %4462 = vmatmul.bf16.gmra.mxu0 %v8682_v49  ;;  %v1921_v57 = vadd.f32 %v1776_v12, %v1399_v29  ;;  %v8789_v40 = vsel %vm1766_vm1, %v2283_v28, %v2284_v26  ;;  %v11127_v24 = vld [vmem:[#allocation22_spill] sm:$0xff] }
 0x397   :  { %v1253_v2 = vsel %vm1244_vm2, %v1234_v54, %v1235_v42  ;;  %3419 = vmatmul.bf16.gmra.mxu2 %v8682_v49 }
 0x398   :  { %v1400_v46 = vadd.f32 %v1253_v2, %v11125_v25  ;;  %3955 = vmatmul.bf16.gmra.mxu3 %v8784_v41  ;;  %v2442_v54 = vadd.f32 %v8717_v18, %v1921_v57 }
 0x39a   :  { %v1661_v12 = vpop.f32.mrf.mxu2 }
 0x39b   :  { %v2198_v48 = vpop.f32.mrf.mxu3  ;;  %v1757_v29 = vrot.slane %v1661_v12, 7  ;;  %v2706_v6 = vpop.f32.mrf.mxu0 }
 0x39c   :  { %v2285_v39 = vrot.slane %v2198_v48, 7  ;;  %v1141_v22 = vpop.f32.mrf.mxu1  ;;  %v8792_v2 = vadd.f32 %v2706_v6, %v2442_v54 }
 0x39d   :  { %v1236_v16 = vrot.slane %v1141_v22, 6  ;;  %v1775_v49 = vsel %vm1766_vm1, %v1756_v62, %v1757_v29 }
 0x39e   :  { %11126 = vst [vmem:[#allocation20_spill] sm:$0xff] %v8792_v2  ;;  %v1922_v28 = vadd.f32 %v1775_v49, %v1400_v46  ;;  %v8801_v18 = vsel %vm1766_vm1, %v2284_v26, %v2285_v39  ;;  %v11129_v26 = vld [vmem:[#allocation24_spill] sm:$0xff]  ;;  %v8814_v49 = vld [vmem:[#allocation2 + $0x38] sm:$0xff] }
 0x39f   :  { %v1252_v25 = vsel %vm1244_vm2, %v1235_v42, %v1236_v16 }
 0x3a0   :  { %v1401_v11 = vadd.f32 %v1252_v25, %v11127_v24  ;;  %v2443_v57 = vadd.f32 %v8732_v9, %v1922_v28 }
 0x3a2   :  { %v1663_v32 = vpop.f32.mrf.mxu2 }
 0x3a3   :  { %v2200_v12 = vpop.f32.mrf.mxu3  ;;  %v1758_v48 = vrot.slane %v1663_v32, 7  ;;  %v2709_v6 = vpop.f32.mrf.mxu0 }
 0x3a4   :  { %v2286_v54 = vrot.slane %v2200_v12, 7  ;;  %v1144_v22 = vpop.f32.mrf.mxu1  ;;  %v8804_v62 = vadd.f32 %v2709_v6, %v2443_v57 }
 0x3a5   :  { %v1237_v2 = vrot.slane %v1144_v22, 6  ;;  %v1774_v42 = vsel %vm1766_vm1, %v1757_v29, %v1758_v48 }
 0x3a6   :  { %11128 = vst [vmem:[#allocation22_spill] sm:$0xff] %v8804_v62  ;;  %2902 = vmatmul.bf16.gmra.mxu1 %v8712_v23  ;;  %4467 = vmatmul.bf16.gmra.mxu0 %v8712_v23  ;;  %v1923_v9 = vadd.f32 %v1774_v42, %v1401_v11  ;;  %v8819_v25 = vsel %vm1766_vm1, %v2285_v39, %v2286_v54  ;;  %v11131_v42 = vld [vmem:[#allocation39_spill] sm:$0xff] }
 0x3a7   :  { %v1251_v24 = vsel %vm1244_vm2, %v1236_v16, %v1237_v2  ;;  %3424 = vmatmul.bf16.gmra.mxu2 %v8712_v23 }
 0x3a8   :  { %v1402_v46 = vadd.f32 %v1251_v24, %v11129_v26  ;;  %3960 = vmatmul.bf16.gmra.mxu3 %v8814_v49  ;;  %v2444_v29 = vadd.f32 %v8753_v44, %v1923_v9  ;;  %v11132_v24 = vrot.slane %v11131_v42, 7  ;;  %v5153_v26 = vld [vmem:[%s10965_s4 + $0x30] sm:$0xff] }
 0x3a9   :  { %5260 = vperm.xlu0 %6851, %v5153_v26  }
 0x3aa   :  { %v1666_v16 = vpop.f32.mrf.mxu2 }
 0x3ab   :  { %v2203_v28 = vpop.f32.mrf.mxu3  ;;  %v1759_v57 = vrot.slane %v1666_v16, 7  ;;  %v2711_v11 = vpop.f32.mrf.mxu0  ;;  %v11133_v16 = vld [vmem:[#allocation26_spill] sm:$0xff] }
 0x3ac   :  { %v2287_v32 = vrot.slane %v2203_v28, 7  ;;  %v1146_v12 = vpop.f32.mrf.mxu1  ;;  %v8822_v6 = vadd.f32 %v2711_v11, %v2444_v29 }
 0x3ad   :  { %v1238_v22 = vrot.slane %v1146_v12, 6  ;;  %v1773_v23 = vsel %vm1766_vm1, %v1758_v48, %v1759_v57 }
 0x3ae   :  { %11130 = vst [vmem:[#allocation24_spill] sm:$0xff] %v8822_v6  ;;  %v8830_v39 = vsel %vm1766_vm1, %v2287_v32, %v11132_v24  ;;  %v1924_v9 = vadd.f32 %v1773_v23, %v1402_v46  ;;  %v8840_v48 = vsel %vm1766_vm1, %v2286_v54, %v2287_v32  ;;  %v5154_v32 = vld [vmem:[%s10965_s4 + $0x38] sm:$0xff] }
 0x3af   :  { %v1250_v44 = vsel %vm1244_vm2, %v1237_v2, %v1238_v22  ;;  %5265 = vperm.xlu1 %6852, %v5154_v32  }
 0x3b0   :  { %v1403_v29 = vadd.f32 %v1250_v44, %v11133_v16  ;;  %v2445_v28 = vadd.f32 %v8768_v51, %v1924_v9  ;;  %v5151_v51 = vld [vmem:[%s10965_s4 + $0x20] sm:$0xff] }
 0x3b1   :  { %5250 = vperm.xlu2 %6853, %v5151_v51  }
 0x3b2   :  { %v1668_v12 = vpop.f32.mrf.mxu2 }
 0x3b3   :  { %v2205_v11 = vpop.f32.mrf.mxu3  ;;  %v1760_v42 = vrot.slane %v1668_v12, 7  ;;  %v2714_v6 = vpop.f32.mrf.mxu0 }
 0x3b4   :  { %v1149_v24 = vpop.f32.mrf.mxu1  ;;  %v8843_v46 = vadd.f32 %v2714_v6, %v2445_v28  ;;  %v11135_v6 = vld [vmem:[#allocation28_spill] sm:$0xff] }
 0x3b5   :  { %v1239_v2 = vrot.slane %v1149_v24, 6  ;;  %v1772_v23 = vsel %vm1766_vm1, %v1759_v57, %v1760_v42  ;;  %v8859_v57 = vld [vmem:[#allocation2 + $0x40] sm:$0xff] }
 0x3b6   :  { %11134 = vst [vmem:[#allocation39_spill] sm:$0xff] %v8843_v46  ;;  %2907 = vmatmul.bf16.gmra.mxu1 %v8748_v19  ;;  %4472 = vmatmul.bf16.gmra.mxu0 %v8748_v19  ;;  %v1925_v54 = vadd.f32 %v1772_v23, %v1403_v29 }
 0x3b7   :  { %v1249_v44 = vsel %vm1244_vm2, %v1238_v22, %v1239_v2  ;;  %3429 = vmatmul.bf16.gmra.mxu2 %v8748_v19 }
 0x3b8   :  { %v1404_v9 = vadd.f32 %v1249_v44, %v11135_v6  ;;  %3965 = vmatmul.bf16.gmra.mxu3 %v8859_v57  ;;  %v2446_v22 = vadd.f32 %v8789_v40, %v1925_v54  ;;  %v5152_v40 = vld [vmem:[%s10965_s4 + $0x28] sm:$0xff]  ;;  %v11138_v54 = vld [vmem:[#allocation30_spill] sm:$0xff] }
 0x3b9   :  { %5255 = vperm.xlu2 %6853, %v5152_v40  }
 0x3ba   :  { %v1671_v26 = vpop.f32.mrf.mxu2 }
 0x3bb   :  { %v8863_v16 = vpop.f32.mrf.mxu3  ;;  %v1761_v29 = vrot.slane %v1671_v26, 7  ;;  %v2716_v12 = vpop.f32.mrf.mxu0 }
 0x3bc   :  { %11136 = vst [vmem:[#allocation26_spill] sm:$0xff] %v8863_v16  ;;  %v1151_v28 = vpop.f32.mrf.mxu1  ;;  %v8865_v24 = vadd.f32 %v2716_v12, %v2446_v22  ;;  %v10980_v6 = vrot.slane %v8863_v16, 2 }
 0x3bd   :  { %v1240_v11 = vrot.slane %v1151_v28, 6  ;;  %v1771_v19 = vsel %vm1766_vm1, %v1760_v42, %v1761_v29 }
 0x3be   :  { %11137 = vst [vmem:[#allocation28_spill] sm:$0xff] %v8865_v24  ;;  %v1926_v44 = vadd.f32 %v1771_v19, %v1404_v9 }
 0x3bf   :  { %v1248_v23 = vsel %vm1244_vm2, %v1239_v2, %v1240_v11 }
 0x3c0   :  { %v1405_v51 = vadd.f32 %v1248_v23, %v11138_v54  ;;  %v2447_v32 = vadd.f32 %v8801_v18, %v1926_v44  ;;  %v5156_v23 = vld [vmem:[%s10965_s4 + $0x48] sm:$0xff] }
 0x3c1   :  { %v11141_v54 = vld [vmem:[#allocation32_spill] sm:$0xff]  ;;  %5275 = vperm.xlu0 %6851, %v5156_v23  }
 0x3c2   :  { %v1673_v22 = vpop.f32.mrf.mxu2 }
 0x3c3   :  { %v3928_v26 = vpop.f32.mrf.mxu3  ;;  %v1762_v42 = vrot.slane %v1673_v22, 7  ;;  %v2719_v2 = vpop.f32.mrf.mxu0 }
 0x3c4   :  { %v4131_v28 = vrot.slane %v3928_v26, 2  ;;  %v1154_v12 = vpop.f32.mrf.mxu1  ;;  %v8878_v19 = vadd.f32 %v2719_v2, %v2447_v32  ;;  %v8897_v32 = vld [vmem:[#allocation2 + $0x48] sm:$0xff] }
 0x3c5   :  { %v1241_v9 = vrot.slane %v1154_v12, 6  ;;  %v1770_v24 = vsel %vm1766_vm1, %v1761_v29, %v1762_v42 }
 0x3c6   :  { %11139 = vst [vmem:[#allocation30_spill] sm:$0xff] %v8878_v19  ;;  %v8886_v18 = vsel %vm4211_vm3, %v10980_v6, %v4131_v28  ;;  %2912 = vmatmul.bf16.gmra.mxu1 %v8784_v41  ;;  %4477 = vmatmul.bf16.gmra.mxu0 %v8784_v41  ;;  %v1927_v40 = vadd.f32 %v1770_v24, %v1405_v51 }
 0x3c7   :  { %11140 = vst [vmem:[#allocation75_spill] sm:$0xff] %v8886_v18  ;;  %v1247_v44 = vsel %vm1244_vm2, %v1240_v11, %v1241_v9  ;;  %3434 = vmatmul.bf16.gmra.mxu2 %v8784_v41 }
 0x3c8   :  { %v1406_v29 = vadd.f32 %v1247_v44, %v11141_v54  ;;  %3970 = vmatmul.bf16.gmra.mxu3 %v8897_v32  ;;  %v2448_v22 = vadd.f32 %v8819_v25, %v1927_v40  ;;  %v5157_v44 = vld [vmem:[%s10965_s4 + $0x50] sm:$0xff] }
 0x3c9   :  { %5280 = vperm.xlu1 %6852, %v5157_v44  }
 0x3ca   :  { %v1676_v26 = vpop.f32.mrf.mxu2 }
 0x3cb   :  { %v8901_v12 = vpop.f32.mrf.mxu3  ;;  %v1763_v11 = vrot.slane %v1676_v26, 7  ;;  %v2721_v16 = vpop.f32.mrf.mxu0 }
 0x3cc   :  { %v10982_v2 = vrot.slane %v8901_v12, 2  ;;  %v1156_v6 = vpop.f32.mrf.mxu1  ;;  %v8904_v24 = vadd.f32 %v2721_v16, %v2448_v22 }
 0x3cd   :  { %v1769_v41 = vsel %vm1766_vm1, %v1762_v42, %v1763_v11  ;;  %v1242_v25 = vrot.slane %v1156_v6, 6 }
 0x3ce   :  { %11142 = vst [vmem:[#allocation32_spill] sm:$0xff] %v8904_v24  ;;  %v8912_v51 = vsel %vm4211_vm3, %v4131_v28, %v10982_v2  ;;  %v1928_v23 = vadd.f32 %v1769_v41, %v1406_v29  ;;  %v11144_v28 = vld [vmem:[#allocation34_spill] sm:$0xff] }
 0x3cf   :  { %11143 = vst [vmem:[#allocation76_spill] sm:$0xff] %v8912_v51  ;;  %v1246_v16 = vsel %vm1244_vm2, %v1241_v9, %v1242_v25  ;;  %v11146_v51 = vld [vmem:[#allocation52_spill] sm:$0xff] }
 0x3d0   :  { %v2449_v40 = vadd.f32 %v8840_v48, %v1928_v23  ;;  %v1326_v2 = vadd.f32 %v1246_v16, %v11144_v28  ;;  %v11147_v48 = vrot.slane %v11146_v51, 6  ;;  %v5155_v23 = vld [vmem:[%s10965_s4 + $0x40] sm:$0xff]  ;;  %v11148_v16 = vld [vmem:[#allocation37_spill] sm:$0xff] }
 0x3d1   :  { %5270 = vperm.xlu2 %6853, %v5155_v23  }
 0x3d2   :  { %v1678_v54 = vpop.f32.mrf.mxu2 }
 0x3d3   :  { %v8920_v42 = vpop.f32.mrf.mxu3  ;;  %v1764_v22 = vrot.slane %v1678_v54, 7  ;;  %v2724_v19 = vpop.f32.mrf.mxu0 }
 0x3d4   :  { %v1159_v26 = vpop.f32.mrf.mxu1  ;;  %v8923_v29 = vadd.f32 %v2724_v19, %v2449_v40  ;;  %v8938_v40 = vld [vmem:[#allocation2 + $0x50] sm:$0xff] }
 0x3d5   :  { %v1243_v6 = vrot.slane %v1159_v26, 6  ;;  %v1768_v41 = vsel %vm1766_vm1, %v1763_v11, %v1764_v22 }
 0x3d6   :  { %11145 = vst [vmem:[#allocation34_spill] sm:$0xff] %v8923_v29  ;;  %v1848_v44 = vadd.f32 %v1768_v41, %v1326_v2  ;;  %2917 = vmatmul.bf16.gmra.mxu1 %v8814_v49  ;;  %4482 = vmatmul.bf16.gmra.mxu0 %v8814_v49 }
 0x3d7   :  { %v1325_v9 = vsel %vm1244_vm2, %v1243_v6, %v11147_v48  ;;  %3439 = vmatmul.bf16.gmra.mxu2 %v8814_v49  ;;  %v1245_v2 = vsel %vm1244_vm2, %v1242_v25, %v1243_v6  ;;  %v11149_v48 = vld [vmem:[#allocation36_spill] sm:$0xff]  ;;  %v5159_v25 = vld [vmem:[%s10965_s4 + $0x60] sm:$0xff]  ;;  %v11152_v6 = vld [vmem:[#allocation42_spill] sm:$0xff] }
 0x3d8   :  { %v1328_v19 = vadd.f32 %v1325_v9, %v11148_v16  ;;  %3975 = vmatmul.bf16.gmra.mxu3 %v8938_v40  ;;  %v8942_v11 = vadd.f32 %v8830_v39, %v1848_v44  ;;  %v1327_v9 = vadd.f32 %v1245_v2, %v11149_v48  ;;  %v11150_v16 = vld [vmem:[#allocation56_spill] sm:$0xff]  ;;  %5290 = vperm.xlu0 %6851, %v5159_v25   ;;  %v5158_v25 = vld [vmem:[%s10965_s4 + $0x58] sm:$0xff] }
 0x3d9   :  { %v11151_v18 = vrot.slane %v11150_v16, 7  ;;  %5285 = vperm.xlu2 %6853, %v5158_v25  }
 0x3da   :  { %v1681_v51 = vpop.f32.mrf.mxu2 }
 0x3db   :  { %v8946_v54 = vpop.f32.mrf.mxu3  ;;  %v1765_v26 = vrot.slane %v1681_v51, 7  ;;  %v2726_v41 = vpop.f32.mrf.mxu0 }
 0x3dc   :  { %v1161_v28 = vpop.f32.mrf.mxu1 }
 0x3dd   :  { %v1767_v49 = vsel %vm1766_vm1, %v1764_v22, %v1765_v26  ;;  %v1847_v39 = vsel %vm1766_vm1, %v1765_v26, %v11151_v18  ;;  %v11153_v28 = vld [vmem:[#allocation45_spill] sm:$0xff]  ;;  %v5160_v18 = vld [vmem:[%s10965_s4 + $0x68] sm:$0xff] }
 0x3de   :  { %v1849_v44 = vadd.f32 %v1767_v49, %v1327_v9  ;;  %v1850_v23 = vadd.f32 %v1847_v39, %v1328_v19  ;;  %v8976_v19 = vld [vmem:[#allocation2 + $0x58] sm:$0xff]  ;;  %5295 = vperm.xlu1 %6852, %v5160_v18  }
 0x3e0   :  { %v8959_v51 = vadd.f32 %v11152_v6, %v1849_v44  ;;  %v8962_v2 = vadd.f32 %v11153_v28, %v1850_v23 }
 0x3e2   :  { %v1683_v41 = vpop.f32.mrf.mxu2 }
 0x3e3   :  { %v8964_v22 = vpop.f32.mrf.mxu3  ;;  %v8968_v16 = vpop.f32.mrf.mxu0 }
 0x3e4   :  { %v8966_v48 = vpop.f32.mrf.mxu1  ;;  %11155 = vst [vmem:[#allocation37_spill] sm:$0xff] %v8968_v16  ;;  %v10984_v26 = vrot.slane %v8968_v16, 3  ;;  %v4135_v58 = vrot.slane %v8964_v22, 2 }
 0x3e5   :  { %11154 = vst [vmem:[#allocation52_spill] sm:$0xff] %v8966_v48  ;;  %v10988_v46 = vrot.slane %v8966_v48, 1 }
 0x3e6   :  { %2922 = vmatmul.bf16.gmra.mxu1 %v8859_v57  ;;  %4487 = vmatmul.bf16.gmra.mxu0 %v8859_v57 }
 0x3e7   :  { %3444 = vmatmul.bf16.gmra.mxu2 %v8859_v57 }
 0x3e8   :  { %3980 = vmatmul.bf16.gmra.mxu3 %v8976_v19 }
 0x3ea   :  { %v8980_v9 = vpop.f32.mrf.mxu2 }
 0x3eb   :  { %11156 = vst [vmem:[#allocation36_spill] sm:$0xff] %v8980_v9  ;;  %v8982_v49 = vpop.f32.mrf.mxu3  ;;  %v4450_v44 = vpop.f32.mrf.mxu0  ;;  %v10985_v41 = vrot.slane %v8980_v9, 1 }
 0x3ec   :  { %v2885_v39 = vpop.f32.mrf.mxu1  ;;  %v4653_v23 = vrot.slane %v4450_v44, 3 }
 0x3ee   :  { %v8989_v57 = vsel %vm4733_vm4, %v10984_v26, %v4653_v23 }
 0x3ef   :  { %11157 = vst [vmem:[#allocation56_spill] sm:$0xff] %v8989_v57 }
 0x3f2   :  { %v3407_v6 = vpop.f32.mrf.mxu2 }
 0x3f3   :  { %v8994_v28 = vpop.f32.mrf.mxu3  ;;  %v3610_v18 = vrot.slane %v3407_v6, 1  ;;  %v4453_v44 = vpop.f32.mrf.mxu0  ;;  %v5162_v6 = vld [vmem:[%s10965_s4 + $0x78] sm:$0xff] }
 0x3f4   :  { %v8997_v29 = vpop.f32.mrf.mxu1  ;;  %v4654_v16 = vrot.slane %v4453_v44, 3  ;;  %v9016_v44 = vld [vmem:[#allocation2 + $0x60] sm:$0xff]  ;;  %5305 = vperm.xlu0 %6851, %v5162_v6   ;;  %v11161_v6 = vld [vmem:[#allocation53_spill] sm:$0xff] }
 0x3f5   :  { %v9004_v26 = vsel %vm3168_vm5, %v10985_v41, %v3610_v18  ;;  %v2728_v62 = vadd.f32 %v11161_v6, %v8942_v11  ;;  %v11162_v11 = vrot.slane %v8901_v12, 2  ;;  %v9054_v6 = vld [vmem:[#allocation2 + $0x68] sm:$0xff]  ;;  %v11163_v12 = vld [vmem:[#allocation57_spill] sm:$0xff] }
 0x3f6   :  { %11158 = vst [vmem:[#allocation42_spill] sm:$0xff] %v9004_v26  ;;  %v9008_v25 = vsel %vm4733_vm4, %v4653_v23, %v4654_v16  ;;  %2927 = vmatmul.bf16.gmra.mxu1 %v8897_v32  ;;  %4492 = vmatmul.bf16.gmra.mxu0 %v8897_v32  ;;  %v3088_v26 = vrot.slane %v2885_v39, 1 }
 0x3f7   :  { %11159 = vst [vmem:[#allocation45_spill] sm:$0xff] %v9008_v25  ;;  %3449 = vmatmul.bf16.gmra.mxu2 %v8897_v32  ;;  %v5163_v32 = vld [vmem:[%s10965_s4 + $0x80] sm:$0xff] }
 0x3f8   :  { %3985 = vmatmul.bf16.gmra.mxu3 %v9016_v44  ;;  %5310 = vperm.xlu1 %6852, %v5163_v32   ;;  %v3089_v32 = vrot.slane %v8997_v29, 1 }
 0x3fa   :  { %v3410_v41 = vpop.f32.mrf.mxu2  ;;  %v3247_v29 = vsel %vm3168_vm5, %v3088_v26, %v3089_v32 }
 0x3fb   :  { %v9019_v9 = vpop.f32.mrf.mxu3  ;;  %v3611_v23 = vrot.slane %v3410_v41, 1  ;;  %v4455_v57 = vpop.f32.mrf.mxu0  ;;  %v3248_v41 = vsel %vm3168_vm5, %v10988_v46, %v3088_v26  ;;  %v9076_v26 = vld [vmem:[%s10963_s2] ss:$0 sm:$0xff] }
 0x3fc   :  { %v9021_v25 = vpop.f32.mrf.mxu1  ;;  %v3250_v33 = vadd.f32 %v3248_v41, %v2728_v62  ;;  %v4655_v46 = vrot.slane %v4455_v57, 3  ;;  %v5161_v62 = vld [vmem:[%s10965_s4 + $0x70] sm:$0xff]  ;;  %v4134_v41 = vrot.slane %v8946_v54, 2  ;;  %v5241_v43 = vpop.permute.xlu1 %5240 }
 0x3fd   :  { %v9025_v24 = vsel %vm3168_vm5, %v3610_v18, %v3611_v23  ;;  %v4133_v18 = vrot.slane %v8920_v42, 2  ;;  %5300 = vperm.xlu2 %6853, %v5161_v62  }
 0x3fe   :  { %11160 = vst [vmem:[#allocation77_spill] sm:$0xff] %v9025_v24  ;;  %v4811_v57 = vsel %vm4733_vm4, %v4654_v16, %v4655_v46  ;;  %v4287_v22 = vsel %vm4211_vm3, %v4134_v41, %v4135_v58 }
 0x3ff   :  { %v4289_v42 = vsel %vm4211_vm3, %v11162_v11, %v4133_v18 }
 0x402   :  { %v3412_v39 = vpop.f32.mrf.mxu2 }
 0x403   :  { %v9037_v20 = vpop.f32.mrf.mxu3  ;;  %v3612_v24 = vrot.slane %v3412_v39, 1  ;;  %v9042_v59 = vpop.f32.mrf.mxu0 }
 0x404   :  { %v9040_v35 = vpop.f32.mrf.mxu1  ;;  %v4656_v16 = vrot.slane %v9042_v59, 3 }
 0x405   :  { %v3767_v48 = vsel %vm3168_vm5, %v3611_v23, %v3612_v24 }
 0x406   :  { %v3771_v13 = vadd.f32 %v3767_v48, %v3250_v33  ;;  %2932 = vmatmul.bf16.gmra.mxu1 %v8938_v40  ;;  %4497 = vmatmul.bf16.gmra.mxu0 %v8938_v40  ;;  %v2729_v48 = vadd.f32 %v11163_v12, %v8959_v51  ;;  %v5231_v12 = vpop.permute.xlu0 %5230 }
 0x407   :  { %3454 = vmatmul.bf16.gmra.mxu2 %v8938_v40 }
 0x408   :  { %3990 = vmatmul.bf16.gmra.mxu3 %v9054_v6  ;;  %v4293_v33 = vadd.f32 %v4289_v42, %v3771_v13  ;;  %v3251_v51 = vadd.f32 %v3247_v29, %v2729_v48  ;;  %v3090_v42 = vrot.slane %v9021_v25, 1  ;;  %v5165_v25 = vld [vmem:[%s10965_s4 + $0x90] sm:$0xff]  ;;  %v4810_v29 = vsel %vm4733_vm4, %v4655_v46, %v4656_v16 }
 0x409   :  { %5320 = vperm.xlu0 %6851, %v5165_v25   ;;  %v3091_v46 = vrot.slane %v9040_v35, 1 }
 0x40a   :  { %v3415_v40 = vpop.f32.mrf.mxu2  ;;  %v4815_v13 = vadd.f32 %v4811_v57, %v4293_v33  ;;  %v9088_v57 = vld [vmem:[%s10964_s3] ss:$0 sm:$0xff] }
 0x40b   :  { %v9066_v23 = vpop.f32.mrf.mxu3  ;;  %v3613_v39 = vrot.slane %v3415_v40, 1  ;;  %v9071_v56 = vpop.f32.mrf.mxu0  ;;  %v4288_v40 = vsel %vm4211_vm3, %v4133_v18, %v4134_v41  ;;  %v11164_v18 = vld [vmem:[#allocation58_spill] sm:$0xff] }
 0x40c   :  { %v9069_v11 = vpop.f32.mrf.mxu1  ;;  %v4900_v33 = vmul.f32 %v9076_v26, %v4815_v13  ;;  %v2730_v48 = vadd.f32 %v11164_v18, %v8962_v2  ;;  %v4657_v18 = vrot.slane %v9071_v56, 3  ;;  %v5166_v56 = vld [vmem:[%s10965_s4 + $0x98] sm:$0xff] }
 0x40d   :  { %v3766_v62 = vsel %vm3168_vm5, %v3612_v24, %v3613_v39  ;;  %v3246_v24 = vsel %vm3168_vm5, %v3089_v32, %v3090_v42  ;;  %5325 = vperm.xlu1 %6852, %v5166_v56  }
 0x40e   :  { %v3772_v54 = vadd.f32 %v3766_v62, %v3251_v51  ;;  %v4985_v61 = vadd.f32 %v9088_v57, %v4900_v33  ;;  %v3252_v32 = vadd.f32 %v3246_v24, %v2730_v48  ;;  %v9117_v24 = vld [vmem:[#allocation2 + $0x70] sm:$0xff]  ;;  %v3245_v48 = vsel %vm3168_vm5, %v3090_v42, %v3091_v46 }
 0x40f   :  { %v3092_v42 = vrot.slane %v9069_v11, 1 }
 0x410   :  { %v4294_v59 = vadd.f32 %v4288_v40, %v3772_v54  ;;  %v5066_v33 = vmax.f32 %v4985_v61, 0.0  ;;  %v4136_v61 = vrot.slane %v8982_v49, 2 }
 0x411   :  { %v3244_v11 = vsel %vm3168_vm5, %v3091_v46, %v3092_v42 }
 0x412   :  { %v3417_v13 = vpop.f32.mrf.mxu2  ;;  %v4816_v62 = vadd.f32 %v4810_v29, %v4294_v59 }
 0x413   :  { %v9099_v51 = vpop.f32.mrf.mxu3  ;;  %v3614_v63 = vrot.slane %v3417_v13, 1  ;;  %v9105_v40 = vpop.f32.mrf.mxu0 }
 0x414   :  { %v9103_v54 = vpop.f32.mrf.mxu1  ;;  %v4901_v25 = vmul.f32 %v9076_v26, %v4816_v62  ;;  %v4658_v49 = vrot.slane %v9105_v40, 3 }
 0x415   :  { %v3765_v2 = vsel %vm3168_vm5, %v3613_v39, %v3614_v63  ;;  %v5236_v39 = vpop.permute.xlu0 %5235 }
 0x416   :  { %v3773_v59 = vadd.f32 %v3765_v2, %v3252_v32  ;;  %2937 = vmatmul.bf16.gmra.mxu1 %v8976_v19  ;;  %4502 = vmatmul.bf16.gmra.mxu0 %v8976_v19  ;;  %v4986_v35 = vadd.f32 %v9088_v57, %v4901_v25  ;;  %v5633_v32 = vmul.f32 %v5231_v12, %v5066_v33 }
 0x417   :  { %3459 = vmatmul.bf16.gmra.mxu2 %v8976_v19  ;;  %v4809_v19 = vsel %vm4733_vm4, %v4656_v16, %v4657_v18  ;;  %v4286_v12 = vsel %vm4211_vm3, %v4135_v58, %v4136_v61  ;;  %v4137_v58 = vrot.slane %v8994_v28, 2 }
 0x418   :  { %3995 = vmatmul.bf16.gmra.mxu3 %v9117_v24  ;;  %v4295_v29 = vadd.f32 %v4287_v22, %v3773_v59  ;;  %v5067_v41 = vmax.f32 %v4986_v35, 0.0  ;;  %v11165_v22 = vld [vmem:[#allocation59_spill] sm:$0xff] }
 0x419   :  { %v3253_v56 = vadd.f32 %v3245_v48, %v11165_v22  ;;  %v4285_v28 = vsel %vm4211_vm3, %v4136_v61, %v4137_v58 }
 0x41a   :  { %v3420_v13 = vpop.f32.mrf.mxu2  ;;  %v5634_v25 = vmul.f32 %v5236_v39, %v5067_v41  ;;  %v4817_v59 = vadd.f32 %v4809_v19, %v4295_v29  ;;  %v5164_v39 = vld [vmem:[%s10965_s4 + $0x88] sm:$0xff] }
 0x41b   :  { %v9129_v62 = vpop.f32.mrf.mxu3  ;;  %v3615_v2 = vrot.slane %v3420_v13, 1  ;;  %v9133_v30 = vpop.f32.mrf.mxu0  ;;  %5315 = vperm.xlu2 %6853, %v5164_v39  }
 0x41c   :  { %v9131_v1 = vpop.f32.mrf.mxu1  ;;  %v6586_v35 = vpack.c.bf16 %v5634_v25, %v5633_v32  ;;  %v4902_v33 = vmul.f32 %v9076_v26, %v4817_v59  ;;  %v3093_v59 = vrot.slane %v9103_v54, 1  ;;  %v4659_v22 = vrot.slane %v9133_v30, 3  ;;  %v5168_v30 = vld [vmem:[%s10965_s4 + $0xa8] sm:$0xff] }
 0x41d   :  { %v3764_v16 = vsel %vm3168_vm5, %v3614_v63, %v3615_v2  ;;  %v4808_v63 = vsel %vm4733_vm4, %v4657_v18, %v4658_v49  ;;  %5335 = vperm.xlu0 %6851, %v5168_v30  }
 0x41e   :  { %v3774_v27 = vadd.f32 %v3764_v16, %v3253_v56  ;;  %6587 = vst [vmem:[#allocation5] sm:$0xff] %v6586_v35   ;;  %v4987_v19 = vadd.f32 %v9088_v57, %v4902_v33  ;;  %v4138_v33 = vrot.slane %v9019_v9, 2 }
 0x420   :  { %v4296_v29 = vadd.f32 %v4286_v12, %v3774_v27  ;;  %v3254_v27 = vadd.f32 %v3244_v11, %v7695_v31  ;;  %v5068_v35 = vmax.f32 %v4987_v19, 0.0  ;;  %v9169_v31 = vld [vmem:[#allocation2 + $0x78] sm:$0xff]  ;;  %v3243_v12 = vsel %vm3168_vm5, %v3092_v42, %v3093_v59 }
 0x421   :  { %v3094_v42 = vrot.slane %v9131_v1, 1 }
 0x422   :  { %v3422_v40 = vpop.f32.mrf.mxu2  ;;  %v4818_v41 = vadd.f32 %v4808_v63, %v4296_v29  ;;  %v5635_v11 = vmul.f32 %v5241_v43, %v5068_v35  ;;  %v4284_v43 = vsel %vm4211_vm3, %v4137_v58, %v4138_v33  ;;  %v4139_v58 = vrot.slane %v9037_v20, 2 }
 0x423   :  { %v9150_v48 = vpop.f32.mrf.mxu3  ;;  %v3616_v13 = vrot.slane %v3422_v40, 1  ;;  %v9156_v25 = vpop.f32.mrf.mxu0  ;;  %v3242_v1 = vsel %vm3168_vm5, %v3093_v59, %v3094_v42 }
 0x424   :  { %v9154_v32 = vpop.f32.mrf.mxu1  ;;  %v4903_v46 = vmul.f32 %v9076_v26, %v4818_v41  ;;  %v4660_v9 = vrot.slane %v9156_v25, 3  ;;  %v4283_v20 = vsel %vm4211_vm3, %v4138_v33, %v4139_v58 }
 0x425   :  { %v3763_v18 = vsel %vm3168_vm5, %v3615_v2, %v3616_v13  ;;  %v5246_v2 = vpop.permute.xlu1 %5245 }
 0x426   :  { %v3775_v56 = vadd.f32 %v3763_v18, %v3254_v27  ;;  %2942 = vmatmul.bf16.gmra.mxu1 %v9016_v44  ;;  %4507 = vmatmul.bf16.gmra.mxu0 %v9016_v44  ;;  %v4988_v54 = vadd.f32 %v9088_v57, %v4903_v46  ;;  %v3255_v46 = vadd.f32 %v3243_v12, %v7711_v7  ;;  %v5169_v7 = vld [vmem:[%s10965_s4 + $0xb0] sm:$0xff] }
 0x427   :  { %3464 = vmatmul.bf16.gmra.mxu2 %v9016_v44  ;;  %v4807_v44 = vsel %vm4733_vm4, %v4658_v49, %v4659_v22  ;;  %5340 = vperm.xlu1 %6852, %v5169_v7  }
 0x428   :  { %4000 = vmatmul.bf16.gmra.mxu3 %v9169_v31  ;;  %v4297_v16 = vadd.f32 %v4285_v28, %v3775_v56  ;;  %v5069_v61 = vmax.f32 %v4988_v54, 0.0  ;;  %v5251_v28 = vpop.permute.xlu2 %5250 }
 0x42a   :  { %v3425_v39 = vpop.f32.mrf.mxu2  ;;  %v5636_v63 = vmul.f32 %v5246_v2, %v5069_v61  ;;  %v4819_v27 = vadd.f32 %v4807_v44, %v4297_v16 }
 0x42b   :  { %v9181_v29 = vpop.f32.mrf.mxu3  ;;  %v3617_v40 = vrot.slane %v3425_v39, 1  ;;  %v9185_v19 = vpop.f32.mrf.mxu0  ;;  %v3256_v39 = vadd.f32 %v3242_v1, %v7723_v8  ;;  %v9221_v8 = vld [vmem:[#allocation2 + $0x80] sm:$0xff] }
 0x42c   :  { %v9183_v41 = vpop.f32.mrf.mxu1  ;;  %v6591_v18 = vpack.c.bf16 %v5636_v63, %v5635_v11  ;;  %v4904_v35 = vmul.f32 %v9076_v26, %v4819_v27  ;;  %v3095_v11 = vrot.slane %v9154_v32, 1  ;;  %v4661_v63 = vrot.slane %v9185_v19, 3 }
 0x42d   :  { %v3762_v49 = vsel %vm3168_vm5, %v3616_v13, %v3617_v40  ;;  %v4806_v13 = vsel %vm4733_vm4, %v4659_v22, %v4660_v9 }
 0x42e   :  { %v3776_v56 = vadd.f32 %v3762_v49, %v3255_v46  ;;  %6783 = vst [vmem:[#allocation5 + $0x8] sm:$0xff] %v6591_v18   ;;  %v4989_v16 = vadd.f32 %v9088_v57, %v4904_v35  ;;  %v3241_v49 = vsel %vm3168_vm5, %v3094_v42, %v3095_v11  ;;  %v3096_v42 = vrot.slane %v9183_v41, 1 }
 0x430   :  { %v4298_v54 = vadd.f32 %v4284_v43, %v3776_v56  ;;  %v5070_v46 = vmax.f32 %v4989_v16, 0.0  ;;  %v5256_v19 = vpop.permute.xlu2 %5255  ;;  %v4140_v56 = vrot.slane %v9066_v23, 2  ;;  %v3257_v16 = vadd.f32 %v3241_v49, %v7738_v53 }
 0x431   :  { %v3240_v41 = vsel %vm3168_vm5, %v3095_v11, %v3096_v42 }
 0x432   :  { %v3427_v25 = vpop.f32.mrf.mxu2  ;;  %v4820_v2 = vadd.f32 %v4806_v13, %v4298_v54  ;;  %v5637_v7 = vmul.f32 %v5251_v28, %v5070_v46  ;;  %v4282_v28 = vsel %vm4211_vm3, %v4139_v58, %v4140_v56  ;;  %v4141_v58 = vrot.slane %v9099_v51, 2 }
 0x433   :  { %v9202_v30 = vpop.f32.mrf.mxu3  ;;  %v3618_v12 = vrot.slane %v3427_v25, 1  ;;  %v9208_v44 = vpop.f32.mrf.mxu0  ;;  %v3258_v49 = vadd.f32 %v3240_v41, %v7750_v4  ;;  %v9273_v4 = vld [vmem:[#allocation2 + $0x88] sm:$0xff] }
 0x434   :  { %v9206_v61 = vpop.f32.mrf.mxu1  ;;  %v4905_v59 = vmul.f32 %v9076_v26, %v4820_v2  ;;  %v4662_v23 = vrot.slane %v9208_v44, 3  ;;  %v4281_v51 = vsel %vm4211_vm3, %v4140_v56, %v4141_v58 }
 0x435   :  { %v3761_v22 = vsel %vm3168_vm5, %v3617_v40, %v3618_v12  ;;  %v5167_v40 = vld [vmem:[%s10965_s4 + $0xa0] sm:$0xff] }
 0x436   :  { %v3777_v27 = vadd.f32 %v3761_v22, %v3256_v39  ;;  %2947 = vmatmul.bf16.gmra.mxu1 %v9054_v6  ;;  %4512 = vmatmul.bf16.gmra.mxu0 %v9054_v6  ;;  %v4990_v32 = vadd.f32 %v9088_v57, %v4905_v59  ;;  %v4804_v44 = vsel %vm4733_vm4, %v4661_v63, %v4662_v23 }
 0x437   :  { %3469 = vmatmul.bf16.gmra.mxu2 %v9054_v6  ;;  %5330 = vperm.xlu2 %6853, %v5167_v40   ;;  %v4805_v6 = vsel %vm4733_vm4, %v4660_v9, %v4661_v63 }
 0x438   :  { %4005 = vmatmul.bf16.gmra.mxu3 %v9221_v8  ;;  %v4299_v18 = vadd.f32 %v4283_v20, %v3777_v27  ;;  %v5071_v33 = vmax.f32 %v4990_v32, 0.0  ;;  %v5171_v27 = vld [vmem:[%s10965_s4 + $0xc0] sm:$0xff] }
 0x439   :  { %5350 = vperm.xlu0 %6851, %v5171_v27  }
 0x43a   :  { %v3430_v43 = vpop.f32.mrf.mxu2  ;;  %v5638_v54 = vmul.f32 %v5256_v19, %v5071_v33  ;;  %v4821_v2 = vadd.f32 %v4805_v6, %v4299_v18  ;;  %v3097_v33 = vrot.slane %v9206_v61, 1 }
 0x43b   :  { %v9233_v35 = vpop.f32.mrf.mxu3  ;;  %v3619_v1 = vrot.slane %v3430_v43, 1  ;;  %v9237_v25 = vpop.f32.mrf.mxu0 }
 0x43c   :  { %v9235_v13 = vpop.f32.mrf.mxu1  ;;  %v6596_v39 = vpack.c.bf16 %v5638_v54, %v5637_v7  ;;  %v4906_v22 = vmul.f32 %v9076_v26, %v4821_v2  ;;  %v4663_v6 = vrot.slane %v9237_v25, 3  ;;  %v5172_v54 = vld [vmem:[%s10965_s4 + $0xc8] sm:$0xff]  ;;  %v5266_v25 = vpop.permute.xlu1 %5265  ;;  %v3239_v56 = vsel %vm3168_vm5, %v3096_v42, %v3097_v33 }
 0x43d   :  { %v3760_v9 = vsel %vm3168_vm5, %v3618_v12, %v3619_v1  ;;  %5355 = vperm.xlu1 %6852, %v5172_v54   ;;  %v3098_v42 = vrot.slane %v9235_v13, 1 }
 0x43e   :  { %v3778_v59 = vadd.f32 %v3760_v9, %v3257_v16  ;;  %6784 = vst [vmem:[#allocation5 + $0x10] sm:$0xff] %v6596_v39   ;;  %v4991_v32 = vadd.f32 %v9088_v57, %v4906_v22  ;;  %v4803_v39 = vsel %vm4733_vm4, %v4662_v23, %v4663_v6 }
 0x43f   :  { %v3238_v13 = vsel %vm3168_vm5, %v3097_v33, %v3098_v42 }
 0x440   :  { %v4300_v53 = vadd.f32 %v4282_v28, %v3778_v59  ;;  %v5072_v7 = vmax.f32 %v4991_v32, 0.0 }
 0x442   :  { %v3432_v12 = vpop.f32.mrf.mxu2  ;;  %v4822_v46 = vadd.f32 %v4804_v44, %v4300_v53 }
 0x443   :  { %v9254_v20 = vpop.f32.mrf.mxu3  ;;  %v3620_v40 = vrot.slane %v3432_v12, 1  ;;  %v9260_v18 = vpop.f32.mrf.mxu0  ;;  %v3259_v12 = vadd.f32 %v3239_v56, %v7765_v15 }
 0x444   :  { %v9258_v19 = vpop.f32.mrf.mxu1  ;;  %v4907_v11 = vmul.f32 %v9076_v26, %v4822_v46 }
 0x445   :  { %v3759_v63 = vsel %vm3168_vm5, %v3619_v1, %v3620_v40  ;;  %v5261_v1 = vpop.permute.xlu0 %5260 }
 0x446   :  { %v3779_v43 = vadd.f32 %v3759_v63, %v3258_v49  ;;  %2952 = vmatmul.bf16.gmra.mxu1 %v9117_v24  ;;  %4517 = vmatmul.bf16.gmra.mxu0 %v9117_v24  ;;  %v4992_v61 = vadd.f32 %v9088_v57, %v4907_v11  ;;  %v5639_v28 = vmul.f32 %v5261_v1, %v5072_v7  ;;  %v5170_v63 = vld [vmem:[%s10965_s4 + $0xb8] sm:$0xff] }
 0x447   :  { %3474 = vmatmul.bf16.gmra.mxu2 %v9117_v24  ;;  %v4142_v24 = vrot.slane %v9129_v62, 2  ;;  %v4664_v62 = vrot.slane %v9260_v18, 3  ;;  %5345 = vperm.xlu2 %6853, %v5170_v63  }
 0x448   :  { %4010 = vmatmul.bf16.gmra.mxu3 %v9273_v4  ;;  %v4301_v2 = vadd.f32 %v4281_v51, %v3779_v43  ;;  %v5073_v16 = vmax.f32 %v4992_v61, 0.0 }
 0x449   :  { %v4280_v49 = vsel %vm4211_vm3, %v4141_v58, %v4142_v24  ;;  %v4802_v18 = vsel %vm4733_vm4, %v4663_v6, %v4664_v62  ;;  %v4143_v58 = vrot.slane %v9150_v48, 2 }
 0x44a   :  { %v3435_v9 = vpop.f32.mrf.mxu2  ;;  %v5640_v22 = vmul.f32 %v5266_v25, %v5073_v16  ;;  %v4823_v44 = vadd.f32 %v4803_v39, %v4301_v2  ;;  %v3260_v25 = vadd.f32 %v3238_v13, %v7777_v21  ;;  %v3099_v2 = vrot.slane %v9258_v19, 1  ;;  %v9325_v21 = vld [vmem:[#allocation2 + $0x90] sm:$0xff] }
 0x44b   :  { %v9285_v59 = vpop.f32.mrf.mxu3  ;;  %v3621_v27 = vrot.slane %v3435_v9, 1  ;;  %v9289_v41 = vpop.f32.mrf.mxu0  ;;  %v4279_v48 = vsel %vm4211_vm3, %v4142_v24, %v4143_v58  ;;  %v5174_v9 = vld [vmem:[%s10965_s4 + $0xd8] sm:$0xff] }
 0x44c   :  { %v9287_v53 = vpop.f32.mrf.mxu1  ;;  %v6601_v46 = vpack.c.bf16 %v5640_v22, %v5639_v28  ;;  %v4908_v11 = vmul.f32 %v9076_v26, %v4823_v44  ;;  %v4665_v56 = vrot.slane %v9289_v41, 3  ;;  %v5271_v28 = vpop.permute.xlu2 %5270  ;;  %5365 = vperm.xlu0 %6851, %v5174_v9   ;;  %v3237_v24 = vsel %vm3168_vm5, %v3098_v42, %v3099_v2 }
 0x44d   :  { %v3758_v23 = vsel %vm3168_vm5, %v3620_v40, %v3621_v27  ;;  %v5276_v22 = vpop.permute.xlu0 %5275  ;;  %v3261_v13 = vadd.f32 %v3237_v24, %v7792_v60  ;;  %v3100_v42 = vrot.slane %v9287_v53, 1 }
 0x44e   :  { %v3780_v32 = vadd.f32 %v3758_v23, %v3259_v12  ;;  %6785 = vst [vmem:[#allocation5 + $0x18] sm:$0xff] %v6601_v46   ;;  %v4993_v7 = vadd.f32 %v9088_v57, %v4908_v11  ;;  %v4801_v44 = vsel %vm4733_vm4, %v4664_v62, %v4665_v56 }
 0x44f   :  { %v3236_v53 = vsel %vm3168_vm5, %v3099_v2, %v3100_v42 }
 0x450   :  { %v4302_v15 = vadd.f32 %v4280_v49, %v3780_v32  ;;  %v5074_v39 = vmax.f32 %v4993_v7, 0.0  ;;  %v3262_v9 = vadd.f32 %v3236_v53, %v7813_v47  ;;  %v9377_v47 = vld [vmem:[#allocation2 + $0x98] sm:$0xff] }
 0x452   :  { %v3437_v40 = vpop.f32.mrf.mxu2  ;;  %v4824_v51 = vadd.f32 %v4802_v18, %v4302_v15  ;;  %v5641_v23 = vmul.f32 %v5271_v28, %v5074_v39 }
 0x453   :  { %v9306_v43 = vpop.f32.mrf.mxu3  ;;  %v3622_v61 = vrot.slane %v3437_v40, 1  ;;  %v9312_v1 = vpop.f32.mrf.mxu0 }
 0x454   :  { %v9310_v54 = vpop.f32.mrf.mxu1  ;;  %v4909_v33 = vmul.f32 %v9076_v26, %v4824_v51 }
 0x455   :  { %v3757_v6 = vsel %vm3168_vm5, %v3621_v27, %v3622_v61  ;;  %v3101_v28 = vrot.slane %v9310_v54, 1 }
 0x456   :  { %v3781_v16 = vadd.f32 %v3757_v6, %v3260_v25  ;;  %2957 = vmatmul.bf16.gmra.mxu1 %v9169_v31  ;;  %4522 = vmatmul.bf16.gmra.mxu0 %v9169_v31  ;;  %v4994_v19 = vadd.f32 %v9088_v57, %v4909_v33  ;;  %v5175_v25 = vld [vmem:[%s10965_s4 + $0xe0] sm:$0xff] }
 0x457   :  { %3479 = vmatmul.bf16.gmra.mxu2 %v9169_v31  ;;  %v4144_v31 = vrot.slane %v9181_v29, 2  ;;  %v4666_v29 = vrot.slane %v9312_v1, 3  ;;  %5370 = vperm.xlu1 %6852, %v5175_v25   ;;  %v11166_v25 = vld [vmem:[#allocation60_spill] sm:$0xff] }
 0x458   :  { %4015 = vmatmul.bf16.gmra.mxu3 %v9325_v21  ;;  %v4303_v27 = vadd.f32 %v4279_v48, %v3781_v16  ;;  %v5075_v41 = vmax.f32 %v4994_v19, 0.0 }
 0x459   :  { %v4278_v51 = vsel %vm4211_vm3, %v4143_v58, %v4144_v31  ;;  %v4800_v1 = vsel %vm4733_vm4, %v4665_v56, %v4666_v29  ;;  %v4145_v58 = vrot.slane %v9202_v30, 2 }
 0x45a   :  { %v3440_v12 = vpop.f32.mrf.mxu2  ;;  %v5642_v32 = vmul.f32 %v5276_v22, %v5075_v41  ;;  %v4825_v15 = vadd.f32 %v4801_v44, %v4303_v27  ;;  %v5173_v41 = vld [vmem:[%s10965_s4 + $0xd0] sm:$0xff]  ;;  %v5281_v44 = vpop.permute.xlu1 %5280 }
 0x45b   :  { %v9337_v46 = vpop.f32.mrf.mxu3  ;;  %v3623_v49 = vrot.slane %v3440_v12, 1  ;;  %v9341_v63 = vpop.f32.mrf.mxu0  ;;  %v4277_v30 = vsel %vm4211_vm3, %v4144_v31, %v4145_v58  ;;  %5360 = vperm.xlu2 %6853, %v5173_v41   ;;  %v3235_v31 = vsel %vm3168_vm5, %v3100_v42, %v3101_v28 }
 0x45c   :  { %v9339_v11 = vpop.f32.mrf.mxu1  ;;  %v6606_v18 = vpack.c.bf16 %v5642_v32, %v5641_v23  ;;  %v4910_v7 = vmul.f32 %v9076_v26, %v4825_v15  ;;  %v4667_v22 = vrot.slane %v9341_v63, 3  ;;  %v5286_v12 = vpop.permute.xlu2 %5285 }
 0x45d   :  { %v3756_v62 = vsel %vm3168_vm5, %v3622_v61, %v3623_v49  ;;  %v3102_v42 = vrot.slane %v9339_v11, 1 }
 0x45e   :  { %v3782_v40 = vadd.f32 %v3756_v62, %v3261_v13  ;;  %6786 = vst [vmem:[#allocation5 + $0x20] sm:$0xff] %v6606_v18   ;;  %v4995_v16 = vadd.f32 %v9088_v57, %v4910_v7 }
 0x45f   :  { %v3234_v11 = vsel %vm3168_vm5, %v3101_v28, %v3102_v42 }
 0x460   :  { %v4304_v60 = vadd.f32 %v4278_v51, %v3782_v40  ;;  %v5076_v24 = vmax.f32 %v4995_v16, 0.0  ;;  %v5177_v16 = vld [vmem:[%s10965_s4 + $0xf0] sm:$0xff]  ;;  %v3264_v41 = vadd.f32 %v3234_v11, %v7846_v5  ;;  %v9429_v5 = vld [vmem:[#allocation2 + $0xa0] sm:$0xff] }
 0x461   :  { %5380 = vperm.xlu0 %6851, %v5177_v16  }
 0x462   :  { %v3442_v61 = vpop.f32.mrf.mxu2  ;;  %v4826_v6 = vadd.f32 %v4800_v1, %v4304_v60  ;;  %v5643_v13 = vmul.f32 %v5281_v44, %v5076_v24  ;;  %v3263_v60 = vadd.f32 %v3235_v31, %v11166_v25 }
 0x463   :  { %v9358_v33 = vpop.f32.mrf.mxu3  ;;  %v3624_v48 = vrot.slane %v3442_v61, 1  ;;  %v9364_v19 = vpop.f32.mrf.mxu0 }
 0x464   :  { %v9362_v39 = vpop.f32.mrf.mxu1  ;;  %v4911_v2 = vmul.f32 %v9076_v26, %v4826_v6 }
 0x465   :  { %v3755_v56 = vsel %vm3168_vm5, %v3623_v49, %v3624_v48  ;;  %v4799_v49 = vsel %vm4733_vm4, %v4666_v29, %v4667_v22  ;;  %v3103_v44 = vrot.slane %v9362_v39, 1 }
 0x466   :  { %v3783_v27 = vadd.f32 %v3755_v56, %v3262_v9  ;;  %2962 = vmatmul.bf16.gmra.mxu1 %v9221_v8  ;;  %4527 = vmatmul.bf16.gmra.mxu0 %v9221_v8  ;;  %v4996_v54 = vadd.f32 %v9088_v57, %v4911_v2 }
 0x467   :  { %3484 = vmatmul.bf16.gmra.mxu2 %v9221_v8  ;;  %v4146_v8 = vrot.slane %v9233_v35, 2  ;;  %v4668_v35 = vrot.slane %v9364_v19, 3 }
 0x468   :  { %4020 = vmatmul.bf16.gmra.mxu3 %v9377_v47  ;;  %v4305_v23 = vadd.f32 %v4277_v30, %v3783_v27  ;;  %v5077_v32 = vmax.f32 %v4996_v54, 0.0 }
 0x469   :  { %v4276_v61 = vsel %vm4211_vm3, %v4145_v58, %v4146_v8  ;;  %v4798_v19 = vsel %vm4733_vm4, %v4667_v22, %v4668_v35  ;;  %v4147_v58 = vrot.slane %v9254_v20, 2 }
 0x46a   :  { %v3445_v63 = vpop.f32.mrf.mxu2  ;;  %v5644_v18 = vmul.f32 %v5286_v12, %v5077_v32  ;;  %v4827_v7 = vadd.f32 %v4799_v49, %v4305_v23  ;;  %v5178_v32 = vld [vmem:[%s10965_s4 + $0xf8] sm:$0xff]  ;;  %v5291_v49 = vpop.permute.xlu0 %5290 }
 0x46b   :  { %v9389_v15 = vpop.f32.mrf.mxu3  ;;  %v3625_v62 = vrot.slane %v3445_v63, 1  ;;  %v9393_v51 = vpop.f32.mrf.mxu0  ;;  %v4275_v20 = vsel %vm4211_vm3, %v4146_v8, %v4147_v58  ;;  %5385 = vperm.xlu1 %6852, %v5178_v32   ;;  %v3233_v8 = vsel %vm3168_vm5, %v3102_v42, %v3103_v44 }
 0x46c   :  { %v9391_v40 = vpop.f32.mrf.mxu1  ;;  %v6611_v53 = vpack.c.bf16 %v5644_v18, %v5643_v13  ;;  %v4912_v6 = vmul.f32 %v9076_v26, %v4827_v7  ;;  %v4669_v12 = vrot.slane %v9393_v51, 3  ;;  %v5296_v63 = vpop.permute.xlu1 %5295 }
 0x46d   :  { %v3754_v29 = vsel %vm3168_vm5, %v3624_v48, %v3625_v62  ;;  %v3104_v42 = vrot.slane %v9391_v40, 1 }
 0x46e   :  { %v3784_v1 = vadd.f32 %v3754_v29, %v3263_v60  ;;  %6787 = vst [vmem:[#allocation5 + $0x28] sm:$0xff] %v6611_v53   ;;  %v4997_v27 = vadd.f32 %v9088_v57, %v4912_v6  ;;  %v3265_v6 = vadd.f32 %v3233_v8, %v7864_v36 }
 0x46f   :  { %v3232_v40 = vsel %vm3168_vm5, %v3103_v44, %v3104_v42 }
 0x470   :  { %v4306_v9 = vadd.f32 %v4276_v61, %v3784_v1  ;;  %v5078_v31 = vmax.f32 %v4997_v27, 0.0 }
 0x472   :  { %v3447_v48 = vpop.f32.mrf.mxu2  ;;  %v4828_v56 = vadd.f32 %v4798_v19, %v4306_v9  ;;  %v5645_v25 = vmul.f32 %v5291_v49, %v5078_v31  ;;  %v5306_v8 = vpop.permute.xlu0 %5305 }
 0x473   :  { %v9410_v2 = vpop.f32.mrf.mxu3  ;;  %v3626_v30 = vrot.slane %v3447_v48, 1  ;;  %v9416_v54 = vpop.f32.mrf.mxu0  ;;  %v5176_v48 = vld [vmem:[%s10965_s4 + $0xe8] sm:$0xff] }
 0x474   :  { %v9414_v24 = vpop.f32.mrf.mxu1  ;;  %v4913_v28 = vmul.f32 %v9076_v26, %v4828_v56  ;;  %5375 = vperm.xlu2 %6853, %v5176_v48  }
 0x475   :  { %v3753_v22 = vsel %vm3168_vm5, %v3625_v62, %v3626_v30  ;;  %v4797_v62 = vsel %vm4733_vm4, %v4668_v35, %v4669_v12  ;;  %v3105_v31 = vrot.slane %v9414_v24, 1 }
 0x476   :  { %v3785_v23 = vadd.f32 %v3753_v22, %v3264_v41  ;;  %2967 = vmatmul.bf16.gmra.mxu1 %v9273_v4  ;;  %4532 = vmatmul.bf16.gmra.mxu0 %v9273_v4  ;;  %v4998_v39 = vadd.f32 %v9088_v57, %v4913_v28 }
 0x477   :  { %3489 = vmatmul.bf16.gmra.mxu2 %v9273_v4  ;;  %v4148_v4 = vrot.slane %v9285_v59, 2  ;;  %v4670_v59 = vrot.slane %v9416_v54, 3 }
 0x478   :  { %4025 = vmatmul.bf16.gmra.mxu3 %v9429_v5  ;;  %v4307_v13 = vadd.f32 %v4275_v20, %v3785_v23  ;;  %v5079_v18 = vmax.f32 %v4998_v39, 0.0  ;;  %v3266_v20 = vadd.f32 %v3232_v40, %v7876_v37  ;;  %v9481_v37 = vld [vmem:[#allocation2 + $0xa8] sm:$0xff]  ;;  %v5181_v40 = vld [vmem:[%s10965_s4 + $0x110] sm:$0xff] }
 0x479   :  { %v4274_v11 = vsel %vm4211_vm3, %v4147_v58, %v4148_v4  ;;  %v4796_v56 = vsel %vm4733_vm4, %v4669_v12, %v4670_v59  ;;  %v4149_v58 = vrot.slane %v9306_v43, 2  ;;  %5400 = vperm.xlu1 %6852, %v5181_v40   ;;  %v5183_v40 = vld [vmem:[%s10965_s4 + $0x120] sm:$0xff] }
 0x47a   :  { %v3450_v51 = vpop.f32.mrf.mxu2  ;;  %v5646_v60 = vmul.f32 %v5296_v63, %v5079_v18  ;;  %v4829_v61 = vadd.f32 %v4797_v62, %v4307_v13  ;;  %v5180_v63 = vld [vmem:[%s10965_s4 + $0x108] sm:$0xff]  ;;  %v5301_v13 = vpop.permute.xlu2 %5300 }
 0x47b   :  { %v9441_v7 = vpop.f32.mrf.mxu3  ;;  %v3627_v53 = vrot.slane %v3450_v51, 1  ;;  %v9445_v1 = vpop.f32.mrf.mxu0  ;;  %v4273_v43 = vsel %vm4211_vm3, %v4148_v4, %v4149_v58  ;;  %5395 = vperm.xlu0 %6851, %v5180_v63   ;;  %v3231_v4 = vsel %vm3168_vm5, %v3104_v42, %v3105_v31  ;;  %v5179_v63 = vld [vmem:[%s10965_s4 + $0x100] sm:$0xff] }
 0x47c   :  { %v9443_v29 = vpop.f32.mrf.mxu1  ;;  %v6616_v16 = vpack.c.bf16 %v5646_v60, %v5645_v25  ;;  %v4914_v19 = vmul.f32 %v9076_v26, %v4829_v61  ;;  %v4671_v39 = vrot.slane %v9445_v1, 3  ;;  %5390 = vperm.xlu2 %6853, %v5179_v63  }
 0x47d   :  { %v3752_v35 = vsel %vm3168_vm5, %v3626_v30, %v3627_v53  ;;  %v3106_v42 = vrot.slane %v9443_v29, 1 }
 0x47e   :  { %v3786_v9 = vadd.f32 %v3752_v35, %v3265_v6  ;;  %6788 = vst [vmem:[#allocation5 + $0x30] sm:$0xff] %v6616_v16   ;;  %v4999_v41 = vadd.f32 %v9088_v57, %v4914_v19  ;;  %v4795_v51 = vsel %vm4733_vm4, %v4670_v59, %v4671_v39 }
 0x47f   :  { %v3230_v29 = vsel %vm3168_vm5, %v3105_v31, %v3106_v42 }
 0x480   :  { %v4308_v36 = vadd.f32 %v4274_v11, %v3786_v9  ;;  %v5080_v49 = vmax.f32 %v4999_v41, 0.0  ;;  %v3267_v9 = vadd.f32 %v3231_v4, %v7894_v3 }
 0x482   :  { %v3452_v27 = vpop.f32.mrf.mxu2  ;;  %v4830_v54 = vadd.f32 %v4796_v56, %v4308_v36 }
 0x483   :  { %v9462_v30 = vpop.f32.mrf.mxu3  ;;  %v3628_v28 = vrot.slane %v3452_v27, 1  ;;  %v9468_v23 = vpop.f32.mrf.mxu0  ;;  %5410 = vperm.xlu0 %6851, %v5183_v40  }
 0x484   :  { %v9466_v22 = vpop.f32.mrf.mxu1  ;;  %v4915_v44 = vmul.f32 %v9076_v26, %v4830_v54 }
 0x485   :  { %v3751_v12 = vsel %vm3168_vm5, %v3627_v53, %v3628_v28  ;;  %v5647_v53 = vmul.f32 %v5301_v13, %v5080_v49  ;;  %v5311_v13 = vpop.permute.xlu1 %5310 }
 0x486   :  { %v3787_v32 = vadd.f32 %v3751_v12, %v3266_v20  ;;  %2972 = vmatmul.bf16.gmra.mxu1 %v9325_v21  ;;  %4537 = vmatmul.bf16.gmra.mxu0 %v9325_v21  ;;  %v5000_v24 = vadd.f32 %v9088_v57, %v4915_v44  ;;  %v3268_v12 = vadd.f32 %v3230_v29, %v7906_v55  ;;  %v9533_v55 = vld [vmem:[#allocation2 + $0xb0] sm:$0xff] }
 0x487   :  { %3494 = vmatmul.bf16.gmra.mxu2 %v9325_v21  ;;  %v4150_v21 = vrot.slane %v9337_v46, 2  ;;  %v4672_v46 = vrot.slane %v9468_v23, 3 }
 0x488   :  { %4030 = vmatmul.bf16.gmra.mxu3 %v9481_v37  ;;  %v4309_v18 = vadd.f32 %v4273_v43, %v3787_v32  ;;  %v5081_v62 = vmax.f32 %v5000_v24, 0.0  ;;  %v3107_v32 = vrot.slane %v9466_v22, 1 }
 0x489   :  { %v4272_v48 = vsel %vm4211_vm3, %v4149_v58, %v4150_v21  ;;  %v4794_v56 = vsel %vm4733_vm4, %v4671_v39, %v4672_v46  ;;  %v4151_v58 = vrot.slane %v9358_v33, 2 }
 0x48a   :  { %v3455_v25 = vpop.f32.mrf.mxu2  ;;  %v5648_v1 = vmul.f32 %v5306_v8, %v5081_v62  ;;  %v4831_v35 = vadd.f32 %v4795_v51, %v4309_v18  ;;  %v5316_v8 = vpop.permute.xlu2 %5315  ;;  %v3229_v4 = vsel %vm3168_vm5, %v3106_v42, %v3107_v32 }
 0x48b   :  { %v9493_v60 = vpop.f32.mrf.mxu3  ;;  %v3629_v61 = vrot.slane %v3455_v25, 1  ;;  %v9497_v16 = vpop.f32.mrf.mxu0  ;;  %v4271_v33 = vsel %vm4211_vm3, %v4150_v21, %v4151_v58 }
 0x48c   :  { %v9495_v6 = vpop.f32.mrf.mxu1  ;;  %v6621_v11 = vpack.c.bf16 %v5648_v1, %v5647_v53  ;;  %v4916_v36 = vmul.f32 %v9076_v26, %v4831_v35  ;;  %v4673_v43 = vrot.slane %v9497_v16, 3 }
 0x48d   :  { %v3750_v59 = vsel %vm3168_vm5, %v3628_v28, %v3629_v61  ;;  %v3108_v42 = vrot.slane %v9495_v6, 1 }
 0x48e   :  { %v3788_v19 = vadd.f32 %v3750_v59, %v3267_v9  ;;  %6789 = vst [vmem:[#allocation5 + $0x38] sm:$0xff] %v6621_v11   ;;  %v5001_v28 = vadd.f32 %v9088_v57, %v4916_v36  ;;  %v4793_v21 = vsel %vm4733_vm4, %v4672_v46, %v4673_v43  ;;  %v3269_v11 = vadd.f32 %v3229_v4, %v7924_v38 }
 0x48f   :  { %v3228_v6 = vsel %vm3168_vm5, %v3107_v32, %v3108_v42 }
 0x490   :  { %v4310_v3 = vadd.f32 %v4272_v48, %v3788_v19  ;;  %v5082_v24 = vmax.f32 %v5001_v28, 0.0 }
 0x492   :  { %v3457_v27 = vpop.f32.mrf.mxu2  ;;  %v4832_v41 = vadd.f32 %v4794_v56, %v4310_v3  ;;  %v5649_v53 = vmul.f32 %v5311_v13, %v5082_v24  ;;  %v5321_v24 = vpop.permute.xlu0 %5320 }
 0x493   :  { %v9514_v54 = vpop.f32.mrf.mxu3  ;;  %v3630_v23 = vrot.slane %v3457_v27, 1  ;;  %v9520_v44 = vpop.f32.mrf.mxu0 }
 0x494   :  { %v9518_v20 = vpop.f32.mrf.mxu1  ;;  %v4917_v31 = vmul.f32 %v9076_v26, %v4832_v41  ;;  %v4153_v41 = vrot.slane %v9410_v2, 2 }
 0x495   :  { %v3749_v39 = vsel %vm3168_vm5, %v3629_v61, %v3630_v23  ;;  %v3109_v32 = vrot.slane %v9518_v20, 1  ;;  %v5184_v20 = vld [vmem:[%s10965_s4 + $0x128] sm:$0xff] }
 0x496   :  { %v3789_v49 = vadd.f32 %v3749_v39, %v3268_v12  ;;  %2977 = vmatmul.bf16.gmra.mxu1 %v9377_v47  ;;  %4542 = vmatmul.bf16.gmra.mxu0 %v9377_v47  ;;  %v5002_v22 = vadd.f32 %v9088_v57, %v4917_v31  ;;  %v3270_v12 = vadd.f32 %v3228_v6, %v7936_v0  ;;  %v9585_v0 = vld [vmem:[#allocation2 + $0xb8] sm:$0xff] }
 0x497   :  { %3499 = vmatmul.bf16.gmra.mxu2 %v9377_v47  ;;  %v4152_v47 = vrot.slane %v9389_v15, 2  ;;  %v4674_v15 = vrot.slane %v9520_v44, 3  ;;  %5415 = vperm.xlu1 %6852, %v5184_v20   ;;  %v3227_v13 = vsel %vm3168_vm5, %v3108_v42, %v3109_v32  ;;  %v5331_v20 = vpop.permute.xlu2 %5330 }
 0x498   :  { %4035 = vmatmul.bf16.gmra.mxu3 %v9533_v55  ;;  %v4311_v18 = vadd.f32 %v4271_v33, %v3789_v49  ;;  %v5083_v62 = vmax.f32 %v5002_v22, 0.0  ;;  %v5326_v22 = vpop.permute.xlu1 %5325 }
 0x499   :  { %v4270_v48 = vsel %vm4211_vm3, %v4151_v58, %v4152_v47  ;;  %v4792_v3 = vsel %vm4733_vm4, %v4673_v43, %v4674_v15  ;;  %v4269_v2 = vsel %vm4211_vm3, %v4152_v47, %v4153_v41 }
 0x49a   :  { %v3460_v51 = vpop.f32.mrf.mxu2  ;;  %v5650_v1 = vmul.f32 %v5316_v8, %v5083_v62  ;;  %v4833_v9 = vadd.f32 %v4793_v21, %v4311_v18 }
 0x49b   :  { %v9545_v25 = vpop.f32.mrf.mxu3  ;;  %v3631_v61 = vrot.slane %v3460_v51, 1  ;;  %v9549_v35 = vpop.f32.mrf.mxu0 }
 0x49c   :  { %v9547_v16 = vpop.f32.mrf.mxu1  ;;  %v6626_v59 = vpack.c.bf16 %v5650_v1, %v5649_v53  ;;  %v4918_v36 = vmul.f32 %v9076_v26, %v4833_v9  ;;  %v4675_v43 = vrot.slane %v9549_v35, 3 }
 0x49d   :  { %v3748_v46 = vsel %vm3168_vm5, %v3630_v23, %v3631_v61  ;;  %v3110_v35 = vrot.slane %v9547_v16, 1  ;;  %v5182_v16 = vld [vmem:[%s10965_s4 + $0x118] sm:$0xff] }
 0x49e   :  { %v3790_v19 = vadd.f32 %v3748_v46, %v3269_v11  ;;  %6790 = vst [vmem:[#allocation5 + $0x40] sm:$0xff] %v6626_v59   ;;  %v5003_v58 = vadd.f32 %v9088_v57, %v4918_v36  ;;  %v4791_v18 = vsel %vm4733_vm4, %v4674_v15, %v4675_v43  ;;  %v9613_v59 = vld [vmem:[%s10963_s2] ss:$0 sm:$0xff]  ;;  %5405 = vperm.xlu2 %6853, %v5182_v16  }
 0x49f   :  { %v5187_v46 = vld [vmem:[%s10965_s4 + $0x140] sm:$0xff]  ;;  %v3226_v36 = vsel %vm3168_vm5, %v3109_v32, %v3110_v35 }
 0x4a0   :  { %v4312_v38 = vadd.f32 %v4270_v48, %v3790_v19  ;;  %v5084_v33 = vmax.f32 %v5003_v58, 0.0  ;;  %v5186_v19 = vld [vmem:[%s10965_s4 + $0x138] sm:$0xff]  ;;  %5430 = vperm.xlu1 %6852, %v5187_v46  }
 0x4a1   :  { %5425 = vperm.xlu0 %6851, %v5186_v19  }
 0x4a2   :  { %v3462_v29 = vpop.f32.mrf.mxu2  ;;  %v4834_v27 = vadd.f32 %v4792_v3, %v4312_v38 }
 0x4a3   :  { %v9566_v56 = vpop.f32.mrf.mxu3  ;;  %v3632_v28 = vrot.slane %v3462_v29, 1  ;;  %v9572_v44 = vpop.f32.mrf.mxu0  ;;  %v4155_v29 = vrot.slane %v9462_v30, 2 }
 0x4a4   :  { %v9570_v23 = vpop.f32.mrf.mxu1  ;;  %v4919_v31 = vmul.f32 %v9076_v26, %v4834_v27  ;;  %v9635_v27 = vld [vmem:[%s10964_s3] ss:$0 sm:$0xff] }
 0x4a5   :  { %v3747_v39 = vsel %vm3168_vm5, %v3631_v61, %v3632_v28  ;;  %v3271_v61 = vadd.f32 %v3227_v13, %v7954_v14  ;;  %v3111_v32 = vrot.slane %v9570_v23, 1  ;;  %v4156_v13 = vrot.slane %v9493_v60, 2 }
 0x4a6   :  { %v3791_v49 = vadd.f32 %v3747_v39, %v3270_v12  ;;  %2982 = vmatmul.bf16.gmra.mxu1 %v9429_v5  ;;  %4547 = vmatmul.bf16.gmra.mxu0 %v9429_v5  ;;  %v5004_v26 = vadd.f32 %v9088_v57, %v4919_v31  ;;  %v5651_v57 = vmul.f32 %v5321_v24, %v5084_v33  ;;  %v5190_v33 = vld [vmem:[%s10965_s4 + $0x158] sm:$0xff]  ;;  %v5336_v24 = vpop.permute.xlu0 %5335 }
 0x4a7   :  { %3504 = vmatmul.bf16.gmra.mxu2 %v9429_v5  ;;  %v4154_v5 = vrot.slane %v9441_v7, 2  ;;  %v4676_v7 = vrot.slane %v9572_v44, 3  ;;  %v3272_v12 = vadd.f32 %v3226_v36, %v7972_v34  ;;  %v9653_v34 = vld [vmem:[#allocation2 + $0xc0] sm:$0xff] }
 0x4a8   :  { %4040 = vmatmul.bf16.gmra.mxu3 %v9585_v0  ;;  %v4313_v63 = vadd.f32 %v4269_v2, %v3791_v49  ;;  %v5085_v8 = vmax.f32 %v5004_v26, 0.0  ;;  %v5189_v26 = vld [vmem:[%s10965_s4 + $0x150] sm:$0xff]  ;;  %5445 = vperm.xlu1 %6852, %v5190_v33   ;;  %v5341_v33 = vpop.permute.xlu1 %5340 }
 0x4a9   :  { %v4268_v15 = vsel %vm4211_vm3, %v4153_v41, %v4154_v5  ;;  %v4790_v40 = vsel %vm4733_vm4, %v4675_v43, %v4676_v7  ;;  %v4267_v49 = vsel %vm4211_vm3, %v4154_v5, %v4155_v29  ;;  %5440 = vperm.xlu0 %6851, %v5189_v26  }
 0x4aa   :  { %v3465_v4 = vpop.f32.mrf.mxu2  ;;  %v5652_v47 = vmul.f32 %v5326_v22, %v5085_v8  ;;  %v4835_v1 = vadd.f32 %v4791_v18, %v4313_v63 }
 0x4ab   :  { %v9597_v62 = vpop.f32.mrf.mxu3  ;;  %v3633_v21 = vrot.slane %v3465_v4, 1  ;;  %v9601_v53 = vpop.f32.mrf.mxu0 }
 0x4ac   :  { %v9599_v51 = vpop.f32.mrf.mxu1  ;;  %v6631_v9 = vpack.c.bf16 %v5652_v47, %v5651_v57  ;;  %v4920_v14 = vmul.f32 %v9613_v59, %v4835_v1  ;;  %v4677_v39 = vrot.slane %v9601_v53, 3 }
 0x4ad   :  { %v3746_v11 = vsel %vm3168_vm5, %v3632_v28, %v3633_v21 }
 0x4ae   :  { %v3792_v42 = vadd.f32 %v3746_v11, %v3271_v61  ;;  %6791 = vst [vmem:[#allocation5 + $0x48] sm:$0xff] %v6631_v9   ;;  %v5005_v41 = vadd.f32 %v9635_v27, %v4920_v14  ;;  %v4789_v8 = vsel %vm4733_vm4, %v4676_v7, %v4677_v39  ;;  %v5185_v14 = vld [vmem:[%s10965_s4 + $0x130] sm:$0xff] }
 0x4af   :  { %5420 = vperm.xlu2 %6853, %v5185_v14  }
 0x4b0   :  { %v4314_v48 = vadd.f32 %v4268_v15, %v3792_v42  ;;  %v5086_v2 = vmax.f32 %v5005_v41, 0.0  ;;  %v4266_v42 = vsel %vm4211_vm3, %v4155_v29, %v4156_v13 }
 0x4b2   :  { %v3467_v38 = vpop.f32.mrf.mxu2  ;;  %v4836_v3 = vadd.f32 %v4790_v40, %v4314_v48  ;;  %v5653_v4 = vmul.f32 %v5331_v20, %v5086_v2  ;;  %v5196_v2 = vld [vmem:[%s10965_s4 + $0x188] sm:$0xff] }
 0x4b3   :  { %v9629_v6 = vpop.f32.mrf.mxu3  ;;  %v3634_v58 = vrot.slane %v3467_v38, 1  ;;  %v9640_v44 = vpop.f32.mrf.mxu0  ;;  %v4157_v38 = vrot.slane %v9514_v54, 2 }
 0x4b4   :  { %v9638_v28 = vpop.f32.mrf.mxu1  ;;  %v4921_v31 = vmul.f32 %v9613_v59, %v4836_v3  ;;  %v4678_v60 = vrot.slane %v9640_v44, 3 }
 0x4b5   :  { %v3745_v30 = vsel %vm3168_vm5, %v3633_v21, %v3634_v58  ;;  %v4265_v54 = vsel %vm4211_vm3, %v4156_v13, %v4157_v38 }
 0x4b6   :  { %v3793_v43 = vadd.f32 %v3745_v30, %v3272_v12  ;;  %2987 = vmatmul.bf16.gmra.mxu1 %v9481_v37  ;;  %4552 = vmatmul.bf16.gmra.mxu0 %v9481_v37  ;;  %v5006_v23 = vadd.f32 %v9635_v27, %v4921_v31  ;;  %v4788_v19 = vsel %vm4733_vm4, %v4677_v39, %v4678_v60  ;;  %v3113_v31 = vrot.slane %v9638_v28, 1 }
 0x4b7   :  { %3509 = vmatmul.bf16.gmra.mxu2 %v9481_v37  ;;  %v3225_v37 = vsel %vm3168_vm5, %v3110_v35, %v3111_v32  ;;  %v3112_v35 = vrot.slane %v9599_v51, 1  ;;  %v5192_v51 = vld [vmem:[%s10965_s4 + $0x168] sm:$0xff] }
 0x4b8   :  { %4045 = vmatmul.bf16.gmra.mxu3 %v9653_v34  ;;  %v4315_v22 = vadd.f32 %v4267_v49, %v3793_v43  ;;  %v5087_v63 = vmax.f32 %v5006_v23, 0.0  ;;  %v3273_v61 = vadd.f32 %v3225_v37, %v7996_v50  ;;  %v5193_v50 = vld [vmem:[%s10965_s4 + $0x170] sm:$0xff]  ;;  %5455 = vperm.xlu0 %6851, %v5192_v51   ;;  %v5188_v49 = vld [vmem:[%s10965_s4 + $0x148] sm:$0xff]  ;;  %v5195_v23 = vld [vmem:[%s10965_s4 + $0x180] sm:$0xff] }
 0x4b9   :  { %5460 = vperm.xlu1 %6852, %v5193_v50   ;;  %v3224_v46 = vsel %vm3168_vm5, %v3111_v32, %v3112_v35  ;;  %5435 = vperm.xlu2 %6853, %v5188_v49   ;;  %v3223_v20 = vsel %vm3168_vm5, %v3112_v35, %v3113_v31 }
 0x4ba   :  { %v3470_v5 = vpop.f32.mrf.mxu2  ;;  %v5654_v57 = vmul.f32 %v5336_v24, %v5087_v63  ;;  %v4837_v1 = vadd.f32 %v4789_v8, %v4315_v22  ;;  %v3274_v44 = vadd.f32 %v3224_v46, %v8008_v45  ;;  %v9714_v45 = vld [vmem:[#allocation2 + $0xc8] sm:$0xff]  ;;  %v4158_v22 = vrot.slane %v9545_v25, 2 }
 0x4bb   :  { %v9668_v18 = vpop.f32.mrf.mxu3  ;;  %v3635_v47 = vrot.slane %v3470_v5, 1  ;;  %v9672_v53 = vpop.f32.mrf.mxu0 }
 0x4bc   :  { %v9670_v21 = vpop.f32.mrf.mxu1  ;;  %v6636_v9 = vpack.c.bf16 %v5654_v57, %v5653_v4  ;;  %v4922_v15 = vmul.f32 %v9613_v59, %v4837_v1  ;;  %v4679_v30 = vrot.slane %v9672_v53, 3  ;;  %v3275_v1 = vadd.f32 %v3223_v20, %v8026_v52  ;;  %v5199_v52 = vld [vmem:[%s10965_s4 + $0x1a0] sm:$0xff] }
 0x4bd   :  { %v3744_v7 = vsel %vm3168_vm5, %v3634_v58, %v3635_v47 }
 0x4be   :  { %v3794_v11 = vadd.f32 %v3744_v7, %v3273_v61  ;;  %6792 = vst [vmem:[#allocation5 + $0x50] sm:$0xff] %v6636_v9   ;;  %v5007_v3 = vadd.f32 %v9635_v27, %v4922_v15  ;;  %v4787_v37 = vsel %vm4733_vm4, %v4678_v60, %v4679_v30  ;;  %v3114_v61 = vrot.slane %v9670_v21, 1  ;;  %v5198_v21 = vld [vmem:[%s10965_s4 + $0x198] sm:$0xff] }
 0x4bf   :  { %v4264_v7 = vsel %vm4211_vm3, %v4157_v38, %v4158_v22 }
 0x4c0   :  { %v4316_v16 = vadd.f32 %v4266_v42, %v3794_v11  ;;  %v5088_v43 = vmax.f32 %v5007_v3, 0.0  ;;  %5470 = vperm.xlu0 %6851, %v5195_v23   ;;  %v5191_v42 = vld [vmem:[%s10965_s4 + $0x160] sm:$0xff]  ;;  %v3222_v14 = vsel %vm3168_vm5, %v3113_v31, %v3114_v61 }
 0x4c1   :  { %5475 = vperm.xlu1 %6852, %v5196_v2   ;;  %5450 = vperm.xlu2 %6853, %v5191_v42  }
 0x4c2   :  { %v3472_v48 = vpop.f32.mrf.mxu2  ;;  %v4838_v40 = vadd.f32 %v4788_v19, %v4316_v16  ;;  %v5655_v8 = vmul.f32 %v5341_v33, %v5088_v43  ;;  %v4159_v19 = vrot.slane %v9566_v56, 2  ;;  %v5201_v43 = vld [vmem:[%s10965_s4 + $0x1b0] sm:$0xff]  ;;  %v4160_v33 = vrot.slane %v9597_v62, 2 }
 0x4c3   :  { %v9695_v36 = vpop.f32.mrf.mxu3  ;;  %v3636_v29 = vrot.slane %v3472_v48, 1  ;;  %v9701_v58 = vpop.f32.mrf.mxu0 }
 0x4c4   :  { %v9699_v41 = vpop.f32.mrf.mxu1  ;;  %v4923_v12 = vmul.f32 %v9613_v59, %v4838_v40  ;;  %v4680_v25 = vrot.slane %v9701_v58, 3  ;;  %v4263_v56 = vsel %vm4211_vm3, %v4158_v22, %v4159_v19 }
 0x4c5   :  { %v3743_v32 = vsel %vm3168_vm5, %v3635_v47, %v3636_v29 }
 0x4c6   :  { %v3795_v39 = vadd.f32 %v3743_v32, %v3274_v44  ;;  %2992 = vmatmul.bf16.gmra.mxu1 %v9533_v55  ;;  %4557 = vmatmul.bf16.gmra.mxu0 %v9533_v55  ;;  %v5008_v28 = vadd.f32 %v9635_v27, %v4923_v12  ;;  %v4786_v50 = vsel %vm4733_vm4, %v4679_v30, %v4680_v25  ;;  %v3115_v44 = vrot.slane %v9699_v41, 1 }
 0x4c7   :  { %3514 = vmatmul.bf16.gmra.mxu2 %v9533_v55  ;;  %v5346_v55 = vpop.permute.xlu2 %5345 }
 0x4c8   :  { %4050 = vmatmul.bf16.gmra.mxu3 %v9714_v45  ;;  %v4317_v26 = vadd.f32 %v4265_v54, %v3795_v39  ;;  %v5089_v24 = vmax.f32 %v5008_v28, 0.0  ;;  %5485 = vperm.xlu0 %6851, %v5198_v21   ;;  %v5194_v39 = vld [vmem:[%s10965_s4 + $0x178] sm:$0xff]  ;;  %v5351_v28 = vpop.permute.xlu0 %5350  ;;  %v3221_v2 = vsel %vm3168_vm5, %v3114_v61, %v3115_v44 }
 0x4c9   :  { %5490 = vperm.xlu1 %6852, %v5199_v52   ;;  %v5202_v54 = vld [vmem:[%s10965_s4 + $0x1b8] sm:$0xff]  ;;  %5465 = vperm.xlu2 %6853, %v5194_v39   ;;  %v5207_v39 = vld [vmem:[%s10965_s4 + $0x1e0] sm:$0xff] }
 0x4ca   :  { %v3475_v63 = vpop.f32.mrf.mxu2  ;;  %v5656_v5 = vmul.f32 %v5346_v55, %v5089_v24  ;;  %v4839_v53 = vadd.f32 %v4787_v37, %v4317_v26 }
 0x4cb   :  { %v9732_v13 = vpop.f32.mrf.mxu3  ;;  %v3637_v4 = vrot.slane %v3475_v63, 1  ;;  %v9736_v47 = vpop.f32.mrf.mxu0 }
 0x4cc   :  { %v9734_v57 = vpop.f32.mrf.mxu1  ;;  %v6641_v35 = vpack.c.bf16 %v5656_v5, %v5655_v8  ;;  %v4924_v11 = vmul.f32 %v9613_v59, %v4839_v53  ;;  %v4681_v31 = vrot.slane %v9736_v47, 3 }
 0x4cd   :  { %v3742_v60 = vsel %vm3168_vm5, %v3636_v29, %v3637_v4  ;;  %v3276_v29 = vadd.f32 %v3222_v14, %v8038_v10  ;;  %v9778_v10 = vld [vmem:[#allocation2 + $0xd0] sm:$0xff]  ;;  %v3116_v53 = vrot.slane %v9734_v57, 1 }
 0x4ce   :  { %v3796_v9 = vadd.f32 %v3742_v60, %v3275_v1  ;;  %6793 = vst [vmem:[#allocation5 + $0x58] sm:$0xff] %v6641_v35   ;;  %v5009_v48 = vadd.f32 %v9635_v27, %v4924_v11  ;;  %v4785_v55 = vsel %vm4733_vm4, %v4680_v25, %v4681_v31  ;;  %v4262_v35 = vsel %vm4211_vm3, %v4159_v19, %v4160_v33  ;;  %v5205_v57 = vld [vmem:[%s10965_s4 + $0x1d0] sm:$0xff] }
 0x4cf   :  { %v3220_v42 = vsel %vm3168_vm5, %v3115_v44, %v3116_v53 }
 0x4d0   :  { %v4318_v15 = vadd.f32 %v4264_v7, %v3796_v9  ;;  %v5090_v30 = vmax.f32 %v5009_v48, 0.0  ;;  %5500 = vperm.xlu0 %6851, %v5201_v43   ;;  %v5197_v9 = vld [vmem:[%s10965_s4 + $0x190] sm:$0xff]  ;;  %v5204_v7 = vld [vmem:[%s10965_s4 + $0x1c8] sm:$0xff] }
 0x4d1   :  { %5505 = vperm.xlu1 %6852, %v5202_v54   ;;  %5480 = vperm.xlu2 %6853, %v5197_v9   ;;  %v5361_v54 = vpop.permute.xlu2 %5360 }
 0x4d2   :  { %v3477_v51 = vpop.f32.mrf.mxu2  ;;  %v4840_v46 = vadd.f32 %v4786_v50, %v4318_v15  ;;  %v5657_v24 = vmul.f32 %v5351_v28, %v5090_v30  ;;  %v4161_v50 = vrot.slane %v9629_v6, 2  ;;  %v5200_v30 = vld [vmem:[%s10965_s4 + $0x1a8] sm:$0xff] }
 0x4d3   :  { %v9759_v16 = vpop.f32.mrf.mxu3  ;;  %v3638_v40 = vrot.slane %v3477_v51, 1  ;;  %v9765_v3 = vpop.f32.mrf.mxu0 }
 0x4d4   :  { %v9763_v38 = vpop.f32.mrf.mxu1  ;;  %v4925_v58 = vmul.f32 %v9613_v59, %v4840_v46  ;;  %v4682_v62 = vrot.slane %v9765_v3, 3  ;;  %v4261_v6 = vsel %vm4211_vm3, %v4160_v33, %v4161_v50 }
 0x4d5   :  { %v3741_v12 = vsel %vm3168_vm5, %v3637_v4, %v3638_v40  ;;  %v11167_v4 = vld [vmem:[#allocation61_spill] sm:$0xff] }
 0x4d6   :  { %v3797_v32 = vadd.f32 %v3741_v12, %v3276_v29  ;;  %2997 = vmatmul.bf16.gmra.mxu1 %v9585_v0  ;;  %4562 = vmatmul.bf16.gmra.mxu0 %v9585_v0  ;;  %v5010_v41 = vadd.f32 %v9635_v27, %v4925_v58  ;;  %v3277_v47 = vadd.f32 %v3221_v2, %v11167_v4  ;;  %v3117_v58 = vrot.slane %v9763_v38, 1 }
 0x4d7   :  { %3519 = vmatmul.bf16.gmra.mxu2 %v9585_v0  ;;  %v5356_v0 = vpop.permute.xlu1 %5355  ;;  %v4784_v52 = vsel %vm4733_vm4, %v4681_v31, %v4682_v62 }
 0x4d8   :  { %4055 = vmatmul.bf16.gmra.mxu3 %v9778_v10  ;;  %v4319_v49 = vadd.f32 %v4263_v56, %v3797_v32  ;;  %v5091_v23 = vmax.f32 %v5010_v41, 0.0  ;;  %5515 = vperm.xlu0 %6851, %v5204_v7   ;;  %v9842_v56 = vld [vmem:[#allocation2 + $0xd8] sm:$0xff]  ;;  %v5208_v41 = vld [vmem:[%s10965_s4 + $0x1e8] sm:$0xff]  ;;  %v3219_v28 = vsel %vm3168_vm5, %v3116_v53, %v3117_v58 }
 0x4d9   :  { %5520 = vperm.xlu1 %6852, %v5205_v57   ;;  %5495 = vperm.xlu2 %6853, %v5200_v30   ;;  %v5213_v30 = vld [vmem:[%s10965_s4 + $0x210] sm:$0xff] }
 0x4da   :  { %v3480_v26 = vpop.f32.mrf.mxu2  ;;  %v5658_v22 = vmul.f32 %v5356_v0, %v5091_v23  ;;  %v4841_v5 = vadd.f32 %v4785_v55, %v4319_v49  ;;  %v4162_v49 = vrot.slane %v9668_v18, 2 }
 0x4db   :  { %v9796_v20 = vpop.f32.mrf.mxu3  ;;  %v3639_v37 = vrot.slane %v3480_v26, 1  ;;  %v9800_v8 = vpop.f32.mrf.mxu0 }
 0x4dc   :  { %v9798_v63 = vpop.f32.mrf.mxu1  ;;  %v6646_v1 = vpack.c.bf16 %v5658_v22, %v5657_v24  ;;  %v4926_v60 = vmul.f32 %v9613_v59, %v4841_v5  ;;  %v4683_v12 = vrot.slane %v9800_v8, 3  ;;  %v11169_v5 = vld [vmem:[#allocation63_spill] sm:$0xff] }
 0x4dd   :  { %v3740_v61 = vsel %vm3168_vm5, %v3638_v40, %v3639_v37  ;;  %v11168_v40 = vld [vmem:[#allocation62_spill] sm:$0xff]  ;;  %v3279_v4 = vadd.f32 %v3219_v28, %v11169_v5 }
 0x4de   :  { %v3798_v25 = vadd.f32 %v3740_v61, %v3277_v47  ;;  %6794 = vst [vmem:[#allocation5 + $0x60] sm:$0xff] %v6646_v1   ;;  %v5011_v51 = vadd.f32 %v9635_v27, %v4926_v60  ;;  %v3278_v3 = vadd.f32 %v3220_v42, %v11168_v40  ;;  %v4783_v2 = vsel %vm4733_vm4, %v4682_v62, %v4683_v12  ;;  %v5210_v60 = vld [vmem:[%s10965_s4 + $0x1f8] sm:$0xff] }
 0x4df   :  { %v3118_v47 = vrot.slane %v9798_v63, 1  ;;  %v4260_v61 = vsel %vm4211_vm3, %v4161_v50, %v4162_v49  ;;  %v5211_v63 = vld [vmem:[%s10965_s4 + $0x200] sm:$0xff] }
 0x4e0   :  { %v4320_v11 = vadd.f32 %v4262_v35, %v3798_v25  ;;  %v5092_v32 = vmax.f32 %v5011_v51, 0.0  ;;  %5530 = vperm.xlu0 %6851, %v5207_v39   ;;  %v5203_v35 = vld [vmem:[%s10965_s4 + $0x1c0] sm:$0xff] }
 0x4e1   :  { %5535 = vperm.xlu1 %6852, %v5208_v41   ;;  %5510 = vperm.xlu2 %6853, %v5203_v35   ;;  %v3218_v57 = vsel %vm3168_vm5, %v3117_v58, %v3118_v47  ;;  %v5371_v41 = vpop.permute.xlu1 %5370 }
 0x4e2   :  { %v3482_v21 = vpop.f32.mrf.mxu2  ;;  %v4842_v14 = vadd.f32 %v4784_v52, %v4320_v11  ;;  %v5659_v55 = vmul.f32 %v5361_v54, %v5092_v32  ;;  %v5206_v32 = vld [vmem:[%s10965_s4 + $0x1d8] sm:$0xff] }
 0x4e3   :  { %v9823_v15 = vpop.f32.mrf.mxu3  ;;  %v3640_v46 = vrot.slane %v3482_v21, 1  ;;  %v9829_v48 = vpop.f32.mrf.mxu0  ;;  %v4163_v21 = vrot.slane %v9695_v36, 2 }
 0x4e4   :  { %v9827_v19 = vpop.f32.mrf.mxu1  ;;  %v4927_v29 = vmul.f32 %v9613_v59, %v4842_v14  ;;  %v4684_v18 = vrot.slane %v9829_v48, 3  ;;  %v11170_v48 = vld [vmem:[#allocation64_spill] sm:$0xff] }
 0x4e5   :  { %v3739_v44 = vsel %vm3168_vm5, %v3639_v37, %v3640_v46  ;;  %v3280_v40 = vadd.f32 %v3218_v57, %v11170_v48  ;;  %v4259_v36 = vsel %vm4211_vm3, %v4162_v49, %v4163_v21 }
 0x4e6   :  { %v3799_v31 = vadd.f32 %v3739_v44, %v3278_v3  ;;  %3002 = vmatmul.bf16.gmra.mxu1 %v9653_v34  ;;  %4567 = vmatmul.bf16.gmra.mxu0 %v9653_v34  ;;  %v5012_v38 = vadd.f32 %v9635_v27, %v4927_v29  ;;  %v4782_v7 = vsel %vm4733_vm4, %v4683_v12, %v4684_v18  ;;  %v3119_v29 = vrot.slane %v9827_v19, 1 }
 0x4e7   :  { %3524 = vmatmul.bf16.gmra.mxu2 %v9653_v34  ;;  %v5366_v34 = vpop.permute.xlu0 %5365 }
 0x4e8   :  { %4060 = vmatmul.bf16.gmra.mxu3 %v9842_v56  ;;  %v4321_v43 = vadd.f32 %v4261_v6, %v3799_v31  ;;  %v5093_v0 = vmax.f32 %v5012_v38, 0.0  ;;  %5545 = vperm.xlu0 %6851, %v5210_v60   ;;  %v9906_v6 = vld [vmem:[#allocation2 + $0xe0] sm:$0xff]  ;;  %v5214_v38 = vld [vmem:[%s10965_s4 + $0x218] sm:$0xff]  ;;  %v3217_v54 = vsel %vm3168_vm5, %v3118_v47, %v3119_v29 }
 0x4e9   :  { %5550 = vperm.xlu1 %6852, %v5211_v63   ;;  %5525 = vperm.xlu2 %6853, %v5206_v32   ;;  %v5219_v32 = vld [vmem:[%s10965_s4 + $0x240] sm:$0xff] }
 0x4ea   :  { %v3485_v23 = vpop.f32.mrf.mxu2  ;;  %v5660_v26 = vmul.f32 %v5366_v34, %v5093_v0  ;;  %v4843_v8 = vadd.f32 %v4783_v2, %v4321_v43  ;;  %v4164_v43 = vrot.slane %v9732_v13, 2 }
 0x4eb   :  { %v9860_v33 = vpop.f32.mrf.mxu3  ;;  %v3641_v24 = vrot.slane %v3485_v23, 1  ;;  %v9864_v37 = vpop.f32.mrf.mxu0 }
 0x4ec   :  { %v9862_v22 = vpop.f32.mrf.mxu1  ;;  %v6651_v53 = vpack.c.bf16 %v5660_v26, %v5659_v55  ;;  %v4928_v25 = vmul.f32 %v9613_v59, %v4843_v8  ;;  %v4685_v44 = vrot.slane %v9864_v37, 3  ;;  %v11171_v8 = vld [vmem:[#allocation65_spill] sm:$0xff] }
 0x4ed   :  { %v3738_v62 = vsel %vm3168_vm5, %v3640_v46, %v3641_v24  ;;  %v3281_v5 = vadd.f32 %v3217_v54, %v11171_v8 }
 0x4ee   :  { %v3800_v1 = vadd.f32 %v3738_v62, %v3279_v4  ;;  %6795 = vst [vmem:[#allocation5 + $0x68] sm:$0xff] %v6651_v53   ;;  %v5013_v14 = vadd.f32 %v9635_v27, %v4928_v25  ;;  %v4781_v28 = vsel %vm4733_vm4, %v4684_v18, %v4685_v44  ;;  %v3120_v4 = vrot.slane %v9862_v22, 1  ;;  %v5217_v22 = vld [vmem:[%s10965_s4 + $0x230] sm:$0xff]  ;;  %v5216_v25 = vld [vmem:[%s10965_s4 + $0x228] sm:$0xff] }
 0x4ef   :  { %v4258_v62 = vsel %vm4211_vm3, %v4163_v21, %v4164_v43 }
 0x4f0   :  { %v4322_v9 = vadd.f32 %v4260_v61, %v3800_v1  ;;  %v5094_v31 = vmax.f32 %v5013_v14, 0.0  ;;  %5560 = vperm.xlu0 %6851, %v5213_v30   ;;  %v5209_v61 = vld [vmem:[%s10965_s4 + $0x1f0] sm:$0xff]  ;;  %v3216_v63 = vsel %vm3168_vm5, %v3119_v29, %v3120_v4 }
 0x4f1   :  { %5565 = vperm.xlu1 %6852, %v5214_v38   ;;  %5540 = vperm.xlu2 %6853, %v5209_v61   ;;  %v5381_v38 = vpop.permute.xlu0 %5380 }
 0x4f2   :  { %v3487_v11 = vpop.f32.mrf.mxu2  ;;  %v4844_v52 = vadd.f32 %v4782_v7, %v4322_v9  ;;  %v5661_v2 = vmul.f32 %v5371_v41, %v5094_v31  ;;  %v5212_v31 = vld [vmem:[%s10965_s4 + $0x208] sm:$0xff] }
 0x4f3   :  { %v9887_v42 = vpop.f32.mrf.mxu3  ;;  %v3642_v50 = vrot.slane %v3487_v11, 1  ;;  %v9893_v46 = vpop.f32.mrf.mxu0  ;;  %v4165_v11 = vrot.slane %v9759_v16, 2 }
 0x4f4   :  { %v9891_v51 = vpop.f32.mrf.mxu1  ;;  %v4929_v3 = vmul.f32 %v9613_v59, %v4844_v52  ;;  %v4686_v13 = vrot.slane %v9893_v46, 3  ;;  %v11172_v46 = vld [vmem:[#allocation66_spill] sm:$0xff] }
 0x4f5   :  { %v3737_v58 = vsel %vm3168_vm5, %v3641_v24, %v3642_v50  ;;  %v3282_v48 = vadd.f32 %v3216_v63, %v11172_v46  ;;  %v4257_v16 = vsel %vm4211_vm3, %v4164_v43, %v4165_v11 }
 0x4f6   :  { %v3801_v12 = vadd.f32 %v3737_v58, %v3280_v40  ;;  %3007 = vmatmul.bf16.gmra.mxu1 %v9714_v45  ;;  %4572 = vmatmul.bf16.gmra.mxu0 %v9714_v45  ;;  %v5014_v19 = vadd.f32 %v9635_v27, %v4929_v3  ;;  %v4780_v60 = vsel %vm4733_vm4, %v4685_v44, %v4686_v13  ;;  %v3121_v3 = vrot.slane %v9891_v51, 1 }
 0x4f7   :  { %3529 = vmatmul.bf16.gmra.mxu2 %v9714_v45  ;;  %v5376_v45 = vpop.permute.xlu2 %5375 }
 0x4f8   :  { %4065 = vmatmul.bf16.gmra.mxu3 %v9906_v6  ;;  %v4323_v39 = vadd.f32 %v4259_v36, %v3801_v12  ;;  %v5095_v34 = vmax.f32 %v5014_v19, 0.0  ;;  %5575 = vperm.xlu0 %6851, %v5216_v25   ;;  %v9970_v36 = vld [vmem:[#allocation2 + $0xe8] sm:$0xff]  ;;  %v3215_v41 = vsel %vm3168_vm5, %v3120_v4, %v3121_v3 }
 0x4f9   :  { %5580 = vperm.xlu1 %6852, %v5217_v22   ;;  %v5220_v19 = vld [vmem:[%s10965_s4 + $0x248] sm:$0xff]  ;;  %5555 = vperm.xlu2 %6853, %v5212_v31   ;;  %v5225_v31 = vld [vmem:[%s10965_s4 + $0x270] sm:$0xff] }
 0x4fa   :  { %v3490_v0 = vpop.f32.mrf.mxu2  ;;  %v5662_v23 = vmul.f32 %v5376_v45, %v5095_v34  ;;  %v4845_v37 = vadd.f32 %v4781_v28, %v4323_v39  ;;  %v4166_v39 = vrot.slane %v9796_v20, 2 }
 0x4fb   :  { %v9924_v49 = vpop.f32.mrf.mxu3  ;;  %v3643_v55 = vrot.slane %v3490_v0, 1  ;;  %v9928_v24 = vpop.f32.mrf.mxu0 }
 0x4fc   :  { %v9926_v26 = vpop.f32.mrf.mxu1  ;;  %v6656_v47 = vpack.c.bf16 %v5662_v23, %v5661_v2  ;;  %v4930_v1 = vmul.f32 %v9613_v59, %v4845_v37  ;;  %v4687_v58 = vrot.slane %v9928_v24, 3  ;;  %v11173_v37 = vld [vmem:[#allocation67_spill] sm:$0xff] }
 0x4fd   :  { %v3736_v18 = vsel %vm3168_vm5, %v3642_v50, %v3643_v55  ;;  %v3283_v8 = vadd.f32 %v3215_v41, %v11173_v37 }
 0x4fe   :  { %v3802_v53 = vadd.f32 %v3736_v18, %v3281_v5  ;;  %6796 = vst [vmem:[#allocation5 + $0x70] sm:$0xff] %v6656_v47   ;;  %v5015_v52 = vadd.f32 %v9635_v27, %v4930_v1  ;;  %v4779_v54 = vsel %vm4733_vm4, %v4686_v13, %v4687_v58  ;;  %v3122_v5 = vrot.slane %v9926_v26, 1  ;;  %v5223_v26 = vld [vmem:[%s10965_s4 + $0x260] sm:$0xff]  ;;  %v5222_v1 = vld [vmem:[%s10965_s4 + $0x258] sm:$0xff] }
 0x4ff   :  { %v4256_v18 = vsel %vm4211_vm3, %v4165_v11, %v4166_v39 }
 0x500   :  { %v4324_v35 = vadd.f32 %v4258_v62, %v3802_v53  ;;  %v5096_v12 = vmax.f32 %v5015_v52, 0.0  ;;  %5590 = vperm.xlu0 %6851, %v5219_v32   ;;  %v5215_v62 = vld [vmem:[%s10965_s4 + $0x220] sm:$0xff]  ;;  %v3214_v22 = vsel %vm3168_vm5, %v3121_v3, %v3122_v5 }
 0x501   :  { %5595 = vperm.xlu1 %6852, %v5220_v19   ;;  %5570 = vperm.xlu2 %6853, %v5215_v62   ;;  %v5391_v19 = vpop.permute.xlu2 %5390 }
 0x502   :  { %v3492_v9 = vpop.f32.mrf.mxu2  ;;  %v4846_v7 = vadd.f32 %v4780_v60, %v4324_v35  ;;  %v5663_v28 = vmul.f32 %v5381_v38, %v5096_v12  ;;  %v5218_v12 = vld [vmem:[%s10965_s4 + $0x238] sm:$0xff] }
 0x503   :  { %v9951_v57 = vpop.f32.mrf.mxu3  ;;  %v3644_v21 = vrot.slane %v3492_v9, 1  ;;  %v9957_v50 = vpop.f32.mrf.mxu0  ;;  %v4167_v9 = vrot.slane %v9823_v15, 2 }
 0x504   :  { %v9955_v14 = vpop.f32.mrf.mxu1  ;;  %v4931_v40 = vmul.f32 %v9613_v59, %v4846_v7  ;;  %v4688_v20 = vrot.slane %v9957_v50, 3  ;;  %v11174_v50 = vld [vmem:[#allocation68_spill] sm:$0xff] }
 0x505   :  { %v3735_v29 = vsel %vm3168_vm5, %v3643_v55, %v3644_v21  ;;  %v3284_v46 = vadd.f32 %v3214_v22, %v11174_v50  ;;  %v4255_v15 = vsel %vm4211_vm3, %v4166_v39, %v4167_v9  ;;  %v4169_v22 = vrot.slane %v9887_v42, 2 }
 0x506   :  { %v3803_v44 = vadd.f32 %v3735_v29, %v3282_v48  ;;  %3012 = vmatmul.bf16.gmra.mxu1 %v9778_v10  ;;  %4577 = vmatmul.bf16.gmra.mxu0 %v9778_v10  ;;  %v5016_v51 = vadd.f32 %v9635_v27, %v4931_v40  ;;  %v4778_v25 = vsel %vm4733_vm4, %v4687_v58, %v4688_v20  ;;  %v3123_v40 = vrot.slane %v9955_v14, 1 }
 0x507   :  { %3534 = vmatmul.bf16.gmra.mxu2 %v9778_v10  ;;  %v5386_v10 = vpop.permute.xlu1 %5385 }
 0x508   :  { %4070 = vmatmul.bf16.gmra.mxu3 %v9970_v36  ;;  %v4325_v30 = vadd.f32 %v4257_v16, %v3803_v44  ;;  %v5097_v45 = vmax.f32 %v5016_v51, 0.0  ;;  %5605 = vperm.xlu0 %6851, %v5222_v1   ;;  %v10034_v16 = vld [vmem:[#allocation2 + $0xf0] sm:$0xff]  ;;  %v5226_v51 = vld [vmem:[%s10965_s4 + $0x278] sm:$0xff]  ;;  %v3213_v38 = vsel %vm3168_vm5, %v3122_v5, %v3123_v40 }
 0x509   :  { %5610 = vperm.xlu1 %6852, %v5223_v26   ;;  %5585 = vperm.xlu2 %6853, %v5218_v12  }
 0x50a   :  { %v3495_v34 = vpop.f32.mrf.mxu2  ;;  %v5664_v0 = vmul.f32 %v5386_v10, %v5097_v45  ;;  %v4847_v24 = vadd.f32 %v4779_v54, %v4325_v30  ;;  %v4168_v30 = vrot.slane %v9860_v33, 2 }
 0x50b   :  { %v9988_v43 = vpop.f32.mrf.mxu3  ;;  %v3645_v2 = vrot.slane %v3495_v34, 1  ;;  %v9992_v55 = vpop.f32.mrf.mxu0 }
 0x50c   :  { %v9990_v23 = vpop.f32.mrf.mxu1  ;;  %v6661_v4 = vpack.c.bf16 %v5664_v0, %v5663_v28  ;;  %v4932_v53 = vmul.f32 %v9613_v59, %v4847_v24  ;;  %v4689_v29 = vrot.slane %v9992_v55, 3  ;;  %v11175_v24 = vld [vmem:[#allocation69_spill] sm:$0xff]  ;;  %v4253_v42 = vsel %vm4211_vm3, %v4168_v30, %v4169_v22 }
 0x50d   :  { %v3734_v13 = vsel %vm3168_vm5, %v3644_v21, %v3645_v2  ;;  %v3285_v37 = vadd.f32 %v3213_v38, %v11175_v24 }
 0x50e   :  { %v3804_v47 = vadd.f32 %v3734_v13, %v3283_v8  ;;  %6797 = vst [vmem:[#allocation5 + $0x78] sm:$0xff] %v6661_v4   ;;  %v5017_v7 = vadd.f32 %v9635_v27, %v4932_v53  ;;  %v4777_v41 = vsel %vm4733_vm4, %v4688_v20, %v4689_v29  ;;  %v3124_v8 = vrot.slane %v9990_v23, 1 }
 0x50f   :  { %v4254_v13 = vsel %vm4211_vm3, %v4167_v9, %v4168_v30 }
 0x510   :  { %v4326_v61 = vadd.f32 %v4256_v18, %v3804_v47  ;;  %v5098_v44 = vmax.f32 %v5017_v7, 0.0  ;;  %5620 = vperm.xlu0 %6851, %v5225_v31   ;;  %v5221_v18 = vld [vmem:[%s10965_s4 + $0x250] sm:$0xff]  ;;  %v3212_v23 = vsel %vm3168_vm5, %v3123_v40, %v3124_v8  ;;  %v11176_v7 = vld [vmem:[#allocation70_spill] sm:$0xff] }
 0x511   :  { %5625 = vperm.xlu1 %6852, %v5226_v51   ;;  %5600 = vperm.xlu2 %6853, %v5221_v18   ;;  %v4171_v18 = vrot.slane %v9951_v57, 2 }
 0x512   :  { %v3497_v35 = vpop.f32.mrf.mxu2  ;;  %v4848_v60 = vadd.f32 %v4778_v25, %v4326_v61  ;;  %v5665_v54 = vmul.f32 %v5391_v19, %v5098_v44  ;;  %v5406_v44 = vpop.permute.xlu2 %5405 }
 0x513   :  { %v10015_v63 = vpop.f32.mrf.mxu3  ;;  %v3646_v11 = vrot.slane %v3497_v35, 1  ;;  %v10021_v21 = vpop.f32.mrf.mxu0 }
 0x514   :  { %v10019_v52 = vpop.f32.mrf.mxu1  ;;  %v4933_v48 = vmul.f32 %v9613_v59, %v4848_v60  ;;  %v4690_v33 = vrot.slane %v10021_v21, 3 }
 0x515   :  { %v3733_v3 = vsel %vm3168_vm5, %v3645_v2, %v3646_v11  ;;  %v3125_v50 = vrot.slane %v10019_v52, 1 }
 0x516   :  { %v3805_v58 = vadd.f32 %v3733_v3, %v3284_v46  ;;  %3017 = vmatmul.bf16.gmra.mxu1 %v9842_v56  ;;  %4582 = vmatmul.bf16.gmra.mxu0 %v9842_v56  ;;  %v5018_v14 = vadd.f32 %v9635_v27, %v4933_v48  ;;  %v4776_v62 = vsel %vm4733_vm4, %v4689_v29, %v4690_v33  ;;  %v10092_v29 = vld [vmem:[#allocation2 + $0xf8] sm:$0xff] }
 0x517   :  { %3539 = vmatmul.bf16.gmra.mxu2 %v9842_v56  ;;  %v5396_v56 = vpop.permute.xlu0 %5395  ;;  %v3211_v12 = vsel %vm3168_vm5, %v3124_v8, %v3125_v50 }
 0x518   :  { %4075 = vmatmul.bf16.gmra.mxu3 %v10034_v16  ;;  %v4327_v32 = vadd.f32 %v4255_v15, %v3805_v58  ;;  %v5099_v10 = vmax.f32 %v5018_v14, 0.0  ;;  %v5224_v58 = vld [vmem:[%s10965_s4 + $0x268] sm:$0xff]  ;;  %v5401_v15 = vpop.permute.xlu1 %5400 }
 0x519   :  { %5615 = vperm.xlu2 %6853, %v5224_v58  }
 0x51a   :  { %v3500_v45 = vpop.f32.mrf.mxu2  ;;  %v5666_v34 = vmul.f32 %v5396_v56, %v5099_v10  ;;  %v4849_v55 = vadd.f32 %v4777_v41, %v4327_v32 }
 0x51b   :  { %v10052_v39 = vpop.f32.mrf.mxu3  ;;  %v3647_v28 = vrot.slane %v3500_v45, 1  ;;  %v10056_v2 = vpop.f32.mrf.mxu0 }
 0x51c   :  { %v10054_v0 = vpop.f32.mrf.mxu1  ;;  %v6666_v5 = vpack.c.bf16 %v5666_v34, %v5665_v54  ;;  %v4934_v47 = vmul.f32 %v9613_v59, %v4849_v55  ;;  %v4691_v48 = vrot.slane %v10056_v2, 3  ;;  %v11177_v54 = vld [vmem:[#allocation71_spill] sm:$0xff] }
 0x51d   :  { %v3732_v20 = vsel %vm3168_vm5, %v3646_v11, %v3647_v28  ;;  %v3286_v11 = vadd.f32 %v3212_v23, %v11176_v7  ;;  %v3287_v34 = vadd.f32 %v3211_v12, %v11177_v54 }
 0x51e   :  { %v3806_v4 = vadd.f32 %v3732_v20, %v3285_v37  ;;  %6798 = vst [vmem:[#allocation5 + $0x80] sm:$0xff] %v6666_v5   ;;  %v5019_v25 = vadd.f32 %v9635_v27, %v4934_v47  ;;  %v4775_v31 = vsel %vm4733_vm4, %v4690_v33, %v4691_v48  ;;  %v5227_v33 = vld [vmem:[%s10965_s4 + $0x280] sm:$0xff] }
 0x520   :  { %v4328_v53 = vadd.f32 %v4254_v13, %v3806_v4  ;;  %v5100_v3 = vmax.f32 %v5019_v25, 0.0 }
 0x521   :  { %5630 = vperm.xlu2 %6853, %v5227_v33  }
 0x522   :  { %v3502_v26 = vpop.f32.mrf.mxu2  ;;  %v4850_v61 = vadd.f32 %v4776_v62, %v4328_v53  ;;  %v5667_v32 = vmul.f32 %v5401_v15, %v5100_v3 }
 0x523   :  { %v10073_v1 = vpop.f32.mrf.mxu3  ;;  %v3648_v35 = vrot.slane %v3502_v26, 1  ;;  %v10079_v9 = vpop.f32.mrf.mxu0 }
 0x524   :  { %v10077_v60 = vpop.f32.mrf.mxu1  ;;  %v4935_v21 = vmul.f32 %v9613_v59, %v4850_v61  ;;  %v11178_v61 = vld [vmem:[#allocation72_spill] sm:$0xff] }
 0x525   :  { %v3731_v46 = vsel %vm3168_vm5, %v3647_v28, %v3648_v35  ;;  %v3126_v28 = vrot.slane %v10054_v0, 1 }
 0x526   :  { %v3807_v40 = vadd.f32 %v3731_v46, %v3286_v11  ;;  %3022 = vmatmul.bf16.gmra.mxu1 %v9906_v6  ;;  %4587 = vmatmul.bf16.gmra.mxu0 %v9906_v6  ;;  %v5020_v52 = vadd.f32 %v9635_v27, %v4935_v21 }
 0x527   :  { %3544 = vmatmul.bf16.gmra.mxu2 %v9906_v6  ;;  %v4170_v6 = vrot.slane %v9924_v49, 2  ;;  %v4692_v49 = vrot.slane %v10079_v9, 3  ;;  %v3210_v0 = vsel %vm3168_vm5, %v3125_v50, %v3126_v28  ;;  %v10144_v50 = vld [vmem:[#allocation2 + $0x100] sm:$0xff] }
 0x528   :  { %4080 = vmatmul.bf16.gmra.mxu3 %v10092_v29  ;;  %v4329_v14 = vadd.f32 %v4253_v42, %v3807_v40  ;;  %v5101_v51 = vmax.f32 %v5020_v52, 0.0 }
 0x529   :  { %v4252_v37 = vsel %vm4211_vm3, %v4169_v22, %v4170_v6  ;;  %v4774_v20 = vsel %vm4733_vm4, %v4691_v48, %v4692_v49  ;;  %v3288_v22 = vadd.f32 %v3210_v0, %v11178_v61  ;;  %v4251_v57 = vsel %vm4211_vm3, %v4170_v6, %v4171_v18  ;;  %v5416_v48 = vpop.permute.xlu1 %5415 }
 0x52a   :  { %v3505_v19 = vpop.f32.mrf.mxu2  ;;  %v5668_v38 = vmul.f32 %v5406_v44, %v5101_v51  ;;  %v4851_v45 = vadd.f32 %v4775_v31, %v4329_v14  ;;  %v11179_v31 = vld [vmem:[#allocation73_spill] sm:$0xff] }
 0x52b   :  { %v10104_v56 = vpop.f32.mrf.mxu3  ;;  %v3649_v10 = vrot.slane %v3505_v19, 1  ;;  %v10108_v41 = vpop.f32.mrf.mxu0 }
 0x52c   :  { %v10106_v30 = vpop.f32.mrf.mxu1  ;;  %v6671_v2 = vpack.c.bf16 %v5668_v38, %v5667_v32  ;;  %v4936_v8 = vmul.f32 %v9613_v59, %v4851_v45  ;;  %v4693_v9 = vrot.slane %v10108_v41, 3 }
 0x52d   :  { %v3730_v55 = vsel %vm3168_vm5, %v3648_v35, %v3649_v10  ;;  %v3127_v35 = vrot.slane %v10077_v60, 1  ;;  %v5411_v60 = vpop.permute.xlu0 %5410  ;;  %v3128_v32 = vrot.slane %v10106_v30, 1 }
 0x52e   :  { %v3808_v24 = vadd.f32 %v3730_v55, %v3287_v34  ;;  %6799 = vst [vmem:[#allocation5 + $0x88] sm:$0xff] %v6671_v2   ;;  %v5021_v53 = vadd.f32 %v9635_v27, %v4936_v8  ;;  %v4773_v42 = vsel %vm4733_vm4, %v4692_v49, %v4693_v9  ;;  %v4173_v8 = vrot.slane %v10015_v63, 2  ;;  %v10193_v63 = vld [vmem:[%s10964_s3] ss:$0 sm:$0xff] }
 0x52f   :  { %v3209_v40 = vsel %vm3168_vm5, %v3126_v28, %v3127_v35  ;;  %v3208_v30 = vsel %vm3168_vm5, %v3127_v35, %v3128_v32 }
 0x530   :  { %v4330_v5 = vadd.f32 %v4252_v37, %v3808_v24  ;;  %v5102_v21 = vmax.f32 %v5021_v53, 0.0  ;;  %v3289_v19 = vadd.f32 %v3209_v40, %v11179_v31  ;;  %v4174_v40 = vrot.slane %v10052_v39, 2 }
 0x532   :  { %v3507_v4 = vpop.f32.mrf.mxu2  ;;  %v4852_v47 = vadd.f32 %v4774_v20, %v4330_v5  ;;  %v5669_v44 = vmul.f32 %v5411_v60, %v5102_v21  ;;  %v11180_v20 = vld [vmem:[#allocation74_spill] sm:$0xff]  ;;  %v4248_v39 = vsel %vm4211_vm3, %v4173_v8, %v4174_v40 }
 0x533   :  { %v10125_v13 = vpop.f32.mrf.mxu3  ;;  %v3650_v23 = vrot.slane %v3507_v4, 1  ;;  %v10131_v26 = vpop.f32.mrf.mxu0  ;;  %v3290_v4 = vadd.f32 %v3208_v30, %v11180_v20 }
 0x534   :  { %v10129_v62 = vpop.f32.mrf.mxu1  ;;  %v4937_v25 = vmul.f32 %v9613_v59, %v4852_v47  ;;  %v4694_v38 = vrot.slane %v10131_v26, 3 }
 0x535   :  { %v3729_v7 = vsel %vm3168_vm5, %v3649_v10, %v3650_v23 }
 0x536   :  { %v3809_v11 = vadd.f32 %v3729_v7, %v3288_v22  ;;  %3027 = vmatmul.bf16.gmra.mxu1 %v9970_v36  ;;  %4592 = vmatmul.bf16.gmra.mxu0 %v9970_v36  ;;  %v5022_v59 = vadd.f32 %v9635_v27, %v4937_v25  ;;  %v4772_v49 = vsel %vm4733_vm4, %v4693_v9, %v4694_v38  ;;  %v5421_v7 = vpop.permute.xlu2 %5420 }
 0x537   :  { %3549 = vmatmul.bf16.gmra.mxu2 %v9970_v36  ;;  %v4172_v36 = vrot.slane %v9988_v43, 2  ;;  %v10167_v43 = vld [vmem:[%s10963_s2] ss:$0 sm:$0xff] }
 0x538   :  { %4085 = vmatmul.bf16.gmra.mxu3 %v10144_v50  ;;  %v4331_v46 = vadd.f32 %v4251_v57, %v3809_v11  ;;  %v5103_v3 = vmax.f32 %v5022_v59, 0.0  ;;  %v5426_v57 = vpop.permute.xlu0 %5425 }
 0x539   :  { %v4250_v34 = vsel %vm4211_vm3, %v4171_v18, %v4172_v36  ;;  %v3129_v18 = vrot.slane %v10129_v62, 1  ;;  %v4249_v22 = vsel %vm4211_vm3, %v4172_v36, %v4173_v8  ;;  %v10200_v62 = vld [vmem:[#allocation2 + $0x108] sm:$0xff] }
 0x53a   :  { %v4853_v52 = vadd.f32 %v4773_v42, %v4331_v46  ;;  %v3510_v58 = vpop.f32.mrf.mxu2  ;;  %v5670_v14 = vmul.f32 %v5416_v48, %v5103_v3 }
 0x53b   :  { %v10152_v15 = vpop.f32.mrf.mxu3  ;;  %v3651_v12 = vrot.slane %v3510_v58, 1  ;;  %v10157_v6 = vpop.f32.mrf.mxu0  ;;  %v3207_v9 = vsel %vm3168_vm5, %v3128_v32, %v3129_v18 }
 0x53c   :  { %v10155_v51 = vpop.f32.mrf.mxu1  ;;  %v6676_v10 = vpack.c.bf16 %v5670_v14, %v5669_v44  ;;  %v4938_v45 = vmul.f32 %v10167_v43, %v4853_v52  ;;  %v4695_v53 = vrot.slane %v10157_v6, 3  ;;  %v11181_v52 = vld [vmem:[#allocation43_spill] sm:$0xff] }
 0x53d   :  { %v3728_v41 = vsel %vm3168_vm5, %v3650_v23, %v3651_v12  ;;  %v3291_v58 = vadd.f32 %v3207_v9, %v11181_v52  ;;  %v3130_v44 = vrot.slane %v10155_v51, 1 }
 0x53e   :  { %v3810_v54 = vadd.f32 %v3728_v41, %v3289_v19  ;;  %6800 = vst [vmem:[#allocation5 + $0x90] sm:$0xff] %v6676_v10   ;;  %v5023_v2 = vadd.f32 %v9635_v27, %v4938_v45  ;;  %v4771_v11 = vsel %vm4733_vm4, %v4694_v38, %v4695_v53 }
 0x53f   :  { %v3206_v32 = vsel %vm3168_vm5, %v3129_v18, %v3130_v44 }
 0x540   :  { %v4332_v28 = vadd.f32 %v4250_v34, %v3810_v54  ;;  %v5104_v23 = vmax.f32 %v5023_v2, 0.0  ;;  %v4175_v54 = vrot.slane %v10073_v1, 2 }
 0x542   :  { %v4854_v55 = vadd.f32 %v4772_v49, %v4332_v28  ;;  %v3512_v24 = vpop.f32.mrf.mxu2  ;;  %v5671_v21 = vmul.f32 %v5421_v7, %v5104_v23  ;;  %v11182_v49 = vld [vmem:[#allocation46_spill] sm:$0xff]  ;;  %v4176_v7 = vrot.slane %v10104_v56, 2 }
 0x543   :  { %v10177_v37 = vpop.f32.mrf.mxu3  ;;  %v3652_v33 = vrot.slane %v3512_v24, 1  ;;  %v10182_v0 = vpop.f32.mrf.mxu0  ;;  %v3292_v2 = vadd.f32 %v3206_v32, %v11182_v49 }
 0x544   :  { %v10180_v5 = vpop.f32.mrf.mxu1  ;;  %v4939_v47 = vmul.f32 %v10167_v43, %v4854_v55  ;;  %v4696_v14 = vrot.slane %v10182_v0, 3  ;;  %v4246_v56 = vsel %vm4211_vm3, %v4175_v54, %v4176_v7 }
 0x545   :  { %v3727_v27 = vsel %vm3168_vm5, %v3651_v12, %v3652_v33  ;;  %v3131_v24 = vrot.slane %v10180_v5, 1 }
 0x546   :  { %v5024_v26 = vadd.f32 %v10193_v63, %v4939_v47  ;;  %v3811_v61 = vadd.f32 %v3727_v27, %v3290_v4  ;;  %3032 = vmatmul.bf16.gmra.mxu1 %v10034_v16  ;;  %4597 = vmatmul.bf16.gmra.mxu0 %v10034_v16  ;;  %v4770_v38 = vsel %vm4733_vm4, %v4695_v53, %v4696_v14  ;;  %v10246_v47 = vld [vmem:[#allocation2 + $0x110] sm:$0xff]  ;;  %v5436_v53 = vpop.permute.xlu2 %5435  ;;  %v5431_v27 = vpop.permute.xlu1 %5430 }
 0x547   :  { %3554 = vmatmul.bf16.gmra.mxu2 %v10034_v16  ;;  %v4247_v4 = vsel %vm4211_vm3, %v4174_v40, %v4175_v54  ;;  %v3205_v23 = vsel %vm3168_vm5, %v3130_v44, %v3131_v24 }
 0x548   :  { %4090 = vmatmul.bf16.gmra.mxu3 %v10200_v62  ;;  %v5105_v25 = vmax.f32 %v5024_v26, 0.0  ;;  %v4333_v35 = vadd.f32 %v4249_v22, %v3811_v61 }
 0x54a   :  { %v5672_v59 = vmul.f32 %v5426_v57, %v5105_v25  ;;  %v4855_v60 = vadd.f32 %v4771_v11, %v4333_v35  ;;  %v3515_v46 = vpop.f32.mrf.mxu2 }
 0x54b   :  { %v10208_v48 = vpop.f32.mrf.mxu3  ;;  %v3653_v42 = vrot.slane %v3515_v46, 1  ;;  %v10213_v16 = vpop.f32.mrf.mxu0 }
 0x54c   :  { %v10211_v3 = vpop.f32.mrf.mxu1  ;;  %v6681_v36 = vpack.c.bf16 %v5672_v59, %v5671_v21  ;;  %v4940_v6 = vmul.f32 %v10167_v43, %v4855_v60  ;;  %v4697_v8 = vrot.slane %v10213_v16, 3  ;;  %v11183_v21 = vld [vmem:[#allocation48_spill] sm:$0xff] }
 0x54d   :  { %v3726_v12 = vsel %vm3168_vm5, %v3652_v33, %v3653_v42  ;;  %v3293_v59 = vadd.f32 %v3205_v23, %v11183_v21  ;;  %v3132_v46 = vrot.slane %v10211_v3, 1 }
 0x54e   :  { %6801 = vst [vmem:[#allocation5 + $0x98] sm:$0xff] %v6681_v36   ;;  %v3812_v31 = vadd.f32 %v3726_v12, %v3291_v58  ;;  %v5025_v51 = vadd.f32 %v10193_v63, %v4940_v6  ;;  %v4769_v26 = vsel %vm4733_vm4, %v4696_v14, %v4697_v8 }
 0x54f   :  { %v3204_v36 = vsel %vm3168_vm5, %v3131_v24, %v3132_v46 }
 0x550   :  { %v4334_v19 = vadd.f32 %v4248_v39, %v3812_v31  ;;  %v5106_v0 = vmax.f32 %v5025_v51, 0.0  ;;  %v4177_v31 = vrot.slane %v10125_v13, 2 }
 0x552   :  { %v4856_v10 = vadd.f32 %v4770_v38, %v4334_v19  ;;  %v3517_v41 = vpop.f32.mrf.mxu2  ;;  %v5673_v61 = vmul.f32 %v5431_v27, %v5106_v0  ;;  %v11184_v38 = vld [vmem:[#allocation51_spill] sm:$0xff]  ;;  %v4178_v27 = vrot.slane %v10152_v15, 2 }
 0x553   :  { %v10228_v45 = vpop.f32.mrf.mxu3  ;;  %v3654_v34 = vrot.slane %v3517_v41, 1  ;;  %v10233_v30 = vpop.f32.mrf.mxu0  ;;  %v3294_v51 = vadd.f32 %v3204_v36, %v11184_v38 }
 0x554   :  { %v10231_v28 = vpop.f32.mrf.mxu1  ;;  %v4941_v55 = vmul.f32 %v10167_v43, %v4856_v10  ;;  %v4698_v40 = vrot.slane %v10233_v30, 3  ;;  %v4244_v15 = vsel %vm4211_vm3, %v4177_v31, %v4178_v27 }
 0x555   :  { %v3725_v33 = vsel %vm3168_vm5, %v3653_v42, %v3654_v34  ;;  %v3133_v41 = vrot.slane %v10231_v28, 1 }
 0x556   :  { %v5026_v20 = vadd.f32 %v10193_v63, %v4941_v55  ;;  %v3813_v1 = vadd.f32 %v3725_v33, %v3292_v2  ;;  %3037 = vmatmul.bf16.gmra.mxu1 %v10092_v29  ;;  %4602 = vmatmul.bf16.gmra.mxu0 %v10092_v29  ;;  %v4768_v44 = vsel %vm4733_vm4, %v4697_v8, %v4698_v40  ;;  %v10292_v55 = vld [vmem:[#allocation2 + $0x118] sm:$0xff]  ;;  %v5446_v8 = vpop.permute.xlu1 %5445  ;;  %v5441_v33 = vpop.permute.xlu0 %5440 }
 0x557   :  { %3559 = vmatmul.bf16.gmra.mxu2 %v10092_v29  ;;  %v4245_v2 = vsel %vm4211_vm3, %v4176_v7, %v4177_v31  ;;  %v3203_v0 = vsel %vm3168_vm5, %v3132_v46, %v3133_v41 }
 0x558   :  { %4095 = vmatmul.bf16.gmra.mxu3 %v10246_v47  ;;  %v5107_v5 = vmax.f32 %v5026_v20, 0.0  ;;  %v4335_v18 = vadd.f32 %v4247_v4, %v3813_v1 }
 0x55a   :  { %v5674_v22 = vmul.f32 %v5436_v53, %v5107_v5  ;;  %v4857_v25 = vadd.f32 %v4769_v26, %v4335_v18  ;;  %v3520_v35 = vpop.f32.mrf.mxu2 }
 0x55b   :  { %v10254_v9 = vpop.f32.mrf.mxu3  ;;  %v3655_v11 = vrot.slane %v3520_v35, 1  ;;  %v10259_v29 = vpop.f32.mrf.mxu0 }
 0x55c   :  { %v10257_v57 = vpop.f32.mrf.mxu1  ;;  %v6686_v60 = vpack.c.bf16 %v5674_v22, %v5673_v61  ;;  %v4942_v16 = vmul.f32 %v10167_v43, %v4857_v25  ;;  %v4699_v54 = vrot.slane %v10259_v29, 3  ;;  %v11185_v61 = vld [vmem:[#allocation50_spill] sm:$0xff] }
 0x55d   :  { %v3724_v42 = vsel %vm3168_vm5, %v3654_v34, %v3655_v11  ;;  %v3295_v22 = vadd.f32 %v3203_v0, %v11185_v61  ;;  %v3134_v35 = vrot.slane %v10257_v57, 1 }
 0x55e   :  { %6802 = vst [vmem:[#allocation5 + $0xa0] sm:$0xff] %v6686_v60   ;;  %v3814_v52 = vadd.f32 %v3724_v42, %v3293_v59  ;;  %v5027_v3 = vadd.f32 %v10193_v63, %v4942_v16  ;;  %v4767_v20 = vsel %vm4733_vm4, %v4698_v40, %v4699_v54 }
 0x55f   :  { %v3202_v60 = vsel %vm3168_vm5, %v3133_v41, %v3134_v35 }
 0x560   :  { %v4336_v58 = vadd.f32 %v4246_v56, %v3814_v52  ;;  %v5108_v30 = vmax.f32 %v5027_v3, 0.0  ;;  %v4179_v52 = vrot.slane %v10177_v37, 2 }
 0x562   :  { %v4858_v14 = vadd.f32 %v4768_v44, %v4336_v58  ;;  %v3522_v12 = vpop.f32.mrf.mxu2  ;;  %v5675_v1 = vmul.f32 %v5441_v33, %v5108_v30  ;;  %v11186_v44 = vld [vmem:[#allocation9_spill] sm:$0xff]  ;;  %v4180_v33 = vrot.slane %v10208_v48, 2 }
 0x563   :  { %v10274_v6 = vpop.f32.mrf.mxu3  ;;  %v3656_v39 = vrot.slane %v3522_v12, 1  ;;  %v10279_v32 = vpop.f32.mrf.mxu0  ;;  %v3296_v3 = vadd.f32 %v3202_v60, %v11186_v44 }
 0x564   :  { %v10277_v19 = vpop.f32.mrf.mxu1  ;;  %v4943_v10 = vmul.f32 %v10167_v43, %v4858_v14  ;;  %v4700_v7 = vrot.slane %v10279_v32, 3  ;;  %v4242_v48 = vsel %vm4211_vm3, %v4179_v52, %v4180_v33 }
 0x565   :  { %v3723_v34 = vsel %vm3168_vm5, %v3655_v11, %v3656_v39  ;;  %v3135_v12 = vrot.slane %v10277_v19, 1 }
 0x566   :  { %v5028_v49 = vadd.f32 %v10193_v63, %v4943_v10  ;;  %v3815_v13 = vadd.f32 %v3723_v34, %v3294_v51  ;;  %3042 = vmatmul.bf16.gmra.mxu1 %v10144_v50  ;;  %4607 = vmatmul.bf16.gmra.mxu0 %v10144_v50  ;;  %v4766_v46 = vsel %vm4733_vm4, %v4699_v54, %v4700_v7  ;;  %v10338_v10 = vld [vmem:[#allocation2 + $0x120] sm:$0xff]  ;;  %v5451_v54 = vpop.permute.xlu2 %5450  ;;  %v5456_v34 = vpop.permute.xlu0 %5455 }
 0x567   :  { %3564 = vmatmul.bf16.gmra.mxu2 %v10144_v50  ;;  %v4243_v51 = vsel %vm4211_vm3, %v4178_v27, %v4179_v52  ;;  %v3201_v30 = vsel %vm3168_vm5, %v3134_v35, %v3135_v12 }
 0x568   :  { %4100 = vmatmul.bf16.gmra.mxu3 %v10292_v55  ;;  %v5109_v28 = vmax.f32 %v5028_v49, 0.0  ;;  %v4337_v24 = vadd.f32 %v4245_v2, %v3815_v13 }
 0x56a   :  { %v5676_v4 = vmul.f32 %v5446_v8, %v5109_v28  ;;  %v4859_v5 = vadd.f32 %v4767_v20, %v4337_v24  ;;  %v3525_v18 = vpop.f32.mrf.mxu2 }
 0x56b   :  { %v10300_v53 = vpop.f32.mrf.mxu3  ;;  %v3657_v23 = vrot.slane %v3525_v18, 1  ;;  %v10305_v50 = vpop.f32.mrf.mxu0 }
 0x56c   :  { %v10303_v26 = vpop.f32.mrf.mxu1  ;;  %v6691_v25 = vpack.c.bf16 %v5676_v4, %v5675_v1  ;;  %v4944_v29 = vmul.f32 %v10167_v43, %v4859_v5  ;;  %v4701_v31 = vrot.slane %v10305_v50, 3  ;;  %v11187_v1 = vld [vmem:[#allocation11_spill] sm:$0xff] }
 0x56d   :  { %v3722_v11 = vsel %vm3168_vm5, %v3656_v39, %v3657_v23  ;;  %v3297_v4 = vadd.f32 %v3201_v30, %v11187_v1  ;;  %v3136_v18 = vrot.slane %v10303_v26, 1 }
 0x56e   :  { %6803 = vst [vmem:[#allocation5 + $0xa8] sm:$0xff] %v6691_v25   ;;  %v3816_v21 = vadd.f32 %v3722_v11, %v3295_v22  ;;  %v5029_v57 = vadd.f32 %v10193_v63, %v4944_v29  ;;  %v4765_v49 = vsel %vm4733_vm4, %v4700_v7, %v4701_v31 }
 0x56f   :  { %v3200_v25 = vsel %vm3168_vm5, %v3135_v12, %v3136_v18 }
 0x570   :  { %v4338_v59 = vadd.f32 %v4244_v15, %v3816_v21  ;;  %v5110_v32 = vmax.f32 %v5029_v57, 0.0  ;;  %v4181_v21 = vrot.slane %v10228_v45, 2 }
 0x572   :  { %v4860_v40 = vadd.f32 %v4766_v46, %v4338_v59  ;;  %v3527_v42 = vpop.f32.mrf.mxu2  ;;  %v5677_v13 = vmul.f32 %v5451_v54, %v5110_v32  ;;  %v11188_v46 = vld [vmem:[#allocation13_spill] sm:$0xff] }
 0x573   :  { %v10320_v16 = vpop.f32.mrf.mxu3  ;;  %v3658_v56 = vrot.slane %v3527_v42, 1  ;;  %v10325_v36 = vpop.f32.mrf.mxu0  ;;  %v3298_v57 = vadd.f32 %v3200_v25, %v11188_v46 }
 0x574   :  { %v10323_v58 = vpop.f32.mrf.mxu1  ;;  %v4945_v14 = vmul.f32 %v10167_v43, %v4860_v40  ;;  %v4702_v27 = vrot.slane %v10325_v36, 3 }
 0x575   :  { %v3721_v39 = vsel %vm3168_vm5, %v3657_v23, %v3658_v56  ;;  %v3137_v42 = vrot.slane %v10323_v58, 1 }
 0x576   :  { %v5030_v38 = vadd.f32 %v10193_v63, %v4945_v14  ;;  %v3817_v37 = vadd.f32 %v3721_v39, %v3296_v3  ;;  %3047 = vmatmul.bf16.gmra.mxu1 %v10200_v62  ;;  %4612 = vmatmul.bf16.gmra.mxu0 %v10200_v62  ;;  %v4764_v35 = vsel %vm4733_vm4, %v4701_v31, %v4702_v27  ;;  %v10384_v14 = vld [vmem:[#allocation2 + $0x128] sm:$0xff]  ;;  %v5466_v31 = vpop.permute.xlu2 %5465  ;;  %v5461_v39 = vpop.permute.xlu1 %5460 }
 0x577   :  { %3569 = vmatmul.bf16.gmra.mxu2 %v10200_v62  ;;  %v4241_v3 = vsel %vm4211_vm3, %v4180_v33, %v4181_v21  ;;  %v3199_v32 = vsel %vm3168_vm5, %v3136_v18, %v3137_v42 }
 0x578   :  { %4105 = vmatmul.bf16.gmra.mxu3 %v10338_v10  ;;  %v5111_v19 = vmax.f32 %v5030_v38, 0.0  ;;  %v4339_v41 = vadd.f32 %v4243_v51, %v3817_v37 }
 0x57a   :  { %v5678_v2 = vmul.f32 %v5456_v34, %v5111_v19  ;;  %v4861_v28 = vadd.f32 %v4765_v49, %v4339_v41  ;;  %v3530_v24 = vpop.f32.mrf.mxu2  ;;  %v4182_v34 = vrot.slane %v10254_v9, 2 }
 0x57b   :  { %v10346_v8 = vpop.f32.mrf.mxu3  ;;  %v3659_v0 = vrot.slane %v3530_v24, 1  ;;  %v10351_v62 = vpop.f32.mrf.mxu0 }
 0x57c   :  { %v10349_v20 = vpop.f32.mrf.mxu1  ;;  %v6696_v5 = vpack.c.bf16 %v5678_v2, %v5677_v13  ;;  %v4946_v50 = vmul.f32 %v10167_v43, %v4861_v28  ;;  %v4703_v52 = vrot.slane %v10351_v62, 3  ;;  %v11189_v13 = vld [vmem:[#allocation15_spill] sm:$0xff]  ;;  %v4240_v9 = vsel %vm4211_vm3, %v4181_v21, %v4182_v34 }
 0x57d   :  { %v3720_v23 = vsel %vm3168_vm5, %v3658_v56, %v3659_v0  ;;  %v3299_v2 = vadd.f32 %v3199_v32, %v11189_v13  ;;  %v3138_v24 = vrot.slane %v10349_v20, 1 }
 0x57e   :  { %6804 = vst [vmem:[#allocation5 + $0xb0] sm:$0xff] %v6696_v5   ;;  %v3818_v61 = vadd.f32 %v3720_v23, %v3297_v4  ;;  %v5031_v26 = vadd.f32 %v10193_v63, %v4946_v50  ;;  %v4763_v38 = vsel %vm4733_vm4, %v4702_v27, %v4703_v52 }
 0x57f   :  { %v3198_v5 = vsel %vm3168_vm5, %v3137_v42, %v3138_v24 }
 0x580   :  { %v4340_v22 = vadd.f32 %v4242_v48, %v3818_v61  ;;  %v5112_v36 = vmax.f32 %v5031_v26, 0.0  ;;  %v4183_v61 = vrot.slane %v10274_v6, 2 }
 0x582   :  { %v4862_v7 = vadd.f32 %v4764_v35, %v4340_v22  ;;  %v3532_v11 = vpop.f32.mrf.mxu2  ;;  %v5679_v37 = vmul.f32 %v5461_v39, %v5112_v36  ;;  %v11190_v35 = vld [vmem:[#allocation17_spill] sm:$0xff]  ;;  %v4184_v39 = vrot.slane %v10300_v53, 2 }
 0x583   :  { %v10366_v29 = vpop.f32.mrf.mxu3  ;;  %v3660_v15 = vrot.slane %v3532_v11, 1  ;;  %v10371_v60 = vpop.f32.mrf.mxu0  ;;  %v3300_v26 = vadd.f32 %v3198_v5, %v11190_v35 }
 0x584   :  { %v10369_v59 = vpop.f32.mrf.mxu1  ;;  %v4947_v40 = vmul.f32 %v10167_v43, %v4862_v7  ;;  %v4704_v33 = vrot.slane %v10371_v60, 3  ;;  %v4238_v53 = vsel %vm4211_vm3, %v4183_v61, %v4184_v39 }
 0x585   :  { %v3719_v56 = vsel %vm3168_vm5, %v3659_v0, %v3660_v15  ;;  %v3139_v11 = vrot.slane %v10369_v59, 1 }
 0x586   :  { %v5032_v44 = vadd.f32 %v10193_v63, %v4947_v40  ;;  %v3819_v45 = vadd.f32 %v3719_v56, %v3298_v57  ;;  %3052 = vmatmul.bf16.gmra.mxu1 %v10246_v47  ;;  %4617 = vmatmul.bf16.gmra.mxu0 %v10246_v47  ;;  %v4762_v18 = vsel %vm4733_vm4, %v4703_v52, %v4704_v33  ;;  %v10430_v40 = vld [vmem:[#allocation2 + $0x130] sm:$0xff]  ;;  %v5476_v52 = vpop.permute.xlu1 %5475  ;;  %v5471_v56 = vpop.permute.xlu0 %5470 }
 0x587   :  { %3574 = vmatmul.bf16.gmra.mxu2 %v10246_v47  ;;  %v4239_v57 = vsel %vm4211_vm3, %v4182_v34, %v4183_v61  ;;  %v3197_v36 = vsel %vm3168_vm5, %v3138_v24, %v3139_v11 }
 0x588   :  { %4110 = vmatmul.bf16.gmra.mxu3 %v10384_v14  ;;  %v5113_v58 = vmax.f32 %v5032_v44, 0.0  ;;  %v4341_v12 = vadd.f32 %v4241_v3, %v3819_v45 }
 0x58a   :  { %v5680_v51 = vmul.f32 %v5466_v31, %v5113_v58  ;;  %v4863_v19 = vadd.f32 %v4763_v38, %v4341_v12  ;;  %v3535_v41 = vpop.f32.mrf.mxu2 }
 0x58b   :  { %v10392_v54 = vpop.f32.mrf.mxu3  ;;  %v3661_v30 = vrot.slane %v3535_v41, 1  ;;  %v10397_v47 = vpop.f32.mrf.mxu0 }
 0x58c   :  { %v10395_v49 = vpop.f32.mrf.mxu1  ;;  %v6701_v28 = vpack.c.bf16 %v5680_v51, %v5679_v37  ;;  %v4948_v62 = vmul.f32 %v10167_v43, %v4863_v19  ;;  %v4705_v21 = vrot.slane %v10397_v47, 3  ;;  %v11191_v37 = vld [vmem:[#allocation19_spill] sm:$0xff] }
 0x58d   :  { %v3718_v0 = vsel %vm3168_vm5, %v3660_v15, %v3661_v30  ;;  %v3301_v51 = vadd.f32 %v3197_v36, %v11191_v37  ;;  %v3140_v41 = vrot.slane %v10395_v49, 1 }
 0x58e   :  { %6805 = vst [vmem:[#allocation5 + $0xb8] sm:$0xff] %v6701_v28   ;;  %v3820_v1 = vadd.f32 %v3718_v0, %v3299_v2  ;;  %v5033_v20 = vadd.f32 %v10193_v63, %v4948_v62  ;;  %v4761_v44 = vsel %vm4733_vm4, %v4704_v33, %v4705_v21 }
 0x58f   :  { %v3196_v28 = vsel %vm3168_vm5, %v3139_v11, %v3140_v41 }
 0x590   :  { %v4342_v4 = vadd.f32 %v4240_v9, %v3820_v1  ;;  %v5114_v60 = vmax.f32 %v5033_v20, 0.0  ;;  %v4185_v1 = vrot.slane %v10320_v16, 2 }
 0x592   :  { %v4864_v27 = vadd.f32 %v4762_v18, %v4342_v4  ;;  %v3537_v23 = vpop.f32.mrf.mxu2  ;;  %v5681_v45 = vmul.f32 %v5471_v56, %v5114_v60  ;;  %v11192_v18 = vld [vmem:[#allocation21_spill] sm:$0xff]  ;;  %v4186_v56 = vrot.slane %v10346_v8, 2 }
 0x593   :  { %v10412_v50 = vpop.f32.mrf.mxu3  ;;  %v3662_v48 = vrot.slane %v3537_v23, 1  ;;  %v10417_v25 = vpop.f32.mrf.mxu0  ;;  %v3302_v20 = vadd.f32 %v3196_v28, %v11192_v18 }
 0x594   :  { %v10415_v22 = vpop.f32.mrf.mxu1  ;;  %v4949_v7 = vmul.f32 %v10167_v43, %v4864_v27  ;;  %v4706_v34 = vrot.slane %v10417_v25, 3  ;;  %v4236_v8 = vsel %vm4211_vm3, %v4185_v1, %v4186_v56 }
 0x595   :  { %v3717_v15 = vsel %vm3168_vm5, %v3661_v30, %v3662_v48  ;;  %v3141_v23 = vrot.slane %v10415_v22, 1 }
 0x596   :  { %v5034_v46 = vadd.f32 %v10193_v63, %v4949_v7  ;;  %v3821_v6 = vadd.f32 %v3717_v15, %v3300_v26  ;;  %3057 = vmatmul.bf16.gmra.mxu1 %v10292_v55  ;;  %4622 = vmatmul.bf16.gmra.mxu0 %v10292_v55  ;;  %v4760_v24 = vsel %vm4733_vm4, %v4705_v21, %v4706_v34  ;;  %v10476_v7 = vld [vmem:[#allocation2 + $0x138] sm:$0xff]  ;;  %v5481_v21 = vpop.permute.xlu2 %5480  ;;  %v5486_v15 = vpop.permute.xlu0 %5485 }
 0x597   :  { %3579 = vmatmul.bf16.gmra.mxu2 %v10292_v55  ;;  %v4237_v26 = vsel %vm4211_vm3, %v4184_v39, %v4185_v1  ;;  %v3195_v60 = vsel %vm3168_vm5, %v3140_v41, %v3141_v23 }
 0x598   :  { %4115 = vmatmul.bf16.gmra.mxu3 %v10430_v40  ;;  %v5115_v59 = vmax.f32 %v5034_v46, 0.0  ;;  %v4343_v42 = vadd.f32 %v4239_v57, %v3821_v6 }
 0x59a   :  { %v5682_v3 = vmul.f32 %v5476_v52, %v5115_v59  ;;  %v4865_v58 = vadd.f32 %v4761_v44, %v4343_v42  ;;  %v3540_v12 = vpop.f32.mrf.mxu2 }
 0x59b   :  { %v10438_v31 = vpop.f32.mrf.mxu3  ;;  %v3663_v32 = vrot.slane %v3540_v12, 1  ;;  %v10443_v55 = vpop.f32.mrf.mxu0 }
 0x59c   :  { %v10441_v38 = vpop.f32.mrf.mxu1  ;;  %v6706_v19 = vpack.c.bf16 %v5682_v3, %v5681_v45  ;;  %v4950_v47 = vmul.f32 %v10167_v43, %v4865_v58  ;;  %v4707_v61 = vrot.slane %v10443_v55, 3  ;;  %v11193_v45 = vld [vmem:[#allocation23_spill] sm:$0xff] }
 0x59d   :  { %v3716_v30 = vsel %vm3168_vm5, %v3662_v48, %v3663_v32  ;;  %v3303_v3 = vadd.f32 %v3195_v60, %v11193_v45  ;;  %v3142_v12 = vrot.slane %v10441_v38, 1 }
 0x59e   :  { %6806 = vst [vmem:[#allocation5 + $0xc0] sm:$0xff] %v6706_v19   ;;  %v3822_v13 = vadd.f32 %v3716_v30, %v3301_v51  ;;  %v5035_v49 = vadd.f32 %v10193_v63, %v4950_v47  ;;  %v4759_v46 = vsel %vm4733_vm4, %v4706_v34, %v4707_v61 }
 0x59f   :  { %v3194_v19 = vsel %vm3168_vm5, %v3141_v23, %v3142_v12 }
 0x5a0   :  { %v4344_v2 = vadd.f32 %v4238_v53, %v3822_v13  ;;  %v5116_v25 = vmax.f32 %v5035_v49, 0.0  ;;  %v4187_v13 = vrot.slane %v10366_v29, 2 }
 0x5a2   :  { %v4866_v33 = vadd.f32 %v4760_v24, %v4344_v2  ;;  %v3542_v0 = vpop.f32.mrf.mxu2  ;;  %v5683_v6 = vmul.f32 %v5481_v21, %v5116_v25  ;;  %v11194_v24 = vld [vmem:[#allocation25_spill] sm:$0xff]  ;;  %v4235_v29 = vsel %vm4211_vm3, %v4186_v56, %v4187_v13 }
 0x5a3   :  { %v10458_v62 = vpop.f32.mrf.mxu3  ;;  %v3664_v9 = vrot.slane %v3542_v0, 1  ;;  %v10463_v5 = vpop.f32.mrf.mxu0  ;;  %v3304_v49 = vadd.f32 %v3194_v19, %v11194_v24  ;;  %v11197_v19 = vld [vmem:[#allocation29_spill] sm:$0xff] }
 0x5a4   :  { %v10461_v4 = vpop.f32.mrf.mxu1  ;;  %v4951_v27 = vmul.f32 %v10167_v43, %v4866_v33  ;;  %v4708_v39 = vrot.slane %v10463_v5, 3 }
 0x5a5   :  { %v3715_v48 = vsel %vm3168_vm5, %v3663_v32, %v3664_v9  ;;  %v3143_v0 = vrot.slane %v10461_v4, 1  ;;  %v5496_v4 = vpop.permute.xlu2 %5495 }
 0x5a6   :  { %v5036_v35 = vadd.f32 %v10193_v63, %v4951_v27  ;;  %v3823_v16 = vadd.f32 %v3715_v48, %v3302_v20  ;;  %3062 = vmatmul.bf16.gmra.mxu1 %v10338_v10  ;;  %4627 = vmatmul.bf16.gmra.mxu0 %v10338_v10  ;;  %v4758_v41 = vsel %vm4733_vm4, %v4707_v61, %v4708_v39  ;;  %v11195_v27 = vld [vmem:[#allocation8_spill] sm:$0xff]  ;;  %v5491_v48 = vpop.permute.xlu1 %5490 }
 0x5a7   :  { %3584 = vmatmul.bf16.gmra.mxu2 %v10338_v10  ;;  %v3193_v25 = vsel %vm3168_vm5, %v3142_v12, %v3143_v0 }
 0x5a8   :  { %4120 = vmatmul.bf16.gmra.mxu3 %v10476_v7  ;;  %v5117_v22 = vmax.f32 %v5036_v35, 0.0  ;;  %v4345_v11 = vadd.f32 %v4237_v26, %v3823_v16 }
 0x5aa   :  { %v5684_v57 = vmul.f32 %v5486_v15, %v5117_v22  ;;  %v4867_v59 = vadd.f32 %v4759_v46, %v4345_v11  ;;  %v3545_v42 = vpop.f32.mrf.mxu2  ;;  %v4188_v15 = vrot.slane %v10392_v54, 2 }
 0x5ab   :  { %v10484_v52 = vpop.f32.mrf.mxu3  ;;  %v3665_v36 = vrot.slane %v3545_v42, 1  ;;  %v4590_v10 = vpop.f32.mrf.mxu0 }
 0x5ac   :  { %v10487_v44 = vpop.f32.mrf.mxu1  ;;  %v6711_v58 = vpack.c.bf16 %v5684_v57, %v5683_v6  ;;  %v4952_v55 = vmul.f32 %v10167_v43, %v4867_v59  ;;  %v4709_v1 = vrot.slane %v4590_v10, 3  ;;  %v11196_v6 = vld [vmem:[#allocation27_spill] sm:$0xff]  ;;  %v4234_v54 = vsel %vm4211_vm3, %v4187_v13, %v4188_v15 }
 0x5ad   :  { %v3714_v32 = vsel %vm3168_vm5, %v3664_v9, %v3665_v36  ;;  %v3305_v57 = vadd.f32 %v3193_v25, %v11196_v6  ;;  %v3144_v42 = vrot.slane %v10487_v44, 1 }
 0x5ae   :  { %6807 = vst [vmem:[#allocation5 + $0xc8] sm:$0xff] %v6711_v58   ;;  %v3824_v37 = vadd.f32 %v3714_v32, %v3303_v3  ;;  %v5037_v38 = vadd.f32 %v10193_v63, %v4952_v55  ;;  %v4757_v35 = vsel %vm4733_vm4, %v4708_v39, %v4709_v1 }
 0x5af   :  { %v3192_v58 = vsel %vm3168_vm5, %v3143_v0, %v3144_v42 }
 0x5b0   :  { %v4346_v51 = vadd.f32 %v4236_v8, %v3824_v37  ;;  %v5118_v5 = vmax.f32 %v5037_v38, 0.0  ;;  %v4189_v37 = vrot.slane %v10412_v50, 2 }
 0x5b2   :  { %v4868_v34 = vadd.f32 %v4758_v41, %v4346_v51  ;;  %v3547_v30 = vpop.f32.mrf.mxu2  ;;  %v5685_v16 = vmul.f32 %v5491_v48, %v5118_v5  ;;  %v3306_v41 = vadd.f32 %v3192_v58, %v11197_v19  ;;  %v4233_v50 = vsel %vm4211_vm3, %v4188_v15, %v4189_v37 }
 0x5b3   :  { %v10502_v47 = vpop.f32.mrf.mxu3  ;;  %v3666_v53 = vrot.slane %v3547_v30, 1  ;;  %v10507_v28 = vpop.f32.mrf.mxu0 }
 0x5b4   :  { %v10505_v2 = vpop.f32.mrf.mxu1  ;;  %v4953_v33 = vmul.f32 %v10167_v43, %v4868_v34  ;;  %v4710_v56 = vrot.slane %v10507_v28, 3 }
 0x5b5   :  { %v3713_v9 = vsel %vm3168_vm5, %v3665_v36, %v3666_v53  ;;  %v3145_v34 = vrot.slane %v10505_v2, 1  ;;  %v5506_v2 = vpop.permute.xlu1 %5505 }
 0x5b6   :  { %v5038_v18 = vadd.f32 %v10193_v63, %v4953_v33  ;;  %v3825_v20 = vadd.f32 %v3713_v9, %v3304_v49  ;;  %3067 = vmatmul.bf16.gmra.mxu1 %v10384_v14  ;;  %4632 = vmatmul.bf16.gmra.mxu0 %v10384_v14  ;;  %v4756_v12 = vsel %vm4733_vm4, %v4709_v1, %v4710_v56  ;;  %v5501_v1 = vpop.permute.xlu0 %5500 }
 0x5b7   :  { %3589 = vmatmul.bf16.gmra.mxu2 %v10384_v14  ;;  %v3191_v9 = vsel %vm3168_vm5, %v3144_v42, %v3145_v34 }
 0x5b8   :  { %4125 = vmatmul.bf16.gmra.mxu3 %v11195_v27  ;;  %v5119_v23 = vmax.f32 %v5038_v18, 0.0  ;;  %v4347_v61 = vadd.f32 %v4235_v29, %v3825_v20 }
 0x5ba   :  { %v5686_v26 = vmul.f32 %v5496_v4, %v5119_v23  ;;  %v4869_v22 = vadd.f32 %v4757_v35, %v4347_v61  ;;  %v3550_v11 = vpop.f32.mrf.mxu2  ;;  %v4190_v4 = vrot.slane %v10438_v31, 2 }
 0x5bb   :  { %v10525_v21 = vpop.f32.mrf.mxu3  ;;  %v3667_v60 = vrot.slane %v3550_v11, 1  ;;  %v4595_v14 = vpop.f32.mrf.mxu0 }
 0x5bc   :  { %v10528_v46 = vpop.f32.mrf.mxu1  ;;  %v6716_v59 = vpack.c.bf16 %v5686_v26, %v5685_v16  ;;  %v4954_v10 = vmul.f32 %v10167_v43, %v4869_v22  ;;  %v4711_v30 = vrot.slane %v4595_v14, 3  ;;  %v4232_v31 = vsel %vm4211_vm3, %v4189_v37, %v4190_v4 }
 0x5bd   :  { %v3712_v36 = vsel %vm3168_vm5, %v3666_v53, %v3667_v60  ;;  %v3146_v26 = vrot.slane %v10528_v46, 1 }
 0x5be   :  { %6808 = vst [vmem:[#allocation5 + $0xd0] sm:$0xff] %v6716_v59   ;;  %v3826_v45 = vadd.f32 %v3712_v36, %v3305_v57  ;;  %v5039_v44 = vadd.f32 %v10193_v63, %v4954_v10  ;;  %v4755_v5 = vsel %vm4733_vm4, %v4710_v56, %v4711_v30  ;;  %v4191_v10 = vrot.slane %v10458_v62, 2 }
 0x5bf   :  { %v3190_v57 = vsel %vm3168_vm5, %v3145_v34, %v3146_v26 }
 0x5c0   :  { %v4348_v3 = vadd.f32 %v4234_v54, %v3826_v45  ;;  %v5120_v28 = vmax.f32 %v5039_v44, 0.0  ;;  %v4231_v62 = vsel %vm4211_vm3, %v4190_v4, %v4191_v10 }
 0x5c2   :  { %v4870_v39 = vadd.f32 %v4756_v12, %v4348_v3  ;;  %v3552_v32 = vpop.f32.mrf.mxu2  ;;  %v5687_v18 = vmul.f32 %v5501_v1, %v5120_v28  ;;  %v11199_v3 = vld [vmem:[#allocation33_spill] sm:$0xff] }
 0x5c3   :  { %v10543_v55 = vpop.f32.mrf.mxu3  ;;  %v3668_v8 = vrot.slane %v3552_v32, 1  ;;  %v4598_v53 = vpop.f32.mrf.mxu0  ;;  %v3308_v58 = vadd.f32 %v3190_v57, %v11199_v3 }
 0x5c4   :  { %v10546_v51 = vpop.f32.mrf.mxu1  ;;  %v4955_v38 = vmul.f32 %v10167_v43, %v4870_v39  ;;  %v4712_v22 = vrot.slane %v4598_v53, 3 }
 0x5c5   :  { %v3711_v13 = vsel %vm3168_vm5, %v3667_v60, %v3668_v8  ;;  %v3147_v44 = vrot.slane %v10546_v51, 1  ;;  %v5511_v51 = vpop.permute.xlu2 %5510 }
 0x5c6   :  { %v5040_v24 = vadd.f32 %v10193_v63, %v4955_v38  ;;  %v3827_v49 = vadd.f32 %v3711_v13, %v3306_v41  ;;  %3072 = vmatmul.bf16.gmra.mxu1 %v10430_v40  ;;  %4637 = vmatmul.bf16.gmra.mxu0 %v10430_v40  ;;  %v4754_v59 = vsel %vm4733_vm4, %v4711_v30, %v4712_v22  ;;  %v5516_v30 = vpop.permute.xlu0 %5515 }
 0x5c7   :  { %3594 = vmatmul.bf16.gmra.mxu2 %v10430_v40  ;;  %v11198_v40 = vld [vmem:[#allocation31_spill] sm:$0xff]  ;;  %v3189_v13 = vsel %vm3168_vm5, %v3146_v26, %v3147_v44 }
 0x5c8   :  { %v5121_v33 = vmax.f32 %v5040_v24, 0.0  ;;  %v4349_v0 = vadd.f32 %v4233_v50, %v3827_v49  ;;  %v3307_v35 = vadd.f32 %v3191_v9, %v11198_v40 }
 0x5ca   :  { %v5688_v20 = vmul.f32 %v5506_v2, %v5121_v33  ;;  %v4871_v29 = vadd.f32 %v4755_v5, %v4349_v0  ;;  %v3555_v23 = vpop.f32.mrf.mxu2  ;;  %v4192_v0 = vrot.slane %v10484_v52, 2 }
 0x5cb   :  { %v10563_v61 = vpop.f32.mrf.mxu3  ;;  %v3669_v48 = vrot.slane %v3555_v23, 1  ;;  %v4600_v15 = vpop.f32.mrf.mxu0 }
 0x5cc   :  { %v10566_v25 = vpop.f32.mrf.mxu1  ;;  %v6721_v16 = vpack.c.bf16 %v5688_v20, %v5687_v18  ;;  %v4956_v60 = vmul.f32 %v10167_v43, %v4871_v29  ;;  %v4713_v39 = vrot.slane %v4600_v15, 3  ;;  %v4230_v52 = vsel %vm4211_vm3, %v4191_v10, %v4192_v0 }
 0x5cd   :  { %v3710_v11 = vsel %vm3168_vm5, %v3668_v8, %v3669_v48  ;;  %v3148_v18 = vrot.slane %v10566_v25, 1  ;;  %v4193_v15 = vrot.slane %v10502_v47, 2 }
 0x5ce   :  { %6809 = vst [vmem:[#allocation5 + $0xd8] sm:$0xff] %v6721_v16   ;;  %v3828_v14 = vadd.f32 %v3710_v11, %v3307_v35  ;;  %v5041_v46 = vadd.f32 %v10193_v63, %v4956_v60  ;;  %v4753_v53 = vsel %vm4733_vm4, %v4712_v22, %v4713_v39 }
 0x5cf   :  { %v3188_v35 = vsel %vm3168_vm5, %v3147_v44, %v3148_v18  ;;  %v4229_v47 = vsel %vm4211_vm3, %v4192_v0, %v4193_v15 }
 0x5d0   :  { %v4350_v6 = vadd.f32 %v4232_v31, %v3828_v14  ;;  %v5122_v8 = vmax.f32 %v5041_v46, 0.0  ;;  %v11201_v31 = vld [vmem:[#allocation38_spill] sm:$0xff] }
 0x5d2   :  { %v4872_v42 = vadd.f32 %v4754_v59, %v4350_v6  ;;  %v3557_v56 = vpop.f32.mrf.mxu2  ;;  %v5689_v28 = vmul.f32 %v5511_v51, %v5122_v8  ;;  %v3310_v6 = vadd.f32 %v3188_v35, %v11201_v31 }
 0x5d3   :  { %v10580_v36 = vpop.f32.mrf.mxu3  ;;  %v3670_v45 = vrot.slane %v3557_v56, 1  ;;  %v4603_v37 = vpop.f32.mrf.mxu0 }
 0x5d4   :  { %v10583_v54 = vpop.f32.mrf.mxu1  ;;  %v4957_v12 = vmul.f32 %v10167_v43, %v4872_v42  ;;  %v4714_v20 = vrot.slane %v4603_v37, 3 }
 0x5d5   :  { %v3709_v32 = vsel %vm3168_vm5, %v3669_v48, %v3670_v45  ;;  %v3149_v59 = vrot.slane %v10583_v54, 1  ;;  %v5526_v54 = vpop.permute.xlu2 %5525 }
 0x5d6   :  { %v5042_v19 = vadd.f32 %v10193_v63, %v4957_v12  ;;  %v3829_v41 = vadd.f32 %v3709_v32, %v3308_v58  ;;  %3077 = vmatmul.bf16.gmra.mxu1 %v10476_v7  ;;  %4642 = vmatmul.bf16.gmra.mxu0 %v10476_v7  ;;  %v4752_v16 = vsel %vm4733_vm4, %v4713_v39, %v4714_v20  ;;  %v5521_v12 = vpop.permute.xlu1 %5520 }
 0x5d7   :  { %3599 = vmatmul.bf16.gmra.mxu2 %v10476_v7  ;;  %v11200_v7 = vld [vmem:[#allocation35_spill] sm:$0xff]  ;;  %v3187_v44 = vsel %vm3168_vm5, %v3148_v18, %v3149_v59 }
 0x5d8   :  { %v5123_v38 = vmax.f32 %v5042_v19, 0.0  ;;  %v4351_v34 = vadd.f32 %v4231_v62, %v3829_v41  ;;  %v3309_v9 = vadd.f32 %v3189_v13, %v11200_v7  ;;  %v4194_v62 = vrot.slane %v10525_v21, 2 }
 0x5da   :  { %v5690_v24 = vmul.f32 %v5516_v30, %v5123_v38  ;;  %v4873_v49 = vadd.f32 %v4753_v53, %v4351_v34  ;;  %v3560_v50 = vpop.f32.mrf.mxu2  ;;  %v4228_v0 = vsel %vm4211_vm3, %v4193_v15, %v4194_v62 }
 0x5db   :  { %v10600_v33 = vpop.f32.mrf.mxu3  ;;  %v3671_v2 = vrot.slane %v3560_v50, 1  ;;  %v4605_v23 = vpop.f32.mrf.mxu0 }
 0x5dc   :  { %v10603_v1 = vpop.f32.mrf.mxu1  ;;  %v6726_v5 = vpack.c.bf16 %v5690_v24, %v5689_v28  ;;  %v4958_v4 = vmul.f32 %v10167_v43, %v4873_v49  ;;  %v4715_v46 = vrot.slane %v4605_v23, 3  ;;  %v10649_v49 = vld [vmem:[%s10963_s2] ss:$0 sm:$0xff] }
 0x5dd   :  { %v3708_v29 = vsel %vm3168_vm5, %v3670_v45, %v3671_v2  ;;  %v3150_v13 = vrot.slane %v10603_v1, 1 }
 0x5de   :  { %6810 = vst [vmem:[#allocation5 + $0xe0] sm:$0xff] %v6726_v5   ;;  %v3830_v48 = vadd.f32 %v3708_v29, %v3309_v9  ;;  %v5043_v25 = vadd.f32 %v10193_v63, %v4958_v4  ;;  %v4751_v39 = vsel %vm4733_vm4, %v4714_v20, %v4715_v46  ;;  %v4195_v29 = vrot.slane %v10543_v55, 2 }
 0x5df   :  { %v3186_v1 = vsel %vm3168_vm5, %v3149_v59, %v3150_v13 }
 0x5e0   :  { %v4352_v40 = vadd.f32 %v4230_v52, %v3830_v48  ;;  %v5124_v10 = vmax.f32 %v5043_v25, 0.0  ;;  %v11203_v48 = vld [vmem:[#allocation41_spill] sm:$0xff] }
 0x5e1   :  { %v3312_v52 = vadd.f32 %v3186_v1, %v11203_v48 }
 0x5e2   :  { %v4874_v26 = vadd.f32 %v4752_v16, %v4352_v40  ;;  %v3562_v22 = vpop.f32.mrf.mxu2  ;;  %v5691_v32 = vmul.f32 %v5521_v12, %v5124_v10 }
 0x5e3   :  { %v10617_v11 = vpop.f32.mrf.mxu3  ;;  %v3672_v60 = vrot.slane %v3562_v22, 1  ;;  %v4608_v56 = vpop.f32.mrf.mxu0  ;;  %v10672_v22 = vld [vmem:[%s10964_s3] ss:$0 sm:$0xff]  ;;  %s6987_s3 = smov [#allocation5]  }
 0x5e4   :  { %v10620_v14 = vpop.f32.mrf.mxu1  ;;  %v4959_v57 = vmul.f32 %v10167_v43, %v4874_v26  ;;  %v4716_v53 = vrot.slane %v4608_v56, 3  ;;  %s5880_s25 = sshll.u32 %s6987_s3, 4  ;;  %s5881_s25 = int_to_ptr.vmem [resolvable:$true] %s5880_s25 }
 0x5e5   :  { %v3707_v42 = vsel %vm3168_vm5, %v3671_v2, %v3672_v60  ;;  %v3151_v35 = vrot.slane %v10620_v14, 1  ;;  %v5536_v14 = vpop.permute.xlu1 %5535 }
 0x5e6   :  { %v5044_v45 = vadd.f32 %v10193_v63, %v4959_v57  ;;  %v3831_v3 = vadd.f32 %v3707_v42, %v3310_v6  ;;  %3082 = vmatmul.bf16.gmra.mxu1 %v11195_v27  ;;  %4647 = vmatmul.bf16.gmra.mxu0 %v11195_v27  ;;  %v4750_v7 = vsel %vm4733_vm4, %v4715_v46, %v4716_v53  ;;  %v5531_v57 = vpop.permute.xlu0 %5530 }
 0x5e7   :  { %3604 = vmatmul.bf16.gmra.mxu2 %v11195_v27  ;;  %v11202_v27 = vld [vmem:[#allocation40_spill] sm:$0xff]  ;;  %v3185_v59 = vsel %vm3168_vm5, %v3150_v13, %v3151_v35 }
 0x5e8   :  { %v5125_v58 = vmax.f32 %v5044_v45, 0.0  ;;  %v4353_v43 = vadd.f32 %v4229_v47, %v3831_v3  ;;  %v3311_v51 = vadd.f32 %v3187_v44, %v11202_v27  ;;  %v4196_v47 = vrot.slane %v10563_v61, 2 }
 0x5ea   :  { %v5692_v37 = vmul.f32 %v5526_v54, %v5125_v58  ;;  %v4875_v8 = vadd.f32 %v4751_v39, %v4353_v43  ;;  %v3565_v19 = vpop.f32.mrf.mxu2  ;;  %v11204_v54 = vld [vmem:[#allocation44_spill] sm:$0xff]  ;;  %v4226_v61 = vsel %vm4211_vm3, %v4195_v29, %v4196_v47 }
 0x5eb   :  { %v10637_v41 = vpop.f32.mrf.mxu3  ;;  %v3673_v38 = vrot.slane %v3565_v19, 1  ;;  %v4610_v24 = vpop.f32.mrf.mxu0  ;;  %v3313_v12 = vadd.f32 %v3185_v59, %v11204_v54 }
 0x5ec   :  { %v10640_v34 = vpop.f32.mrf.mxu1  ;;  %v6731_v30 = vpack.c.bf16 %v5692_v37, %v5691_v32  ;;  %v4960_v21 = vmul.f32 %v10649_v49, %v4875_v8  ;;  %v4717_v16 = vrot.slane %v4610_v24, 3 }
 0x5ed   :  { %v3706_v28 = vsel %vm3168_vm5, %v3672_v60, %v3673_v38  ;;  %v4227_v60 = vsel %vm4211_vm3, %v4194_v62, %v4195_v29  ;;  %v3152_v39 = vrot.slane %v10640_v34, 1 }
 0x5ee   :  { %6811 = vst [vmem:[#allocation5 + $0xe8] sm:$0xff] %v6731_v30   ;;  %v3832_v50 = vadd.f32 %v3706_v28, %v3311_v51  ;;  %v5045_v9 = vadd.f32 %v10193_v63, %v4960_v21  ;;  %v4749_v46 = vsel %vm4733_vm4, %v4716_v53, %v4717_v16  ;;  %v4197_v28 = vrot.slane %v10580_v36, 2 }
 0x5ef   :  { %v3184_v27 = vsel %vm3168_vm5, %v3151_v35, %v3152_v39  ;;  %v5546_v35 = vpop.permute.xlu0 %5545 }
 0x5f0   :  { %v4354_v2 = vadd.f32 %v4228_v0, %v3832_v50  ;;  %v5126_v26 = vmax.f32 %v5045_v9, 0.0  ;;  %v11205_v50 = vld [vmem:[#allocation47_spill] sm:$0xff]  ;;  %v4225_v36 = vsel %vm4211_vm3, %v4196_v47, %v4197_v28 }
 0x5f1   :  { %v3314_v0 = vadd.f32 %v3184_v27, %v11205_v50 }
 0x5f2   :  { %v4876_v5 = vadd.f32 %v4750_v7, %v4354_v2  ;;  %v3567_v18 = vpop.f32.mrf.mxu2  ;;  %v5693_v42 = vmul.f32 %v5531_v57, %v5126_v26 }
 0x5f3   :  { %v10659_v20 = vpop.f32.mrf.mxu3  ;;  %v3674_v23 = vrot.slane %v3567_v18, 1  ;;  %v4613_v63 = vpop.f32.mrf.mxu0 }
 0x5f4   :  { %v10662_v4 = vpop.f32.mrf.mxu1  ;;  %v4961_v40 = vmul.f32 %v10649_v49, %v4876_v5  ;;  %v4718_v32 = vrot.slane %v4613_v63, 3 }
 0x5f5   :  { %v3705_v25 = vsel %vm3168_vm5, %v3673_v38, %v3674_v23  ;;  %v3153_v1 = vrot.slane %v10662_v4, 1 }
 0x5f6   :  { %v5046_v55 = vadd.f32 %v10672_v22, %v4961_v40  ;;  %v3833_v15 = vadd.f32 %v3705_v25, %v3312_v52  ;;  %v4748_v51 = vsel %vm4733_vm4, %v4717_v16, %v4718_v32  ;;  %v5541_v40 = vpop.permute.xlu2 %5540 }
 0x5f7   :  { %v3183_v16 = vsel %vm3168_vm5, %v3152_v39, %v3153_v1 }
 0x5f8   :  { %v5127_v31 = vmax.f32 %v5046_v55, 0.0  ;;  %v4355_v6 = vadd.f32 %v4227_v60, %v3833_v15  ;;  %v4198_v60 = vrot.slane %v10600_v33, 2 }
 0x5fa   :  { %v5694_v56 = vmul.f32 %v5536_v14, %v5127_v31  ;;  %v4877_v10 = vadd.f32 %v4749_v46, %v4355_v6  ;;  %v3570_v45 = vpop.f32.mrf.mxu2  ;;  %v11206_v14 = vld [vmem:[#allocation49_spill] sm:$0xff]  ;;  %v4224_v33 = vsel %vm4211_vm3, %v4197_v28, %v4198_v60 }
 0x5fb   :  { %v10681_v3 = vpop.f32.mrf.mxu3  ;;  %v3675_v58 = vrot.slane %v3570_v45, 1  ;;  %v4615_v8 = vpop.f32.mrf.mxu0  ;;  %v3315_v57 = vadd.f32 %v3183_v16, %v11206_v14 }
 0x5fc   :  { %v10684_v43 = vpop.f32.mrf.mxu1  ;;  %v6736_v44 = vpack.c.bf16 %v5694_v56, %v5693_v42  ;;  %v4962_v19 = vmul.f32 %v10649_v49, %v4877_v10  ;;  %v4719_v7 = vrot.slane %v4615_v8, 3 }
 0x5fd   :  { %v3704_v37 = vsel %vm3168_vm5, %v3674_v23, %v3675_v58  ;;  %v3154_v46 = vrot.slane %v10684_v43, 1 }
 0x5fe   :  { %6812 = vst [vmem:[#allocation5 + $0xf0] sm:$0xff] %v6736_v44   ;;  %v3834_v62 = vadd.f32 %v3704_v37, %v3313_v12  ;;  %v5047_v34 = vadd.f32 %v10672_v22, %v4962_v19  ;;  %v4747_v4 = vsel %vm4733_vm4, %v4718_v32, %v4719_v7  ;;  %v4199_v37 = vrot.slane %v10617_v11, 2 }
 0x5ff   :  { %v3182_v54 = vsel %vm3168_vm5, %v3153_v1, %v3154_v46  ;;  %v5551_v1 = vpop.permute.xlu1 %5550 }
 0x600   :  { %v4356_v38 = vadd.f32 %v4226_v61, %v3834_v62  ;;  %v5128_v18 = vmax.f32 %v5047_v34, 0.0  ;;  %v11207_v62 = vld [vmem:[#allocation55_spill] sm:$0xff]  ;;  %v4223_v11 = vsel %vm4211_vm3, %v4198_v60, %v4199_v37 }
 0x601   :  { %v3316_v61 = vadd.f32 %v3182_v54, %v11207_v62 }
 0x602   :  { %v4878_v30 = vadd.f32 %v4748_v51, %v4356_v38  ;;  %v3572_v13 = vpop.f32.mrf.mxu2  ;;  %v5695_v25 = vmul.f32 %v5541_v40, %v5128_v18  ;;  %v11208_v40 = vld [vmem:[#allocation54_spill] sm:$0xff] }
 0x603   :  { %v10698_v53 = vpop.f32.mrf.mxu3  ;;  %v3676_v24 = vrot.slane %v3572_v13, 1  ;;  %v4618_v5 = vpop.f32.mrf.mxu0 }
 0x604   :  { %v10701_v21 = vpop.f32.mrf.mxu1  ;;  %v4963_v2 = vmul.f32 %v10649_v49, %v4878_v30  ;;  %v4720_v42 = vrot.slane %v4618_v5, 3 }
 0x605   :  { %v3703_v9 = vsel %vm3168_vm5, %v3675_v58, %v3676_v24  ;;  %v3155_v27 = vrot.slane %v10701_v21, 1 }
 0x606   :  { %v5048_v29 = vadd.f32 %v10672_v22, %v4963_v2  ;;  %v3835_v23 = vadd.f32 %v3703_v9, %v3314_v0  ;;  %v4746_v12 = vsel %vm4733_vm4, %v4719_v7, %v4720_v42  ;;  %v5556_v2 = vpop.permute.xlu2 %5555 }
 0x607   :  { %v3181_v7 = vsel %vm3168_vm5, %v3154_v46, %v3155_v27 }
 0x608   :  { %v5129_v48 = vmax.f32 %v5048_v29, 0.0  ;;  %v4357_v52 = vadd.f32 %v4225_v36, %v3835_v23  ;;  %v4200_v36 = vrot.slane %v10637_v41, 2 }
 0x60a   :  { %v5696_v63 = vmul.f32 %v5546_v35, %v5129_v48  ;;  %v4879_v26 = vadd.f32 %v4747_v4, %v4357_v52  ;;  %v3575_v55 = vpop.f32.mrf.mxu2  ;;  %v3317_v35 = vadd.f32 %v3181_v7, %v11208_v40  ;;  %v4222_v41 = vsel %vm4211_vm3, %v4199_v37, %v4200_v36 }
 0x60b   :  { %v10715_v15 = vpop.f32.mrf.mxu3  ;;  %v3677_v31 = vrot.slane %v3575_v55, 1  ;;  %v4620_v10 = vpop.f32.mrf.mxu0 }
 0x60c   :  { %v10718_v6 = vpop.f32.mrf.mxu1  ;;  %v6741_v59 = vpack.c.bf16 %v5696_v63, %v5695_v25  ;;  %v4964_v45 = vmul.f32 %v10649_v49, %v4879_v26  ;;  %v4721_v51 = vrot.slane %v4620_v10, 3 }
 0x60d   :  { %v3702_v56 = vsel %vm3168_vm5, %v3676_v24, %v3677_v31  ;;  %v3156_v4 = vrot.slane %v10718_v6, 1 }
 0x60e   :  { %6813 = vst [vmem:[#allocation5 + $0xf8] sm:$0xff] %v6741_v59   ;;  %v3836_v47 = vadd.f32 %v3702_v56, %v3315_v57  ;;  %v5049_v43 = vadd.f32 %v10672_v22, %v4964_v45  ;;  %v4745_v21 = vsel %vm4733_vm4, %v4720_v42, %v4721_v51  ;;  %v4201_v56 = vrot.slane %v10659_v20, 2 }
 0x60f   :  { %v3180_v14 = vsel %vm3168_vm5, %v3155_v27, %v3156_v4  ;;  %v5561_v27 = vpop.permute.xlu0 %5560 }
 0x610   :  { %v4358_v58 = vadd.f32 %v4224_v33, %v3836_v47  ;;  %v5130_v13 = vmax.f32 %v5049_v43, 0.0  ;;  %v11209_v47 = vld [vmem:[#allocation10_spill] sm:$0xff]  ;;  %v4221_v20 = vsel %vm4211_vm3, %v4200_v36, %v4201_v56 }
 0x611   :  { %v3318_v33 = vadd.f32 %v3180_v14, %v11209_v47 }
 0x612   :  { %v4880_v44 = vadd.f32 %v4746_v12, %v4358_v58  ;;  %v3577_v39 = vpop.f32.mrf.mxu2  ;;  %v5697_v9 = vmul.f32 %v5551_v1, %v5130_v13 }
 0x613   :  { %v10732_v32 = vpop.f32.mrf.mxu3  ;;  %v3678_v8 = vrot.slane %v3577_v39, 1  ;;  %v4623_v30 = vpop.f32.mrf.mxu0 }
 0x614   :  { %v10735_v19 = vpop.f32.mrf.mxu1  ;;  %v4965_v38 = vmul.f32 %v10649_v49, %v4880_v44  ;;  %v4722_v25 = vrot.slane %v4623_v30, 3 }
 0x615   :  { %v3701_v34 = vsel %vm3168_vm5, %v3677_v31, %v3678_v8  ;;  %v3157_v54 = vrot.slane %v10735_v19, 1 }
 0x616   :  { %v5050_v28 = vadd.f32 %v10672_v22, %v4965_v38  ;;  %v3837_v24 = vadd.f32 %v3701_v34, %v3316_v61  ;;  %v4744_v57 = vsel %vm4733_vm4, %v4721_v51, %v4722_v25  ;;  %v5566_v38 = vpop.permute.xlu1 %5565 }
 0x617   :  { %v3179_v51 = vsel %vm3168_vm5, %v3156_v4, %v3157_v54 }
 0x618   :  { %v5131_v50 = vmax.f32 %v5050_v28, 0.0  ;;  %v4359_v0 = vadd.f32 %v4223_v11, %v3837_v24  ;;  %v4202_v11 = vrot.slane %v10681_v3, 2 }
 0x61a   :  { %v5698_v5 = vmul.f32 %v5556_v2, %v5131_v50  ;;  %v4881_v18 = vadd.f32 %v4745_v21, %v4359_v0  ;;  %v3580_v29 = vpop.f32.mrf.mxu2  ;;  %v11210_v2 = vld [vmem:[#allocation12_spill] sm:$0xff]  ;;  %v4220_v3 = vsel %vm4211_vm3, %v4201_v56, %v4202_v11 }
 0x61b   :  { %v10749_v23 = vpop.f32.mrf.mxu3  ;;  %v3679_v48 = vrot.slane %v3580_v29, 1  ;;  %v4625_v26 = vpop.f32.mrf.mxu0  ;;  %v3319_v1 = vadd.f32 %v3179_v51, %v11210_v2 }
 0x61c   :  { %v10752_v52 = vpop.f32.mrf.mxu1  ;;  %v6746_v16 = vpack.c.bf16 %v5698_v5, %v5697_v9  ;;  %v4966_v55 = vmul.f32 %v10649_v49, %v4881_v18  ;;  %v4723_v12 = vrot.slane %v4625_v26, 3 }
 0x61d   :  { %v3700_v63 = vsel %vm3168_vm5, %v3678_v8, %v3679_v48  ;;  %v3158_v21 = vrot.slane %v10752_v52, 1 }
 0x61e   :  { %6814 = vst [vmem:[#allocation5 + $0x100] sm:$0xff] %v6746_v16   ;;  %v3838_v60 = vadd.f32 %v3700_v63, %v3317_v35  ;;  %v5051_v6 = vadd.f32 %v10672_v22, %v4966_v55  ;;  %v4743_v19 = vsel %vm4733_vm4, %v4722_v25, %v4723_v12  ;;  %v4203_v63 = vrot.slane %v10698_v53, 2 }
 0x61f   :  { %v3178_v40 = vsel %vm3168_vm5, %v3157_v54, %v3158_v21  ;;  %v5576_v54 = vpop.permute.xlu0 %5575 }
 0x620   :  { %v4360_v31 = vadd.f32 %v4222_v41, %v3838_v60  ;;  %v5132_v39 = vmax.f32 %v5051_v6, 0.0  ;;  %v11211_v60 = vld [vmem:[#allocation14_spill] sm:$0xff]  ;;  %v4219_v53 = vsel %vm4211_vm3, %v4202_v11, %v4203_v63 }
 0x621   :  { %v3320_v41 = vadd.f32 %v3178_v40, %v11211_v60 }
 0x622   :  { %v4882_v59 = vadd.f32 %v4744_v57, %v4360_v31  ;;  %v3582_v46 = vpop.f32.mrf.mxu2  ;;  %v5699_v34 = vmul.f32 %v5561_v27, %v5132_v39 }
 0x623   :  { %v10766_v42 = vpop.f32.mrf.mxu3  ;;  %v3680_v10 = vrot.slane %v3582_v46, 1  ;;  %v4628_v44 = vpop.f32.mrf.mxu0 }
 0x624   :  { %v10769_v45 = vpop.f32.mrf.mxu1  ;;  %v4967_v58 = vmul.f32 %v10649_v49, %v4882_v59  ;;  %v4724_v9 = vrot.slane %v4628_v44, 3 }
 0x625   :  { %v3699_v43 = vsel %vm3168_vm5, %v3679_v48, %v3680_v10  ;;  %v3159_v14 = vrot.slane %v10769_v45, 1 }
 0x626   :  { %v5052_v37 = vadd.f32 %v10672_v22, %v4967_v58  ;;  %v3839_v8 = vadd.f32 %v3699_v43, %v3318_v33  ;;  %v4742_v35 = vsel %vm4733_vm4, %v4723_v12, %v4724_v9  ;;  %v5571_v58 = vpop.permute.xlu2 %5570 }
 0x627   :  { %v3177_v12 = vsel %vm3168_vm5, %v3158_v21, %v3159_v14 }
 0x628   :  { %v5133_v62 = vmax.f32 %v5052_v37, 0.0  ;;  %v4361_v61 = vadd.f32 %v4221_v20, %v3839_v8  ;;  %v4204_v20 = vrot.slane %v10715_v15, 2 }
 0x62a   :  { %v5700_v30 = vmul.f32 %v5566_v38, %v5133_v62  ;;  %v4883_v13 = vadd.f32 %v4743_v19, %v4361_v61  ;;  %v3585_v28 = vpop.f32.mrf.mxu2  ;;  %v11212_v38 = vld [vmem:[#allocation16_spill] sm:$0xff]  ;;  %v4218_v15 = vsel %vm4211_vm3, %v4203_v63, %v4204_v20 }
 0x62b   :  { %v10783_v24 = vpop.f32.mrf.mxu3  ;;  %v3681_v50 = vrot.slane %v3585_v28, 1  ;;  %v4630_v18 = vpop.f32.mrf.mxu0  ;;  %v3321_v27 = vadd.f32 %v3177_v12, %v11212_v38 }
 0x62c   :  { %v10786_v0 = vpop.f32.mrf.mxu1  ;;  %v6751_v7 = vpack.c.bf16 %v5700_v30, %v5699_v34  ;;  %v4968_v29 = vmul.f32 %v10649_v49, %v4883_v13  ;;  %v4725_v57 = vrot.slane %v4630_v18, 3 }
 0x62d   :  { %v3698_v5 = vsel %vm3168_vm5, %v3680_v10, %v3681_v50  ;;  %v3160_v19 = vrot.slane %v10786_v0, 1 }
 0x62e   :  { %6815 = vst [vmem:[#allocation5 + $0x108] sm:$0xff] %v6751_v7   ;;  %v3840_v36 = vadd.f32 %v3698_v5, %v3319_v1  ;;  %v5053_v52 = vadd.f32 %v10672_v22, %v4968_v29  ;;  %v4741_v45 = vsel %vm4733_vm4, %v4724_v9, %v4725_v57  ;;  %v4205_v5 = vrot.slane %v10732_v32, 2 }
 0x62f   :  { %v3176_v2 = vsel %vm3168_vm5, %v3159_v14, %v3160_v19  ;;  %v5581_v14 = vpop.permute.xlu1 %5580 }
 0x630   :  { %v4362_v48 = vadd.f32 %v4220_v3, %v3840_v36  ;;  %v5134_v46 = vmax.f32 %v5053_v52, 0.0  ;;  %v11213_v36 = vld [vmem:[#allocation18_spill] sm:$0xff]  ;;  %v4217_v32 = vsel %vm4211_vm3, %v4204_v20, %v4205_v5 }
 0x631   :  { %v3322_v3 = vadd.f32 %v3176_v2, %v11213_v36  ;;  %v5591_v36 = vpop.permute.xlu0 %5590 }
 0x632   :  { %v4884_v16 = vadd.f32 %v4742_v35, %v4362_v48  ;;  %v3587_v4 = vpop.f32.mrf.mxu2  ;;  %v5701_v43 = vmul.f32 %v5571_v58, %v5134_v46 }
 0x633   :  { %v10800_v25 = vpop.f32.mrf.mxu3  ;;  %v3682_v26 = vrot.slane %v3587_v4, 1  ;;  %v4633_v59 = vpop.f32.mrf.mxu0 }
 0x634   :  { %v10803_v55 = vpop.f32.mrf.mxu1  ;;  %v4969_v31 = vmul.f32 %v10649_v49, %v4884_v16  ;;  %v4726_v34 = vrot.slane %v4633_v59, 3 }
 0x635   :  { %v3697_v6 = vsel %vm3168_vm5, %v3681_v50, %v3682_v26  ;;  %v3161_v40 = vrot.slane %v10803_v55, 1 }
 0x636   :  { %v5054_v56 = vadd.f32 %v10672_v22, %v4969_v31  ;;  %v3841_v10 = vadd.f32 %v3697_v6, %v3320_v41  ;;  %v4740_v1 = vsel %vm4733_vm4, %v4725_v57, %v4726_v34  ;;  %v5586_v31 = vpop.permute.xlu2 %5585 }
 0x637   :  { %v3175_v57 = vsel %vm3168_vm5, %v3160_v19, %v3161_v40  ;;  %v4207_v19 = vrot.slane %v10766_v42, 2 }
 0x638   :  { %v5135_v47 = vmax.f32 %v5054_v56, 0.0  ;;  %v4363_v33 = vadd.f32 %v4219_v53, %v3841_v10  ;;  %v4206_v10 = vrot.slane %v10749_v23, 2 }
 0x63a   :  { %v5702_v44 = vmul.f32 %v5576_v54, %v5135_v47  ;;  %v4885_v39 = vadd.f32 %v4741_v45, %v4363_v33  ;;  %v3590_v37 = vpop.f32.mrf.mxu2  ;;  %v11214_v33 = vld [vmem:[#allocation20_spill] sm:$0xff]  ;;  %v4216_v23 = vsel %vm4211_vm3, %v4205_v5, %v4206_v10  ;;  %v4215_v42 = vsel %vm4211_vm3, %v4206_v10, %v4207_v19 }
 0x63b   :  { %v10817_v8 = vpop.f32.mrf.mxu3  ;;  %v3683_v62 = vrot.slane %v3590_v37, 1  ;;  %v4635_v13 = vpop.f32.mrf.mxu0  ;;  %v3323_v58 = vadd.f32 %v3175_v57, %v11214_v33 }
 0x63c   :  { %v10820_v61 = vpop.f32.mrf.mxu1  ;;  %v6756_v51 = vpack.c.bf16 %v5702_v44, %v5701_v43  ;;  %v4970_v28 = vmul.f32 %v10649_v49, %v4885_v39  ;;  %v4727_v35 = vrot.slane %v4635_v13, 3  ;;  %v11215_v13 = vld [vmem:[#allocation22_spill] sm:$0xff] }
 0x63d   :  { %v3696_v30 = vsel %vm3168_vm5, %v3682_v26, %v3683_v62  ;;  %v3162_v12 = vrot.slane %v10820_v61, 1 }
 0x63e   :  { %6816 = vst [vmem:[#allocation5 + $0x110] sm:$0xff] %v6756_v51   ;;  %v3842_v11 = vadd.f32 %v3696_v30, %v3321_v27  ;;  %v5055_v0 = vadd.f32 %v10672_v22, %v4970_v28  ;;  %v4739_v55 = vsel %vm4733_vm4, %v4726_v34, %v4727_v35 }
 0x640   :  { %v4364_v50 = vadd.f32 %v4218_v15, %v3842_v11  ;;  %v5136_v4 = vmax.f32 %v5055_v0, 0.0 }
 0x642   :  { %v4886_v7 = vadd.f32 %v4740_v1, %v4364_v50  ;;  %v3592_v21 = vpop.f32.mrf.mxu2  ;;  %v5703_v6 = vmul.f32 %v5581_v14, %v5136_v4 }
 0x643   :  { %v4128_v9 = vpop.f32.mrf.mxu3  ;;  %v3684_v18 = vrot.slane %v3592_v21, 1  ;;  %v4638_v16 = vpop.f32.mrf.mxu0 }
 0x644   :  { %v10835_v29 = vpop.f32.mrf.mxu1  ;;  %v4971_v48 = vmul.f32 %v10649_v49, %v4886_v7  ;;  %v4728_v45 = vrot.slane %v4638_v16, 3  ;;  %v4208_v16 = vrot.slane %v10783_v24, 2 }
 0x645   :  { %v3695_v52 = vsel %vm3168_vm5, %v3683_v62, %v3684_v18  ;;  %v3174_v62 = vsel %vm3168_vm5, %v3161_v40, %v3162_v12  ;;  %v3163_v15 = vrot.slane %v10835_v29, 1 }
 0x646   :  { %v5056_v63 = vadd.f32 %v10672_v22, %v4971_v48  ;;  %v3843_v26 = vadd.f32 %v3695_v52, %v3322_v3  ;;  %v4738_v38 = vsel %vm4733_vm4, %v4727_v35, %v4728_v45  ;;  %v3324_v28 = vadd.f32 %v3174_v62, %v11215_v13 }
 0x647   :  { %v3173_v3 = vsel %vm3168_vm5, %v3162_v12, %v3163_v15  ;;  %v4214_v24 = vsel %vm4211_vm3, %v4207_v19, %v4208_v16  ;;  %v11218_v19 = vld [vmem:[#allocation52_spill] sm:$0xff] }
 0x648   :  { %v5137_v60 = vmax.f32 %v5056_v63, 0.0  ;;  %v4365_v41 = vadd.f32 %v4217_v32, %v3843_v26  ;;  %v11216_v26 = vld [vmem:[#allocation24_spill] sm:$0xff] }
 0x649   :  { %v3325_v32 = vadd.f32 %v3173_v3, %v11216_v26 }
 0x64a   :  { %v5704_v59 = vmul.f32 %v5586_v31, %v5137_v60  ;;  %v4887_v46 = vadd.f32 %v4739_v55, %v4365_v41  ;;  %v3595_v56 = vpop.f32.mrf.mxu2 }
 0x64b   :  { %v3685_v53 = vrot.slane %v3595_v56, 1  ;;  %v4640_v44 = vpop.f32.mrf.mxu0 }
 0x64c   :  { %v10850_v47 = vpop.f32.mrf.mxu1  ;;  %v6761_v54 = vpack.c.bf16 %v5704_v59, %v5703_v6  ;;  %v4972_v39 = vmul.f32 %v10649_v49, %v4887_v46  ;;  %v4729_v50 = vrot.slane %v4640_v44, 3  ;;  %v5601_v59 = vpop.permute.xlu2 %5600 }
 0x64d   :  { %v3694_v43 = vsel %vm3168_vm5, %v3684_v18, %v3685_v53  ;;  %v5596_v18 = vpop.permute.xlu1 %5595  ;;  %v3164_v41 = vrot.slane %v10850_v47, 1 }
 0x64e   :  { %6817 = vst [vmem:[#allocation5 + $0x118] sm:$0xff] %v6761_v54   ;;  %v3844_v37 = vadd.f32 %v3694_v43, %v3323_v58  ;;  %v5057_v61 = vadd.f32 %v10672_v22, %v4972_v39  ;;  %v4737_v29 = vsel %vm4733_vm4, %v4728_v45, %v4729_v50  ;;  %v4209_v58 = vrot.slane %v10800_v25, 2  ;;  %v11217_v54 = vld [vmem:[#allocation39_spill] sm:$0xff] }
 0x64f   :  { %v3172_v46 = vsel %vm3168_vm5, %v3163_v15, %v3164_v41  ;;  %v11221_v15 = vld [vmem:[#allocation34_spill] sm:$0xff] }
 0x650   :  { %v4366_v20 = vadd.f32 %v4216_v23, %v3844_v37  ;;  %v5138_v0 = vmax.f32 %v5057_v61, 0.0  ;;  %v3326_v12 = vadd.f32 %v3172_v46, %v11217_v54  ;;  %v4213_v13 = vsel %vm4211_vm3, %v4208_v16, %v4209_v58  ;;  %v11224_v16 = vld [vmem:[#allocation75_spill] sm:$0xff] }
 0x652   :  { %v4888_v27 = vadd.f32 %v4738_v38, %v4366_v20  ;;  %v3597_v51 = vpop.f32.mrf.mxu2  ;;  %v5705_v48 = vmul.f32 %v5591_v36, %v5138_v0 }
 0x653   :  { %v3686_v34 = vrot.slane %v3597_v51, 1  ;;  %v4643_v1 = vpop.f32.mrf.mxu0 }
 0x654   :  { %v10865_v30 = vpop.f32.mrf.mxu1  ;;  %v4973_v11 = vmul.f32 %v10649_v49, %v4888_v27  ;;  %v4730_v14 = vrot.slane %v4643_v1, 3  ;;  %v5616_v3 = vpop.permute.xlu2 %5615 }
 0x655   :  { %v3693_v2 = vsel %vm3168_vm5, %v3685_v53, %v3686_v34  ;;  %v3165_v44 = vrot.slane %v10865_v30, 1 }
 0x656   :  { %v5058_v7 = vadd.f32 %v10672_v22, %v4973_v11  ;;  %v3845_v21 = vadd.f32 %v3693_v2, %v3324_v28  ;;  %v4736_v53 = vsel %vm4733_vm4, %v4729_v50, %v4730_v14  ;;  %v11220_v28 = vld [vmem:[#allocation32_spill] sm:$0xff] }
 0x657   :  { %v3171_v2 = vsel %vm3168_vm5, %v3164_v41, %v3165_v44  ;;  %v11226_v41 = vld [vmem:[#allocation28_spill] sm:$0xff] }
 0x658   :  { %v5139_v9 = vmax.f32 %v5058_v7, 0.0  ;;  %v4367_v5 = vadd.f32 %v4215_v42, %v3845_v21  ;;  %v5606_v7 = vpop.permute.xlu0 %5605 }
 0x65a   :  { %v5706_v40 = vmul.f32 %v5596_v18, %v5139_v9  ;;  %v4889_v35 = vadd.f32 %v4737_v29, %v4367_v5  ;;  %v3600_v52 = vpop.f32.mrf.mxu2  ;;  %v11222_v9 = vld [vmem:[#allocation42_spill] sm:$0xff]  ;;  %v11223_v18 = vld [vmem:[#allocation77_spill] sm:$0xff] }
 0x65b   :  { %v3687_v4 = vrot.slane %v3600_v52, 1  ;;  %v10885_v55 = vpop.f32.mrf.mxu0  ;;  %v4210_v52 = vrot.slane %v10817_v8, 2  ;;  %v11230_v8 = vld [vmem:[#allocation36_spill] sm:$0xff] }
 0x65c   :  { %v3080_v63 = vpop.f32.mrf.mxu1  ;;  %v6766_v60 = vpack.c.bf16 %v5706_v40, %v5705_v48  ;;  %v4974_v31 = vmul.f32 %v10649_v49, %v4889_v35  ;;  %v4731_v62 = vrot.slane %v10885_v55, 3 }
 0x65d   :  { %v3692_v57 = vsel %vm3168_vm5, %v3686_v34, %v3687_v4  ;;  %v3166_v37 = vrot.slane %v3080_v63, 1  ;;  %v11219_v34 = vrot.slane %v11218_v19, 1  ;;  %v11225_v63 = vld [vmem:[#allocation76_spill] sm:$0xff]  ;;  %v11234_v19 = vld [vmem:[#allocation37_spill] sm:$0xff] }
 0x65e   :  { %6818 = vst [vmem:[#allocation5 + $0x120] sm:$0xff] %v6766_v60   ;;  %v3846_v6 = vadd.f32 %v3692_v57, %v3325_v32  ;;  %v5059_v10 = vadd.f32 %v10672_v22, %v4974_v31  ;;  %v4735_v42 = vsel %vm4733_vm4, %v4730_v14, %v4731_v62  ;;  %v3327_v31 = vadd.f32 %v3171_v2, %v11226_v41  ;;  %v11227_v57 = vld [vmem:[#allocation30_spill] sm:$0xff]  ;;  %v5631_v2 = vpop.permute.xlu2 %5630 }
 0x65f   :  { %v3170_v21 = vsel %vm3168_vm5, %v3165_v44, %v3166_v37  ;;  %v5611_v44 = vpop.permute.xlu1 %5610 }
 0x660   :  { %v4368_v56 = vadd.f32 %v4214_v24, %v3846_v6  ;;  %v5140_v20 = vmax.f32 %v5059_v10, 0.0  ;;  %v3328_v55 = vadd.f32 %v3170_v21, %v11227_v57  ;;  %v11228_v24 = vld [vmem:[#allocation56_spill] sm:$0xff] }
 0x662   :  { %v4890_v47 = vadd.f32 %v4736_v53, %v4368_v56  ;;  %v3602_v33 = vpop.f32.mrf.mxu2  ;;  %v5707_v29 = vmul.f32 %v5601_v59, %v5140_v20  ;;  %v11229_v59 = vld [vmem:[#allocation45_spill] sm:$0xff]  ;;  %v11231_v53 = vrot.slane %v11230_v8, 1 }
 0x663   :  { %v3688_v45 = vrot.slane %v3602_v33, 1  ;;  %v4648_v61 = vpop.f32.mrf.mxu0 }
 0x664   :  { %v3083_v43 = vpop.f32.mrf.mxu1  ;;  %v4975_v39 = vmul.f32 %v10649_v49, %v4890_v47  ;;  %v4732_v6 = vrot.slane %v4648_v61, 3 }
 0x665   :  { %v3167_v23 = vrot.slane %v3083_v43, 1  ;;  %v3691_v38 = vsel %vm3168_vm5, %v3687_v4, %v3688_v45 }
 0x666   :  { %v5060_v27 = vadd.f32 %v10672_v22, %v4975_v39  ;;  %v3847_v25 = vadd.f32 %v3691_v38, %v3326_v12  ;;  %v4212_v39 = vsel %vm4211_vm3, %v4209_v58, %v4210_v52 }
 0x667   :  { %v3169_v51 = vsel %vm3168_vm5, %v3166_v37, %v3167_v23  ;;  %v3249_v30 = vsel %vm3168_vm5, %v3167_v23, %v11219_v34  ;;  %v11232_v37 = vld [vmem:[#allocation26_spill] sm:$0xff]  ;;  %v11235_v34 = vrot.slane %v11234_v19, 3 }
 0x668   :  { %v3329_v11 = vadd.f32 %v3169_v51, %v11220_v28  ;;  %v3330_v50 = vadd.f32 %v3249_v30, %v11221_v15  ;;  %v5141_v1 = vmax.f32 %v5060_v27, 0.0  ;;  %v4369_v0 = vadd.f32 %v4213_v13, %v3847_v25 }
 0x669   :  { %v11233_v23 = vrot.slane %v11232_v37, 2  ;;  %v4734_v51 = vsel %vm4733_vm4, %v4731_v62, %v4732_v6  ;;  %v4814_v58 = vsel %vm4733_vm4, %v4732_v6, %v11235_v34 }
 0x66a   :  { %v3850_v5 = vadd.f32 %v11222_v9, %v3329_v11  ;;  %v3851_v36 = vadd.f32 %v11223_v18, %v3330_v50  ;;  %v5708_v48 = vmul.f32 %v5606_v7, %v5141_v1  ;;  %v4891_v40 = vadd.f32 %v4735_v42, %v4369_v0  ;;  %v3605_v35 = vpop.f32.mrf.mxu2 }
 0x66b   :  { %v3689_v32 = vrot.slane %v3605_v35, 1  ;;  %v4650_v33 = vpop.f32.mrf.mxu0 }
 0x66c   :  { %v4372_v4 = vadd.f32 %v11224_v16, %v3850_v5  ;;  %v4373_v26 = vadd.f32 %v11225_v63, %v3851_v36  ;;  %v3085_v60 = vpop.f32.mrf.mxu1  ;;  %v6771_v14 = vpack.c.bf16 %v5708_v48, %v5707_v29  ;;  %v4976_v54 = vmul.f32 %v10649_v49, %v4891_v40  ;;  %v5626_v36 = vpop.permute.xlu1 %5625 }
 0x66d   :  { %v3690_v10 = vsel %vm3168_vm5, %v3688_v45, %v3689_v32  ;;  %v3770_v47 = vsel %vm3168_vm5, %v3689_v32, %v11231_v53  ;;  %v4292_v45 = vsel %vm4211_vm3, %v4210_v52, %v11233_v23  ;;  %v5621_v29 = vpop.permute.xlu0 %5620 }
 0x66e   :  { %v4894_v46 = vadd.f32 %v11228_v24, %v4372_v4  ;;  %v4895_v56 = vadd.f32 %v11229_v59, %v4373_v26  ;;  %6819 = vst [vmem:[#allocation5 + $0x128] sm:$0xff] %v6771_v14   ;;  %v3848_v12 = vadd.f32 %v3690_v10, %v3327_v31  ;;  %v3849_v43 = vadd.f32 %v3770_v47, %v3328_v55 }
 0x66f   :  { %v5061_v30 = vadd.f32 %v10672_v22, %v4976_v54 }
 0x670   :  { %v4979_v20 = vmul.f32 %v10649_v49, %v4894_v46  ;;  %v4980_v38 = vmul.f32 %v10649_v49, %v4895_v56  ;;  %v4370_v61 = vadd.f32 %v4212_v39, %v3848_v12  ;;  %v4371_v27 = vadd.f32 %v4292_v45, %v3849_v43 }
 0x671   :  { %v5142_v62 = vmax.f32 %v5061_v30, 0.0 }
 0x672   :  { %v5065_v25 = vadd.f32 %v10672_v22, %v4980_v38  ;;  %v5064_v13 = vadd.f32 %v10672_v22, %v4979_v20  ;;  %v4892_v28 = vadd.f32 %v4734_v51, %v4370_v61  ;;  %v4893_v11 = vadd.f32 %v4814_v58, %v4371_v27  ;;  %v3607_v15 = vpop.f32.mrf.mxu2 }
 0x673   :  { %v5709_v48 = vmul.f32 %v5611_v44, %v5142_v62 }
 0x674   :  { %v5146_v50 = vmax.f32 %v5065_v25, 0.0  ;;  %v4977_v1 = vmul.f32 %v10649_v49, %v4892_v28  ;;  %v4978_v0 = vmul.f32 %v10649_v49, %v4893_v11  ;;  %v5145_v21 = vmax.f32 %v5064_v13, 0.0 }
 0x676   :  { %v5713_v7 = vmul.f32 %v5631_v2, %v5146_v50  ;;  %v5062_v42 = vadd.f32 %v10672_v22, %v4977_v1  ;;  %v5063_v17 = vadd.f32 %v10672_v22, %v4978_v0  ;;  %v5712_v40 = vmul.f32 %v5626_v36, %v5145_v21 }
 0x678   :  { %v5794_v9 = vpack.c.bf16 %v5713_v7, %v5713_v7  ;;  %v5143_v5 = vmax.f32 %v5062_v42, 0.0  ;;  %v5144_v18 = vmax.f32 %v5063_v17, 0.0 }
 0x67a   :  { %5875 = vst [vmem:[#allocation5 + $0x140] sm:$0xf] %v5794_v9  ;;  %v5710_v35 = vmul.f32 %v5616_v3, %v5143_v5  ;;  %v5711_v52 = vmul.f32 %v5621_v29, %v5144_v18 }
 0x67c   :  { %v6776_v49 = vpack.c.bf16 %v5710_v35, %v5709_v48  ;;  %v6781_v16 = vpack.c.bf16 %v5712_v40, %v5711_v52 }
 0x67e   :  { %6820 = vst [vmem:[#allocation5 + $0x130] sm:$0xff] %v6776_v49  }
 0x67f   :  { %6821 = vst [vmem:[#allocation5 + $0x138] sm:$0xff] %v6781_v16  }
 0x680   :  { %5888 = dma.vmem_to_hbm [thread:$0]  %s5881_s25, 5184, %s5883_s0, [#allocation4], %s6984_s23, %s6984_s23, %s6985_s24  }
 0x681   :  { %6981 = dma.done.wait [#allocation4], 5184  }
 0x682   :  { %6982 = vsyncadd [#allocation4], 4294962112 }
 0x683   :  { %5893 = vsyncpa [#allocation3], 1 }
 0x684   :  { %5894 = vsyncpa [#allocation4], 1 }

</bundles_post_ra>
